<compile_context>
chip_gen: v7x
topology: tpu7x:2x2x1
jax: 0.10.0
libtpu: 0.0.40
codegen_flags: <defaults>
</compile_context>

<pallas_src>
import math
import functools

import jax
import jax.numpy as jnp
from jax.experimental import pallas as pl
from jax.experimental.pallas import tpu as pltpu

NEG_SLOPE = 0.2        # LeakyReLU slope used by GATConv attention
MASK_VALUE = -1e9      # additive mask for non-edges


def _row_tile(n):
    """Destination-row tile size: 128-multiples when possible, else whole axis."""
    for t in (256, 128):
        if n % t == 0:
            return t
    return n


def _compiler_params():
    # 64 MiB keeps headroom on v5e/v6e (128 MiB physical) and fits v7x (64 MiB).
    return pltpu.CompilerParams(
        dimension_semantics=("parallel",),
        vmem_limit_bytes=64 * 1024 * 1024,
    )


# ---------------------------------------------------------------------------
# Kernel 1: fused twin projection + all-head attention score terms.
# ---------------------------------------------------------------------------
def _gat_proj_kernel(x_ref, xt_ref, w_ref, a_att_ref, xw_ref, xwt_ref, e_ref):
    """xw, xwt = [x; x_] @ W (single MXU pass over 2*TM rows).
    e = xw @ A_blockdiag -> [TM, 2H]; cols 0..H-1 = dst term, H..2H-1 = src term."""
    tm = x_ref.shape[0]
    both = jnp.concatenate([x_ref[...], xt_ref[...]], axis=0)            # [2TM, Cin]
    xwb = jnp.dot(both, w_ref[...], preferred_element_type=jnp.float32)  # [2TM, H*F]
    xw = xwb[:tm]
    xwt = xwb[tm:]
    xw_ref[...] = xw.astype(xw_ref.dtype)     # bf16 out: halves HBM/VMEM for source side
    xwt_ref[...] = xwt.astype(xwt_ref.dtype)
    e_ref[...] = jnp.dot(xw, a_att_ref[...],
                         preferred_element_type=jnp.float32).astype(e_ref.dtype)


# ---------------------------------------------------------------------------
# Kernel 2: attention softmax + twin aggregation, tiled over destination rows.
# ---------------------------------------------------------------------------
def _gat_attn_kernel(ed_ref, est_ref, adjb_ref, xwp_ref, bp_ref, out_ref,
                     *, n_head, n_hid):
    # TODO(synk): for very large N on v7x (64 MiB VMEM), tile the source axis too
    # (flash-style online softmax); here the full source axis stays VMEM-resident.
    ed = ed_ref[...]                               # [TM, H]  f32 destination terms
    est = est_ref[...]                             # [H, N]   f32 source terms (pre-transposed)
    adjb = adjb_ref[...].astype(jnp.float32)       # [TM, N]  additive edge mask
    xwp = xwp_ref[...]                             # [N, H*2F] bf16, per-head [xw | xwt] pairs
    f2 = 2 * n_hid

    aggs = []
    for h in range(n_head):
        logits = ed[:, h:h + 1] + est[h:h + 1, :]                      # [TM, N]
        logits = jnp.where(logits >= 0, logits, NEG_SLOPE * logits)    # LeakyReLU
        logits = logits + adjb                                         # mask AFTER LeakyReLU
        logits = logits - jnp.max(logits, axis=1, keepdims=True)
        p = jnp.exp(logits)
        inv = pl.reciprocal(jnp.sum(p, axis=1, keepdims=True), approx=True)
        alpha = (p * inv).astype(jnp.bfloat16)
        rhs = xwp[:, h * f2:(h + 1) * f2]                              # [N, 2F] both streams
        aggs.append(jnp.dot(alpha, rhs, preferred_element_type=jnp.float32))

    out = jnp.concatenate(aggs, axis=1) + bp_ref[...]                  # [TM, H*2F]
    out_ref[...] = jnp.maximum(out, 0.0).astype(out_ref.dtype)         # skip='vanilla' + ReLU


# ---------------------------------------------------------------------------
# Kernel 3: Summarize(scope='local', kernel='dp') + out_lin, fused & row-tiled.
# ---------------------------------------------------------------------------
def _summarize_kernel(hs_ref, hst_ref, wout_ref, bout_ref, out_ref, alpha_ref,
                      *, scale, n_layer):
    # TODO(synk): exact Summarize variants ('wdp'/'global'/...) not reproduced;
    # this is the local scaled-dot-product case.
    hs = hs_ref[...]                                    # [TM, L, C]
    hst = hst_ref[...]
    scores = jnp.sum(hs * hst, axis=-1) * scale         # one multiply + lane reduce -> [TM, L]
    scores = scores - jnp.max(scores, axis=-1, keepdims=True)
    p = jnp.exp(scores)
    inv = pl.reciprocal(jnp.sum(p, axis=-1, keepdims=True), approx=True)
    alpha = p * inv                                     # [TM, L]

    h = alpha[:, 0:1] * hs[:, 0, :]
    for l in range(1, n_layer):
        h = h + alpha[:, l:l + 1] * hs[:, l, :]         # [TM, C]

    out = jnp.dot(h, wout_ref[...], preferred_element_type=jnp.float32) + bout_ref[...]
    out_ref[...] = out.astype(out_ref.dtype)
    alpha_ref[...] = alpha.astype(alpha_ref.dtype)


# ---------------------------------------------------------------------------
# Wrappers
# ---------------------------------------------------------------------------
def gat_twin_layer(x, x_, adj_bias, w, a_src, a_dst, b):
    n, c_in = x.shape
    n_head, n_hid = a_src.shape
    hf = n_head * n_hid
    tm = _row_tile(n)
    grid = (n // tm,)

    # Host-side block-diagonal attention matrix: e = xw @ A -> [., 2H] (dst | src).
    a_att = jnp.zeros((hf, 2 * n_head), jnp.float32)
    for h in range(n_head):
        a_att = a_att.at[h * n_hid:(h + 1) * n_hid, h].set(a_dst[h])
        a_att = a_att.at[h * n_hid:(h + 1) * n_hid, n_head + h].set(a_src[h])

    xw, xwt, e = pl.pallas_call(
        _gat_proj_kernel,
        grid=grid,
        in_specs=[
            pl.BlockSpec((tm, c_in), lambda i: (i, 0)),
            pl.BlockSpec((tm, c_in), lambda i: (i, 0)),
            pl.BlockSpec((c_in, hf), lambda i: (0, 0)),
            pl.BlockSpec((hf, 2 * n_head), lambda i: (0, 0)),
        ],
        out_specs=(
            pl.BlockSpec((tm, hf), lambda i: (i, 0)),
            pl.BlockSpec((tm, hf), lambda i: (i, 0)),
            pl.BlockSpec((tm, 2 * n_head), lambda i: (i, 0)),
        ),
        out_shape=(
            jax.ShapeDtypeStruct((n, hf), jnp.bfloat16),
            jax.ShapeDtypeStruct((n, hf), jnp.bfloat16),
            jax.ShapeDtypeStruct((n, 2 * n_head), jnp.float32),
        ),
        compiler_params=_compiler_params(),
    )(x, x_, w, a_att)

    # Wrapper-side layout plumbing (cheap XLA ops, keeps kernel stores lane-dense):
    e_dst = e[:, :n_head]                                         # [N, H]
    e_src_t = e[:, n_head:].T                                     # [H, N]
    xw_pair = jnp.concatenate(
        [xw.reshape(n, n_head, n_hid), xwt.reshape(n, n_head, n_hid)],
        axis=-1).reshape(n, n_head * 2 * n_hid)                   # [N, H*2F]
    b_pair = jnp.concatenate(
        [b.reshape(1, n_head, n_hid)] * 2, axis=-1).reshape(1, n_head * 2 * n_hid)

    out_pair = pl.pallas_call(
        functools.partial(_gat_attn_kernel, n_head=n_head, n_hid=n_hid),
        grid=grid,
        in_specs=[
            pl.BlockSpec((tm, n_head), lambda i: (i, 0)),
            pl.BlockSpec((n_head, n), lambda i: (0, 0)),
            pl.BlockSpec((tm, n), lambda i: (i, 0)),
            pl.BlockSpec((n, n_head * 2 * n_hid), lambda i: (0, 0)),
            pl.BlockSpec((1, n_head * 2 * n_hid), lambda i: (0, 0)),
        ],
        out_specs=pl.BlockSpec((tm, n_head * 2 * n_hid), lambda i: (i, 0)),
        out_shape=jax.ShapeDtypeStruct((n, n_head * 2 * n_hid), jnp.float32),
        compiler_params=_compiler_params(),
    )(e_dst, e_src_t, adj_bias, xw_pair, b_pair)

    hp = out_pair.reshape(n, n_head, 2, n_hid)
    h = hp[:, :, 0, :].reshape(n, hf)
    ht = hp[:, :, 1, :].reshape(n, hf)
    return h, ht


def summarize_and_classify(hs, hs_, w_out, b_out, temperature):
    n, n_layer, chans = hs.shape
    n_class = w_out.shape[1]
    tm = _row_tile(n)
    grid = (n // tm,)
    scale = 1.0 / (math.sqrt(chans) * temperature)
    kernel = functools.partial(_summarize_kernel, scale=scale, n_layer=n_layer)
    return pl.pallas_call(
        kernel,
        grid=grid,
        in_specs=[
            pl.BlockSpec((tm, n_layer, chans), lambda i: (i, 0, 0)),
            pl.BlockSpec((tm, n_layer, chans), lambda i: (i, 0, 0)),
            pl.BlockSpec((chans, n_class), lambda i: (0, 0)),
            pl.BlockSpec((1, n_class), lambda i: (0, 0)),
        ],
        out_specs=(
            pl.BlockSpec((tm, n_class), lambda i: (i, 0)),
            pl.BlockSpec((tm, n_layer), lambda i: (i, 0)),
        ),
        out_shape=(
            jax.ShapeDtypeStruct((n, n_class), jnp.float32),
            jax.ShapeDtypeStruct((n, n_layer), jnp.float32),
        ),
        compiler_params=_compiler_params(),
    )(hs, hs_, w_out, b_out)


def twin_gat_forward(x, edge_index, params, *, temperature=1.0):
    """Mirrors TwinGAT.forward(x, edge_index) -> (logits, alpha)."""
    n = x.shape[0]
    # Dense additive edge bias: 0 for each edge dst<-src plus self-loops, -1e9 else.
    adj = jnp.zeros((n, n), jnp.float32)
    adj = adj.at[edge_index[1], edge_index[0]].set(1.0)
    adj = jnp.maximum(adj, jnp.eye(n, dtype=jnp.float32))
    adj_bias = jnp.where(adj > 0, 0.0, MASK_VALUE).astype(jnp.bfloat16)

    x_ = x  # x.clone().detach()
    hs, hs_ = [], []
    # TODO(synk): adjacency is re-streamed once per layer; fusing all layers into a
    # single pallas_call conflicts with row tiling (each layer needs all nodes of the
    # previous one), so layers stay as separate pipelined calls.
    for (w, a_src, a_dst, b) in params["layers"]:
        # TODO(synk): F.dropout is identity here (eval mode / p effectively 0).
        h, h_ = gat_twin_layer(x, x_, adj_bias, w, a_src, a_dst, b)
        x, x_ = h, h_          # skip='vanilla' + ReLU fused in kernel
        hs.append(x)
        hs_.append(x_)

    hs = jnp.stack(hs, axis=1)      # [N, L, C]
    hs_ = jnp.stack(hs_, axis=1)    # [N, L, C]
    logits, alpha = summarize_and_classify(hs, hs_, params["w_out"],
                                           params["b_out"], temperature)
    return logits, alpha


if __name__ == "__main__":
    # Small synthetic config consistent with the module.
    N, E = 64, 256
    n_feat, n_hid, n_head, n_layer, n_class = 16, 8, 2, 2, 4
    temperature = 1.0

    key = jax.random.PRNGKey(0)
    keys = jax.random.split(key, 16)

    x = jax.random.normal(keys[0], (N, n_feat), jnp.float32)
    src = jax.random.randint(keys[1], (E,), 0, N)
    dst = jax.random.randint(keys[2], (E,), 0, N)
    edge_index = jnp.stack([src, dst], axis=0)            # [2, E]

    def init_layer(k, c_in, scale=0.1):
        k1, k2, k3, k4 = jax.random.split(k, 4)
        w = scale * jax.random.normal(k1, (c_in, n_head * n_hid), jnp.float32)
        a_src = scale * jax.random.normal(k2, (n_head, n_hid), jnp.float32)
        a_dst = scale * jax.random.normal(k3, (n_head, n_hid), jnp.float32)
        b = scale * jax.random.normal(k4, (1, n_head * n_hid), jnp.float32)
        return (w, a_src, a_dst, b)

    # Layer 0: in = n_feat; layers 1..L-1: in = n_hid * n_head (skip != 'dense').
    layers = [init_layer(keys[3], n_feat)]
    for i in range(1, n_layer):
        layers.append(init_layer(keys[3 + i], n_hid * n_head))
    w_out = 0.1 * jax.random.normal(keys[10], (n_hid * n_head, n_class), jnp.float32)
    b_out = 0.1 * jax.random.normal(keys[11], (1, n_class), jnp.float32)
    params = {"layers": layers, "w_out": w_out, "b_out": b_out}

    fwd = jax.jit(lambda xx, ei: twin_gat_forward(xx, ei, params,
                                                  temperature=temperature))
    logits, alpha = fwd(x, edge_index)
    jax.block_until_ready((logits, alpha))

    assert logits.shape == (N, n_class), logits.shape
    assert alpha.shape == (N, n_layer), alpha.shape
    assert bool(jnp.all(jnp.isfinite(logits))) and bool(jnp.all(jnp.isfinite(alpha)))
    print("KERNEL_OK")
</pallas_src>

<mosaic_0001>
module attributes {stable_mosaic.version = 11 : i64} {
  func.func @_gat_proj_kernel(%arg0: i32, %arg1: memref<64x16xf32, #tpu.memory_space<vmem>>, %arg2: memref<64x16xf32, #tpu.memory_space<vmem>>, %arg3: memref<16x16xf32, #tpu.memory_space<vmem>>, %arg4: memref<16x4xf32, #tpu.memory_space<vmem>>, %arg5: memref<64x16xbf16, #tpu.memory_space<vmem>>, %arg6: memref<64x16xbf16, #tpu.memory_space<vmem>>, %arg7: memref<64x4xf32, #tpu.memory_space<vmem>>) attributes {dimension_semantics = [#tpu.dimension_semantics<parallel>], iteration_bounds = array<i64: 1>, scalar_prefetch = 0 : i64, scratch_operands = 0 : i64, tpu.core_type = #tpu.core_type<tc>, window_params = [{transform_indices = @transform_0, window_bounds = array<i64: 64, 16>}, {transform_indices = @transform_1, window_bounds = array<i64: 64, 16>}, {pipeline_mode = #tpu.pipeline_mode<synchronous>, transform_indices = @transform_2, window_bounds = array<i64: 16, 16>}, {pipeline_mode = #tpu.pipeline_mode<synchronous>, transform_indices = @transform_3, window_bounds = array<i64: 16, 4>}, {transform_indices = @transform_4, window_bounds = array<i64: 64, 16>}, {transform_indices = @transform_5, window_bounds = array<i64: 64, 16>}, {transform_indices = @transform_6, window_bounds = array<i64: 64, 4>}]} {
    %c0 = arith.constant 0 : index
    %c0_0 = arith.constant 0 : index
    %0 = vector.load %arg1[%c0, %c0_0] : memref<64x16xf32, #tpu.memory_space<vmem>>, vector<64x16xf32>
    %c0_1 = arith.constant 0 : index
    %c0_2 = arith.constant 0 : index
    %1 = vector.load %arg2[%c0_1, %c0_2] : memref<64x16xf32, #tpu.memory_space<vmem>>, vector<64x16xf32>
    %2 = tpu.concatenate %0, %1 in 0 : vector<64x16xf32>, vector<64x16xf32> -> vector<128x16xf32>
    %c0_3 = arith.constant 0 : index
    %c0_4 = arith.constant 0 : index
    %3 = vector.load %arg3[%c0_3, %c0_4] : memref<16x16xf32, #tpu.memory_space<vmem>>, vector<16x16xf32>
    %cst = arith.constant dense<0.000000e+00> : vector<128x16xf32>
    %4 = tpu.matmul %2, %3, %cst {dimension_numbers = #tpu.dot_dimension_numbers<[1], [0], [0], [1], [0, 0, 1, 1], [], []>} : vector<128x16xf32>, vector<16x16xf32>, vector<128x16xf32> -> vector<128x16xf32>
    %5 = vector.extract_strided_slice %4 {offsets = [0, 0], sizes = [64, 16], strides = [1, 1]} : vector<128x16xf32> to vector<64x16xf32>
    %6 = vector.extract_strided_slice %4 {offsets = [64, 0], sizes = [64, 16], strides = [1, 1]} : vector<128x16xf32> to vector<64x16xf32>
    %7 = arith.truncf %5 : vector<64x16xf32> to vector<64x16xbf16>
    %c0_5 = arith.constant 0 : index
    %c0_6 = arith.constant 0 : index
    %8 = vector.load %arg5[%c0_5, %c0_6] : memref<64x16xbf16, #tpu.memory_space<vmem>>, vector<64x16xbf16>
    tpu.vector_store %arg5[%c0_5, %c0_6], %7 {strides = array<i32>} : memref<64x16xbf16, #tpu.memory_space<vmem>>, vector<64x16xbf16>,
    %9 = arith.truncf %6 : vector<64x16xf32> to vector<64x16xbf16>
    %c0_7 = arith.constant 0 : index
    %c0_8 = arith.constant 0 : index
    %10 = vector.load %arg6[%c0_7, %c0_8] : memref<64x16xbf16, #tpu.memory_space<vmem>>, vector<64x16xbf16>
    tpu.vector_store %arg6[%c0_7, %c0_8], %9 {strides = array<i32>} : memref<64x16xbf16, #tpu.memory_space<vmem>>, vector<64x16xbf16>,
    %c0_9 = arith.constant 0 : index
    %c0_10 = arith.constant 0 : index
    %11 = vector.load %arg4[%c0_9, %c0_10] : memref<16x4xf32, #tpu.memory_space<vmem>>, vector<16x4xf32>
    %cst_11 = arith.constant dense<0.000000e+00> : vector<64x4xf32>
    %12 = tpu.matmul %5, %11, %cst_11 {dimension_numbers = #tpu.dot_dimension_numbers<[1], [0], [0], [1], [0, 0, 1, 1], [], []>} : vector<64x16xf32>, vector<16x4xf32>, vector<64x4xf32> -> vector<64x4xf32>
    %c0_12 = arith.constant 0 : index
    %c0_13 = arith.constant 0 : index
    %13 = vector.load %arg7[%c0_12, %c0_13] : memref<64x4xf32, #tpu.memory_space<vmem>>, vector<64x4xf32>
    tpu.vector_store %arg7[%c0_12, %c0_13], %12 {strides = array<i32>} : memref<64x4xf32, #tpu.memory_space<vmem>>, vector<64x4xf32>,
    return
  }
  func.func @transform_0(%arg0: i32) -> (i32, i32) {
    %c0_i32 = arith.constant 0 : i32
    %c0_i32_0 = arith.constant 0 : i32
    return %arg0, %c0_i32 : i32, i32
  }
  func.func @transform_1(%arg0: i32) -> (i32, i32) {
    %c0_i32 = arith.constant 0 : i32
    %c0_i32_0 = arith.constant 0 : i32
    return %arg0, %c0_i32 : i32, i32
  }
  func.func @transform_2(%arg0: i32) -> (i32, i32) {
    %c0_i32 = arith.constant 0 : i32
    %c0_i32_0 = arith.constant 0 : i32
    %c0_i32_1 = arith.constant 0 : i32
    return %c0_i32, %c0_i32_0 : i32, i32
  }
  func.func @transform_3(%arg0: i32) -> (i32, i32) {
    %c0_i32 = arith.constant 0 : i32
    %c0_i32_0 = arith.constant 0 : i32
    %c0_i32_1 = arith.constant 0 : i32
    return %c0_i32, %c0_i32_0 : i32, i32
  }
  func.func @transform_4(%arg0: i32) -> (i32, i32) {
    %c0_i32 = arith.constant 0 : i32
    %c0_i32_0 = arith.constant 0 : i32
    return %arg0, %c0_i32 : i32, i32
  }
  func.func @transform_5(%arg0: i32) -> (i32, i32) {
    %c0_i32 = arith.constant 0 : i32
    %c0_i32_0 = arith.constant 0 : i32
    return %arg0, %c0_i32 : i32, i32
  }
  func.func @transform_6(%arg0: i32) -> (i32, i32) {
    %c0_i32 = arith.constant 0 : i32
    %c0_i32_0 = arith.constant 0 : i32
    return %arg0, %c0_i32 : i32, i32
  }
}

module attributes {stable_mosaic.version = 11 : i64} {
  func.func @_gat_attn_kernel(%arg0: i32, %arg1: memref<64x2xf32, #tpu.memory_space<vmem>>, %arg2: memref<2x64xf32, #tpu.memory_space<vmem>>, %arg3: memref<64x64xbf16, #tpu.memory_space<vmem>>, %arg4: memref<64x32xbf16, #tpu.memory_space<vmem>>, %arg5: memref<1x32xf32, #tpu.memory_space<vmem>>, %arg6: memref<64x32xf32, #tpu.memory_space<vmem>>) attributes {dimension_semantics = [#tpu.dimension_semantics<parallel>], iteration_bounds = array<i64: 1>, scalar_prefetch = 0 : i64, scratch_operands = 0 : i64, tpu.core_type = #tpu.core_type<tc>, window_params = [{transform_indices = @transform_0, window_bounds = array<i64: 64, 2>}, {pipeline_mode = #tpu.pipeline_mode<synchronous>, transform_indices = @transform_1, window_bounds = array<i64: 2, 64>}, {transform_indices = @transform_2, window_bounds = array<i64: 64, 64>}, {pipeline_mode = #tpu.pipeline_mode<synchronous>, transform_indices = @transform_3, window_bounds = array<i64: 64, 32>}, {pipeline_mode = #tpu.pipeline_mode<synchronous>, transform_indices = @transform_4, window_bounds = array<i64: 1, 32>}, {transform_indices = @transform_5, window_bounds = array<i64: 64, 32>}]} {
    %c0 = arith.constant 0 : index
    %c0_0 = arith.constant 0 : index
    %0 = vector.load %arg1[%c0, %c0_0] : memref<64x2xf32, #tpu.memory_space<vmem>>, vector<64x2xf32>
    %c0_1 = arith.constant 0 : index
    %c0_2 = arith.constant 0 : index
    %1 = vector.load %arg2[%c0_1, %c0_2] : memref<2x64xf32, #tpu.memory_space<vmem>>, vector<2x64xf32>
    %c0_3 = arith.constant 0 : index
    %c0_4 = arith.constant 0 : index
    %2 = vector.load %arg3[%c0_3, %c0_4] : memref<64x64xbf16, #tpu.memory_space<vmem>>, vector<64x64xbf16>
    %3 = arith.extf %2 : vector<64x64xbf16> to vector<64x64xf32>
    %c0_5 = arith.constant 0 : index
    %c0_6 = arith.constant 0 : index
    %4 = vector.load %arg4[%c0_5, %c0_6] : memref<64x32xbf16, #tpu.memory_space<vmem>>, vector<64x32xbf16>
    %5 = vector.extract_strided_slice %0 {offsets = [0, 0], sizes = [64, 1], strides = [1, 1]} : vector<64x2xf32> to vector<64x1xf32>
    %6 = vector.extract_strided_slice %1 {offsets = [0, 0], sizes = [1, 64], strides = [1, 1]} : vector<2x64xf32> to vector<1x64xf32>
    %7 = vector.broadcast %5 : vector<64x1xf32> to vector<64x64xf32>
    %8 = vector.broadcast %6 : vector<1x64xf32> to vector<64x64xf32>
    %9 = arith.addf %7, %8 : vector<64x64xf32>
    %cst = arith.constant 0.000000e+00 : f32
    %10 = vector.broadcast %cst : f32 to vector<64x64xf32>
    %11 = arith.cmpf oge, %9, %10 : vector<64x64xf32>
    %cst_7 = arith.constant 2.000000e-01 : f32
    %12 = vector.broadcast %cst_7 : f32 to vector<64x64xf32>
    %13 = arith.mulf %12, %9 : vector<64x64xf32>
    %14 = arith.select %11, %9, %13 : vector<64x64xi1>, vector<64x64xf32>
    %15 = arith.addf %14, %3 : vector<64x64xf32>
    %cst_8 = arith.constant dense<0xFF800000> : vector<64xf32>
    %16 = vector.multi_reduction <maximumf>, %15, %cst_8 [1] : vector<64x64xf32> to vector<64xf32>
    %17 = vector.shape_cast %16 : vector<64xf32> to vector<64x1xf32>
    %18 = vector.broadcast %17 : vector<64x1xf32> to vector<64x64xf32>
    %19 = arith.subf %15, %18 : vector<64x64xf32>
    %20 = math.exp %19 : vector<64x64xf32>
    %cst_9 = arith.constant dense<0.000000e+00> : vector<64xf32>
    %21 = vector.multi_reduction <add>, %20, %cst_9 [1] : vector<64x64xf32> to vector<64xf32>
    %22 = vector.shape_cast %21 : vector<64xf32> to vector<64x1xf32>
    %23 = tpu.reciprocal %22 {approx = true} : vector<64x1xf32> -> vector<64x1xf32>
    %24 = vector.broadcast %23 : vector<64x1xf32> to vector<64x64xf32>
    %25 = arith.mulf %20, %24 : vector<64x64xf32>
    %26 = arith.truncf %25 : vector<64x64xf32> to vector<64x64xbf16>
    %27 = vector.extract_strided_slice %4 {offsets = [0, 0], sizes = [64, 16], strides = [1, 1]} : vector<64x32xbf16> to vector<64x16xbf16>
    %cst_10 = arith.constant dense<0.000000e+00> : vector<64x16xf32>
    %28 = tpu.matmul %26, %27, %cst_10 {dimension_numbers = #tpu.dot_dimension_numbers<[1], [0], [0], [1], [0, 0, 1, 1], [], []>} : vector<64x64xbf16>, vector<64x16xbf16>, vector<64x16xf32> -> vector<64x16xf32>
    %29 = vector.extract_strided_slice %0 {offsets = [0, 1], sizes = [64, 1], strides = [1, 1]} : vector<64x2xf32> to vector<64x1xf32>
    %30 = vector.extract_strided_slice %1 {offsets = [1, 0], sizes = [1, 64], strides = [1, 1]} : vector<2x64xf32> to vector<1x64xf32>
    %31 = vector.broadcast %29 : vector<64x1xf32> to vector<64x64xf32>
    %32 = vector.broadcast %30 : vector<1x64xf32> to vector<64x64xf32>
    %33 = arith.addf %31, %32 : vector<64x64xf32>
    %cst_11 = arith.constant 0.000000e+00 : f32
    %34 = vector.broadcast %cst_11 : f32 to vector<64x64xf32>
    %35 = arith.cmpf oge, %33, %34 : vector<64x64xf32>
    %cst_12 = arith.constant 2.000000e-01 : f32
    %36 = vector.broadcast %cst_12 : f32 to vector<64x64xf32>
    %37 = arith.mulf %36, %33 : vector<64x64xf32>
    %38 = arith.select %35, %33, %37 : vector<64x64xi1>, vector<64x64xf32>
    %39 = arith.addf %38, %3 : vector<64x64xf32>
    %cst_13 = arith.constant dense<0xFF800000> : vector<64xf32>
    %40 = vector.multi_reduction <maximumf>, %39, %cst_13 [1] : vector<64x64xf32> to vector<64xf32>
    %41 = vector.shape_cast %40 : vector<64xf32> to vector<64x1xf32>
    %42 = vector.broadcast %41 : vector<64x1xf32> to vector<64x64xf32>
    %43 = arith.subf %39, %42 : vector<64x64xf32>
    %44 = math.exp %43 : vector<64x64xf32>
    %cst_14 = arith.constant dense<0.000000e+00> : vector<64xf32>
    %45 = vector.multi_reduction <add>, %44, %cst_14 [1] : vector<64x64xf32> to vector<64xf32>
    %46 = vector.shape_cast %45 : vector<64xf32> to vector<64x1xf32>
    %47 = tpu.reciprocal %46 {approx = true} : vector<64x1xf32> -> vector<64x1xf32>
    %48 = vector.broadcast %47 : vector<64x1xf32> to vector<64x64xf32>
    %49 = arith.mulf %44, %48 : vector<64x64xf32>
    %50 = arith.truncf %49 : vector<64x64xf32> to vector<64x64xbf16>
    %51 = vector.extract_strided_slice %4 {offsets = [0, 16], sizes = [64, 16], strides = [1, 1]} : vector<64x32xbf16> to vector<64x16xbf16>
    %cst_15 = arith.constant dense<0.000000e+00> : vector<64x16xf32>
    %52 = tpu.matmul %50, %51, %cst_15 {dimension_numbers = #tpu.dot_dimension_numbers<[1], [0], [0], [1], [0, 0, 1, 1], [], []>} : vector<64x64xbf16>, vector<64x16xbf16>, vector<64x16xf32> -> vector<64x16xf32>
    %53 = tpu.concatenate %28, %52 in 1 : vector<64x16xf32>, vector<64x16xf32> -> vector<64x32xf32>
    %c0_16 = arith.constant 0 : index
    %c0_17 = arith.constant 0 : index
    %54 = vector.load %arg5[%c0_16, %c0_17] : memref<1x32xf32, #tpu.memory_space<vmem>>, vector<1x32xf32>
    %55 = vector.broadcast %54 : vector<1x32xf32> to vector<64x32xf32>
    %56 = arith.addf %53, %55 : vector<64x32xf32>
    %cst_18 = arith.constant 0.000000e+00 : f32
    %57 = vector.broadcast %cst_18 : f32 to vector<64x32xf32>
    %58 = arith.maximumf %56, %57 : vector<64x32xf32>
    %c0_19 = arith.constant 0 : index
    %c0_20 = arith.constant 0 : index
    %59 = vector.load %arg6[%c0_19, %c0_20] : memref<64x32xf32, #tpu.memory_space<vmem>>, vector<64x32xf32>
    tpu.vector_store %arg6[%c0_19, %c0_20], %58 {strides = array<i32>} : memref<64x32xf32, #tpu.memory_space<vmem>>, vector<64x32xf32>,
    return
  }
  func.func @transform_0(%arg0: i32) -> (i32, i32) {
    %c0_i32 = arith.constant 0 : i32
    %c0_i32_0 = arith.constant 0 : i32
    return %arg0, %c0_i32 : i32, i32
  }
  func.func @transform_1(%arg0: i32) -> (i32, i32) {
    %c0_i32 = arith.constant 0 : i32
    %c0_i32_0 = arith.constant 0 : i32
    %c0_i32_1 = arith.constant 0 : i32
    return %c0_i32, %c0_i32_0 : i32, i32
  }
  func.func @transform_2(%arg0: i32) -> (i32, i32) {
    %c0_i32 = arith.constant 0 : i32
    %c0_i32_0 = arith.constant 0 : i32
    return %arg0, %c0_i32 : i32, i32
  }
  func.func @transform_3(%arg0: i32) -> (i32, i32) {
    %c0_i32 = arith.constant 0 : i32
    %c0_i32_0 = arith.constant 0 : i32
    %c0_i32_1 = arith.constant 0 : i32
    return %c0_i32, %c0_i32_0 : i32, i32
  }
  func.func @transform_4(%arg0: i32) -> (i32, i32) {
    %c0_i32 = arith.constant 0 : i32
    %c0_i32_0 = arith.constant 0 : i32
    %c0_i32_1 = arith.constant 0 : i32
    return %c0_i32, %c0_i32_0 : i32, i32
  }
  func.func @transform_5(%arg0: i32) -> (i32, i32) {
    %c0_i32 = arith.constant 0 : i32
    %c0_i32_0 = arith.constant 0 : i32
    return %arg0, %c0_i32 : i32, i32
  }
}

module attributes {stable_mosaic.version = 11 : i64} {
  func.func @_summarize_kernel(%arg0: i32, %arg1: memref<64x2x16xf32, #tpu.memory_space<vmem>>, %arg2: memref<64x2x16xf32, #tpu.memory_space<vmem>>, %arg3: memref<16x4xf32, #tpu.memory_space<vmem>>, %arg4: memref<1x4xf32, #tpu.memory_space<vmem>>, %arg5: memref<64x4xf32, #tpu.memory_space<vmem>>, %arg6: memref<64x2xf32, #tpu.memory_space<vmem>>) attributes {dimension_semantics = [#tpu.dimension_semantics<parallel>], iteration_bounds = array<i64: 1>, scalar_prefetch = 0 : i64, scratch_operands = 0 : i64, tpu.core_type = #tpu.core_type<tc>, window_params = [{transform_indices = @transform_0, window_bounds = array<i64: 64, 2, 16>}, {transform_indices = @transform_1, window_bounds = array<i64: 64, 2, 16>}, {pipeline_mode = #tpu.pipeline_mode<synchronous>, transform_indices = @transform_2, window_bounds = array<i64: 16, 4>}, {pipeline_mode = #tpu.pipeline_mode<synchronous>, transform_indices = @transform_3, window_bounds = array<i64: 1, 4>}, {transform_indices = @transform_4, window_bounds = array<i64: 64, 4>}, {transform_indices = @transform_5, window_bounds = array<i64: 64, 2>}]} {
    %c0 = arith.constant 0 : index
    %c0_0 = arith.constant 0 : index
    %c0_1 = arith.constant 0 : index
    %0 = vector.load %arg1[%c0, %c0_0, %c0_1] : memref<64x2x16xf32, #tpu.memory_space<vmem>>, vector<64x2x16xf32>
    %c0_2 = arith.constant 0 : index
    %c0_3 = arith.constant 0 : index
    %c0_4 = arith.constant 0 : index
    %1 = vector.load %arg2[%c0_2, %c0_3, %c0_4] : memref<64x2x16xf32, #tpu.memory_space<vmem>>, vector<64x2x16xf32>
    %2 = arith.mulf %0, %1 : vector<64x2x16xf32>
    %cst = arith.constant dense<0.000000e+00> : vector<64x2xf32>
    %3 = vector.multi_reduction <add>, %2, %cst [2] : vector<64x2x16xf32> to vector<64x2xf32>
    %cst_5 = arith.constant 2.500000e-01 : f32
    %4 = vector.broadcast %cst_5 : f32 to vector<64x2xf32>
    %5 = arith.mulf %3, %4 : vector<64x2xf32>
    %cst_6 = arith.constant dense<0xFF800000> : vector<64xf32>
    %6 = vector.multi_reduction <maximumf>, %5, %cst_6 [1] : vector<64x2xf32> to vector<64xf32>
    %7 = vector.shape_cast %6 : vector<64xf32> to vector<64x1xf32>
    %8 = vector.broadcast %7 : vector<64x1xf32> to vector<64x2xf32>
    %9 = arith.subf %5, %8 : vector<64x2xf32>
    %10 = math.exp %9 : vector<64x2xf32>
    %cst_7 = arith.constant dense<0.000000e+00> : vector<64xf32>
    %11 = vector.multi_reduction <add>, %10, %cst_7 [1] : vector<64x2xf32> to vector<64xf32>
    %12 = vector.shape_cast %11 : vector<64xf32> to vector<64x1xf32>
    %13 = tpu.reciprocal %12 {approx = true} : vector<64x1xf32> -> vector<64x1xf32>
    %14 = vector.broadcast %13 : vector<64x1xf32> to vector<64x2xf32>
    %15 = arith.mulf %10, %14 : vector<64x2xf32>
    %16 = vector.extract_strided_slice %15 {offsets = [0, 0], sizes = [64, 1], strides = [1, 1]} : vector<64x2xf32> to vector<64x1xf32>
    %17 = vector.extract_strided_slice %0 {offsets = [0, 0, 0], sizes = [64, 1, 16], strides = [1, 1, 1]} : vector<64x2x16xf32> to vector<64x1x16xf32>
    %18 = vector.shape_cast %17 : vector<64x1x16xf32> to vector<64x16xf32>
    %19 = vector.broadcast %16 : vector<64x1xf32> to vector<64x16xf32>
    %20 = arith.mulf %19, %18 : vector<64x16xf32>
    %21 = vector.extract_strided_slice %15 {offsets = [0, 1], sizes = [64, 1], strides = [1, 1]} : vector<64x2xf32> to vector<64x1xf32>
    %22 = vector.extract_strided_slice %0 {offsets = [0, 1, 0], sizes = [64, 1, 16], strides = [1, 1, 1]} : vector<64x2x16xf32> to vector<64x1x16xf32>
    %23 = vector.shape_cast %22 : vector<64x1x16xf32> to vector<64x16xf32>
    %24 = vector.broadcast %21 : vector<64x1xf32> to vector<64x16xf32>
    %25 = arith.mulf %24, %23 : vector<64x16xf32>
    %26 = arith.addf %20, %25 : vector<64x16xf32>
    %c0_8 = arith.constant 0 : index
    %c0_9 = arith.constant 0 : index
    %27 = vector.load %arg3[%c0_8, %c0_9] : memref<16x4xf32, #tpu.memory_space<vmem>>, vector<16x4xf32>
    %cst_10 = arith.constant dense<0.000000e+00> : vector<64x4xf32>
    %28 = tpu.matmul %26, %27, %cst_10 {dimension_numbers = #tpu.dot_dimension_numbers<[1], [0], [0], [1], [0, 0, 1, 1], [], []>} : vector<64x16xf32>, vector<16x4xf32>, vector<64x4xf32> -> vector<64x4xf32>
    %c0_11 = arith.constant 0 : index
    %c0_12 = arith.constant 0 : index
    %29 = vector.load %arg4[%c0_11, %c0_12] : memref<1x4xf32, #tpu.memory_space<vmem>>, vector<1x4xf32>
    %30 = vector.broadcast %29 : vector<1x4xf32> to vector<64x4xf32>
    %31 = arith.addf %28, %30 : vector<64x4xf32>
    %c0_13 = arith.constant 0 : index
    %c0_14 = arith.constant 0 : index
    %32 = vector.load %arg5[%c0_13, %c0_14] : memref<64x4xf32, #tpu.memory_space<vmem>>, vector<64x4xf32>
    tpu.vector_store %arg5[%c0_13, %c0_14], %31 {strides = array<i32>} : memref<64x4xf32, #tpu.memory_space<vmem>>, vector<64x4xf32>,
    %c0_15 = arith.constant 0 : index
    %c0_16 = arith.constant 0 : index
    %33 = vector.load %arg6[%c0_15, %c0_16] : memref<64x2xf32, #tpu.memory_space<vmem>>, vector<64x2xf32>
    tpu.vector_store %arg6[%c0_15, %c0_16], %15 {strides = array<i32>} : memref<64x2xf32, #tpu.memory_space<vmem>>, vector<64x2xf32>,
    return
  }
  func.func @transform_0(%arg0: i32) -> (i32, i32, i32) {
    %c0_i32 = arith.constant 0 : i32
    %c0_i32_0 = arith.constant 0 : i32
    %c0_i32_1 = arith.constant 0 : i32
    return %arg0, %c0_i32, %c0_i32_0 : i32, i32, i32
  }
  func.func @transform_1(%arg0: i32) -> (i32, i32, i32) {
    %c0_i32 = arith.constant 0 : i32
    %c0_i32_0 = arith.constant 0 : i32
    %c0_i32_1 = arith.constant 0 : i32
    return %arg0, %c0_i32, %c0_i32_0 : i32, i32, i32
  }
  func.func @transform_2(%arg0: i32) -> (i32, i32) {
    %c0_i32 = arith.constant 0 : i32
    %c0_i32_0 = arith.constant 0 : i32
    %c0_i32_1 = arith.constant 0 : i32
    return %c0_i32, %c0_i32_0 : i32, i32
  }
  func.func @transform_3(%arg0: i32) -> (i32, i32) {
    %c0_i32 = arith.constant 0 : i32
    %c0_i32_0 = arith.constant 0 : i32
    %c0_i32_1 = arith.constant 0 : i32
    return %c0_i32, %c0_i32_0 : i32, i32
  }
  func.func @transform_4(%arg0: i32) -> (i32, i32) {
    %c0_i32 = arith.constant 0 : i32
    %c0_i32_0 = arith.constant 0 : i32
    return %arg0, %c0_i32 : i32, i32
  }
  func.func @transform_5(%arg0: i32) -> (i32, i32) {
    %c0_i32 = arith.constant 0 : i32
    %c0_i32_0 = arith.constant 0 : i32
    return %arg0, %c0_i32 : i32, i32
  }
}

</mosaic_0001>

<bundles_post_ra>
// kernel: _lambda_.5
= control target key start
LH: loop header
LB: loop body
LE: loop exit
PB: predicated region body
PF: predicated region fallthrough
CT: control target
= control target key end

     0   :  { %12 = vsyncpa [#allocation3], 0  ;;  %s1080_s0 = inlined_call_operand.hbm [shape: f32[64,16], index: 0, kind: input, shape index: {}, may-alias: {0,1}]   ;;  %s1081_s1 = inlined_call_operand.hbm [shape: f32[64,16], index: 1, kind: input, shape index: {}, may-alias: {0,1}]   ;;  %s1082_s2 = inlined_call_operand.hbm [shape: f32[16,16], index: 2, kind: input, shape index: {}]   ;;  %s1083_s3 = inlined_call_operand.hbm [shape: f32[16,4], index: 3, kind: input, shape index: {}]   ;;  %s1084_s4 = inlined_call_operand.hbm [shape: bf16[64,16], index: 4, kind: output, shape index: {0}]   ;;  %s1085_s5 = inlined_call_operand.hbm [shape: bf16[64,16], index: 5, kind: output, shape index: {1}]   ;;  %s1086_s6 = inlined_call_operand.hbm [shape: f32[64,4], index: 6, kind: output, shape index: {2}]  }
   0x1   :  { %13 = vsyncpa [#allocation6], 0 }
   0x2   :  { %14 = vsyncpa [#allocation9], 0 }
   0x3   :  { %15 = vsyncpa [#allocation4], 0 }
   0x4   :  { %16 = vsyncpa [#allocation12], 0  ;;  %s873_s21 = smov [#allocation5]   ;;  %s874_s23 = smov [#allocation2]  }
   0x5   :  { %s34_s22 = sshll.u32 %s873_s21, 4  ;;  %s22_s24 = sshll.u32 %s874_s23, 4  ;;  %s35_s22 = int_to_ptr.vmem [resolvable:$true] %s34_s22  ;;  %s919_s24 = int_to_ptr.vmem [resolvable:$true] %s22_s24 }
   0x6   :  { %s709_s27 = scalar_lea.hbm %s1081_s1, 1024 }
   0x7   :  { %p710_p0 = scmp.ne.s32.totalorder %s1081_s1, %s709_s27  ;;  %p713_p1 = scmp.lt.u32.totalorder %s709_s27, %s1081_s1 }
   0x9   :  { %p715_p2 = pnand %p713_p1, %p710_p0 }
   0xb   :  { %718 = shalt.err (!%p715_p2)
}
   0xc   :  { %s719_s8 = scalar_lea.vmem %s35_s22, 1024  ;;  %p724_p4 = scmp.lt.s32.totalorder %s35_s22, %s35_s22 }
   0xd   :  { %p720_p3 = scmp.ne.s32.totalorder %s35_s22, %s719_s8  ;;  %p725_p5 = scmp.lt.s32.totalorder %s719_s8, %s719_s8 }
   0xf   :  { %p726_p6 = por %p725_p5, %p724_p4 }
  0x11   :  { %p727_p7 = pnand %p726_p6, %p720_p3 }
  0x13   :  { %730 = shalt.err (!%p727_p7)
}
  0x14   :  { %s875_s9 = smov 128   ;;  %s876_s10 = smov 8  }
  0x15   :  { %40 = dma.hbm_to_vmem [thread:$0]  %s1081_s1, 1024, %s35_s22, [#allocation6], %s875_s9, %s875_s9, %s876_s10  }
  0x16   :  { %s731_s15 = scalar_lea.hbm %s1080_s0, 1024 }
  0x17   :  { %p732_p8 = scmp.ne.s32.totalorder %s1080_s0, %s731_s15  ;;  %p735_p9 = scmp.lt.u32.totalorder %s731_s15, %s1080_s0 }
  0x19   :  { %p737_p10 = pnand %p735_p9, %p732_p8 }
  0x1b   :  { %740 = shalt.err (!%p737_p10)
}
  0x1c   :  { %s741_s20 = scalar_lea.vmem %s919_s24, 1024  ;;  %p746_p12 = scmp.lt.s32.totalorder %s919_s24, %s919_s24 }
  0x1d   :  { %p742_p11 = scmp.ne.s32.totalorder %s919_s24, %s741_s20  ;;  %p747_p13 = scmp.lt.s32.totalorder %s741_s20, %s741_s20 }
  0x1f   :  { %p748_p0 = por %p747_p13, %p746_p12 }
  0x21   :  { %p749_p1 = pnand %p748_p0, %p742_p11 }
  0x23   :  { %752 = shalt.err (!%p749_p1)
}
  0x24   :  { %28 = dma.hbm_to_vmem [thread:$0]  %s1080_s0, 1024, %s919_s24, [#allocation3], %s875_s9, %s875_s9, %s876_s10  }
  0x25   :  { %s877_s22 = smov [#allocation7]   ;;  %s878_s25 = smov [#allocation8]  }
  0x26   :  { %s46_s23 = sshll.u32 %s877_s22, 4  ;;  %s58_s26 = sshll.u32 %s878_s25, 4  ;;  %s47_s23 = int_to_ptr.vmem [resolvable:$true] %s46_s23  ;;  %s956_s26 = int_to_ptr.vmem [resolvable:$true] %s58_s26 }
  0x27   :  { %s753_s29 = scalar_lea.hbm %s1082_s2, 256 }
  0x28   :  { %p754_p2 = scmp.ne.s32.totalorder %s1082_s2, %s753_s29  ;;  %p757_p3 = scmp.lt.u32.totalorder %s753_s29, %s1082_s2 }
  0x2a   :  { %p759_p4 = pnand %p757_p3, %p754_p2 }
  0x2c   :  { %762 = shalt.err (!%p759_p4)
}
  0x2d   :  { %s763_s0 = scalar_lea.vmem %s47_s23, 256  ;;  %p768_p6 = scmp.lt.s32.totalorder %s47_s23, %s47_s23 }
  0x2e   :  { %p764_p5 = scmp.ne.s32.totalorder %s47_s23, %s763_s0  ;;  %p769_p7 = scmp.lt.s32.totalorder %s763_s0, %s763_s0 }
  0x30   :  { %p770_p8 = por %p769_p7, %p768_p6 }
  0x32   :  { %p771_p9 = pnand %p770_p8, %p764_p5 }
  0x34   :  { %774 = shalt.err (!%p771_p9)
}
  0x35   :  { %52 = dma.hbm_to_vmem [thread:$0]  %s1082_s2, 256, %s47_s23, [#allocation6], %s875_s9, %s875_s9, %s876_s10  }
  0x36   :  { %s775_s15 = scalar_lea.hbm %s1083_s3, 256 }
  0x37   :  { %p776_p10 = scmp.ne.s32.totalorder %s1083_s3, %s775_s15  ;;  %p779_p11 = scmp.lt.u32.totalorder %s775_s15, %s1083_s3 }
  0x39   :  { %p781_p12 = pnand %p779_p11, %p776_p10 }
  0x3b   :  { %784 = shalt.err (!%p781_p12)
}
  0x3c   :  { %s785_s20 = scalar_lea.vmem %s956_s26, 256  ;;  %p790_p0 = scmp.lt.s32.totalorder %s956_s26, %s956_s26 }
  0x3d   :  { %p786_p13 = scmp.ne.s32.totalorder %s956_s26, %s785_s20  ;;  %p791_p1 = scmp.lt.s32.totalorder %s785_s20, %s785_s20 }
  0x3f   :  { %p792_p2 = por %p791_p1, %p790_p0 }
  0x41   :  { %p793_p3 = pnand %p792_p2, %p786_p13 }
  0x43   :  { %796 = shalt.err (!%p793_p3)
}
  0x44   :  { %64 = dma.hbm_to_vmem [thread:$0]  %s1083_s3, 256, %s956_s26, [#allocation9], %s875_s9, %s875_s9, %s876_s10  }
  0x45   :  { %863 = dma.done.wait [#allocation3], 1024  }
  0x46   :  { %864 = vsyncadd [#allocation3], 4294966272 }
  0x47   :  { %865 = dma.done.wait [#allocation6], 1280  }
  0x48   :  { %866 = vsyncadd [#allocation6], 4294966016 }
  0x49   :  { %867 = dma.done.wait [#allocation9], 256  }
  0x4a   :  { %868 = vsyncadd [#allocation9], 4294967040  ;;  %vm95_vm0 = vcmask 130048   ;;  %v93_v0 = vld [vmem:[#allocation7] sm:$0xff]  ;;  %v94_v1 = vld [vmem:[#allocation7 + $0x8] sm:$0xff]  ;;  %vm321_vm1 = vcmask 125952  }
  0x4b   :  { %v77_v2 = vld [vmem:[#allocation2] sm:$0xff]  ;;  %v688_v3 = vpack.c.bf16 %v94_v1, %v93_v0  ;;  %v78_v4 = vld [vmem:[#allocation2 + $0x8] sm:$0xff]  ;;  %v370_v7 = vld [vmem:[#allocation8] sm:$0xff]  ;;  %s879_s3 = smov [#allocation11]   ;;  %s880_s22 = smov [#allocation10]  }
  0x4c   :  { %648 = vmatprep.mubr.msk.f32.mxu0 %vm95_vm0, %v77_v2  ;;  %v89_v5 = vld [vmem:[#allocation5 + $0x20] sm:$0xff]  ;;  %v90_v6 = vld [vmem:[#allocation5 + $0x28] sm:$0xff]  ;;  %v371_v8 = vld [vmem:[#allocation8 + $0x8] sm:$0xff]  ;;  %s527_s21 = sshll.u32 %s879_s3, 4  ;;  %s515_s23 = sshll.u32 %s880_s22, 4  ;;  %s528_s21 = int_to_ptr.vmem [resolvable:$true] %s527_s21  ;;  %s516_s23 = int_to_ptr.vmem [resolvable:$true] %s515_s23 }
  0x4d   :  { %689 = vmatprep.subr.bf16.mxu0 %v688_v3  ;;  %696 = vmatprep.subr.bf16.mxu1 %v688_v3  ;;  %v79_v9 = vld [vmem:[#allocation2 + $0x10] sm:$0xff]  ;;  %v692_v10 = vpack.c.bf16 %v371_v8, %v370_v7  ;;  %v80_v12 = vld [vmem:[#allocation2 + $0x18] sm:$0xff]  ;;  %v81_v14 = vld [vmem:[#allocation2 + $0x20] sm:$0xff]  ;;  %s797_s25 = scalar_lea.vmem %s528_s21, 512  ;;  %p802_p5 = scmp.lt.s32.totalorder %s528_s21, %s528_s21 }
  0x4e   :  { %691 = vmatpush3.bf16.msra.mxu0 %v688_v3  ;;  %697 = vmatpush3.bf16.msra.mxu1 %v688_v3  ;;  %v91_v11 = vld [vmem:[#allocation5 + $0x30] sm:$0xff]  ;;  %v92_v13 = vld [vmem:[#allocation5 + $0x38] sm:$0xff]  ;;  %v82_v15 = vld [vmem:[#allocation2 + $0x28] sm:$0xff]  ;;  %p798_p4 = scmp.ne.s32.totalorder %s528_s21, %s797_s25  ;;  %p803_p6 = scmp.lt.s32.totalorder %s797_s25, %s797_s25 }
  0x4f   :  { %666 = vmatprep.mubr.msk.f32.mxu1 %vm95_vm0, %v89_v5  ;;  %693 = vmatprep.subr.bf16.mxu1 %v692_v10  ;;  %v83_v16 = vld [vmem:[#allocation2 + $0x30] sm:$0xff]  ;;  %v84_v17 = vld [vmem:[#allocation2 + $0x38] sm:$0xff]  ;;  %v85_v18 = vld [vmem:[#allocation5] sm:$0xff] }
  0x50   :  { %v86_v19 = vld [vmem:[#allocation5 + $0x8] sm:$0xff]  ;;  %v87_v20 = vld [vmem:[#allocation5 + $0x10] sm:$0xff]  ;;  %v88_v21 = vld [vmem:[#allocation5 + $0x18] sm:$0xff]  ;;  %p804_p7 = por %p803_p6, %p802_p5 }
  0x51   :  { %649 = vmatmul.mubr.msk.f32.vlgmr.msra.gmra.mrb[0].mxu0 %vm95_vm0, %v78_v4  ;;  %667 = vmatmul.mubr.msk.f32.vlgmr.msra.gmra.mrb[0].mxu1 %vm95_vm0, %v90_v6 }
  0x52   :  { %651 = vmatprep.mubr.msk.f32.mxu0 %vm95_vm0, %v79_v9  ;;  %695 = vmatpush3.bf16.msra.mxu1 %v692_v10  ;;  %p805_p8 = pnand %p804_p7, %p798_p4 }
  0x53   :  { %669 = vmatprep.mubr.msk.f32.mxu1 %vm95_vm0, %v91_v11 }
  0x55   :  { %652 = vmatmul.mubr.msk.f32.gmra.mrb[2].mxu0 %vm95_vm0, %v80_v12  ;;  %670 = vmatmul.mubr.msk.f32.gmra.mrb[2].mxu1 %vm95_vm0, %v92_v13 }
  0x56   :  { %654 = vmatprep.mubr.msk.f32.mxu0 %vm95_vm0, %v81_v14 }
  0x59   :  { %655 = vmatmul.mubr.msk.f32.gmra.mrb[4].mxu0 %vm95_vm0, %v82_v15 }
  0x5a   :  { %657 = vmatprep.mubr.msk.f32.mxu0 %vm95_vm0, %v83_v16 }
  0x5d   :  { %658 = vmatmul.mubr.msk.f32.gmra.mrb[6].mxu0 %vm95_vm0, %v84_v17 }
  0x5e   :  { %660 = vmatprep.mubr.msk.f32.mxu0 %vm95_vm0, %v85_v18 }
  0x61   :  { %661 = vmatmul.mubr.msk.f32.gmra.mrb[8].mxu0 %vm95_vm0, %v86_v19 }
  0x62   :  { %663 = vmatprep.mubr.msk.f32.mxu0 %vm95_vm0, %v87_v20 }
  0x65   :  { %664 = vmatmul.mubr.msk.f32.gmra.mrb[10].mxu0 %vm95_vm0, %v88_v21 }
 0x124   :  { %v650_v22 = vpop.f32.mrb[0].mxu0  ;;  %v668_v23 = vpop.f32.mrb[0].mxu1 }
 0x125   :  { %v601_v24 = vpack.c.bf16 %v650_v22, %v650_v22  ;;  %v210_v25 = vpop.f32.mrb[1].mxu0  ;;  %v613_v26 = vpack.c.bf16 %v668_v23, %v668_v23  ;;  %v270_v27 = vpop.f32.mrb[1].mxu1 }
 0x126   :  { %v600_v28 = vpack.c.bf16 %v210_v25, %v210_v25  ;;  %676 = vmatprep.mubr.msk.f32.mxu1 %vm95_vm0, %v210_v25  ;;  %v612_v29 = vpack.c.bf16 %v270_v27, %v270_v27 }
 0x127   :  { %323 = vst.msk [vmem:[#allocation10 + $0x4] sm:$0xf] %vm321_vm1, %v601_v24  ;;  %677 = vmatmul.mubr.msk.f32.vlgmr.msra.gmra.mrb[4].mxu1 %vm95_vm0, %v650_v22  ;;  %367 = vst.msk [vmem:[#allocation11 + $0x14] sm:$0xf] %vm321_vm1, %v613_v26 }
 0x128   :  { %322 = vst.msk [vmem:[#allocation10] sm:$0xf] %vm321_vm1, %v600_v28  ;;  %v653_v30 = vpop.f32.mrb[2].mxu0  ;;  %366 = vst.msk [vmem:[#allocation11 + $0x10] sm:$0xf] %vm321_vm1, %v612_v29  ;;  %v671_v31 = vpop.f32.mrb[2].mxu1 }
 0x129   :  { %v603_v32 = vpack.c.bf16 %v653_v30, %v653_v30  ;;  %v220_v33 = vpop.f32.mrb[3].mxu0  ;;  %v615_v34 = vpack.c.bf16 %v671_v31, %v671_v31  ;;  %v280_v35 = vpop.f32.mrb[3].mxu1 }
 0x12a   :  { %v602_v36 = vpack.c.bf16 %v220_v33, %v220_v33  ;;  %679 = vmatprep.mubr.msk.f32.mxu1 %vm95_vm0, %v220_v33  ;;  %v614_v37 = vpack.c.bf16 %v280_v35, %v280_v35 }
 0x12b   :  { %325 = vst.msk [vmem:[#allocation10 + $0xc] sm:$0xf] %vm321_vm1, %v603_v32  ;;  %680 = vmatmul.mubr.msk.f32.gmra.mrb[6].mxu1 %vm95_vm0, %v653_v30  ;;  %369 = vst.msk [vmem:[#allocation11 + $0x1c] sm:$0xf] %vm321_vm1, %v615_v34 }
 0x12c   :  { %324 = vst.msk [vmem:[#allocation10 + $0x8] sm:$0xf] %vm321_vm1, %v602_v36  ;;  %v656_v38 = vpop.f32.mrb[4].mxu0  ;;  %368 = vst.msk [vmem:[#allocation11 + $0x18] sm:$0xf] %vm321_vm1, %v614_v37 }
 0x12d   :  { %v605_v39 = vpack.c.bf16 %v656_v38, %v656_v38  ;;  %v230_v40 = vpop.f32.mrb[5].mxu0 }
 0x12e   :  { %v604_v41 = vpack.c.bf16 %v230_v40, %v230_v40  ;;  %682 = vmatprep.mubr.msk.f32.mxu1 %vm95_vm0, %v230_v40 }
 0x12f   :  { %327 = vst.msk [vmem:[#allocation10 + $0x14] sm:$0xf] %vm321_vm1, %v605_v39  ;;  %683 = vmatmul.mubr.msk.f32.gmra.mrb[8].mxu1 %vm95_vm0, %v656_v38 }
 0x130   :  { %326 = vst.msk [vmem:[#allocation10 + $0x10] sm:$0xf] %vm321_vm1, %v604_v41  ;;  %v659_v42 = vpop.f32.mrb[6].mxu0 }
 0x131   :  { %v607_v43 = vpack.c.bf16 %v659_v42, %v659_v42  ;;  %v240_v44 = vpop.f32.mrb[7].mxu0 }
 0x132   :  { %v606_v45 = vpack.c.bf16 %v240_v44, %v240_v44  ;;  %685 = vmatprep.mubr.msk.f32.mxu1 %vm95_vm0, %v240_v44 }
 0x133   :  { %329 = vst.msk [vmem:[#allocation10 + $0x1c] sm:$0xf] %vm321_vm1, %v607_v43  ;;  %686 = vmatmul.mubr.msk.f32.gmra.mrb[10].mxu1 %vm95_vm0, %v659_v42 }
 0x134   :  { %328 = vst.msk [vmem:[#allocation10 + $0x18] sm:$0xf] %vm321_vm1, %v606_v45  ;;  %v662_v46 = vpop.f32.mrb[8].mxu0 }
 0x135   :  { %v609_v47 = vpack.c.bf16 %v662_v46, %v662_v46  ;;  %v250_v48 = vpop.f32.mrb[9].mxu0 }
 0x136   :  { %v608_v49 = vpack.c.bf16 %v250_v48, %v250_v48 }
 0x137   :  { %363 = vst.msk [vmem:[#allocation11 + $0x4] sm:$0xf] %vm321_vm1, %v609_v47 }
 0x138   :  { %362 = vst.msk [vmem:[#allocation11] sm:$0xf] %vm321_vm1, %v608_v49  ;;  %v665_v50 = vpop.f32.mrb[10].mxu0 }
 0x139   :  { %v611_v51 = vpack.c.bf16 %v665_v50, %v665_v50  ;;  %v260_v52 = vpop.f32.mrb[11].mxu0 }
 0x13a   :  { %v610_v53 = vpack.c.bf16 %v260_v52, %v260_v52 }
 0x13b   :  { %365 = vst.msk [vmem:[#allocation11 + $0xc] sm:$0xf] %vm321_vm1, %v611_v51 }
 0x13c   :  { %364 = vst.msk [vmem:[#allocation11 + $0x8] sm:$0xf] %vm321_vm1, %v610_v53 }
 0x13d   :  { %808 = shalt.err (!%p805_p8)
}
 0x13e   :  { %s809_s28 = scalar_lea.hbm %s1085_s5, 512 }
 0x13f   :  { %p810_p9 = scmp.ne.s32.totalorder %s1085_s5, %s809_s28  ;;  %p813_p10 = scmp.lt.u32.totalorder %s809_s28, %s1085_s5 }
 0x141   :  { %p815_p11 = pnand %p813_p10, %p810_p9 }
 0x143   :  { %818 = shalt.err (!%p815_p11)
}
 0x144   :  { %s881_s11 = smov 64   ;;  %s882_s0 = smov 4  }
 0x145   :  { %533 = dma.vmem_to_hbm [thread:$0]  %s528_s21, 512, %s1085_s5, [#allocation12], %s881_s11, %s881_s11, %s882_s0  }
 0x146   :  { %s819_s13 = scalar_lea.vmem %s516_s23, 512  ;;  %p824_p13 = scmp.lt.s32.totalorder %s516_s23, %s516_s23 }
 0x147   :  { %p820_p12 = scmp.ne.s32.totalorder %s516_s23, %s819_s13  ;;  %p825_p0 = scmp.lt.s32.totalorder %s819_s13, %s819_s13 }
 0x149   :  { %p826_p1 = por %p825_p0, %p824_p13 }
 0x14b   :  { %p827_p2 = pnand %p826_p1, %p820_p12 }
 0x14d   :  { %830 = shalt.err (!%p827_p2)
}
 0x14e   :  { %s831_s16 = scalar_lea.hbm %s1084_s4, 512 }
 0x14f   :  { %p832_p3 = scmp.ne.s32.totalorder %s1084_s4, %s831_s16  ;;  %p835_p4 = scmp.lt.u32.totalorder %s831_s16, %s1084_s4 }
 0x151   :  { %p837_p5 = pnand %p835_p4, %p832_p3 }
 0x153   :  { %840 = shalt.err (!%p837_p5)
}
 0x154   :  { %521 = dma.vmem_to_hbm [thread:$0]  %s516_s23, 512, %s1084_s4, [#allocation4], %s881_s11, %s881_s11, %s882_s0   ;;  %vm501_vm2 = vcmask 31744  }
 0x155   :  { %s883_s1 = smov [#allocation13]  }
 0x156   :  { %s539_s3 = sshll.u32 %s883_s1, 4  ;;  %s540_s3 = int_to_ptr.vmem [resolvable:$true] %s539_s3 }
 0x157   :  { %s841_s4 = scalar_lea.vmem %s540_s3, 1024  ;;  %p846_p7 = scmp.lt.s32.totalorder %s540_s3, %s540_s3 }
 0x158   :  { %p842_p6 = scmp.ne.s32.totalorder %s540_s3, %s841_s4  ;;  %p847_p8 = scmp.lt.s32.totalorder %s841_s4, %s841_s4 }
 0x15a   :  { %p848_p9 = por %p847_p8, %p846_p7 }
 0x15c   :  { %p849_p10 = pnand %p848_p9, %p842_p6 }
 0x1fa   :  { %v678_v54 = vpop.f32.mrb[4].mxu1 }
 0x1fb   :  { %503 = vst.msk [vmem:[#allocation13 + $0x8] sm:$0xff] %vm501_vm2, %v678_v54  ;;  %v462_v55 = vpop.f32.mrb[5].mxu1 }
 0x1fc   :  { %502 = vst.msk [vmem:[#allocation13] sm:$0xff] %vm501_vm2, %v462_v55 }
 0x1fe   :  { %v681_v56 = vpop.f32.mrb[6].mxu1 }
 0x1ff   :  { %505 = vst.msk [vmem:[#allocation13 + $0x18] sm:$0xff] %vm501_vm2, %v681_v56  ;;  %v472_v57 = vpop.f32.mrb[7].mxu1 }
 0x200   :  { %504 = vst.msk [vmem:[#allocation13 + $0x10] sm:$0xff] %vm501_vm2, %v472_v57 }
 0x202   :  { %v684_v58 = vpop.f32.mrb[8].mxu1 }
 0x203   :  { %507 = vst.msk [vmem:[#allocation13 + $0x28] sm:$0xff] %vm501_vm2, %v684_v58  ;;  %v482_v59 = vpop.f32.mrb[9].mxu1 }
 0x204   :  { %506 = vst.msk [vmem:[#allocation13 + $0x20] sm:$0xff] %vm501_vm2, %v482_v59 }
 0x206   :  { %v687_v60 = vpop.f32.mrb[10].mxu1 }
 0x207   :  { %509 = vst.msk [vmem:[#allocation13 + $0x38] sm:$0xff] %vm501_vm2, %v687_v60  ;;  %v492_v61 = vpop.f32.mrb[11].mxu1 }
 0x208   :  { %508 = vst.msk [vmem:[#allocation13 + $0x30] sm:$0xff] %vm501_vm2, %v492_v61 }
 0x209   :  { %852 = shalt.err (!%p849_p10)
}
 0x20a   :  { %s853_s23 = scalar_lea.hbm %s1086_s6, 1024 }
 0x20b   :  { %p854_p11 = scmp.ne.s32.totalorder %s1086_s6, %s853_s23  ;;  %p857_p12 = scmp.lt.u32.totalorder %s853_s23, %s1086_s6 }
 0x20d   :  { %p859_p13 = pnand %p857_p12, %p854_p11 }
 0x20f   :  { %862 = shalt.err (!%p859_p13)
}
 0x210   :  { %545 = dma.vmem_to_hbm [thread:$0]  %s540_s3, 1024, %s1086_s6, [#allocation12], %s875_s9, %s875_s9, %s876_s10  }
 0x211   :  { %869 = dma.done.wait [#allocation4], 512  }
 0x212   :  { %870 = vsyncadd [#allocation4], 4294966784 }
 0x213   :  { %871 = dma.done.wait [#allocation12], 1536  }
 0x214   :  { %872 = vsyncadd [#allocation12], 4294965760 }
 0x215   :  { %555 = vsyncpa [#allocation3], 1 }
 0x216   :  { %556 = vsyncpa [#allocation6], 1 }
 0x217   :  { %557 = vsyncpa [#allocation9], 1 }
 0x218   :  { %558 = vsyncpa [#allocation4], 1 }
 0x219   :  { %559 = vsyncpa [#allocation12], 1 }

// kernel: _lambda_.6
= control target key start
LH: loop header
LB: loop body
LE: loop exit
PB: predicated region body
PF: predicated region fallthrough
CT: control target
= control target key end

     0   :  { %10 = vsyncpa [#allocation3], 0  ;;  %s1444_s0 = inlined_call_operand.hbm [shape: f32[64,2], index: 0, kind: input, shape index: {}]   ;;  %s1445_s1 = inlined_call_operand.hbm [shape: f32[2,64], index: 1, kind: input, shape index: {}]   ;;  %s1446_s2 = inlined_call_operand.hbm [shape: bf16[64,64], index: 2, kind: input, shape index: {}]   ;;  %s1447_s3 = inlined_call_operand.hbm [shape: bf16[64,32], index: 3, kind: input, shape index: {}]   ;;  %s1448_s4 = inlined_call_operand.hbm [shape: f32[1,32], index: 4, kind: input, shape index: {}]   ;;  %s1449_s5 = inlined_call_operand.hbm [shape: f32[64,32], index: 5, kind: output, shape index: {}]  }
   0x1   :  { %11 = vsyncpa [#allocation6], 0 }
   0x2   :  { %12 = vsyncpa [#allocation9], 0 }
   0x3   :  { %13 = vsyncpa [#allocation4], 0  ;;  %s1053_s18 = smov [#allocation5]   ;;  %s913_s22 = scalar_lea.hbm %s1445_s1, 32 }
   0x4   :  { %s32_s19 = sshll.u32 %s1053_s18, 4  ;;  %p914_p0 = scmp.ne.s32.totalorder %s1445_s1, %s913_s22  ;;  %s33_s19 = int_to_ptr.vmem [resolvable:$true] %s32_s19 }
   0x5   :  { %p917_p1 = scmp.lt.u32.totalorder %s913_s22, %s1445_s1 }
   0x7   :  { %p919_p2 = pnand %p917_p1, %p914_p0 }
   0x9   :  { %922 = shalt.err (!%p919_p2)
}
   0xa   :  { %s923_s27 = scalar_lea.vmem %s33_s19, 32  ;;  %p928_p4 = scmp.lt.s32.totalorder %s33_s19, %s33_s19 }
   0xb   :  { %p924_p3 = scmp.ne.s32.totalorder %s33_s19, %s923_s27  ;;  %p929_p5 = scmp.lt.s32.totalorder %s923_s27, %s923_s27 }
   0xd   :  { %p930_p6 = por %p929_p5, %p928_p4 }
   0xf   :  { %p931_p7 = pnand %p930_p6, %p924_p3 }
  0x11   :  { %934 = shalt.err (!%p931_p7)
}
  0x12   :  { %35 = dma.hbm_to_vmem [thread:$0]  %s1445_s1, 32, %s33_s19, [#allocation6]  }
  0x13   :  { %s1054_s30 = smov [#allocation8]   ;;  %s1055_s7 = smov [#allocation2]  }
  0x14   :  { %s53_s6 = sshll.u32 %s1054_s30, 4  ;;  %s19_s8 = sshll.u32 %s1055_s7, 4  ;;  %s54_s6 = int_to_ptr.vmem [resolvable:$true] %s53_s6  ;;  %s20_s8 = int_to_ptr.vmem [resolvable:$true] %s19_s8 }
  0x15   :  { %s935_s11 = scalar_lea.hbm %s1447_s3, 512 }
  0x16   :  { %p936_p8 = scmp.ne.s32.totalorder %s1447_s3, %s935_s11  ;;  %p939_p9 = scmp.lt.u32.totalorder %s935_s11, %s1447_s3 }
  0x18   :  { %p941_p10 = pnand %p939_p9, %p936_p8 }
  0x1a   :  { %944 = shalt.err (!%p941_p10)
}
  0x1b   :  { %s945_s1 = scalar_lea.vmem %s54_s6, 512  ;;  %p950_p12 = scmp.lt.s32.totalorder %s54_s6, %s54_s6 }
  0x1c   :  { %p946_p11 = scmp.ne.s32.totalorder %s54_s6, %s945_s1  ;;  %p951_p13 = scmp.lt.s32.totalorder %s945_s1, %s945_s1 }
  0x1e   :  { %p952_p0 = por %p951_p13, %p950_p12 }
  0x20   :  { %p953_p1 = pnand %p952_p0, %p946_p11 }
  0x22   :  { %956 = shalt.err (!%p953_p1)
}
  0x23   :  { %s1056_s16 = smov 64   ;;  %s1057_s17 = smov 4  }
  0x24   :  { %59 = dma.hbm_to_vmem [thread:$0]  %s1447_s3, 512, %s54_s6, [#allocation9], %s1056_s16, %s1056_s16, %s1057_s17  }
  0x25   :  { %s957_s22 = scalar_lea.hbm %s1444_s0, 1024 }
  0x26   :  { %p958_p2 = scmp.ne.s32.totalorder %s1444_s0, %s957_s22  ;;  %p961_p3 = scmp.lt.u32.totalorder %s957_s22, %s1444_s0 }
  0x28   :  { %p963_p4 = pnand %p961_p3, %p958_p2 }
  0x2a   :  { %966 = shalt.err (!%p963_p4)
}
  0x2b   :  { %s967_s27 = scalar_lea.vmem %s20_s8, 1024  ;;  %p972_p6 = scmp.lt.s32.totalorder %s20_s8, %s20_s8 }
  0x2c   :  { %p968_p5 = scmp.ne.s32.totalorder %s20_s8, %s967_s27  ;;  %p973_p7 = scmp.lt.s32.totalorder %s967_s27, %s967_s27 }
  0x2e   :  { %p974_p8 = por %p973_p7, %p972_p6 }
  0x30   :  { %p975_p9 = pnand %p974_p8, %p968_p5 }
  0x32   :  { %978 = shalt.err (!%p975_p9)
}
  0x33   :  { %s1058_s3 = smov 128   ;;  %s1059_s28 = smov 8  }
  0x34   :  { %25 = dma.hbm_to_vmem [thread:$0]  %s1444_s0, 1024, %s20_s8, [#allocation3], %s1058_s3, %s1058_s3, %s1059_s28  }
  0x35   :  { %s1060_s6 = smov [#allocation7]   ;;  %s1061_s9 = smov [#allocation10]  }
  0x36   :  { %s41_s7 = sshll.u32 %s1060_s6, 4  ;;  %s66_s10 = sshll.u32 %s1061_s9, 4  ;;  %s42_s7 = int_to_ptr.vmem [resolvable:$true] %s41_s7  ;;  %s67_s10 = int_to_ptr.vmem [resolvable:$true] %s66_s10 }
  0x37   :  { %s979_s13 = scalar_lea.hbm %s1446_s2, 512 }
  0x38   :  { %p980_p10 = scmp.ne.s32.totalorder %s1446_s2, %s979_s13  ;;  %p983_p11 = scmp.lt.u32.totalorder %s979_s13, %s1446_s2 }
  0x3a   :  { %p985_p12 = pnand %p983_p11, %p980_p10 }
  0x3c   :  { %988 = shalt.err (!%p985_p12)
}
  0x3d   :  { %s989_s0 = scalar_lea.vmem %s42_s7, 512  ;;  %p994_p0 = scmp.lt.s32.totalorder %s42_s7, %s42_s7 }
  0x3e   :  { %p990_p13 = scmp.ne.s32.totalorder %s42_s7, %s989_s0  ;;  %p995_p1 = scmp.lt.s32.totalorder %s989_s0, %s989_s0 }
  0x40   :  { %p996_p2 = por %p995_p1, %p994_p0 }
  0x42   :  { %p997_p3 = pnand %p996_p2, %p990_p13 }
  0x44   :  { %1000 = shalt.err (!%p997_p3)
}
  0x45   :  { %47 = dma.hbm_to_vmem [thread:$0]  %s1446_s2, 512, %s42_s7, [#allocation6], %s1056_s16, %s1056_s16, %s1057_s17  }
  0x46   :  { %s1001_s22 = scalar_lea.hbm %s1448_s4, 16 }
  0x47   :  { %p1002_p4 = scmp.ne.s32.totalorder %s1448_s4, %s1001_s22  ;;  %p1005_p5 = scmp.lt.u32.totalorder %s1001_s22, %s1448_s4 }
  0x49   :  { %p1007_p6 = pnand %p1005_p5, %p1002_p4 }
  0x4b   :  { %1010 = shalt.err (!%p1007_p6)
}
  0x4c   :  { %s1011_s27 = scalar_lea.vmem %s67_s10, 16  ;;  %s1015_s29 = scalar_lea.vmem %s67_s10, 32 }
  0x4d   :  { %p1012_p7 = scmp.ne.s32.totalorder %s67_s10, %s1011_s27  ;;  %p1016_p8 = scmp.lt.s32.totalorder %s67_s10, %s67_s10 }
  0x4e   :  { %p1017_p9 = scmp.lt.s32.totalorder %s1015_s29, %s1011_s27 }
  0x50   :  { %p1018_p10 = por %p1017_p9, %p1016_p8 }
  0x52   :  { %p1019_p11 = pnand %p1018_p10, %p1012_p7 }
  0x54   :  { %1022 = shalt.err (!%p1019_p11)
}
  0x55   :  { %69 = dma.hbm_to_vmem [thread:$0]  %s1448_s4, 16, %s67_s10, [#allocation9]  }
  0x56   :  { %1045 = dma.done.wait [#allocation3], 1024  }
  0x57   :  { %1046 = vsyncadd [#allocation3], 4294966272 }
  0x58   :  { %1047 = dma.done.wait [#allocation6], 544  }
  0x59   :  { %1048 = vsyncadd [#allocation6], 4294966752 }
  0x5a   :  { %1049 = dma.done.wait [#allocation9], 528  }
  0x5b   :  { %1050 = vsyncadd [#allocation9], 4294966768  ;;  %v1062_v0 = vmov 1   ;;  %v88_v1 = vld [vmem:[#allocation2 + $0x10] sm:$0xff]  ;;  %v86_v2 = vld [vmem:[#allocation2] sm:$0xff]  ;;  %v1063_v9 = vmov 0   ;;  %v159_v12 = vlaneseq }
  0x5c   :  { %841 = vset.pattern.permute.xlu1 %v1062_v0  ;;  %840 = vset.pattern.permute.xlu0 %v1062_v0  ;;  %v89_v3 = vld [vmem:[#allocation2 + $0x18] sm:$0xff]  ;;  %v87_v4 = vld [vmem:[#allocation2 + $0x8] sm:$0xff]  ;;  %v90_v6 = vld [vmem:[#allocation2 + $0x20] sm:$0xff]  ;;  %vm203_vm1 = vcmask 523264   ;;  %s1064_s4 = smov 112   ;;  %s1065_s17 = smov 16  }
  0x5d   :  { %406 = vperm.xlu1 %841, %v88_v1   ;;  %398 = vperm.xlu0 %840, %v86_v2   ;;  %v91_v5 = vld [vmem:[#allocation2 + $0x28] sm:$0xff]  ;;  %v93_v7 = vld [vmem:[#allocation2 + $0x38] sm:$0xff]  ;;  %v92_v8 = vld [vmem:[#allocation2 + $0x30] sm:$0xff]  ;;  %v160_v13 = vshrl.u32 %v159_v12, 7  ;;  %s1066_s30 = smov [#allocation11]  }
  0x5e   :  { %v1166_v10 = vld [vmem:[#allocation8] sm:$0xff]   ;;  %v1168_v11 = vld [vmem:[#allocation8 + $0x8] sm:$0xff]   ;;  %v94_v15 = vld [vmem:[#allocation5] sm:$0x3]  ;;  %s732_s6 = sshll.u32 %s1066_s30, 4  ;;  %s733_s6 = int_to_ptr.vmem [resolvable:$true] %s732_s6 }
  0x5f   :  { %794 = vmatprep.subr.bf16.mxu0 %v1166_v10  ;;  %v161_v14 = vsub.s32 0, %v160_v13  ;;  %v431_v17 = vsub.s32 1, %v160_v13  ;;  %v1176_v19 = vld [vmem:[#allocation7] sm:$0xff]   ;;  %v1179_v32 = vld [vmem:[#allocation7 + $0x8] sm:$0xff]   ;;  %v1187_v36 = vld [vmem:[#allocation7 + $0x10] sm:$0xff]   ;;  %s1023_s7 = scalar_lea.vmem %s733_s6, 1024  ;;  %p1028_p13 = scmp.lt.s32.totalorder %s733_s6, %s733_s6 }
  0x60   :  { %795 = vmatpush3.bf16.msra.mxu0 %v1166_v10  ;;  %v761_v24 = vunpack.c.l.bf16 %v1176_v19  ;;  %v766_v34 = vunpack.c.h.bf16 %v1179_v32  ;;  %v762_v35 = vunpack.c.h.bf16 %v1176_v19  ;;  %v765_v42 = vunpack.c.l.bf16 %v1179_v32  ;;  %v1202_v51 = vld [vmem:[#allocation7 + $0x18] sm:$0xff]   ;;  %p1024_p12 = scmp.ne.s32.totalorder %s733_s6, %s1023_s7  ;;  %p1029_p0 = scmp.lt.s32.totalorder %s1023_s7, %s1023_s7 }
  0x61   :  { %410 = vperm.xlu1 %841, %v89_v3   ;;  %402 = vperm.xlu0 %840, %v87_v4   ;;  %v1174_v16 = vrot.slane %v94_v15, %v161_v14  ;;  %v432_v18 = vrot.slane %v94_v15, %v431_v17  ;;  %v770_v50 = vunpack.c.h.bf16 %v1187_v36  ;;  %v769_v59 = vunpack.c.l.bf16 %v1187_v36 }
  0x62   :  { %796 = vmatprep.subr.bf16.mxu0 %v1168_v11  ;;  %p1030_p1 = por %p1029_p0, %p1028_p13 }
  0x64   :  { %797 = vmatpush3.bf16.msra.mxu0 %v1168_v11  ;;  %p1031_p2 = pnand %p1030_p1, %p1024_p12 }
  0x65   :  { %418 = vperm.xlu1 %841, %v91_v5   ;;  %414 = vperm.xlu0 %840, %v90_v6  }
  0x69   :  { %426 = vperm.xlu1 %841, %v93_v7   ;;  %422 = vperm.xlu0 %840, %v92_v8  }
  0x6d   :  { %843 = vset.pattern.permute.xlu1 %v1063_v9  ;;  %842 = vset.pattern.permute.xlu0 %v1063_v9 }
  0x6e   :  { %126 = vperm.xlu1 %843, %v87_v4   ;;  %121 = vperm.xlu0 %842, %v86_v2   ;;  %v773_v2 = vunpack.c.l.bf16 %v1202_v51 }
  0x72   :  { %136 = vperm.xlu0 %842, %v89_v3   ;;  %131 = vperm.xlu1 %843, %v88_v1  }
  0x76   :  { %146 = vperm.xlu0 %842, %v91_v5   ;;  %141 = vperm.xlu1 %843, %v90_v6  }
  0x7a   :  { %156 = vperm.xlu0 %842, %v93_v7   ;;  %151 = vperm.xlu1 %843, %v92_v8  }
  0x7e   :  { %844 = vset.pattern.permute.xlu0 %v1062_v0  ;;  %v774_v0 = vunpack.c.h.bf16 %v1202_v51 }
  0xdc   :  { %v407_v20 = vpop.permute.xlu1 %406  ;;  %v399_v21 = vpop.permute.xlu0 %398 }
  0xdd   :  { %v435_v22 = vadd.f32 %v432_v18, %v407_v20  ;;  %v433_v23 = vadd.f32 %v432_v18, %v399_v21 }
  0xdf   :  { %vm441_vm0 = vcmp.ge.f32.partialorder %v433_v23, 0.0  ;;  %v449_v25 = vmul.f32 0.2, %v433_v23  ;;  %v451_v26 = vmul.f32 0.2, %v435_v22  ;;  %vm443_vm2 = vcmp.ge.f32.partialorder %v435_v22, 0.0 }
  0xe0   :  { %v411_v27 = vpop.permute.xlu1 %410  ;;  %v403_v28 = vpop.permute.xlu0 %402 }
  0xe1   :  { %v436_v29 = vadd.f32 %v432_v18, %v411_v27  ;;  %v434_v30 = vadd.f32 %v432_v18, %v403_v28  ;;  %v457_v31 = vsel %vm441_vm0, %v433_v23, %v449_v25  ;;  %v459_v43 = vsel %vm443_vm2, %v435_v22, %v451_v26 }
  0xe2   :  { %v1183_v33 = vadd.f32 %v761_v24, %v457_v31  ;;  %v1210_v58 = vadd.f32 %v765_v42, %v459_v43  ;;  %vm718_vm2 = vcmask 261120  }
  0xe3   :  { %vm444_vm3 = vcmp.ge.f32.partialorder %v436_v29, 0.0  ;;  %v452_v37 = vmul.f32 0.2, %v436_v29  ;;  %vm442_vm4 = vcmp.ge.f32.partialorder %v434_v30, 0.0  ;;  %v450_v38 = vmul.f32 0.2, %v434_v30 }
  0xe4   :  { %v419_v39 = vpop.permute.xlu1 %418  ;;  %v415_v40 = vpop.permute.xlu0 %414  ;;  %v473_v41 = vsel %vm203_vm1, %v1183_v33, -inf  ;;  %v479_v6 = vsel %vm203_vm1, %v1210_v58, -inf }
  0xe5   :  { %v438_v44 = vadd.f32 %v432_v18, %v419_v39  ;;  %v437_v45 = vadd.f32 %v432_v18, %v415_v40  ;;  %474 = vmax.xlane.f32.xlu1 %v473_v41  ;;  %v460_v46 = vsel %vm444_vm3, %v436_v29, %v452_v37  ;;  %v458_v47 = vsel %vm442_vm4, %v434_v30, %v450_v38 }
  0xe6   :  { %v1195_v48 = vadd.f32 %v766_v34, %v460_v46  ;;  %v1199_v49 = vadd.f32 %v762_v35, %v458_v47 }
  0xe7   :  { %vm446_vm5 = vcmp.ge.f32.partialorder %v438_v44, 0.0  ;;  %v454_v52 = vmul.f32 0.2, %v438_v44  ;;  %vm445_vm6 = vcmp.ge.f32.partialorder %v437_v45, 0.0  ;;  %v453_v53 = vmul.f32 0.2, %v437_v45 }
  0xe8   :  { %v427_v54 = vpop.permute.xlu1 %426  ;;  %v423_v55 = vpop.permute.xlu0 %422  ;;  %v482_v56 = vsel %vm203_vm1, %v1195_v48, -inf  ;;  %v476_v57 = vsel %vm203_vm1, %v1199_v49, -inf }
  0xe9   :  { %v440_v60 = vadd.f32 %v432_v18, %v427_v54  ;;  %v439_v61 = vadd.f32 %v432_v18, %v423_v55  ;;  %483 = vmax.xlane.f32.xlu1 %v482_v56  ;;  %477 = vmax.xlane.f32.xlu0 %v476_v57  ;;  %v462_v62 = vsel %vm446_vm5, %v438_v44, %v454_v52 }
  0xea   :  { %v1215_v63 = vadd.f32 %v770_v50, %v462_v62  ;;  %v461_v1 = vsel %vm445_vm6, %v437_v45, %v453_v53 }
  0xeb   :  { %vm448_vm7 = vcmp.ge.f32.partialorder %v440_v60, 0.0  ;;  %v456_v3 = vmul.f32 0.2, %v440_v60  ;;  %vm447_vm8 = vcmp.ge.f32.partialorder %v439_v61, 0.0  ;;  %v455_v4 = vmul.f32 0.2, %v439_v61 }
  0xec   :  { %v488_v5 = vsel %vm203_vm1, %v1215_v63, -inf  ;;  %v1225_v7 = vadd.f32 %v769_v59, %v461_v1 }
  0xed   :  { %489 = vmax.xlane.f32.xlu1 %v488_v5  ;;  %480 = vmax.xlane.f32.xlu0 %v479_v6  ;;  %v464_v8 = vsel %vm448_vm7, %v440_v60, %v456_v3  ;;  %v463_v9 = vsel %vm447_vm8, %v439_v61, %v455_v4  ;;  %v127_v12 = vpop.permute.xlu1 %126  ;;  %v122_v13 = vpop.permute.xlu0 %121 }
  0xee   :  { %v1229_v14 = vadd.f32 %v774_v0, %v464_v8  ;;  %v1231_v15 = vadd.f32 %v773_v2, %v463_v9  ;;  %v163_v17 = vadd.f32 %v1174_v16, %v122_v13  ;;  %v485_v20 = vsel %vm203_vm1, %v1225_v7, -inf }
  0xef   :  { %v164_v36 = vadd.f32 %v1174_v16, %v127_v12 }
  0xf0   :  { %v494_v18 = vsel %vm203_vm1, %v1229_v14, -inf  ;;  %vm171_vm9 = vcmp.ge.f32.partialorder %v163_v17, 0.0  ;;  %v179_v21 = vmul.f32 0.2, %v163_v17  ;;  %v491_v27 = vsel %vm203_vm1, %v1231_v15, -inf }
  0xf1   :  { %495 = vmax.xlane.f32.xlu1 %v494_v18  ;;  %486 = vmax.xlane.f32.xlu0 %v485_v20  ;;  %v137_v22 = vpop.permute.xlu0 %136  ;;  %v132_v23 = vpop.permute.xlu1 %131  ;;  %v180_v51 = vmul.f32 0.2, %v164_v36  ;;  %vm172_vm0 = vcmp.ge.f32.partialorder %v164_v36, 0.0 }
  0xf2   :  { %v166_v25 = vadd.f32 %v1174_v16, %v137_v22  ;;  %v165_v26 = vadd.f32 %v1174_v16, %v132_v23  ;;  %v187_v28 = vsel %vm171_vm9, %v163_v17, %v179_v21 }
  0xf3   :  { %v1244_v38 = vadd.f32 %v761_v24, %v187_v28 }
  0xf4   :  { %vm174_vm10 = vcmp.ge.f32.partialorder %v166_v25, 0.0  ;;  %v182_v29 = vmul.f32 0.2, %v166_v25  ;;  %vm173_vm11 = vcmp.ge.f32.partialorder %v165_v26, 0.0  ;;  %v181_v30 = vmul.f32 0.2, %v165_v26 }
  0xf5   :  { %492 = vmax.xlane.f32.xlu0 %v491_v27  ;;  %v147_v31 = vpop.permute.xlu0 %146  ;;  %v142_v37 = vpop.permute.xlu1 %141 }
  0xf6   :  { %v168_v39 = vadd.f32 %v1174_v16, %v147_v31  ;;  %v167_v40 = vadd.f32 %v1174_v16, %v142_v37  ;;  %v190_v41 = vsel %vm174_vm10, %v166_v25, %v182_v29  ;;  %v189_v43 = vsel %vm173_vm11, %v165_v26, %v181_v30 }
  0xf7   :  { %v1250_v44 = vadd.f32 %v766_v34, %v190_v41  ;;  %v1254_v45 = vadd.f32 %v765_v42, %v189_v43 }
  0xf8   :  { %vm176_vm12 = vcmp.ge.f32.partialorder %v168_v39, 0.0  ;;  %v184_v46 = vmul.f32 0.2, %v168_v39  ;;  %vm175_vm13 = vcmp.ge.f32.partialorder %v167_v40, 0.0  ;;  %v183_v47 = vmul.f32 0.2, %v167_v40 }
  0xf9   :  { %v157_v24 = vpop.permute.xlu0 %156  ;;  %v152_v52 = vpop.permute.xlu1 %151  ;;  %v210_v19 = vsel %vm203_vm1, %v1254_v45, -inf }
  0xfa   :  { %v170_v53 = vadd.f32 %v1174_v16, %v157_v24  ;;  %v169_v54 = vadd.f32 %v1174_v16, %v152_v52  ;;  %v192_v55 = vsel %vm176_vm12, %v168_v39, %v184_v46  ;;  %v191_v56 = vsel %vm175_vm13, %v167_v40, %v183_v47 }
  0xfb   :  { %v1260_v34 = vadd.f32 %v770_v50, %v192_v55  ;;  %v1264_v32 = vadd.f32 %v769_v59, %v191_v56  ;;  %v1277_v50 = vld [vmem:[#allocation8 + $0x10] sm:$0xff]   ;;  %v188_v59 = vsel %vm172_vm0, %v164_v36, %v180_v51  ;;  %v213_v16 = vsel %vm203_vm1, %v1250_v44, -inf }
  0xfc   :  { %vm178_vm14 = vcmp.ge.f32.partialorder %v170_v53, 0.0  ;;  %v186_v42 = vmul.f32 0.2, %v170_v53  ;;  %vm177_vm15 = vcmp.ge.f32.partialorder %v169_v54, 0.0  ;;  %v185_v57 = vmul.f32 0.2, %v169_v54  ;;  %798 = vmatprep.subr.bf16.mxu0 %v1277_v50 }
  0xfd   :  { %799 = vmatpush3.bf16.msra.mxu0 %v1277_v50  ;;  %v216_v3 = vsel %vm203_vm1, %v1264_v32, -inf }
  0xfe   :  { %v194_v60 = vsel %vm178_vm14, %v170_v53, %v186_v42  ;;  %v193_v61 = vsel %vm177_vm15, %v169_v54, %v185_v57 }
  0xff   :  { %v1268_v62 = vadd.f32 %v774_v0, %v194_v60  ;;  %v1270_v1 = vadd.f32 %v773_v2, %v193_v61  ;;  %v1283_v0 = vadd.f32 %v762_v35, %v188_v59  ;;  %v1287_v2 = vld [vmem:[#allocation8 + $0x18] sm:$0xff]   ;;  %v219_v35 = vsel %vm203_vm1, %v1260_v34, -inf }
 0x100   :  { %800 = vmatprep.subr.bf16.mxu0 %v1287_v2 }
 0x101   :  { %801 = vmatpush3.bf16.msra.mxu0 %v1287_v2  ;;  %v225_v4 = vsel %vm203_vm1, %v1268_v62, -inf  ;;  %v222_v5 = vsel %vm203_vm1, %v1270_v1, -inf }
 0x102   :  { %567 = vrot.lane.b32.xlu1 %v1168_v11, %s1064_s4  ;;  %v207_v11 = vsel %vm203_vm1, %v1283_v0, -inf }
 0x10b   :  { %565 = vrot.lane.b32.xlu0 %v1166_v10, %s1064_s4  ;;  %v204_v10 = vsel %vm203_vm1, %v1244_v38, -inf }
 0x126   :  { %208 = vmax.xlane.f32.xlu1 %v207_v11 }
 0x12a   :  { %205 = vmax.xlane.f32.xlu0 %v204_v10  ;;  %214 = vmax.xlane.f32.xlu1 %v213_v16 }
 0x12e   :  { %211 = vmax.xlane.f32.xlu0 %v210_v19  ;;  %220 = vmax.xlane.f32.xlu1 %v219_v35 }
 0x132   :  { %217 = vmax.xlane.f32.xlu0 %v216_v3  ;;  %226 = vmax.xlane.f32.xlu1 %v225_v4 }
 0x136   :  { %223 = vmax.xlane.f32.xlu0 %v222_v5 }
 0x172   :  { %v475_v6 = vpop.xlane.xlu1 %474 }
 0x173   :  { %v497_v8 = vsub.f32 %v1183_v33, %v475_v6 }
 0x175   :  { %v505_v9 = vmul.f32 1.442695, %v497_v8 }
 0x176   :  { %v484_v12 = vpop.xlane.xlu1 %483  ;;  %v478_v13 = vpop.xlane.xlu0 %477 }
 0x177   :  { %849 = vpow2.f32 %v505_v9  ;;  %v500_v17 = vsub.f32 %v1195_v48, %v484_v12  ;;  %v498_v18 = vsub.f32 %v1199_v49, %v478_v13 }
 0x179   :  { %v507_v20 = vmul.f32 1.442695, %v498_v18  ;;  %v511_v21 = vmul.f32 1.442695, %v500_v17 }
 0x17a   :  { %v490_v22 = vpop.xlane.xlu1 %489  ;;  %v481_v23 = vpop.xlane.xlu0 %480 }
 0x17b   :  { %v502_v25 = vsub.f32 %v1215_v63, %v490_v22  ;;  %v499_v26 = vsub.f32 %v1210_v58, %v481_v23  ;;  %851 = vpow2.f32 %v507_v20 }
 0x17c   :  { %853 = vpow2.f32 %v511_v21 }
 0x17d   :  { %v509_v27 = vmul.f32 1.442695, %v499_v26  ;;  %v515_v33 = vmul.f32 1.442695, %v502_v25 }
 0x17e   :  { %v496_v28 = vpop.xlane.xlu1 %495  ;;  %v487_v29 = vpop.xlane.xlu0 %486 }
 0x17f   :  { %v504_v30 = vsub.f32 %v1229_v14, %v496_v28  ;;  %v501_v48 = vsub.f32 %v1225_v7, %v487_v29  ;;  %855 = vpow2.f32 %v509_v27 }
 0x180   :  { %857 = vpow2.f32 %v515_v33 }
 0x181   :  { %v1312_v49 = vpop.eup %849  ;;  %v513_v31 = vmul.f32 1.442695, %v501_v48  ;;  %v519_v37 = vmul.f32 1.442695, %v504_v30 }
 0x182   :  { %v493_v39 = vpop.xlane.xlu0 %492  ;;  %v521_v58 = vsel %vm203_vm1, %v1312_v49, 0.0  ;;  %v568_v46 = vpop.permute.xlu1 %567 }
 0x183   :  { %v503_v63 = vsub.f32 %v1231_v15, %v493_v39  ;;  %522 = vadd.xlane.f32.xlu0 %v521_v58  ;;  %859 = vpow2.f32 %v513_v31 }
 0x184   :  { %861 = vpow2.f32 %v519_v37 }
 0x185   :  { %v517_v40 = vmul.f32 1.442695, %v503_v63  ;;  %v1317_v41 = vpop.eup %851 }
 0x186   :  { %v566_v14 = vpop.permute.xlu0 %565  ;;  %v524_v7 = vsel %vm203_vm1, %v1317_v41, 0.0  ;;  %v1321_v43 = vpop.eup %853 }
 0x187   :  { %863 = vpow2.f32 %v517_v40  ;;  %810 = vmatprep.subr.bf16.mxu1 %v566_v14  ;;  %525 = vadd.xlane.f32.xlu1 %v524_v7  ;;  %v530_v15 = vsel %vm203_vm1, %v1321_v43, 0.0 }
 0x188   :  { %811 = vmatpush3.bf16.msra.mxu1 %v566_v14 }
 0x189   :  { %812 = vmatprep.subr.bf16.mxu1 %v568_v46  ;;  %v1323_v47 = vpop.eup %855 }
 0x18a   :  { %v527_v24 = vsel %vm203_vm1, %v1323_v47, 0.0  ;;  %v1329_v52 = vpop.eup %857 }
 0x18b   :  { %531 = vadd.xlane.f32.xlu1 %v530_v15  ;;  %528 = vadd.xlane.f32.xlu0 %v527_v24  ;;  %v536_v54 = vsel %vm203_vm1, %v1329_v52, 0.0 }
 0x18c   :  { %813 = vmatpush3.bf16.msra.mxu1 %v568_v46 }
 0x18d   :  { %v1331_v53 = vpop.eup %859 }
 0x18e   :  { %v533_v55 = vsel %vm203_vm1, %v1331_v53, 0.0  ;;  %v1337_v56 = vpop.eup %861 }
 0x18f   :  { %537 = vadd.xlane.f32.xlu1 %v536_v54  ;;  %534 = vadd.xlane.f32.xlu0 %v533_v55  ;;  %v542_v60 = vsel %vm203_vm1, %v1337_v56, 0.0 }
 0x191   :  { %v1339_v42 = vpop.eup %863 }
 0x192   :  { %v539_v57 = vsel %vm203_vm1, %v1339_v42, 0.0 }
 0x193   :  { %543 = vadd.xlane.f32.xlu1 %v542_v60  ;;  %540 = vadd.xlane.f32.xlu0 %v539_v57 }
 0x1a4   :  { %569 = vrot.lane.b32.xlu1 %v1277_v50, %s1064_s4 }
 0x1a9   :  { %571 = vrot.lane.b32.xlu0 %v1287_v2, %s1064_s4 }
 0x1b3   :  { %v209_v61 = vpop.xlane.xlu1 %208 }
 0x1b4   :  { %v229_v36 = vsub.f32 %v1283_v0, %v209_v61 }
 0x1b6   :  { %v238_v51 = vmul.f32 1.442695, %v229_v36 }
 0x1b7   :  { %v215_v59 = vpop.xlane.xlu1 %214  ;;  %v206_v11 = vpop.xlane.xlu0 %205 }
 0x1b8   :  { %v231_v10 = vsub.f32 %v1250_v44, %v215_v59  ;;  %v228_v16 = vsub.f32 %v1244_v38, %v206_v11  ;;  %865 = vpow2.f32 %v238_v51 }
 0x1ba   :  { %v236_v19 = vmul.f32 1.442695, %v228_v16  ;;  %v242_v35 = vmul.f32 1.442695, %v231_v10 }
 0x1bb   :  { %v221_v3 = vpop.xlane.xlu1 %220  ;;  %v212_v4 = vpop.xlane.xlu0 %211 }
 0x1bc   :  { %v233_v50 = vsub.f32 %v1260_v34, %v221_v3  ;;  %v230_v5 = vsub.f32 %v1254_v45, %v212_v4  ;;  %867 = vpow2.f32 %v236_v19 }
 0x1bd   :  { %869 = vpow2.f32 %v242_v35 }
 0x1be   :  { %v240_v2 = vmul.f32 1.442695, %v230_v5  ;;  %v246_v0 = vmul.f32 1.442695, %v233_v50 }
 0x1bf   :  { %v227_v6 = vpop.xlane.xlu1 %226  ;;  %v218_v8 = vpop.xlane.xlu0 %217 }
 0x1c0   :  { %v235_v9 = vsub.f32 %v1268_v62, %v227_v6  ;;  %v232_v44 = vsub.f32 %v1264_v32, %v218_v8  ;;  %871 = vpow2.f32 %v240_v2 }
 0x1c1   :  { %873 = vpow2.f32 %v246_v0 }
 0x1c2   :  { %v244_v38 = vmul.f32 1.442695, %v232_v44  ;;  %v250_v12 = vmul.f32 1.442695, %v235_v9  ;;  %v1357_v34 = vpop.eup %865 }
 0x1c3   :  { %v224_v13 = vpop.xlane.xlu0 %223  ;;  %v255_v62 = vsel %vm203_vm1, %v1357_v34, 0.0 }
 0x1c4   :  { %v234_v17 = vsub.f32 %v1270_v1, %v224_v13  ;;  %875 = vpow2.f32 %v244_v38 }
 0x1c5   :  { %877 = vpow2.f32 %v250_v12 }
 0x1c6   :  { %v248_v45 = vmul.f32 1.442695, %v234_v17  ;;  %v1359_v18 = vpop.eup %867 }
 0x1c7   :  { %v252_v32 = vsel %vm203_vm1, %v1359_v18, 0.0  ;;  %v1365_v20 = vpop.eup %869 }
 0x1c8   :  { %879 = vpow2.f32 %v248_v45  ;;  %256 = vadd.xlane.f32.xlu0 %v255_v62  ;;  %253 = vadd.xlane.f32.xlu1 %v252_v32  ;;  %v261_v1 = vsel %vm203_vm1, %v1365_v20, 0.0 }
 0x1ca   :  { %v1367_v21 = vpop.eup %871 }
 0x1cb   :  { %v258_v22 = vsel %vm203_vm1, %v1367_v21, 0.0  ;;  %v1373_v23 = vpop.eup %873 }
 0x1cc   :  { %262 = vadd.xlane.f32.xlu1 %v261_v1  ;;  %259 = vadd.xlane.f32.xlu0 %v258_v22  ;;  %v267_v26 = vsel %vm203_vm1, %v1373_v23, 0.0 }
 0x1ce   :  { %v1375_v25 = vpop.eup %875 }
 0x1cf   :  { %v264_v27 = vsel %vm203_vm1, %v1375_v25, 0.0  ;;  %v1381_v33 = vpop.eup %877 }
 0x1d0   :  { %268 = vadd.xlane.f32.xlu1 %v267_v26  ;;  %265 = vadd.xlane.f32.xlu0 %v264_v27  ;;  %v273_v30 = vsel %vm203_vm1, %v1381_v33, 0.0 }
 0x1d2   :  { %v1383_v28 = vpop.eup %879 }
 0x1d3   :  { %v270_v29 = vsel %vm203_vm1, %v1383_v28, 0.0 }
 0x1d4   :  { %274 = vadd.xlane.f32.xlu1 %v273_v30  ;;  %271 = vadd.xlane.f32.xlu0 %v270_v29 }
 0x210   :  { %v523_v48 = vpop.xlane.xlu0 %522 }
 0x211   :  { %881 = vrcp.f32 %v523_v48 }
 0x214   :  { %v526_v31 = vpop.xlane.xlu1 %525 }
 0x215   :  { %883 = vrcp.f32 %v526_v31 }
 0x218   :  { %v532_v37 = vpop.xlane.xlu1 %531  ;;  %v529_v39 = vpop.xlane.xlu0 %528 }
 0x219   :  { %885 = vrcp.f32 %v532_v37 }
 0x21a   :  { %887 = vrcp.f32 %v529_v39 }
 0x21b   :  { %v882_v40 = vpop.eup %881 }
 0x21c   :  { %v538_v58 = vpop.xlane.xlu1 %537  ;;  %v535_v63 = vpop.xlane.xlu0 %534  ;;  %v553_v15 = vmul.f32 %v882_v40, %v1312_v49 }
 0x21d   :  { %889 = vrcp.f32 %v538_v58 }
 0x21e   :  { %891 = vrcp.f32 %v535_v63 }
 0x21f   :  { %v884_v14 = vpop.eup %883 }
 0x220   :  { %v544_v7 = vpop.xlane.xlu1 %543  ;;  %v541_v46 = vpop.xlane.xlu0 %540  ;;  %v554_v24 = vmul.f32 %v884_v14, %v1317_v41 }
 0x221   :  { %893 = vrcp.f32 %v544_v7 }
 0x222   :  { %895 = vrcp.f32 %v541_v46  ;;  %v561_v54 = vpack.c.bf16 %v554_v24, %v553_v15  ;;  %v758_v15 = vld [vmem:[#allocation10] ss:$0 sm:$0xff] }
 0x223   :  { %v886_v55 = vpop.eup %885 }
 0x224   :  { %v888_v57 = vpop.eup %887  ;;  %v570_v60 = vpop.permute.xlu1 %569  ;;  %818 = vmatprep.mubr.msk.bf16.mxu1 %vm203_vm1, %v561_v54  ;;  %v556_v59 = vmul.f32 %v886_v55, %v1321_v43 }
 0x225   :  { %v572_v61 = vpop.permute.xlu0 %571  ;;  %814 = vmatprep.subr.bf16.mxu1 %v570_v60  ;;  %v555_v51 = vmul.f32 %v888_v57, %v1323_v47 }
 0x226   :  { %815 = vmatpush3.bf16.msra.mxu1 %v570_v60 }
 0x227   :  { %v890_v36 = vpop.eup %889  ;;  %816 = vmatprep.subr.bf16.mxu1 %v572_v61  ;;  %v562_v16 = vpack.c.bf16 %v556_v59, %v555_v51 }
 0x228   :  { %v892_v49 = vpop.eup %891  ;;  %v558_v41 = vmul.f32 %v890_v36, %v1329_v52 }
 0x229   :  { %v557_v11 = vmul.f32 %v892_v49, %v1331_v53 }
 0x22a   :  { %817 = vmatpush3.bf16.msra.mxu1 %v572_v61 }
 0x22b   :  { %v894_v10 = vpop.eup %893  ;;  %v563_v35 = vpack.c.bf16 %v558_v41, %v557_v11 }
 0x22c   :  { %v896_v19 = vpop.eup %895  ;;  %v560_v47 = vmul.f32 %v894_v10, %v1337_v56 }
 0x22d   :  { %819 = vmatmul.mubr.msk.bf16.vlgmr.msra.gmra.mrb[0].mxu1 %vm203_vm1, %v562_v16  ;;  %v559_v3 = vmul.f32 %v896_v19, %v1339_v42 }
 0x22e   :  { %822 = vmatprep.mubr.msk.bf16.mxu1 %vm203_vm1, %v563_v35 }
 0x22f   :  { %v564_v4 = vpack.c.bf16 %v560_v47, %v559_v3 }
 0x235   :  { %823 = vmatmul.mubr.msk.bf16.gmra.mrb[4].mxu1 %vm203_vm1, %v564_v4 }
 0x255   :  { %v254_v43 = vpop.xlane.xlu1 %253  ;;  %v257_v52 = vpop.xlane.xlu0 %256 }
 0x256   :  { %897 = vrcp.f32 %v254_v43 }
 0x257   :  { %899 = vrcp.f32 %v257_v52 }
 0x259   :  { %v263_v53 = vpop.xlane.xlu1 %262  ;;  %v260_v50 = vpop.xlane.xlu0 %259 }
 0x25a   :  { %901 = vrcp.f32 %v263_v53 }
 0x25b   :  { %903 = vrcp.f32 %v260_v50 }
 0x25d   :  { %v269_v5 = vpop.xlane.xlu1 %268  ;;  %v266_v2 = vpop.xlane.xlu0 %265 }
 0x25e   :  { %905 = vrcp.f32 %v269_v5 }
 0x25f   :  { %907 = vrcp.f32 %v266_v2 }
 0x260   :  { %v898_v0 = vpop.eup %897 }
 0x261   :  { %v900_v6 = vpop.eup %899  ;;  %v275_v42 = vpop.xlane.xlu1 %274  ;;  %v284_v56 = vmul.f32 %v898_v0, %v1359_v18 }
 0x262   :  { %v272_v8 = vpop.xlane.xlu0 %271  ;;  %909 = vrcp.f32 %v275_v42  ;;  %v285_v9 = vmul.f32 %v900_v6, %v1357_v34 }
 0x263   :  { %911 = vrcp.f32 %v272_v8 }
 0x264   :  { %v902_v44 = vpop.eup %901  ;;  %v292_v38 = vpack.c.bf16 %v285_v9, %v284_v56 }
 0x265   :  { %v904_v12 = vpop.eup %903  ;;  %v287_v13 = vmul.f32 %v902_v44, %v1365_v20 }
 0x266   :  { %802 = vmatprep.mubr.msk.bf16.mxu0 %vm203_vm1, %v292_v38  ;;  %v286_v17 = vmul.f32 %v904_v12, %v1367_v21 }
 0x268   :  { %v906_v45 = vpop.eup %905  ;;  %v293_v62 = vpack.c.bf16 %v287_v13, %v286_v17 }
 0x269   :  { %v908_v32 = vpop.eup %907  ;;  %v289_v1 = vmul.f32 %v906_v45, %v1373_v23 }
 0x26a   :  { %803 = vmatmul.mubr.msk.bf16.vlgmr.msra.gmra.mrb[0].mxu0 %vm203_vm1, %v293_v62  ;;  %v288_v18 = vmul.f32 %v908_v32, %v1375_v25 }
 0x26c   :  { %v910_v34 = vpop.eup %909  ;;  %v294_v22 = vpack.c.bf16 %v289_v1, %v288_v18 }
 0x26d   :  { %v912_v26 = vpop.eup %911  ;;  %v291_v27 = vmul.f32 %v910_v34, %v1381_v33 }
 0x26e   :  { %806 = vmatprep.mubr.msk.bf16.mxu0 %vm203_vm1, %v294_v22  ;;  %v290_v20 = vmul.f32 %v912_v26, %v1383_v28 }
 0x270   :  { %v295_v29 = vpack.c.bf16 %v291_v27, %v290_v20 }
 0x272   :  { %807 = vmatmul.mubr.msk.bf16.gmra.mrb[4].mxu0 %vm203_vm1, %v295_v29  ;;  %vm686_vm1 = vcmask 130048  }
 0x300   :  { %v820_v21 = vpop.f32.mrb[0].mxu1 }
 0x301   :  { %666 = vrot.lane.b32.xlu1 %v820_v21, %s1065_s17  ;;  %v623_v23 = vpop.f32.mrb[1].mxu1 }
 0x302   :  { %662 = vrot.lane.b32.xlu0 %v623_v23, %s1065_s17  ;;  %v821_v30 = vpop.f32.mrb[2].mxu1 }
 0x303   :  { %v626_v48 = vpop.f32.mrb[3].mxu1 }
 0x305   :  { %664 = vrot.lane.b32.xlu1 %v626_v48, %s1065_s17 }
 0x306   :  { %668 = vrot.lane.b32.xlu0 %v821_v30, %s1065_s17 }
 0x308   :  { %v824_v25 = vpop.f32.mrb[4].mxu1 }
 0x309   :  { %v639_v31 = vpop.f32.mrb[5].mxu1 }
 0x30a   :  { %670 = vrot.lane.b32.xlu1 %v639_v31, %s1065_s17  ;;  %v825_v33 = vpop.f32.mrb[6].mxu1 }
 0x30b   :  { %v642_v37 = vpop.f32.mrb[7].mxu1 }
 0x30c   :  { %672 = vrot.lane.b32.xlu0 %v642_v37, %s1065_s17 }
 0x30e   :  { %674 = vrot.lane.b32.xlu1 %v824_v25, %s1065_s17 }
 0x310   :  { %676 = vrot.lane.b32.xlu0 %v825_v33, %s1065_s17 }
 0x33d   :  { %v804_v28 = vpop.f32.mrb[0].mxu0 }
 0x33e   :  { %v366_v39 = vpop.f32.mrb[1].mxu0 }
 0x33f   :  { %v805_v58 = vpop.f32.mrb[2].mxu0 }
 0x340   :  { %v369_v63 = vpop.f32.mrb[3].mxu0 }
 0x345   :  { %v808_v40 = vpop.f32.mrb[4].mxu0 }
 0x346   :  { %v382_v14 = vpop.f32.mrb[5].mxu0 }
 0x347   :  { %v809_v7 = vpop.f32.mrb[6].mxu0 }
 0x348   :  { %v385_v46 = vpop.f32.mrb[7].mxu0 }
 0x373   :  { %v667_v24 = vpop.permute.xlu1 %666 }
 0x374   :  { %v689_v54 = vsel %vm686_vm1, %v804_v28, %v667_v24  ;;  %v663_v55 = vpop.permute.xlu0 %662 }
 0x375   :  { %v704_v57 = vadd.f32 %v758_v15, %v689_v54  ;;  %v687_v60 = vsel %vm686_vm1, %v366_v39, %v663_v55 }
 0x376   :  { %v702_v61 = vadd.f32 %v758_v15, %v687_v60 }
 0x377   :  { %v712_v36 = vmax.f32 %v704_v57, 0.0  ;;  %v665_v51 = vpop.permute.xlu1 %664 }
 0x378   :  { %v710_v59 = vmax.f32 %v702_v61, 0.0  ;;  %v688_v49 = vsel %vm686_vm1, %v369_v63, %v665_v51  ;;  %v669_v41 = vpop.permute.xlu0 %668 }
 0x379   :  { %721 = vst.msk [vmem:[#allocation11 + $0x10] sm:$0xff] %vm718_vm2, %v712_v36  ;;  %v703_v11 = vadd.f32 %v758_v15, %v688_v49  ;;  %v690_v10 = vsel %vm686_vm1, %v805_v58, %v669_v41 }
 0x37a   :  { %719 = vst.msk [vmem:[#allocation11] sm:$0xff] %vm718_vm2, %v710_v59  ;;  %v705_v16 = vadd.f32 %v758_v15, %v690_v10 }
 0x37b   :  { %v711_v19 = vmax.f32 %v703_v11, 0.0 }
 0x37c   :  { %v713_v35 = vmax.f32 %v705_v16, 0.0  ;;  %v671_v3 = vpop.permute.xlu1 %670 }
 0x37d   :  { %720 = vst.msk [vmem:[#allocation11 + $0x8] sm:$0xff] %vm718_vm2, %v711_v19  ;;  %v691_v47 = vsel %vm686_vm1, %v382_v14, %v671_v3 }
 0x37e   :  { %722 = vst.msk [vmem:[#allocation11 + $0x18] sm:$0xff] %vm718_vm2, %v713_v35  ;;  %v706_v4 = vadd.f32 %v758_v15, %v691_v47  ;;  %v673_v43 = vpop.permute.xlu0 %672 }
 0x37f   :  { %v692_v52 = vsel %vm686_vm1, %v385_v46, %v673_v43 }
 0x380   :  { %v714_v53 = vmax.f32 %v706_v4, 0.0  ;;  %v707_v50 = vadd.f32 %v758_v15, %v692_v52  ;;  %v675_v5 = vpop.permute.xlu1 %674 }
 0x381   :  { %v693_v2 = vsel %vm686_vm1, %v808_v40, %v675_v5 }
 0x382   :  { %723 = vst.msk [vmem:[#allocation11 + $0x20] sm:$0xff] %vm718_vm2, %v714_v53  ;;  %v715_v0 = vmax.f32 %v707_v50, 0.0  ;;  %v708_v6 = vadd.f32 %v758_v15, %v693_v2  ;;  %v677_v42 = vpop.permute.xlu0 %676 }
 0x383   :  { %v694_v8 = vsel %vm686_vm1, %v809_v7, %v677_v42 }
 0x384   :  { %724 = vst.msk [vmem:[#allocation11 + $0x28] sm:$0xff] %vm718_vm2, %v715_v0  ;;  %v716_v56 = vmax.f32 %v708_v6, 0.0  ;;  %v709_v9 = vadd.f32 %v758_v15, %v694_v8 }
 0x386   :  { %725 = vst.msk [vmem:[#allocation11 + $0x30] sm:$0xff] %vm718_vm2, %v716_v56  ;;  %v717_v44 = vmax.f32 %v709_v9, 0.0 }
 0x388   :  { %726 = vst.msk [vmem:[#allocation11 + $0x38] sm:$0xff] %vm718_vm2, %v717_v44 }
 0x389   :  { %1034 = shalt.err (!%p1031_p2)
}
 0x38a   :  { %s1035_s11 = scalar_lea.hbm %s1449_s5, 1024 }
 0x38b   :  { %p1036_p3 = scmp.ne.s32.totalorder %s1449_s5, %s1035_s11  ;;  %p1039_p4 = scmp.lt.u32.totalorder %s1035_s11, %s1449_s5 }
 0x38d   :  { %p1041_p5 = pnand %p1039_p4, %p1036_p3 }
 0x38f   :  { %1044 = shalt.err (!%p1041_p5)
}
 0x390   :  { %738 = dma.vmem_to_hbm [thread:$0]  %s733_s6, 1024, %s1449_s5, [#allocation4], %s1058_s3, %s1058_s3, %s1059_s28  }
 0x391   :  { %1051 = dma.done.wait [#allocation4], 1024  }
 0x392   :  { %1052 = vsyncadd [#allocation4], 4294966272 }
 0x393   :  { %742 = vsyncpa [#allocation3], 1 }
 0x394   :  { %743 = vsyncpa [#allocation6], 1 }
 0x395   :  { %744 = vsyncpa [#allocation9], 1 }
 0x396   :  { %745 = vsyncpa [#allocation4], 1 }

// kernel: _lambda_.9
= control target key start
LH: loop header
LB: loop body
LE: loop exit
PB: predicated region body
PF: predicated region fallthrough
CT: control target
= control target key end

     0   :  { %11 = vsyncpa [#allocation3], 0  ;;  %s11005_s0 = inlined_call_operand.hbm [shape: f32[64,2,16], index: 0, kind: input, shape index: {}]   ;;  %s11006_s1 = inlined_call_operand.hbm [shape: f32[64,2,16], index: 1, kind: input, shape index: {}]   ;;  %s11007_s2 = inlined_call_operand.hbm [shape: f32[16,4], index: 2, kind: input, shape index: {}]   ;;  %s11008_s3 = inlined_call_operand.hbm [shape: f32[1,4], index: 3, kind: input, shape index: {}]   ;;  %s11009_s4 = inlined_call_operand.hbm [shape: f32[64,4], index: 4, kind: output, shape index: {0}]   ;;  %s11010_s5 = inlined_call_operand.hbm [shape: f32[64,2], index: 5, kind: output, shape index: {1}]  }
   0x1   :  { %12 = vsyncpa [#allocation6], 0 }
   0x2   :  { %13 = vsyncpa [#allocation9], 0 }
   0x3   :  { %14 = vsyncpa [#allocation4], 0 }
   0x4   :  { %15 = vsyncpa [#allocation12], 0  ;;  %s7395_s18 = smov [#allocation5]   ;;  %s7396_s20 = smov [#allocation2]  }
   0x5   :  { %s33_s19 = sshll.u32 %s7395_s18, 4  ;;  %s21_s21 = sshll.u32 %s7396_s20, 4  ;;  %s34_s19 = int_to_ptr.vmem [resolvable:$true] %s33_s19  ;;  %s7436_s21 = int_to_ptr.vmem [resolvable:$true] %s21_s21 }
   0x6   :  { %s7253_s24 = scalar_lea.hbm %s11006_s1, 2048 }
   0x7   :  { %p7254_p0 = scmp.ne.s32.totalorder %s11006_s1, %s7253_s24  ;;  %p7257_p1 = scmp.lt.u32.totalorder %s7253_s24, %s11006_s1 }
   0x9   :  { %p7259_p2 = pnand %p7257_p1, %p7254_p0 }
   0xb   :  { %7262 = shalt.err (!%p7259_p2)
}
   0xc   :  { %s7263_s29 = scalar_lea.vmem %s34_s19, 2048  ;;  %p7268_p4 = scmp.lt.s32.totalorder %s34_s19, %s34_s19 }
   0xd   :  { %p7264_p3 = scmp.ne.s32.totalorder %s34_s19, %s7263_s29  ;;  %p7269_p5 = scmp.lt.s32.totalorder %s7263_s29, %s7263_s29 }
   0xf   :  { %p7270_p6 = por %p7269_p5, %p7268_p4 }
  0x11   :  { %p7271_p7 = pnand %p7270_p6, %p7264_p3 }
  0x13   :  { %7274 = shalt.err (!%p7271_p7)
}
  0x14   :  { %s7397_s30 = smov 32   ;;  %s7398_s6 = smov 2  }
  0x15   :  { %39 = dma.hbm_to_vmem [thread:$0]  %s11006_s1, 2048, %s34_s19, [#allocation6], %s7397_s30, %s7397_s30, %s7398_s6  }
  0x16   :  { %s7275_s11 = scalar_lea.hbm %s11005_s0, 2048 }
  0x17   :  { %p7276_p8 = scmp.ne.s32.totalorder %s11005_s0, %s7275_s11  ;;  %p7279_p9 = scmp.lt.u32.totalorder %s7275_s11, %s11005_s0 }
  0x19   :  { %p7281_p10 = pnand %p7279_p9, %p7276_p8 }
  0x1b   :  { %7284 = shalt.err (!%p7281_p10)
}
  0x1c   :  { %s7285_s16 = scalar_lea.vmem %s7436_s21, 2048  ;;  %p7290_p12 = scmp.lt.s32.totalorder %s7436_s21, %s7436_s21 }
  0x1d   :  { %p7286_p11 = scmp.ne.s32.totalorder %s7436_s21, %s7285_s16  ;;  %p7291_p13 = scmp.lt.s32.totalorder %s7285_s16, %s7285_s16 }
  0x1f   :  { %p7292_p0 = por %p7291_p13, %p7290_p12 }
  0x21   :  { %p7293_p1 = pnand %p7292_p0, %p7286_p11 }
  0x23   :  { %7296 = shalt.err (!%p7293_p1)
}
  0x24   :  { %27 = dma.hbm_to_vmem [thread:$0]  %s11005_s0, 2048, %s7436_s21, [#allocation3], %s7397_s30, %s7397_s30, %s7398_s6  }
  0x25   :  { %s7399_s18 = smov [#allocation7]   ;;  %s7297_s23 = scalar_lea.hbm %s11007_s2, 256 }
  0x26   :  { %s45_s19 = sshll.u32 %s7399_s18, 4  ;;  %p7298_p2 = scmp.ne.s32.totalorder %s11007_s2, %s7297_s23  ;;  %s46_s19 = int_to_ptr.vmem [resolvable:$true] %s45_s19 }
  0x27   :  { %p7301_p3 = scmp.lt.u32.totalorder %s7297_s23, %s11007_s2 }
  0x29   :  { %p7303_p4 = pnand %p7301_p3, %p7298_p2 }
  0x2b   :  { %7306 = shalt.err (!%p7303_p4)
}
  0x2c   :  { %s7307_s28 = scalar_lea.vmem %s46_s19, 256  ;;  %p7312_p6 = scmp.lt.s32.totalorder %s46_s19, %s46_s19 }
  0x2d   :  { %p7308_p5 = scmp.ne.s32.totalorder %s46_s19, %s7307_s28  ;;  %p7313_p7 = scmp.lt.s32.totalorder %s7307_s28, %s7307_s28 }
  0x2f   :  { %p7314_p8 = por %p7313_p7, %p7312_p6 }
  0x31   :  { %p7315_p9 = pnand %p7314_p8, %p7308_p5 }
  0x33   :  { %7318 = shalt.err (!%p7315_p9)
}
  0x34   :  { %s7400_s0 = smov 128   ;;  %s7401_s21 = smov 8  }
  0x35   :  { %51 = dma.hbm_to_vmem [thread:$0]  %s11007_s2, 256, %s46_s19, [#allocation6], %s7400_s0, %s7400_s0, %s7401_s21  }
  0x36   :  { %s7402_s6 = smov [#allocation8]   ;;  %s7319_s10 = scalar_lea.hbm %s11008_s3, 16 }
  0x37   :  { %s58_s7 = sshll.u32 %s7402_s6, 4  ;;  %p7320_p10 = scmp.ne.s32.totalorder %s11008_s3, %s7319_s10  ;;  %s59_s7 = int_to_ptr.vmem [resolvable:$true] %s58_s7 }
  0x38   :  { %p7323_p11 = scmp.lt.u32.totalorder %s7319_s10, %s11008_s3 }
  0x3a   :  { %p7325_p12 = pnand %p7323_p11, %p7320_p10 }
  0x3c   :  { %7328 = shalt.err (!%p7325_p12)
}
  0x3d   :  { %s7329_s15 = scalar_lea.vmem %s59_s7, 16  ;;  %s7333_s2 = scalar_lea.vmem %s59_s7, 32 }
  0x3e   :  { %p7330_p13 = scmp.ne.s32.totalorder %s59_s7, %s7329_s15  ;;  %p7334_p0 = scmp.lt.s32.totalorder %s59_s7, %s59_s7 }
  0x3f   :  { %p7335_p1 = scmp.lt.s32.totalorder %s7333_s2, %s7329_s15 }
  0x41   :  { %p7336_p2 = por %p7335_p1, %p7334_p0 }
  0x43   :  { %p7337_p3 = pnand %p7336_p2, %p7330_p13 }
  0x45   :  { %7340 = shalt.err (!%p7337_p3)
}
  0x46   :  { %61 = dma.hbm_to_vmem [thread:$0]  %s11008_s3, 16, %s59_s7, [#allocation9]  }
  0x47   :  { %7385 = dma.done.wait [#allocation3], 2048  }
  0x48   :  { %7386 = vsyncadd [#allocation3], 4294965248 }
  0x49   :  { %7387 = dma.done.wait [#allocation6], 2304  }
  0x4a   :  { %7388 = vsyncadd [#allocation6], 4294964992 }
  0x4b   :  { %7389 = dma.done.wait [#allocation9], 16  }
  0x4c   :  { %7390 = vsyncadd [#allocation9], 4294967280  ;;  %vm266_vm0 = vcmask 123904   ;;  %v76_v0 = vld [vmem:[#allocation2 + $0x4] sm:$0x3]  ;;  %vm845_vm1 = vcmask 1041409  }
  0x4d   :  { %v140_v1 = vld [vmem:[#allocation5 + $0x4] sm:$0x3]  ;;  %v7494_v2 = vld [vmem:[#allocation2] sm:$0x3]  ;;  %v77_v5 = vld [vmem:[#allocation2 + $0x6] sm:$0x3] }
  0x4e   :  { %v204_v3 = vmul.f32 %v140_v1, %v76_v0  ;;  %v138_v4 = vld [vmem:[#allocation5] sm:$0x3]  ;;  %v141_v6 = vld [vmem:[#allocation5 + $0x6] sm:$0x3]  ;;  %v7497_v9 = vld [vmem:[#allocation2 + $0x2] sm:$0x3] }
  0x4f   :  { %v202_v7 = vmul.f32 %v138_v4, %v7494_v2  ;;  %v205_v8 = vmul.f32 %v141_v6, %v77_v5  ;;  %v139_v10 = vld [vmem:[#allocation5 + $0x2] sm:$0x3]  ;;  %v79_v11 = vld [vmem:[#allocation2 + $0xa] sm:$0x3]  ;;  %v78_v15 = vld [vmem:[#allocation2 + $0x8] sm:$0x3] }
  0x50   :  { %v273_v12 = vsel %vm266_vm0, %v204_v3, 0.0  ;;  %v203_v13 = vmul.f32 %v139_v10, %v7497_v9  ;;  %v143_v14 = vld [vmem:[#allocation5 + $0xa] sm:$0x3]  ;;  %v142_v17 = vld [vmem:[#allocation5 + $0x8] sm:$0x3]  ;;  %vm847_vm2 = vcmask 1042434  }
  0x51   :  { %274 = vadd.xlane.f32.xlu1 %v273_v12  ;;  %v267_v16 = vsel %vm266_vm0, %v202_v7, 0.0  ;;  %v276_v18 = vsel %vm266_vm0, %v205_v8, 0.0  ;;  %v207_v19 = vmul.f32 %v143_v14, %v79_v11  ;;  %v206_v21 = vmul.f32 %v142_v17, %v78_v15  ;;  %v81_v22 = vld [vmem:[#allocation2 + $0xe] sm:$0x3]  ;;  %v80_v24 = vld [vmem:[#allocation2 + $0xc] sm:$0x3] }
  0x52   :  { %268 = vadd.xlane.f32.xlu0 %v267_v16  ;;  %v270_v20 = vsel %vm266_vm0, %v203_v13, 0.0  ;;  %v145_v23 = vld [vmem:[#allocation5 + $0xe] sm:$0x3]  ;;  %v144_v25 = vld [vmem:[#allocation5 + $0xc] sm:$0x3]  ;;  %vm849_vm3 = vcmask 1043459  }
  0x53   :  { %v282_v26 = vsel %vm266_vm0, %v207_v19, 0.0  ;;  %v209_v27 = vmul.f32 %v145_v23, %v81_v22  ;;  %v279_v28 = vsel %vm266_vm0, %v206_v21, 0.0  ;;  %v208_v29 = vmul.f32 %v144_v25, %v80_v24  ;;  %v83_v30 = vld [vmem:[#allocation2 + $0x12] sm:$0x3]  ;;  %v82_v32 = vld [vmem:[#allocation2 + $0x10] sm:$0x3] }
  0x54   :  { %v147_v31 = vld [vmem:[#allocation5 + $0x12] sm:$0x3]  ;;  %v146_v33 = vld [vmem:[#allocation5 + $0x10] sm:$0x3]  ;;  %v85_v38 = vld [vmem:[#allocation2 + $0x16] sm:$0x3] }
  0x55   :  { %277 = vadd.xlane.f32.xlu1 %v276_v18  ;;  %v288_v34 = vsel %vm266_vm0, %v209_v27, 0.0  ;;  %v211_v35 = vmul.f32 %v147_v31, %v83_v30  ;;  %v285_v36 = vsel %vm266_vm0, %v208_v29, 0.0  ;;  %v210_v37 = vmul.f32 %v146_v33, %v82_v32  ;;  %v149_v39 = vld [vmem:[#allocation5 + $0x16] sm:$0x3]  ;;  %v84_v40 = vld [vmem:[#allocation2 + $0x14] sm:$0x3] }
  0x56   :  { %271 = vadd.xlane.f32.xlu0 %v270_v20  ;;  %v148_v41 = vld [vmem:[#allocation5 + $0x14] sm:$0x3]  ;;  %v213_v43 = vmul.f32 %v149_v39, %v85_v38  ;;  %v87_v46 = vld [vmem:[#allocation2 + $0x1a] sm:$0x3]  ;;  %v86_v48 = vld [vmem:[#allocation2 + $0x18] sm:$0x3] }
  0x57   :  { %v294_v42 = vsel %vm266_vm0, %v211_v35, 0.0  ;;  %v291_v44 = vsel %vm266_vm0, %v210_v37, 0.0  ;;  %v212_v45 = vmul.f32 %v148_v41, %v84_v40  ;;  %v151_v47 = vld [vmem:[#allocation5 + $0x1a] sm:$0x3]  ;;  %v150_v49 = vld [vmem:[#allocation5 + $0x18] sm:$0x3] }
  0x58   :  { %v300_v50 = vsel %vm266_vm0, %v213_v43, 0.0  ;;  %v215_v51 = vmul.f32 %v151_v47, %v87_v46  ;;  %v214_v53 = vmul.f32 %v150_v49, %v86_v48  ;;  %v89_v54 = vld [vmem:[#allocation2 + $0x1e] sm:$0x3]  ;;  %v88_v56 = vld [vmem:[#allocation2 + $0x1c] sm:$0x3]  ;;  %vm851_vm4 = vcmask 1044484  }
  0x59   :  { %283 = vadd.xlane.f32.xlu1 %v282_v26  ;;  %v297_v52 = vsel %vm266_vm0, %v212_v45, 0.0  ;;  %v153_v55 = vld [vmem:[#allocation5 + $0x1e] sm:$0x3]  ;;  %v152_v57 = vld [vmem:[#allocation5 + $0x1c] sm:$0x3]  ;;  %vm853_vm5 = vcmask 1045509  }
  0x5a   :  { %280 = vadd.xlane.f32.xlu0 %v279_v28  ;;  %v306_v58 = vsel %vm266_vm0, %v215_v51, 0.0  ;;  %v217_v59 = vmul.f32 %v153_v55, %v89_v54  ;;  %v303_v60 = vsel %vm266_vm0, %v214_v53, 0.0  ;;  %v216_v61 = vmul.f32 %v152_v57, %v88_v56  ;;  %v91_v62 = vld [vmem:[#allocation2 + $0x22] sm:$0x3]  ;;  %v90_v0 = vld [vmem:[#allocation2 + $0x20] sm:$0x3] }
  0x5b   :  { %v155_v63 = vld [vmem:[#allocation5 + $0x22] sm:$0x3]  ;;  %v154_v1 = vld [vmem:[#allocation5 + $0x20] sm:$0x3]  ;;  %v93_v7 = vld [vmem:[#allocation2 + $0x26] sm:$0x3] }
  0x5c   :  { %v312_v3 = vsel %vm266_vm0, %v217_v59, 0.0  ;;  %v219_v4 = vmul.f32 %v155_v63, %v91_v62  ;;  %v309_v5 = vsel %vm266_vm0, %v216_v61, 0.0  ;;  %v218_v6 = vmul.f32 %v154_v1, %v90_v0  ;;  %v157_v8 = vld [vmem:[#allocation5 + $0x26] sm:$0x3]  ;;  %v92_v10 = vld [vmem:[#allocation2 + $0x24] sm:$0x3] }
  0x5d   :  { %289 = vadd.xlane.f32.xlu1 %v288_v34  ;;  %v156_v11 = vld [vmem:[#allocation5 + $0x24] sm:$0x3]  ;;  %v221_v13 = vmul.f32 %v157_v8, %v93_v7  ;;  %v95_v16 = vld [vmem:[#allocation2 + $0x2a] sm:$0x3]  ;;  %v94_v18 = vld [vmem:[#allocation2 + $0x28] sm:$0x3] }
  0x5e   :  { %286 = vadd.xlane.f32.xlu0 %v285_v36  ;;  %v318_v12 = vsel %vm266_vm0, %v219_v4, 0.0  ;;  %v315_v14 = vsel %vm266_vm0, %v218_v6, 0.0  ;;  %v220_v15 = vmul.f32 %v156_v11, %v92_v10  ;;  %v159_v17 = vld [vmem:[#allocation5 + $0x2a] sm:$0x3]  ;;  %v158_v19 = vld [vmem:[#allocation5 + $0x28] sm:$0x3] }
  0x5f   :  { %v324_v20 = vsel %vm266_vm0, %v221_v13, 0.0  ;;  %v223_v21 = vmul.f32 %v159_v17, %v95_v16  ;;  %v222_v23 = vmul.f32 %v158_v19, %v94_v18  ;;  %v97_v24 = vld [vmem:[#allocation2 + $0x2e] sm:$0x3]  ;;  %v96_v26 = vld [vmem:[#allocation2 + $0x2c] sm:$0x3]  ;;  %vm855_vm6 = vcmask 1046534  }
  0x60   :  { %v321_v22 = vsel %vm266_vm0, %v220_v15, 0.0  ;;  %v161_v25 = vld [vmem:[#allocation5 + $0x2e] sm:$0x3]  ;;  %v160_v27 = vld [vmem:[#allocation5 + $0x2c] sm:$0x3]  ;;  %vm857_vm7 = vcmask 1047559  }
  0x61   :  { %295 = vadd.xlane.f32.xlu1 %v294_v42  ;;  %v330_v28 = vsel %vm266_vm0, %v223_v21, 0.0  ;;  %v225_v29 = vmul.f32 %v161_v25, %v97_v24  ;;  %v327_v30 = vsel %vm266_vm0, %v222_v23, 0.0  ;;  %v224_v31 = vmul.f32 %v160_v27, %v96_v26  ;;  %v99_v32 = vld [vmem:[#allocation2 + $0x32] sm:$0x3]  ;;  %v98_v34 = vld [vmem:[#allocation2 + $0x30] sm:$0x3] }
  0x62   :  { %292 = vadd.xlane.f32.xlu0 %v291_v44  ;;  %v163_v33 = vld [vmem:[#allocation5 + $0x32] sm:$0x3]  ;;  %v162_v35 = vld [vmem:[#allocation5 + $0x30] sm:$0x3]  ;;  %v101_v40 = vld [vmem:[#allocation2 + $0x36] sm:$0x3] }
  0x63   :  { %v336_v36 = vsel %vm266_vm0, %v225_v29, 0.0  ;;  %v227_v37 = vmul.f32 %v163_v33, %v99_v32  ;;  %v333_v38 = vsel %vm266_vm0, %v224_v31, 0.0  ;;  %v226_v39 = vmul.f32 %v162_v35, %v98_v34  ;;  %v165_v41 = vld [vmem:[#allocation5 + $0x36] sm:$0x3]  ;;  %v100_v42 = vld [vmem:[#allocation2 + $0x34] sm:$0x3] }
  0x64   :  { %v164_v43 = vld [vmem:[#allocation5 + $0x34] sm:$0x3]  ;;  %v229_v45 = vmul.f32 %v165_v41, %v101_v40  ;;  %v103_v48 = vld [vmem:[#allocation2 + $0x3a] sm:$0x3]  ;;  %v166_v51 = vld [vmem:[#allocation5 + $0x38] sm:$0x3] }
  0x65   :  { %301 = vadd.xlane.f32.xlu1 %v300_v50  ;;  %v342_v44 = vsel %vm266_vm0, %v227_v37, 0.0  ;;  %v339_v46 = vsel %vm266_vm0, %v226_v39, 0.0  ;;  %v228_v47 = vmul.f32 %v164_v43, %v100_v42  ;;  %v167_v49 = vld [vmem:[#allocation5 + $0x3a] sm:$0x3]  ;;  %v102_v50 = vld [vmem:[#allocation2 + $0x38] sm:$0x3] }
  0x66   :  { %298 = vadd.xlane.f32.xlu0 %v297_v52  ;;  %v348_v52 = vsel %vm266_vm0, %v229_v45, 0.0  ;;  %v231_v53 = vmul.f32 %v167_v49, %v103_v48  ;;  %v230_v55 = vmul.f32 %v166_v51, %v102_v50  ;;  %v105_v56 = vld [vmem:[#allocation2 + $0x3e] sm:$0x3]  ;;  %v168_v59 = vld [vmem:[#allocation5 + $0x3c] sm:$0x3]  ;;  %vm916_vm8 = vcmask 15360  }
  0x67   :  { %v345_v54 = vsel %vm266_vm0, %v228_v47, 0.0  ;;  %v169_v57 = vld [vmem:[#allocation5 + $0x3e] sm:$0x3]  ;;  %v107_v0 = vld [vmem:[#allocation2 + $0x42] sm:$0x3]  ;;  %vm5615_vm9 = vcmask 130112  }
  0x68   :  { %v233_v61 = vmul.f32 %v169_v57, %v105_v56  ;;  %v351_v62 = vsel %vm266_vm0, %v230_v55, 0.0  ;;  %v171_v1 = vld [vmem:[#allocation5 + $0x42] sm:$0x3]  ;;  %v170_v4 = vld [vmem:[#allocation5 + $0x40] sm:$0x3]  ;;  %vm6240_vm10 = vcmask 130048  }
  0x69   :  { %307 = vadd.xlane.f32.xlu1 %v306_v58  ;;  %v104_v58 = vld [vmem:[#allocation2 + $0x3c] sm:$0x3]  ;;  %v235_v6 = vmul.f32 %v171_v1, %v107_v0  ;;  %v109_v10 = vld [vmem:[#allocation2 + $0x46] sm:$0x3]  ;;  %v172_v13 = vld [vmem:[#allocation5 + $0x44] sm:$0x3] }
  0x6a   :  { %304 = vadd.xlane.f32.xlu0 %v303_v60  ;;  %v354_v60 = vsel %vm266_vm0, %v231_v53, 0.0  ;;  %v232_v63 = vmul.f32 %v168_v59, %v104_v58  ;;  %v173_v11 = vld [vmem:[#allocation5 + $0x46] sm:$0x3]  ;;  %v111_v18 = vld [vmem:[#allocation2 + $0x4a] sm:$0x3]  ;;  %vm6362_vm11 = vcmask 31744  }
  0x6b   :  { %v237_v15 = vmul.f32 %v173_v11, %v109_v10  ;;  %v175_v19 = vld [vmem:[#allocation5 + $0x4a] sm:$0x3]  ;;  %v174_v21 = vld [vmem:[#allocation5 + $0x48] sm:$0x3]  ;;  %v113_v26 = vld [vmem:[#allocation2 + $0x4e] sm:$0x3] }
  0x6c   :  { %v357_v7 = vsel %vm266_vm0, %v232_v63, 0.0  ;;  %v239_v23 = vmul.f32 %v175_v19, %v111_v18  ;;  %v177_v27 = vld [vmem:[#allocation5 + $0x4e] sm:$0x3]  ;;  %v176_v29 = vld [vmem:[#allocation5 + $0x4c] sm:$0x3]  ;;  %s7404_s3 = smov [#allocation11]  }
  0x6d   :  { %313 = vadd.xlane.f32.xlu1 %v312_v3  ;;  %v106_v3 = vld [vmem:[#allocation2 + $0x40] sm:$0x3]  ;;  %v241_v31 = vmul.f32 %v177_v27, %v113_v26  ;;  %v115_v34 = vld [vmem:[#allocation2 + $0x52] sm:$0x3]  ;;  %v178_v37 = vld [vmem:[#allocation5 + $0x50] sm:$0x3] }
  0x6e   :  { %310 = vadd.xlane.f32.xlu0 %v309_v5  ;;  %v360_v5 = vsel %vm266_vm0, %v233_v61, 0.0  ;;  %v234_v8 = vmul.f32 %v170_v4, %v106_v3  ;;  %v179_v35 = vld [vmem:[#allocation5 + $0x52] sm:$0x3]  ;;  %v117_v42 = vld [vmem:[#allocation2 + $0x56] sm:$0x3]  ;;  %s6972_s17 = sshll.u32 %s7404_s3, 4  ;;  %s6973_s17 = int_to_ptr.vmem [resolvable:$true] %s6972_s17 }
  0x6f   :  { %v243_v39 = vmul.f32 %v179_v35, %v115_v34  ;;  %v181_v43 = vld [vmem:[#allocation5 + $0x56] sm:$0x3]  ;;  %v180_v45 = vld [vmem:[#allocation5 + $0x54] sm:$0x3]  ;;  %v119_v50 = vld [vmem:[#allocation2 + $0x5a] sm:$0x3]  ;;  %p7346_p5 = scmp.lt.s32.totalorder %s6973_s17, %s6973_s17 }
  0x70   :  { %v363_v16 = vsel %vm266_vm0, %v234_v8, 0.0  ;;  %v245_v47 = vmul.f32 %v181_v43, %v117_v42  ;;  %v183_v51 = vld [vmem:[#allocation5 + $0x5a] sm:$0x3]  ;;  %v182_v53 = vld [vmem:[#allocation5 + $0x58] sm:$0x3]  ;;  %s7341_s18 = scalar_lea.vmem %s6973_s17, 1024 }
  0x71   :  { %319 = vadd.xlane.f32.xlu1 %v318_v12  ;;  %v108_v12 = vld [vmem:[#allocation2 + $0x44] sm:$0x3]  ;;  %v247_v55 = vmul.f32 %v183_v51, %v119_v50  ;;  %v121_v58 = vld [vmem:[#allocation2 + $0x5e] sm:$0x3]  ;;  %v184_v61 = vld [vmem:[#allocation5 + $0x5c] sm:$0x3]  ;;  %p7342_p4 = scmp.ne.s32.totalorder %s6973_s17, %s7341_s18  ;;  %p7347_p6 = scmp.lt.s32.totalorder %s7341_s18, %s7341_s18 }
  0x72   :  { %316 = vadd.xlane.f32.xlu0 %v315_v14  ;;  %v366_v14 = vsel %vm266_vm0, %v235_v6, 0.0  ;;  %v236_v17 = vmul.f32 %v172_v13, %v108_v12  ;;  %v185_v59 = vld [vmem:[#allocation5 + $0x5e] sm:$0x3]  ;;  %v123_v3 = vld [vmem:[#allocation2 + $0x62] sm:$0x3] }
  0x73   :  { %v249_v63 = vmul.f32 %v185_v59, %v121_v58  ;;  %v187_v4 = vld [vmem:[#allocation5 + $0x62] sm:$0x3]  ;;  %v186_v6 = vld [vmem:[#allocation5 + $0x60] sm:$0x3]  ;;  %v125_v12 = vld [vmem:[#allocation2 + $0x66] sm:$0x3]  ;;  %p7348_p7 = por %p7347_p6, %p7346_p5 }
  0x74   :  { %v369_v24 = vsel %vm266_vm0, %v236_v17, 0.0  ;;  %v251_v8 = vmul.f32 %v187_v4, %v123_v3  ;;  %v189_v13 = vld [vmem:[#allocation5 + $0x66] sm:$0x3] }
  0x75   :  { %325 = vadd.xlane.f32.xlu1 %v324_v20  ;;  %v110_v20 = vld [vmem:[#allocation2 + $0x48] sm:$0x3]  ;;  %v253_v17 = vmul.f32 %v189_v13, %v125_v12  ;;  %p7349_p8 = pnand %p7348_p7, %p7342_p4 }
  0x76   :  { %322 = vadd.xlane.f32.xlu0 %v321_v22  ;;  %v372_v22 = vsel %vm266_vm0, %v237_v15, 0.0  ;;  %v238_v25 = vmul.f32 %v174_v21, %v110_v20  ;;  %v188_v15 = vld [vmem:[#allocation5 + $0x64] sm:$0x3]  ;;  %v127_v20 = vld [vmem:[#allocation2 + $0x6a] sm:$0x3] }
  0x77   :  { %v191_v21 = vld [vmem:[#allocation5 + $0x6a] sm:$0x3] }
  0x78   :  { %v375_v32 = vsel %vm266_vm0, %v238_v25, 0.0  ;;  %v255_v25 = vmul.f32 %v191_v21, %v127_v20 }
  0x79   :  { %331 = vadd.xlane.f32.xlu1 %v330_v28  ;;  %v112_v28 = vld [vmem:[#allocation2 + $0x4c] sm:$0x3] }
  0x7a   :  { %328 = vadd.xlane.f32.xlu0 %v327_v30  ;;  %v378_v30 = vsel %vm266_vm0, %v239_v23, 0.0  ;;  %v240_v33 = vmul.f32 %v176_v29, %v112_v28  ;;  %v190_v23 = vld [vmem:[#allocation5 + $0x68] sm:$0x3]  ;;  %v129_v28 = vld [vmem:[#allocation2 + $0x6e] sm:$0x3] }
  0x7b   :  { %v193_v29 = vld [vmem:[#allocation5 + $0x6e] sm:$0x3] }
  0x7c   :  { %v381_v40 = vsel %vm266_vm0, %v240_v33, 0.0  ;;  %v257_v33 = vmul.f32 %v193_v29, %v129_v28 }
  0x7d   :  { %337 = vadd.xlane.f32.xlu1 %v336_v36  ;;  %v114_v36 = vld [vmem:[#allocation2 + $0x50] sm:$0x3] }
  0x7e   :  { %334 = vadd.xlane.f32.xlu0 %v333_v38  ;;  %v384_v38 = vsel %vm266_vm0, %v241_v31, 0.0  ;;  %v242_v41 = vmul.f32 %v178_v37, %v114_v36  ;;  %v192_v31 = vld [vmem:[#allocation5 + $0x6c] sm:$0x3]  ;;  %v131_v36 = vld [vmem:[#allocation2 + $0x72] sm:$0x3] }
  0x7f   :  { %v195_v37 = vld [vmem:[#allocation5 + $0x72] sm:$0x3] }
  0x80   :  { %v387_v48 = vsel %vm266_vm0, %v242_v41, 0.0  ;;  %v259_v41 = vmul.f32 %v195_v37, %v131_v36 }
  0x81   :  { %343 = vadd.xlane.f32.xlu1 %v342_v44  ;;  %v116_v44 = vld [vmem:[#allocation2 + $0x54] sm:$0x3] }
  0x82   :  { %340 = vadd.xlane.f32.xlu0 %v339_v46  ;;  %v390_v46 = vsel %vm266_vm0, %v243_v39, 0.0  ;;  %v244_v49 = vmul.f32 %v180_v45, %v116_v44  ;;  %v194_v39 = vld [vmem:[#allocation5 + $0x70] sm:$0x3]  ;;  %v133_v44 = vld [vmem:[#allocation2 + $0x76] sm:$0x3] }
  0x83   :  { %v197_v45 = vld [vmem:[#allocation5 + $0x76] sm:$0x3] }
  0x84   :  { %v393_v56 = vsel %vm266_vm0, %v244_v49, 0.0  ;;  %v261_v49 = vmul.f32 %v197_v45, %v133_v44 }
  0x85   :  { %349 = vadd.xlane.f32.xlu1 %v348_v52  ;;  %v118_v52 = vld [vmem:[#allocation2 + $0x58] sm:$0x3] }
  0x86   :  { %346 = vadd.xlane.f32.xlu0 %v345_v54  ;;  %v396_v54 = vsel %vm266_vm0, %v245_v47, 0.0  ;;  %v246_v57 = vmul.f32 %v182_v53, %v118_v52  ;;  %v196_v47 = vld [vmem:[#allocation5 + $0x74] sm:$0x3]  ;;  %v135_v52 = vld [vmem:[#allocation2 + $0x7a] sm:$0x3] }
  0x87   :  { %v199_v53 = vld [vmem:[#allocation5 + $0x7a] sm:$0x3] }
  0x88   :  { %v399_v0 = vsel %vm266_vm0, %v246_v57, 0.0  ;;  %v263_v57 = vmul.f32 %v199_v53, %v135_v52 }
  0x89   :  { %355 = vadd.xlane.f32.xlu1 %v354_v60  ;;  %v120_v60 = vld [vmem:[#allocation2 + $0x5c] sm:$0x3] }
  0x8a   :  { %352 = vadd.xlane.f32.xlu0 %v351_v62  ;;  %v402_v62 = vsel %vm266_vm0, %v247_v55, 0.0  ;;  %v248_v1 = vmul.f32 %v184_v61, %v120_v60  ;;  %v198_v55 = vld [vmem:[#allocation5 + $0x78] sm:$0x3]  ;;  %v137_v60 = vld [vmem:[#allocation2 + $0x7e] sm:$0x3] }
  0x8b   :  { %v201_v61 = vld [vmem:[#allocation5 + $0x7e] sm:$0x3] }
  0x8c   :  { %v405_v10 = vsel %vm266_vm0, %v248_v1, 0.0  ;;  %v265_v1 = vmul.f32 %v201_v61, %v137_v60 }
  0x8d   :  { %361 = vadd.xlane.f32.xlu1 %v360_v5  ;;  %v122_v5 = vld [vmem:[#allocation2 + $0x60] sm:$0x3] }
  0x8e   :  { %358 = vadd.xlane.f32.xlu0 %v357_v7  ;;  %v408_v7 = vsel %vm266_vm0, %v249_v63, 0.0  ;;  %v250_v11 = vmul.f32 %v186_v6, %v122_v5  ;;  %v200_v63 = vld [vmem:[#allocation5 + $0x7c] sm:$0x3]  ;;  %v456_v5 = vsel %vm266_vm0, %v265_v1, 0.0 }
  0x90   :  { %v411_v18 = vsel %vm266_vm0, %v250_v11, 0.0 }
  0x91   :  { %367 = vadd.xlane.f32.xlu1 %v366_v14  ;;  %v124_v14 = vld [vmem:[#allocation2 + $0x64] sm:$0x3] }
  0x92   :  { %364 = vadd.xlane.f32.xlu0 %v363_v16  ;;  %v414_v16 = vsel %vm266_vm0, %v251_v8, 0.0  ;;  %v252_v19 = vmul.f32 %v188_v15, %v124_v14 }
  0x94   :  { %v417_v26 = vsel %vm266_vm0, %v252_v19, 0.0 }
  0x95   :  { %373 = vadd.xlane.f32.xlu1 %v372_v22  ;;  %v126_v22 = vld [vmem:[#allocation2 + $0x68] sm:$0x3] }
  0x96   :  { %370 = vadd.xlane.f32.xlu0 %v369_v24  ;;  %v420_v24 = vsel %vm266_vm0, %v253_v17, 0.0  ;;  %v254_v27 = vmul.f32 %v190_v23, %v126_v22 }
  0x98   :  { %v423_v34 = vsel %vm266_vm0, %v254_v27, 0.0 }
  0x99   :  { %379 = vadd.xlane.f32.xlu1 %v378_v30  ;;  %v128_v30 = vld [vmem:[#allocation2 + $0x6c] sm:$0x3] }
  0x9a   :  { %376 = vadd.xlane.f32.xlu0 %v375_v32  ;;  %v426_v32 = vsel %vm266_vm0, %v255_v25, 0.0  ;;  %v256_v35 = vmul.f32 %v192_v31, %v128_v30 }
  0x9c   :  { %v429_v42 = vsel %vm266_vm0, %v256_v35, 0.0 }
  0x9d   :  { %385 = vadd.xlane.f32.xlu1 %v384_v38  ;;  %v130_v38 = vld [vmem:[#allocation2 + $0x70] sm:$0x3] }
  0x9e   :  { %382 = vadd.xlane.f32.xlu0 %v381_v40  ;;  %v432_v40 = vsel %vm266_vm0, %v257_v33, 0.0  ;;  %v258_v43 = vmul.f32 %v194_v39, %v130_v38 }
  0xa0   :  { %v435_v50 = vsel %vm266_vm0, %v258_v43, 0.0 }
  0xa1   :  { %391 = vadd.xlane.f32.xlu1 %v390_v46  ;;  %v132_v46 = vld [vmem:[#allocation2 + $0x74] sm:$0x3] }
  0xa2   :  { %388 = vadd.xlane.f32.xlu0 %v387_v48  ;;  %v438_v48 = vsel %vm266_vm0, %v259_v41, 0.0  ;;  %v260_v51 = vmul.f32 %v196_v47, %v132_v46 }
  0xa4   :  { %v441_v58 = vsel %vm266_vm0, %v260_v51, 0.0 }
  0xa5   :  { %397 = vadd.xlane.f32.xlu1 %v396_v54  ;;  %v134_v54 = vld [vmem:[#allocation2 + $0x78] sm:$0x3] }
  0xa6   :  { %394 = vadd.xlane.f32.xlu0 %v393_v56  ;;  %v444_v56 = vsel %vm266_vm0, %v261_v49, 0.0  ;;  %v262_v59 = vmul.f32 %v198_v55, %v134_v54 }
  0xa8   :  { %v447_v3 = vsel %vm266_vm0, %v262_v59, 0.0 }
  0xa9   :  { %403 = vadd.xlane.f32.xlu1 %v402_v62  ;;  %v136_v62 = vld [vmem:[#allocation2 + $0x7c] sm:$0x3] }
  0xaa   :  { %400 = vadd.xlane.f32.xlu0 %v399_v0  ;;  %v450_v0 = vsel %vm266_vm0, %v263_v57, 0.0  ;;  %v264_v4 = vmul.f32 %v200_v63, %v136_v62 }
  0xac   :  { %v453_v6 = vsel %vm266_vm0, %v264_v4, 0.0 }
  0xad   :  { %409 = vadd.xlane.f32.xlu1 %v408_v7  ;;  %v587_v7 = vlaneseq }
  0xae   :  { %406 = vadd.xlane.f32.xlu0 %v405_v10 }
  0xaf   :  { %v7564_v8 = vshrl.u32 %v587_v7, 7  ;;  %v7576_v17 = vand.u32 127, %v587_v7 }
  0xb1   :  { %415 = vadd.xlane.f32.xlu1 %v414_v16  ;;  %11182 = vst [vmem:[#allocation18_spill] sm:$0xff] %v7564_v8  ;;  %v7567_v10 = vsub.s32 0, %v7564_v8  ;;  %11183 = vst [vmem:[#allocation19_spill] sm:$0xff] %v7576_v17 }
  0xb2   :  { %412 = vadd.xlane.f32.xlu0 %v411_v18 }
  0xb3   :  { %v2784_v11 = vrot.slane %v7494_v2, %v7567_v10  ;;  %v7573_v13 = vrot.slane %v7497_v9, %v7567_v10  ;;  %v7582_v2 = vsub.s32 %v7576_v17, %v7564_v8 }
  0xb5   :  { %421 = vadd.xlane.f32.xlu1 %v420_v24  ;;  %11184 = vst [vmem:[#allocation20_spill] sm:$0xff] %v7582_v2 }
  0xb6   :  { %418 = vadd.xlane.f32.xlu0 %v417_v26 }
  0xb9   :  { %427 = vadd.xlane.f32.xlu1 %v426_v32 }
  0xba   :  { %424 = vadd.xlane.f32.xlu0 %v423_v34 }
  0xbd   :  { %433 = vadd.xlane.f32.xlu1 %v432_v40 }
  0xbe   :  { %430 = vadd.xlane.f32.xlu0 %v429_v42 }
  0xc1   :  { %439 = vadd.xlane.f32.xlu1 %v438_v48 }
  0xc2   :  { %436 = vadd.xlane.f32.xlu0 %v435_v50 }
  0xc5   :  { %445 = vadd.xlane.f32.xlu1 %v444_v56 }
  0xc6   :  { %442 = vadd.xlane.f32.xlu0 %v441_v58 }
  0xc9   :  { %451 = vadd.xlane.f32.xlu1 %v450_v0 }
  0xca   :  { %448 = vadd.xlane.f32.xlu0 %v447_v3 }
  0xcd   :  { %457 = vadd.xlane.f32.xlu1 %v456_v5 }
  0xce   :  { %454 = vadd.xlane.f32.xlu0 %v453_v6 }
  0xde   :  { %v275_v12 = vpop.xlane.xlu1 %274  ;;  %2790 = vbcast.lane.b32.xlu1 %v2784_v11, 264 }
  0xdf   :  { %v269_v14 = vpop.xlane.xlu0 %268  ;;  %v7586_v9 = vmul.f32 0.25, %v275_v12 }
  0xe0   :  { %v7584_v21 = vmul.f32 0.25, %v269_v14 }
  0xe1   :  { %v600_v27 = vrot.slane %v7586_v9, %v7582_v2 }
  0xe2   :  { %v278_v15 = vpop.xlane.xlu1 %277  ;;  %2797 = vbcast.lane.b32.xlu1 %v7573_v13, 256  ;;  %v592_v25 = vrot.slane %v7584_v21, %v7582_v2 }
  0xe3   :  { %v272_v16 = vpop.xlane.xlu0 %271  ;;  %v7592_v26 = vmul.f32 0.25, %v278_v15 }
  0xe4   :  { %2786 = vbcast.lane.b32.xlu0 %v2784_v11, 256  ;;  %v7578_v19 = vmul.f32 0.25, %v272_v16 }
  0xe5   :  { %v604_v34 = vrot.slane %v7592_v26, %v7582_v2 }
  0xe6   :  { %v284_v18 = vpop.xlane.xlu1 %283  ;;  %v596_v23 = vrot.slane %v7578_v19, %v7582_v2 }
  0xe7   :  { %v281_v20 = vpop.xlane.xlu0 %280  ;;  %v7606_v37 = vmul.f32 0.25, %v284_v18 }
  0xe8   :  { %v846_v29 = vsel %vm845_vm1, %v596_v23, %v592_v25  ;;  %v7599_v32 = vmul.f32 0.25, %v281_v20 }
  0xe9   :  { %v848_v35 = vsel %vm847_vm2, %v600_v27, %v846_v29  ;;  %v612_v49 = vrot.slane %v7606_v37, %v7582_v2 }
  0xea   :  { %v290_v22 = vpop.xlane.xlu1 %289  ;;  %v608_v42 = vrot.slane %v7599_v32, %v7582_v2  ;;  %v850_v45 = vsel %vm849_vm3, %v604_v34, %v848_v35 }
  0xeb   :  { %v287_v24 = vpop.xlane.xlu0 %286  ;;  %v7621_v46 = vmul.f32 0.25, %v290_v22 }
  0xec   :  { %v7616_v43 = vmul.f32 0.25, %v287_v24  ;;  %v852_v57 = vsel %vm851_vm4, %v608_v42, %v850_v45 }
  0xed   :  { %v620_v58 = vrot.slane %v7621_v46, %v7582_v2  ;;  %v854_v0 = vsel %vm853_vm5, %v612_v49, %v852_v57 }
  0xee   :  { %v296_v28 = vpop.xlane.xlu1 %295  ;;  %v616_v54 = vrot.slane %v7616_v43, %v7582_v2 }
  0xef   :  { %v7597_v30 = vmul.f32 0.25, %v296_v28  ;;  %v293_v31 = vpop.xlane.xlu0 %292 }
  0xf0   :  { %v7601_v33 = vmul.f32 0.25, %v293_v31  ;;  %v856_v4 = vsel %vm855_vm6, %v616_v54, %v854_v0 }
  0xf1   :  { %v628_v38 = vrot.slane %v7597_v30, %v7582_v2  ;;  %v858_v15 = vsel %vm857_vm7, %v620_v58, %v856_v4 }
  0xf2   :  { %v302_v36 = vpop.xlane.xlu1 %301  ;;  %v624_v39 = vrot.slane %v7601_v33, %v7582_v2  ;;  %v917_v23 = vsel %vm916_vm8, %v858_v15, -inf }
  0xf3   :  { %v7612_v40 = vmul.f32 0.25, %v302_v36  ;;  %v299_v41 = vpop.xlane.xlu0 %298 }
  0xf4   :  { %v7618_v44 = vmul.f32 0.25, %v299_v41  ;;  %v859_v50 = vsel %vm845_vm1, %v628_v38, %v624_v39 }
  0xf5   :  { %v636_v51 = vrot.slane %v7612_v40, %v7582_v2 }
  0xf6   :  { %v632_v47 = vrot.slane %v7618_v44, %v7582_v2  ;;  %v308_v48 = vpop.xlane.xlu1 %307 }
  0xf7   :  { %v7630_v52 = vmul.f32 0.25, %v308_v48  ;;  %v305_v53 = vpop.xlane.xlu0 %304 }
  0xf8   :  { %v860_v55 = vsel %vm847_vm2, %v632_v47, %v859_v50  ;;  %v7635_v56 = vmul.f32 0.25, %v305_v53 }
  0xf9   :  { %v644_v61 = vrot.slane %v7630_v52, %v7582_v2  ;;  %v861_v1 = vsel %vm849_vm3, %v636_v51, %v860_v55 }
  0xfa   :  { %v640_v59 = vrot.slane %v7635_v56, %v7582_v2  ;;  %v314_v60 = vpop.xlane.xlu1 %313 }
  0xfb   :  { %v7644_v62 = vmul.f32 0.25, %v314_v60  ;;  %v311_v63 = vpop.xlane.xlu0 %310 }
  0xfc   :  { %v7648_v3 = vmul.f32 0.25, %v311_v63  ;;  %v862_v5 = vsel %vm851_vm4, %v640_v59, %v861_v1 }
  0xfd   :  { %v652_v6 = vrot.slane %v7644_v62, %v7582_v2  ;;  %v863_v16 = vsel %vm853_vm5, %v644_v61, %v862_v5 }
  0xfe   :  { %v648_v7 = vrot.slane %v7648_v3, %v7582_v2  ;;  %v320_v11 = vpop.xlane.xlu1 %319 }
  0xff   :  { %v7656_v12 = vmul.f32 0.25, %v320_v11  ;;  %v317_v14 = vpop.xlane.xlu0 %316 }
 0x100   :  { %v7660_v18 = vmul.f32 0.25, %v317_v14  ;;  %v864_v20 = vsel %vm855_vm6, %v648_v7, %v863_v16 }
 0x101   :  { %v865_v24 = vsel %vm857_vm7, %v652_v6, %v864_v20  ;;  %v660_v25 = vrot.slane %v7656_v12, %v7582_v2 }
 0x102   :  { %v326_v22 = vpop.xlane.xlu1 %325  ;;  %v656_v27 = vrot.slane %v7660_v18, %v7582_v2  ;;  %v920_v34 = vsel %vm916_vm8, %v865_v24, -inf }
 0x103   :  { %v7669_v28 = vmul.f32 0.25, %v326_v22  ;;  %918 = vmax.xlane.f32.xlu0 %v917_v23  ;;  %v323_v29 = vpop.xlane.xlu0 %322 }
 0x104   :  { %v7671_v31 = vmul.f32 0.25, %v323_v29  ;;  %v866_v38 = vsel %vm845_vm1, %v660_v25, %v656_v27 }
 0x105   :  { %v668_v39 = vrot.slane %v7669_v28, %v7582_v2 }
 0x106   :  { %v664_v35 = vrot.slane %v7671_v31, %v7582_v2  ;;  %v332_v36 = vpop.xlane.xlu1 %331  ;;  %921 = vmax.xlane.f32.xlu1 %v920_v34 }
 0x107   :  { %v7679_v41 = vmul.f32 0.25, %v332_v36  ;;  %v329_v42 = vpop.xlane.xlu0 %328 }
 0x108   :  { %v867_v45 = vsel %vm847_vm2, %v664_v35, %v866_v38  ;;  %v7682_v47 = vmul.f32 0.25, %v329_v42 }
 0x109   :  { %v676_v50 = vrot.slane %v7679_v41, %v7582_v2  ;;  %v868_v54 = vsel %vm849_vm3, %v668_v39, %v867_v45 }
 0x10a   :  { %v672_v48 = vrot.slane %v7682_v47, %v7582_v2  ;;  %v338_v49 = vpop.xlane.xlu1 %337 }
 0x10b   :  { %v7688_v51 = vmul.f32 0.25, %v338_v49  ;;  %v335_v53 = vpop.xlane.xlu0 %334 }
 0x10c   :  { %v7691_v55 = vmul.f32 0.25, %v335_v53  ;;  %v869_v57 = vsel %vm851_vm4, %v672_v48, %v868_v54 }
 0x10d   :  { %v684_v58 = vrot.slane %v7688_v51, %v7582_v2  ;;  %v870_v0 = vsel %vm853_vm5, %v676_v50, %v869_v57 }
 0x10e   :  { %v680_v59 = vrot.slane %v7691_v55, %v7582_v2  ;;  %v344_v60 = vpop.xlane.xlu1 %343 }
 0x10f   :  { %v7698_v61 = vmul.f32 0.25, %v344_v60  ;;  %v341_v63 = vpop.xlane.xlu0 %340 }
 0x110   :  { %v7701_v1 = vmul.f32 0.25, %v341_v63  ;;  %v871_v4 = vsel %vm855_vm6, %v680_v59, %v870_v0 }
 0x111   :  { %v872_v5 = vsel %vm857_vm7, %v684_v58, %v871_v4  ;;  %v692_v11 = vrot.slane %v7698_v61, %v7582_v2 }
 0x112   :  { %v350_v6 = vpop.xlane.xlu1 %349  ;;  %v923_v7 = vsel %vm916_vm8, %v872_v5, -inf  ;;  %v688_v14 = vrot.slane %v7701_v1, %v7582_v2 }
 0x113   :  { %v7710_v15 = vmul.f32 0.25, %v350_v6  ;;  %924 = vmax.xlane.f32.xlu0 %v923_v7  ;;  %v347_v16 = vpop.xlane.xlu0 %346 }
 0x114   :  { %v7712_v20 = vmul.f32 0.25, %v347_v16  ;;  %v873_v24 = vsel %vm845_vm1, %v692_v11, %v688_v14 }
 0x115   :  { %v700_v25 = vrot.slane %v7710_v15, %v7582_v2 }
 0x116   :  { %v696_v22 = vrot.slane %v7712_v20, %v7582_v2  ;;  %v356_v23 = vpop.xlane.xlu1 %355 }
 0x117   :  { %v7719_v27 = vmul.f32 0.25, %v356_v23  ;;  %v353_v29 = vpop.xlane.xlu0 %352  ;;  %v7403_v23 = vmov 0  }
 0x118   :  { %v874_v34 = vsel %vm847_vm2, %v696_v22, %v873_v24  ;;  %v7722_v35 = vmul.f32 0.25, %v353_v29  ;;  %7043 = vset.pattern.permute.xlu1 %v7403_v23  ;;  %7042 = vset.pattern.permute.xlu0 %v7403_v23 }
 0x119   :  { %v708_v39 = vrot.slane %v7719_v27, %v7582_v2  ;;  %v875_v48 = vsel %vm849_vm3, %v700_v25, %v874_v34 }
 0x11a   :  { %v704_v36 = vrot.slane %v7722_v35, %v7582_v2  ;;  %v362_v38 = vpop.xlane.xlu1 %361 }
 0x11b   :  { %v7728_v42 = vmul.f32 0.25, %v362_v38  ;;  %v359_v45 = vpop.xlane.xlu0 %358 }
 0x11c   :  { %v7731_v49 = vmul.f32 0.25, %v359_v45  ;;  %v876_v50 = vsel %vm851_vm4, %v704_v36, %v875_v48 }
 0x11d   :  { %v716_v53 = vrot.slane %v7728_v42, %v7582_v2  ;;  %v877_v60 = vsel %vm853_vm5, %v708_v39, %v876_v50 }
 0x11e   :  { %v712_v54 = vrot.slane %v7731_v49, %v7582_v2  ;;  %v368_v57 = vpop.xlane.xlu1 %367 }
 0x11f   :  { %v7738_v58 = vmul.f32 0.25, %v368_v57  ;;  %v365_v59 = vpop.xlane.xlu0 %364 }
 0x120   :  { %v7741_v63 = vmul.f32 0.25, %v365_v59  ;;  %v878_v0 = vsel %vm855_vm6, %v712_v54, %v877_v60 }
 0x121   :  { %v879_v4 = vsel %vm857_vm7, %v716_v53, %v878_v0  ;;  %v724_v7 = vrot.slane %v7738_v58, %v7582_v2 }
 0x122   :  { %v374_v5 = vpop.xlane.xlu1 %373  ;;  %v926_v6 = vsel %vm916_vm8, %v879_v4, -inf  ;;  %v720_v11 = vrot.slane %v7741_v63, %v7582_v2 }
 0x123   :  { %v7750_v14 = vmul.f32 0.25, %v374_v5  ;;  %927 = vmax.xlane.f32.xlu1 %v926_v6  ;;  %v371_v16 = vpop.xlane.xlu0 %370 }
 0x124   :  { %v7752_v22 = vmul.f32 0.25, %v371_v16  ;;  %v880_v29 = vsel %vm845_vm1, %v724_v7, %v720_v11 }
 0x125   :  { %v732_v34 = vrot.slane %v7750_v14, %v7582_v2 }
 0x126   :  { %v728_v24 = vrot.slane %v7752_v22, %v7582_v2  ;;  %v380_v25 = vpop.xlane.xlu1 %379 }
 0x127   :  { %v7759_v36 = vmul.f32 0.25, %v380_v25  ;;  %v377_v38 = vpop.xlane.xlu0 %376 }
 0x128   :  { %v881_v39 = vsel %vm847_vm2, %v728_v24, %v880_v29  ;;  %v7762_v45 = vmul.f32 0.25, %v377_v38 }
 0x129   :  { %v740_v53 = vrot.slane %v7759_v36, %v7582_v2  ;;  %v882_v59 = vsel %vm849_vm3, %v732_v34, %v881_v39 }
 0x12a   :  { %v736_v48 = vrot.slane %v7762_v45, %v7582_v2  ;;  %v386_v50 = vpop.xlane.xlu1 %385 }
 0x12b   :  { %v7768_v54 = vmul.f32 0.25, %v386_v50  ;;  %v383_v57 = vpop.xlane.xlu0 %382 }
 0x12c   :  { %v7771_v60 = vmul.f32 0.25, %v383_v57  ;;  %v883_v0 = vsel %vm851_vm4, %v736_v48, %v882_v59 }
 0x12d   :  { %v748_v4 = vrot.slane %v7768_v54, %v7582_v2  ;;  %v884_v16 = vsel %vm853_vm5, %v740_v53, %v883_v0 }
 0x12e   :  { %11185 = vst [vmem:[#allocation21_spill] sm:$0xff] %v7771_v60  ;;  %v744_v5 = vrot.slane %v7771_v60, %v7582_v2  ;;  %v392_v6 = vpop.xlane.xlu1 %391 }
 0x12f   :  { %v7778_v7 = vmul.f32 0.25, %v392_v6  ;;  %v389_v11 = vpop.xlane.xlu0 %388 }
 0x130   :  { %v7781_v23 = vmul.f32 0.25, %v389_v11  ;;  %v885_v24 = vsel %vm855_vm6, %v744_v5, %v884_v16 }
 0x131   :  { %v886_v25 = vsel %vm857_vm7, %v748_v4, %v885_v24  ;;  %v756_v38 = vrot.slane %v7778_v7, %v7582_v2 }
 0x132   :  { %11186 = vst [vmem:[#allocation22_spill] sm:$0xff] %v7781_v23  ;;  %v398_v29 = vpop.xlane.xlu1 %397  ;;  %v929_v34 = vsel %vm916_vm8, %v886_v25, -inf  ;;  %v752_v39 = vrot.slane %v7781_v23, %v7582_v2 }
 0x133   :  { %v7790_v48 = vmul.f32 0.25, %v398_v29  ;;  %930 = vmax.xlane.f32.xlu0 %v929_v34  ;;  %v395_v50 = vpop.xlane.xlu0 %394 }
 0x134   :  { %v7792_v53 = vmul.f32 0.25, %v395_v50  ;;  %v887_v0 = vsel %vm845_vm1, %v756_v38, %v752_v39 }
 0x135   :  { %v764_v4 = vrot.slane %v7790_v48, %v7582_v2 }
 0x136   :  { %11187 = vst [vmem:[#allocation23_spill] sm:$0xff] %v7792_v53  ;;  %v760_v57 = vrot.slane %v7792_v53, %v7582_v2  ;;  %v404_v59 = vpop.xlane.xlu1 %403 }
 0x137   :  { %v7799_v5 = vmul.f32 0.25, %v404_v59  ;;  %v401_v6 = vpop.xlane.xlu0 %400 }
 0x138   :  { %v888_v11 = vsel %vm847_vm2, %v760_v57, %v887_v0  ;;  %v7802_v16 = vmul.f32 0.25, %v401_v6 }
 0x139   :  { %v772_v29 = vrot.slane %v7799_v5, %v7582_v2  ;;  %v889_v39 = vsel %vm849_vm3, %v764_v4, %v888_v11 }
 0x13a   :  { %11188 = vst [vmem:[#allocation24_spill] sm:$0xff] %v7802_v16  ;;  %v768_v24 = vrot.slane %v7802_v16, %v7582_v2  ;;  %v410_v25 = vpop.xlane.xlu1 %409 }
 0x13b   :  { %v7808_v34 = vmul.f32 0.25, %v410_v25  ;;  %v407_v38 = vpop.xlane.xlu0 %406 }
 0x13c   :  { %v7811_v50 = vmul.f32 0.25, %v407_v38  ;;  %v890_v59 = vsel %vm851_vm4, %v768_v24, %v889_v39 }
 0x13d   :  { %v780_v57 = vrot.slane %v7808_v34, %v7582_v2  ;;  %v891_v25 = vsel %vm853_vm5, %v772_v29, %v890_v59 }
 0x13e   :  { %11189 = vst [vmem:[#allocation25_spill] sm:$0xff] %v7811_v50  ;;  %v776_v0 = vrot.slane %v7811_v50, %v7582_v2  ;;  %v416_v6 = vpop.xlane.xlu1 %415 }
 0x13f   :  { %v7818_v17 = vmul.f32 0.25, %v416_v6  ;;  %v413_v16 = vpop.xlane.xlu0 %412 }
 0x140   :  { %v7821_v53 = vmul.f32 0.25, %v413_v16  ;;  %v892_v4 = vsel %vm855_vm6, %v776_v0, %v891_v25 }
 0x141   :  { %v893_v11 = vsel %vm857_vm7, %v780_v57, %v892_v4  ;;  %v788_v39 = vrot.slane %v7818_v17, %v7582_v2 }
 0x142   :  { %11190 = vst [vmem:[#allocation26_spill] sm:$0xff] %v7821_v53  ;;  %v422_v38 = vpop.xlane.xlu1 %421  ;;  %v932_v24 = vsel %vm916_vm8, %v893_v11, -inf  ;;  %v784_v50 = vrot.slane %v7821_v53, %v7582_v2 }
 0x143   :  { %v7830_v6 = vmul.f32 0.25, %v422_v38  ;;  %933 = vmax.xlane.f32.xlu1 %v932_v24  ;;  %v419_v23 = vpop.xlane.xlu0 %418 }
 0x144   :  { %v7832_v29 = vmul.f32 0.25, %v419_v23  ;;  %v894_v57 = vsel %vm845_vm1, %v788_v39, %v784_v50 }
 0x145   :  { %11191 = vst [vmem:[#allocation27_spill] sm:$0xff] %v7830_v6  ;;  %v796_v0 = vrot.slane %v7830_v6, %v7582_v2 }
 0x146   :  { %11192 = vst [vmem:[#allocation28_spill] sm:$0xff] %v7832_v29  ;;  %v792_v16 = vrot.slane %v7832_v29, %v7582_v2  ;;  %v428_v59 = vpop.xlane.xlu1 %427 }
 0x147   :  { %v7839_v25 = vmul.f32 0.25, %v428_v59  ;;  %v425_v4 = vpop.xlane.xlu0 %424 }
 0x148   :  { %v895_v11 = vsel %vm847_vm2, %v792_v16, %v894_v57  ;;  %v7842_v38 = vmul.f32 0.25, %v425_v4 }
 0x149   :  { %11193 = vst [vmem:[#allocation29_spill] sm:$0xff] %v7839_v25  ;;  %v804_v29 = vrot.slane %v7839_v25, %v7582_v2  ;;  %v896_v39 = vsel %vm849_vm3, %v796_v0, %v895_v11  ;;  %v7188_v25 = vld [vmem:[#allocation2 + $0x4] sm:$0x3] }
 0x14a   :  { %11194 = vst [vmem:[#allocation30_spill] sm:$0xff] %v7842_v38  ;;  %v800_v23 = vrot.slane %v7842_v38, %v7582_v2  ;;  %v434_v24 = vpop.xlane.xlu1 %433 }
 0x14b   :  { %v7848_v53 = vmul.f32 0.25, %v434_v24  ;;  %v431_v50 = vpop.xlane.xlu0 %430  ;;  %v7861_v24 = vrot.slane %v7188_v25, %v7567_v10 }
 0x14c   :  { %v7851_v6 = vmul.f32 0.25, %v431_v50  ;;  %v897_v59 = vsel %vm851_vm4, %v800_v23, %v896_v39 }
 0x14d   :  { %11195 = vst [vmem:[#allocation31_spill] sm:$0xff] %v7848_v53  ;;  %v812_v16 = vrot.slane %v7848_v53, %v7582_v2  ;;  %v898_v4 = vsel %vm853_vm5, %v804_v29, %v897_v59  ;;  %11197 = vst [vmem:[#allocation33_spill] sm:$0xff] %v7861_v24 }
 0x14e   :  { %11196 = vst [vmem:[#allocation32_spill] sm:$0xff] %v7851_v6  ;;  %v808_v57 = vrot.slane %v7851_v6, %v7582_v2  ;;  %v440_v50 = vpop.xlane.xlu1 %439 }
 0x14f   :  { %v437_v23 = vpop.xlane.xlu0 %436  ;;  %v7866_v6 = vmul.f32 0.25, %v440_v50 }
 0x150   :  { %v899_v38 = vsel %vm855_vm6, %v808_v57, %v898_v4  ;;  %v7868_v29 = vmul.f32 0.25, %v437_v23 }
 0x151   :  { %v900_v0 = vsel %vm857_vm7, %v812_v16, %v899_v38  ;;  %11198 = vst [vmem:[#allocation34_spill] sm:$0xff] %v7866_v6  ;;  %v820_v38 = vrot.slane %v7866_v6, %v7582_v2 }
 0x152   :  { %v935_v11 = vsel %vm916_vm8, %v900_v0, -inf  ;;  %v446_v53 = vpop.xlane.xlu1 %445  ;;  %11199 = vst [vmem:[#allocation35_spill] sm:$0xff] %v7868_v29  ;;  %v816_v16 = vrot.slane %v7868_v29, %v7582_v2 }
 0x153   :  { %936 = vmax.xlane.f32.xlu0 %v935_v11  ;;  %v443_v39 = vpop.xlane.xlu0 %442  ;;  %v7876_v4 = vmul.f32 0.25, %v446_v53 }
 0x154   :  { %2808 = vbcast.lane.b32.xlu1 %v7861_v24, 256  ;;  %v7870_v57 = vmul.f32 0.25, %v443_v39  ;;  %v901_v23 = vsel %vm845_vm1, %v820_v38, %v816_v16 }
 0x155   :  { %11201 = vst [vmem:[#allocation37_spill] sm:$0xff] %v7876_v4  ;;  %v828_v39 = vrot.slane %v7876_v4, %v7582_v2 }
 0x156   :  { %11200 = vst [vmem:[#allocation36_spill] sm:$0xff] %v7870_v57  ;;  %v452_v25 = vpop.xlane.xlu1 %451  ;;  %v824_v0 = vrot.slane %v7870_v57, %v7582_v2 }
 0x157   :  { %v449_v59 = vpop.xlane.xlu0 %448  ;;  %v7885_v24 = vmul.f32 0.25, %v452_v25 }
 0x158   :  { %v7880_v11 = vmul.f32 0.25, %v449_v59  ;;  %v902_v6 = vsel %vm847_vm2, %v824_v0, %v901_v23 }
 0x159   :  { %11203 = vst [vmem:[#allocation39_spill] sm:$0xff] %v7885_v24  ;;  %v903_v59 = vsel %vm849_vm3, %v828_v39, %v902_v6  ;;  %v836_v38 = vrot.slane %v7885_v24, %v7582_v2 }
 0x15a   :  { %11202 = vst [vmem:[#allocation38_spill] sm:$0xff] %v7880_v11  ;;  %v832_v29 = vrot.slane %v7880_v11, %v7582_v2  ;;  %v458_v60 = vpop.xlane.xlu1 %457 }
 0x15b   :  { %v455_v50 = vpop.xlane.xlu0 %454  ;;  %v7896_v16 = vmul.f32 0.25, %v458_v60 }
 0x15c   :  { %v7890_v53 = vmul.f32 0.25, %v455_v50  ;;  %v904_v0 = vsel %vm851_vm4, %v832_v29, %v903_v59  ;;  %v7915_v29 = vsub.s32 2, %v7564_v8 }
 0x15d   :  { %11205 = vst [vmem:[#allocation41_spill] sm:$0xff] %v7896_v16  ;;  %v844_v23 = vrot.slane %v7896_v16, %v7582_v2  ;;  %v905_v50 = vsel %vm853_vm5, %v836_v38, %v904_v0  ;;  %v7920_v38 = vsub.s32 3, %v7564_v8 }
 0x15e   :  { %11204 = vst [vmem:[#allocation40_spill] sm:$0xff] %v7890_v53  ;;  %v840_v25 = vrot.slane %v7890_v53, %v7582_v2  ;;  %v7907_v39 = vpop.permute.xlu1 %2790  ;;  %v7912_v53 = vsub.s32 1, %v7564_v8  ;;  %11209 = vst [vmem:[#allocation45_spill] sm:$0xff] %v7915_v29 }
 0x15f   :  { %11206 = vst [vmem:[#allocation42_spill] sm:$0xff] %v7907_v39  ;;  %v7909_v60 = vpop.permute.xlu0 %2786  ;;  %11211 = vst [vmem:[#allocation47_spill] sm:$0xff] %v7920_v38 }
 0x160   :  { %v906_v11 = vsel %vm855_vm6, %v840_v25, %v905_v50  ;;  %11207 = vst [vmem:[#allocation43_spill] sm:$0xff] %v7909_v60  ;;  %11208 = vst [vmem:[#allocation44_spill] sm:$0xff] %v7912_v53  ;;  %v7936_v60 = vsub.s32 4, %v7564_v8 }
 0x162   :  { %v7917_v59 = vpop.permute.xlu1 %2797  ;;  %11212 = vst [vmem:[#allocation48_spill] sm:$0xff] %v7936_v60 }
 0x163   :  { %11210 = vst [vmem:[#allocation46_spill] sm:$0xff] %v7917_v59 }
 0x169   :  { %2801 = vbcast.lane.b32.xlu0 %v7573_v13, 264  ;;  %v907_v13 = vsel %vm857_vm7, %v844_v23, %v906_v11 }
 0x16a   :  { %v938_v6 = vsel %vm916_vm8, %v907_v13, -inf }
 0x178   :  { %939 = vmax.xlane.f32.xlu1 %v938_v6 }
 0x190   :  { %v7922_v25 = vpop.xlane.xlu0 %918 }
 0x191   :  { %v952_v11 = vrot.slane %v7922_v25, %v7567_v10  ;;  %v956_v0 = vrot.slane %v7922_v25, %v7912_v53  ;;  %v960_v23 = vrot.slane %v7922_v25, %v7915_v29  ;;  %v964_v39 = vrot.slane %v7922_v25, %v7920_v38 }
 0x193   :  { %v7930_v50 = vpop.xlane.xlu1 %921  ;;  %v1270_v13 = vsub.f32 %v7578_v19, %v956_v0  ;;  %v1269_v6 = vsub.f32 %v7584_v21, %v952_v11  ;;  %v1271_v59 = vsub.f32 %v7586_v9, %v960_v23  ;;  %v7946_v21 = vsub.s32 5, %v7564_v8 }
 0x194   :  { %v988_v2 = vrot.slane %v7930_v50, %v7912_v53  ;;  %v996_v16 = vrot.slane %v7930_v50, %v7920_v38  ;;  %v968_v11 = vrot.slane %v7922_v25, %v7936_v60  ;;  %v1272_v23 = vsub.f32 %v7592_v26, %v964_v39 }
 0x195   :  { %v1335_v57 = vmul.f32 1.442695, %v1270_v13  ;;  %v1333_v24 = vmul.f32 1.442695, %v1269_v6  ;;  %11213 = vst [vmem:[#allocation49_spill] sm:$0xff] %v7946_v21  ;;  %v1004_v4 = vrot.slane %v7930_v50, %v7946_v21  ;;  %v7955_v6 = vsub.s32 6, %v7564_v8 }
 0x196   :  { %v1278_v19 = vsub.f32 %v7597_v30, %v988_v2  ;;  %v1337_v9 = vmul.f32 1.442695, %v1271_v59  ;;  %v1280_v13 = vsub.f32 %v7612_v40, %v996_v16  ;;  %v7958_v2 = vsub.s32 7, %v7564_v8 }
 0x197   :  { %7044 = vpow2.f32 %v1335_v57  ;;  %11214 = vst [vmem:[#allocation50_spill] sm:$0xff] %v7955_v6  ;;  %v972_v30 = vrot.slane %v7922_v25, %v7946_v21  ;;  %v1339_v57 = vmul.f32 1.442695, %v1272_v23  ;;  %v1273_v26 = vsub.f32 %v7599_v32, %v968_v11 }
 0x198   :  { %v1351_v0 = vmul.f32 1.442695, %v1278_v19  ;;  %7046 = vpow2.f32 %v1333_v24  ;;  %11215 = vst [vmem:[#allocation51_spill] sm:$0xff] %v7958_v2  ;;  %v1012_v39 = vrot.slane %v7930_v50, %v7958_v2  ;;  %v1355_v24 = vmul.f32 1.442695, %v1280_v13 }
 0x199   :  { %7048 = vpow2.f32 %v1337_v9  ;;  %v1282_v40 = vsub.f32 %v7630_v52, %v1004_v4  ;;  %v976_v16 = vrot.slane %v7922_v25, %v7955_v6  ;;  %v1341_v19 = vmul.f32 1.442695, %v1273_v26 }
 0x19a   :  { %7050 = vpow2.f32 %v1351_v0  ;;  %v1274_v9 = vsub.f32 %v7606_v37, %v972_v30  ;;  %v1284_v11 = vsub.f32 %v7644_v62, %v1012_v39  ;;  %v980_v52 = vrot.slane %v7922_v25, %v7958_v2 }
 0x19b   :  { %7052 = vpow2.f32 %v1339_v57  ;;  %v1359_v32 = vmul.f32 1.442695, %v1282_v40  ;;  %v1275_v4 = vsub.f32 %v7616_v43, %v976_v16  ;;  %v984_v25 = vrot.slane %v7930_v50, %v7567_v10 }
 0x19c   :  { %7054 = vpow2.f32 %v1355_v24  ;;  %v1343_v37 = vmul.f32 1.442695, %v1274_v9  ;;  %v1363_v57 = vmul.f32 1.442695, %v1284_v11  ;;  %v1276_v24 = vsub.f32 %v7621_v46, %v980_v52 }
 0x19d   :  { %7056 = vpow2.f32 %v1341_v19  ;;  %v1345_v43 = vmul.f32 1.442695, %v1275_v4 }
 0x19e   :  { %7058 = vpow2.f32 %v1359_v32  ;;  %v1347_v46 = vmul.f32 1.442695, %v1276_v24  ;;  %v1277_v32 = vsub.f32 %v7601_v33, %v984_v25 }
 0x19f   :  { %7060 = vpow2.f32 %v1343_v37 }
 0x1a0   :  { %v7968_v59 = vpop.xlane.xlu0 %924  ;;  %7062 = vpow2.f32 %v1363_v57  ;;  %v1349_v33 = vmul.f32 1.442695, %v1277_v32 }
 0x1a1   :  { %v1020_v0 = vrot.slane %v7968_v59, %v7912_v53  ;;  %v7974_v23 = vpop.eup %7044  ;;  %v1028_v62 = vrot.slane %v7968_v59, %v7920_v38  ;;  %v1036_v40 = vrot.slane %v7968_v59, %v7946_v21  ;;  %7064 = vpow2.f32 %v1345_v43 }
 0x1a2   :  { %11216 = vst [vmem:[#allocation52_spill] sm:$0xff] %v7974_v23  ;;  %v7976_v13 = vpop.eup %7046  ;;  %1529 = vperm.xlu1 %7043, %v7974_v23   ;;  %v1044_v11 = vrot.slane %v7968_v59, %v7958_v2 }
 0x1a3   :  { %11217 = vst [vmem:[#allocation53_spill] sm:$0xff] %v7976_v13  ;;  %1526 = vperm.xlu0 %7042, %v7976_v13   ;;  %v7983_v30 = vpop.eup %7048  ;;  %v1286_v26 = vsub.f32 %v7656_v12, %v1020_v0  ;;  %v1288_v12 = vsub.f32 %v7669_v28, %v1028_v62  ;;  %v992_v0 = vrot.slane %v7930_v50, %v7915_v29 }
 0x1a4   :  { %11218 = vst [vmem:[#allocation54_spill] sm:$0xff] %v7983_v30  ;;  %v7988_v39 = vpop.eup %7050  ;;  %v1290_v52 = vsub.f32 %v7679_v41, %v1036_v40  ;;  %v1000_v62 = vrot.slane %v7930_v50, %v7936_v60  ;;  %v1292_v43 = vsub.f32 %v7688_v51, %v1044_v11 }
 0x1a5   :  { %11219 = vst [vmem:[#allocation55_spill] sm:$0xff] %v7988_v39  ;;  %v1367_v16 = vmul.f32 1.442695, %v1286_v26  ;;  %v7998_v19 = vpop.eup %7052  ;;  %v1371_v28 = vmul.f32 1.442695, %v1288_v12  ;;  %v1279_v26 = vsub.f32 %v7618_v44, %v992_v0 }
 0x1a6   :  { %1532 = vperm.xlu1 %7043, %v7983_v30   ;;  %11220 = vst [vmem:[#allocation56_spill] sm:$0xff] %v7998_v19  ;;  %v8000_v9 = vpop.eup %7054  ;;  %v1375_v25 = vmul.f32 1.442695, %v1290_v52  ;;  %v1281_v12 = vsub.f32 %v7635_v56, %v1000_v62  ;;  %v1379_v51 = vmul.f32 1.442695, %v1292_v43 }
 0x1a7   :  { %1553 = vperm.xlu0 %7042, %v7988_v39   ;;  %11221 = vst [vmem:[#allocation57_spill] sm:$0xff] %v8000_v9  ;;  %7066 = vpow2.f32 %v1367_v16  ;;  %v8010_v37 = vpop.eup %7056  ;;  %v1008_v16 = vrot.slane %v7930_v50, %v7955_v6  ;;  %v1353_v44 = vmul.f32 1.442695, %v1279_v26 }
 0x1a8   :  { %11222 = vst [vmem:[#allocation58_spill] sm:$0xff] %v8010_v37  ;;  %v8012_v4 = vpop.eup %7058  ;;  %7068 = vpow2.f32 %v1347_v46  ;;  %v1357_v56 = vmul.f32 1.442695, %v1281_v12 }
 0x1a9   :  { %11223 = vst [vmem:[#allocation59_spill] sm:$0xff] %v8012_v4  ;;  %7070 = vpow2.f32 %v1371_v28  ;;  %v8024_v24 = vpop.eup %7060  ;;  %v1283_v50 = vsub.f32 %v7648_v3, %v1008_v16  ;;  %v1016_v28 = vrot.slane %v7968_v59, %v7567_v10 }
 0x1aa   :  { %1535 = vperm.xlu1 %7043, %v7998_v19   ;;  %11224 = vst [vmem:[#allocation60_spill] sm:$0xff] %v8024_v24  ;;  %v8026_v40 = vpop.eup %7062  ;;  %7072 = vpow2.f32 %v1349_v33 }
 0x1ab   :  { %1559 = vperm.xlu0 %7042, %v8000_v9   ;;  %11225 = vst [vmem:[#allocation61_spill] sm:$0xff] %v8026_v40  ;;  %7074 = vpow2.f32 %v1375_v25  ;;  %v8036_v32 = vpop.eup %7064  ;;  %v1361_v3 = vmul.f32 1.442695, %v1283_v50  ;;  %v1285_v25 = vsub.f32 %v7660_v18, %v1016_v28  ;;  %v1032_v18 = vrot.slane %v7968_v59, %v7936_v60 }
 0x1ac   :  { %11226 = vst [vmem:[#allocation62_spill] sm:$0xff] %v8036_v32  ;;  %7076 = vpow2.f32 %v1353_v44 }
 0x1ad   :  { %7078 = vpow2.f32 %v1379_v51  ;;  %v1365_v51 = vmul.f32 1.442695, %v1285_v25 }
 0x1ae   :  { %1538 = vperm.xlu1 %7043, %v8010_v37   ;;  %7080 = vpow2.f32 %v1357_v56 }
 0x1af   :  { %1565 = vperm.xlu0 %7042, %v8012_v4   ;;  %v8425_v4 = vld [vmem:[#allocation2 + $0x1c] sm:$0x3] }
 0x1b0   :  { %v8018_v57 = vpop.xlane.xlu1 %927  ;;  %11314 = vst [vmem:[#allocation108_spill] sm:$0xff] %v8425_v4 }
 0x1b1   :  { %v1052_v41 = vrot.slane %v8018_v57, %v7912_v53  ;;  %v1060_v0 = vrot.slane %v8018_v57, %v7920_v38  ;;  %v8038_v11 = vpop.eup %7066  ;;  %v1068_v52 = vrot.slane %v8018_v57, %v7946_v21  ;;  %v1076_v43 = vrot.slane %v8018_v57, %v7958_v2 }
 0x1b2   :  { %1541 = vperm.xlu1 %7043, %v8024_v24   ;;  %11227 = vst [vmem:[#allocation63_spill] sm:$0xff] %v8038_v11  ;;  %v8048_v33 = vpop.eup %7068 }
 0x1b3   :  { %1571 = vperm.xlu0 %7042, %v8026_v40   ;;  %v1294_v46 = vsub.f32 %v7698_v61, %v1052_v41  ;;  %v1296_v62 = vsub.f32 %v7710_v15, %v1060_v0  ;;  %11228 = vst [vmem:[#allocation64_spill] sm:$0xff] %v8048_v33  ;;  %v8050_v26 = vpop.eup %7070  ;;  %v1024_v41 = vrot.slane %v7968_v59, %v7915_v29 }
 0x1b4   :  { %11229 = vst [vmem:[#allocation65_spill] sm:$0xff] %v8050_v26  ;;  %v1298_v15 = vsub.f32 %v7719_v27, %v1068_v52  ;;  %v8060_v44 = vpop.eup %7072  ;;  %v1300_v27 = vsub.f32 %v7728_v42, %v1076_v43 }
 0x1b5   :  { %v1383_v61 = vmul.f32 1.442695, %v1294_v46  ;;  %v1387_v16 = vmul.f32 1.442695, %v1296_v62  ;;  %11230 = vst [vmem:[#allocation66_spill] sm:$0xff] %v8060_v44  ;;  %v8062_v12 = vpop.eup %7074  ;;  %v1287_v0 = vsub.f32 %v7671_v31, %v1024_v41  ;;  %v1040_v31 = vrot.slane %v7968_v59, %v7955_v6 }
 0x1b6   :  { %1544 = vperm.xlu1 %7043, %v8036_v32   ;;  %11231 = vst [vmem:[#allocation67_spill] sm:$0xff] %v8062_v12  ;;  %v1391_v50 = vmul.f32 1.442695, %v1298_v15  ;;  %v8074_v56 = vpop.eup %7076  ;;  %v1395_v42 = vmul.f32 1.442695, %v1300_v27  ;;  %v1048_v15 = vrot.slane %v8018_v57, %v7567_v10  ;;  %v1056_v27 = vrot.slane %v8018_v57, %v7915_v29 }
 0x1b7   :  { %1577 = vperm.xlu0 %7042, %v8038_v11   ;;  %7082 = vpow2.f32 %v1383_v61  ;;  %11232 = vst [vmem:[#allocation68_spill] sm:$0xff] %v8074_v56  ;;  %v8076_v52 = vpop.eup %7078  ;;  %v1289_v61 = vsub.f32 %v7682_v47, %v1032_v18  ;;  %v1369_v62 = vmul.f32 1.442695, %v1287_v0  ;;  %v1291_v59 = vsub.f32 %v7691_v55, %v1040_v31 }
 0x1b8   :  { %7084 = vpow2.f32 %v1361_v3  ;;  %11233 = vst [vmem:[#allocation69_spill] sm:$0xff] %v8076_v52  ;;  %v8086_v25 = vpop.eup %7080 }
 0x1b9   :  { %7086 = vpow2.f32 %v1387_v16  ;;  %11234 = vst [vmem:[#allocation70_spill] sm:$0xff] %v8086_v25  ;;  %v1373_v47 = vmul.f32 1.442695, %v1289_v61  ;;  %v1377_v55 = vmul.f32 1.442695, %v1291_v59 }
 0x1ba   :  { %1547 = vperm.xlu1 %7043, %v8048_v33   ;;  %7088 = vpow2.f32 %v1365_v51  ;;  %v8441_v33 = vld [vmem:[#allocation2 + $0x20] sm:$0x3] }
 0x1bb   :  { %1583 = vperm.xlu0 %7042, %v8050_v26   ;;  %7090 = vpow2.f32 %v1391_v50  ;;  %v1293_v50 = vsub.f32 %v7701_v1, %v1048_v15  ;;  %v1295_v1 = vsub.f32 %v7712_v20, %v1056_v27  ;;  %v1072_v20 = vrot.slane %v8018_v57, %v7955_v6  ;;  %v8409_v26 = vld [vmem:[#allocation2 + $0x18] sm:$0x3]  ;;  %11316 = vst [vmem:[#allocation110_spill] sm:$0xff] %v8441_v33 }
 0x1bc   :  { %7092 = vpow2.f32 %v1369_v62  ;;  %11312 = vst [vmem:[#allocation106_spill] sm:$0xff] %v8409_v26  ;;  %v2960_v32 = vrot.slane %v8441_v33, %v7567_v10 }
 0x1bd   :  { %7094 = vpow2.f32 %v1395_v42  ;;  %v1064_v42 = vrot.slane %v8018_v57, %v7936_v60  ;;  %v1299_v57 = vsub.f32 %v7731_v49, %v1072_v20 }
 0x1be   :  { %1550 = vperm.xlu1 %7043, %v8060_v44   ;;  %7096 = vpow2.f32 %v1373_v47 }
 0x1bf   :  { %1589 = vperm.xlu0 %7042, %v8062_v12   ;;  %v1393_v49 = vmul.f32 1.442695, %v1299_v57 }
 0x1c0   :  { %v8069_v46 = vpop.xlane.xlu0 %930 }
 0x1c1   :  { %v1084_v28 = vrot.slane %v8069_v46, %v7912_v53  ;;  %v1092_v3 = vrot.slane %v8069_v46, %v7920_v38  ;;  %v8088_v43 = vpop.eup %7082  ;;  %v1100_v16 = vrot.slane %v8069_v46, %v7946_v21 }
 0x1c2   :  { %1556 = vperm.xlu1 %7043, %v8074_v56   ;;  %11235 = vst [vmem:[#allocation71_spill] sm:$0xff] %v8088_v43  ;;  %v8098_v0 = vpop.eup %7084  ;;  %v8433_v56 = vld [vmem:[#allocation2 + $0x1e] sm:$0x3] }
 0x1c3   :  { %1595 = vperm.xlu0 %7042, %v8076_v52   ;;  %v1302_v41 = vsub.f32 %v7738_v58, %v1084_v28  ;;  %v1304_v58 = vsub.f32 %v7750_v14, %v1092_v3  ;;  %11236 = vst [vmem:[#allocation72_spill] sm:$0xff] %v8098_v0  ;;  %v8100_v51 = vpop.eup %7086  ;;  %v1108_v28 = vrot.slane %v8069_v46, %v7958_v2  ;;  %v1381_v3 = vmul.f32 1.442695, %v1293_v50 }
 0x1c4   :  { %11237 = vst [vmem:[#allocation73_spill] sm:$0xff] %v8100_v51  ;;  %v1306_v14 = vsub.f32 %v7759_v36, %v1100_v16  ;;  %v8110_v61 = vpop.eup %7088  ;;  %11315 = vst [vmem:[#allocation109_spill] sm:$0xff] %v8433_v56  ;;  %v2949_v39 = vrot.slane %v8433_v56, %v7567_v10  ;;  %v8501_v56 = vld [vmem:[#allocation2 + $0x30] sm:$0x3] }
 0x1c5   :  { %v1399_v18 = vmul.f32 1.442695, %v1302_v41  ;;  %v1403_v31 = vmul.f32 1.442695, %v1304_v58  ;;  %11238 = vst [vmem:[#allocation74_spill] sm:$0xff] %v8110_v61  ;;  %v8112_v62 = vpop.eup %7090  ;;  %v1308_v36 = vsub.f32 %v7768_v54, %v1108_v28  ;;  %v1297_v58 = vsub.f32 %v7722_v35, %v1064_v42  ;;  %11324 = vst [vmem:[#allocation118_spill] sm:$0xff] %v8501_v56 }
 0x1c6   :  { %1562 = vperm.xlu1 %7043, %v8086_v25   ;;  %11239 = vst [vmem:[#allocation75_spill] sm:$0xff] %v8112_v62  ;;  %v1407_v59 = vmul.f32 1.442695, %v1306_v14  ;;  %v8124_v15 = vpop.eup %7092  ;;  %v1080_v14 = vrot.slane %v8069_v46, %v7567_v10  ;;  %v2938_v25 = vrot.slane %v8425_v4, %v7567_v10 }
 0x1c7   :  { %1601 = vperm.xlu0 %7042, %v8088_v43   ;;  %7098 = vpow2.f32 %v1399_v18  ;;  %11240 = vst [vmem:[#allocation76_spill] sm:$0xff] %v8124_v15  ;;  %v8126_v16 = vpop.eup %7094  ;;  %v1385_v18 = vmul.f32 1.442695, %v1295_v1  ;;  %v1411_v54 = vmul.f32 1.442695, %v1308_v36  ;;  %v1088_v36 = vrot.slane %v8069_v46, %v7915_v29 }
 0x1c8   :  { %7100 = vpow2.f32 %v1377_v55  ;;  %11241 = vst [vmem:[#allocation77_spill] sm:$0xff] %v8126_v16  ;;  %v8136_v50 = vpop.eup %7096  ;;  %v1389_v35 = vmul.f32 1.442695, %v1297_v58  ;;  %v8393_v43 = vld [vmem:[#allocation2 + $0x14] sm:$0x3] }
 0x1c9   :  { %7102 = vpow2.f32 %v1403_v31  ;;  %11242 = vst [vmem:[#allocation78_spill] sm:$0xff] %v8136_v50  ;;  %11310 = vst [vmem:[#allocation104_spill] sm:$0xff] %v8393_v43 }
 0x1ca   :  { %1568 = vperm.xlu1 %7043, %v8098_v0   ;;  %7104 = vpow2.f32 %v1381_v3 }
 0x1cb   :  { %1607 = vperm.xlu0 %7042, %v8100_v51   ;;  %7106 = vpow2.f32 %v1407_v59  ;;  %v1301_v59 = vsub.f32 %v7741_v63, %v1080_v14  ;;  %v1303_v63 = vsub.f32 %v7752_v22, %v1088_v36  ;;  %v1104_v22 = vrot.slane %v8069_v46, %v7955_v6 }
 0x1cc   :  { %7108 = vpow2.f32 %v1385_v18 }
 0x1cd   :  { %7110 = vpow2.f32 %v1411_v54  ;;  %v1096_v54 = vrot.slane %v8069_v46, %v7936_v60  ;;  %v11252_v46 = vld [vmem:[#allocation21_spill] sm:$0xff] }
 0x1ce   :  { %1574 = vperm.xlu1 %7043, %v8110_v61   ;;  %7112 = vpow2.f32 %v1389_v35  ;;  %v8417_v61 = vld [vmem:[#allocation2 + $0x1a] sm:$0x3] }
 0x1cf   :  { %1613 = vperm.xlu0 %7042, %v8112_v62   ;;  %11313 = vst [vmem:[#allocation107_spill] sm:$0xff] %v8417_v61  ;;  %v2927_v40 = vrot.slane %v8417_v61, %v7567_v10 }
 0x1d0   :  { %v8119_v41 = vpop.xlane.xlu1 %933 }
 0x1d1   :  { %v1116_v47 = vrot.slane %v8119_v41, %v7912_v53  ;;  %v1124_v55 = vrot.slane %v8119_v41, %v7920_v38  ;;  %v8138_v28 = vpop.eup %7098  ;;  %v1132_v31 = vrot.slane %v8119_v41, %v7946_v21 }
 0x1d2   :  { %1580 = vperm.xlu1 %7043, %v8124_v15   ;;  %11243 = vst [vmem:[#allocation79_spill] sm:$0xff] %v8138_v28  ;;  %v8148_v1 = vpop.eup %7100  ;;  %v2916_v15 = vrot.slane %v8409_v26, %v7567_v10 }
 0x1d3   :  { %1619 = vperm.xlu0 %7042, %v8126_v16   ;;  %v1310_v27 = vsub.f32 %v7778_v7, %v1116_v47  ;;  %v1312_v7 = vsub.f32 %v7790_v48, %v1124_v55  ;;  %11244 = vst [vmem:[#allocation80_spill] sm:$0xff] %v8148_v1  ;;  %v8150_v3 = vpop.eup %7102  ;;  %v1140_v47 = vrot.slane %v8119_v41, %v7958_v2  ;;  %v1397_v55 = vmul.f32 1.442695, %v1301_v59  ;;  %v8377_v16 = vld [vmem:[#allocation2 + $0x10] sm:$0x3] }
 0x1d4   :  { %11245 = vst [vmem:[#allocation81_spill] sm:$0xff] %v8150_v3  ;;  %v1314_v48 = vsub.f32 %v7799_v5, %v1132_v31  ;;  %v8160_v58 = vpop.eup %7104  ;;  %11308 = vst [vmem:[#allocation102_spill] sm:$0xff] %v8377_v16 }
 0x1d5   :  { %v1415_v42 = vmul.f32 1.442695, %v1310_v27  ;;  %v1419_v20 = vmul.f32 1.442695, %v1312_v7  ;;  %11246 = vst [vmem:[#allocation82_spill] sm:$0xff] %v8160_v58  ;;  %v8162_v18 = vpop.eup %7106  ;;  %v1316_v5 = vsub.f32 %v7808_v34, %v1140_v47  ;;  %v1305_v7 = vsub.f32 %v7762_v45, %v1096_v54 }
 0x1d6   :  { %1586 = vperm.xlu1 %7043, %v8136_v50   ;;  %11247 = vst [vmem:[#allocation83_spill] sm:$0xff] %v8162_v18  ;;  %v1423_v57 = vmul.f32 1.442695, %v1314_v48  ;;  %v8174_v14 = vpop.eup %7108  ;;  %v1307_v48 = vsub.f32 %v11252_v46, %v1104_v22  ;;  %v1120_v22 = vrot.slane %v8119_v41, %v7915_v29 }
 0x1d7   :  { %1625 = vperm.xlu0 %7042, %v8138_v28   ;;  %7114 = vpow2.f32 %v1415_v42  ;;  %11248 = vst [vmem:[#allocation84_spill] sm:$0xff] %v8174_v14  ;;  %v8176_v31 = vpop.eup %7110  ;;  %v1401_v42 = vmul.f32 1.442695, %v1303_v63  ;;  %v1427_v34 = vmul.f32 1.442695, %v1316_v5 }
 0x1d8   :  { %7116 = vpow2.f32 %v1393_v49  ;;  %11249 = vst [vmem:[#allocation85_spill] sm:$0xff] %v8176_v31  ;;  %v8186_v59 = vpop.eup %7112  ;;  %v1405_v45 = vmul.f32 1.442695, %v1305_v7  ;;  %v11256_v7 = vld [vmem:[#allocation22_spill] sm:$0xff] }
 0x1d9   :  { %7118 = vpow2.f32 %v1419_v20  ;;  %11250 = vst [vmem:[#allocation86_spill] sm:$0xff] %v8186_v59  ;;  %v1112_v20 = vrot.slane %v8119_v41, %v7567_v10 }
 0x1da   :  { %1592 = vperm.xlu1 %7043, %v8148_v1   ;;  %7120 = vpow2.f32 %v1397_v55  ;;  %v8401_v1 = vld [vmem:[#allocation2 + $0x16] sm:$0x3] }
 0x1db   :  { %1631 = vperm.xlu0 %7042, %v8150_v3   ;;  %7122 = vpow2.f32 %v1423_v57  ;;  %11311 = vst [vmem:[#allocation105_spill] sm:$0xff] %v8401_v1  ;;  %v2905_v12 = vrot.slane %v8401_v1, %v7567_v10 }
 0x1dc   :  { %7124 = vpow2.f32 %v1401_v42  ;;  %v1309_v42 = vsub.f32 %v11256_v7, %v1112_v20 }
 0x1dd   :  { %7126 = vpow2.f32 %v1427_v34 }
 0x1de   :  { %1598 = vperm.xlu1 %7043, %v8160_v58   ;;  %7128 = vpow2.f32 %v1405_v45  ;;  %v11260_v45 = vld [vmem:[#allocation23_spill] sm:$0xff]  ;;  %v1413_v7 = vmul.f32 1.442695, %v1309_v42  ;;  %v2894_v58 = vrot.slane %v8393_v43, %v7567_v10 }
 0x1df   :  { %1637 = vperm.xlu0 %7042, %v8162_v18   ;;  %v1311_v20 = vsub.f32 %v11260_v45, %v1120_v22 }
 0x1e0   :  { %v8169_v27 = vpop.xlane.xlu0 %936 }
 0x1e1   :  { %v1148_v35 = vrot.slane %v8169_v27, %v7912_v53  ;;  %v1156_v49 = vrot.slane %v8169_v27, %v7920_v38  ;;  %v8188_v47 = vpop.eup %7114  ;;  %v1164_v54 = vrot.slane %v8169_v27, %v7946_v21  ;;  %v1172_v34 = vrot.slane %v8169_v27, %v7958_v2 }
 0x1e2   :  { %1604 = vperm.xlu1 %7043, %v8174_v14   ;;  %11251 = vst [vmem:[#allocation87_spill] sm:$0xff] %v8188_v47  ;;  %v8198_v5 = vpop.eup %7116  ;;  %v1417_v22 = vmul.f32 1.442695, %v1311_v20 }
 0x1e3   :  { %1643 = vperm.xlu0 %7042, %v8176_v31   ;;  %v1318_v36 = vsub.f32 %v7818_v17, %v1148_v35  ;;  %v11253_v17 = vld [vmem:[#allocation27_spill] sm:$0xff]  ;;  %11254 = vst [vmem:[#allocation21_spill] sm:$0xff] %v8198_v5  ;;  %v8200_v57 = vpop.eup %7118  ;;  %v1409_v35 = vmul.f32 1.442695, %v1307_v48  ;;  %v1128_v48 = vrot.slane %v8119_v41, %v7936_v60 }
 0x1e4   :  { %v1320_v63 = vsub.f32 %v11253_v17, %v1156_v49  ;;  %11255 = vst [vmem:[#allocation27_spill] sm:$0xff] %v8200_v57  ;;  %v11257_v49 = vld [vmem:[#allocation29_spill] sm:$0xff]  ;;  %v8210_v17 = vpop.eup %7120 }
 0x1e5   :  { %v1431_v55 = vmul.f32 1.442695, %v1318_v36  ;;  %v1322_v36 = vsub.f32 %v11257_v49, %v1164_v54  ;;  %11258 = vst [vmem:[#allocation22_spill] sm:$0xff] %v8210_v17  ;;  %v8212_v8 = vpop.eup %7122  ;;  %v11264_v49 = vld [vmem:[#allocation24_spill] sm:$0xff] }
 0x1e6   :  { %1610 = vperm.xlu1 %7043, %v8186_v59   ;;  %v1435_v46 = vmul.f32 1.442695, %v1320_v63  ;;  %11259 = vst [vmem:[#allocation29_spill] sm:$0xff] %v8212_v8  ;;  %v8220_v63 = vpop.eup %7124  ;;  %v1313_v31 = vsub.f32 %v11264_v49, %v1128_v48  ;;  %v8385_v59 = vld [vmem:[#allocation2 + $0x12] sm:$0x3] }
 0x1e7   :  { %1649 = vperm.xlu0 %7042, %v8188_v47   ;;  %7130 = vpow2.f32 %v1431_v55  ;;  %v1439_v54 = vmul.f32 1.442695, %v1322_v36  ;;  %11262 = vst [vmem:[#allocation23_spill] sm:$0xff] %v8220_v63  ;;  %v8222_v55 = vpop.eup %7126  ;;  %v11267_v36 = vld [vmem:[#allocation25_spill] sm:$0xff]  ;;  %11309 = vst [vmem:[#allocation103_spill] sm:$0xff] %v8385_v59  ;;  %v2883_v51 = vrot.slane %v8385_v59, %v7567_v10  ;;  %v11327_v59 = vld [vmem:[#allocation20_spill] sm:$0xff] }
 0x1e8   :  { %7132 = vpow2.f32 %v1409_v35  ;;  %v1136_v35 = vrot.slane %v8119_v41, %v7955_v6  ;;  %v1421_v45 = vmul.f32 1.442695, %v1313_v31  ;;  %v1144_v41 = vrot.slane %v8169_v27, %v7567_v10 }
 0x1e9   :  { %7134 = vpow2.f32 %v1435_v46 }
 0x1ea   :  { %1616 = vperm.xlu1 %7043, %v8198_v5   ;;  %7136 = vpow2.f32 %v1413_v7  ;;  %v1315_v46 = vsub.f32 %v11267_v36, %v1136_v35  ;;  %v1152_v7 = vrot.slane %v8169_v27, %v7915_v29  ;;  %v2872_v5 = vrot.slane %v8377_v16, %v7567_v10 }
 0x1eb   :  { %1655 = vperm.xlu0 %7042, %v8200_v57   ;;  %v11261_v57 = vld [vmem:[#allocation31_spill] sm:$0xff]  ;;  %7138 = vpow2.f32 %v1439_v54  ;;  %v11270_v54 = vld [vmem:[#allocation26_spill] sm:$0xff] }
 0x1ec   :  { %v1324_v47 = vsub.f32 %v11261_v57, %v1172_v34  ;;  %11263 = vst [vmem:[#allocation31_spill] sm:$0xff] %v8222_v55  ;;  %v8229_v57 = vpop.eup %7128  ;;  %7140 = vpow2.f32 %v1417_v22  ;;  %v1317_v35 = vsub.f32 %v11270_v54, %v1144_v41  ;;  %v1160_v22 = vrot.slane %v8169_v27, %v7936_v60 }
 0x1ed   :  { %11265 = vst [vmem:[#allocation24_spill] sm:$0xff] %v8229_v57 }
 0x1ee   :  { %1622 = vperm.xlu1 %7043, %v8210_v17   ;;  %v1443_v42 = vmul.f32 1.442695, %v1324_v47  ;;  %v1425_v47 = vmul.f32 1.442695, %v1315_v46  ;;  %v1429_v46 = vmul.f32 1.442695, %v1317_v35 }
 0x1ef   :  { %1661 = vperm.xlu0 %7042, %v8212_v8   ;;  %v11279_v8 = vld [vmem:[#allocation32_spill] sm:$0xff] }
 0x1f0   :  { %7142 = vpow2.f32 %v1443_v42  ;;  %v11273_v42 = vld [vmem:[#allocation28_spill] sm:$0xff] }
 0x1f1   :  { %v8231_v34 = vpop.eup %7130  ;;  %7144 = vpow2.f32 %v1421_v45  ;;  %v1319_v36 = vsub.f32 %v11273_v42, %v1152_v7  ;;  %v8256_v45 = vpop.permute.xlu1 %2808 }
 0x1f2   :  { %1628 = vperm.xlu1 %7043, %v8220_v63   ;;  %11266 = vst [vmem:[#allocation88_spill] sm:$0xff] %v8231_v34  ;;  %v8238_v48 = vpop.eup %7132  ;;  %7146 = vpow2.f32 %v1425_v47  ;;  %11274 = vst [vmem:[#allocation28_spill] sm:$0xff] %v8256_v45  ;;  %v11277_v47 = vld [vmem:[#allocation30_spill] sm:$0xff]  ;;  %v8369_v63 = vld [vmem:[#allocation2 + $0xe] sm:$0x3] }
 0x1f3   :  { %1667 = vperm.xlu0 %7042, %v8222_v55   ;;  %11268 = vst [vmem:[#allocation25_spill] sm:$0xff] %v8238_v48  ;;  %v8240_v20 = vpop.eup %7134  ;;  %7148 = vpow2.f32 %v1429_v46  ;;  %v1433_v55 = vmul.f32 1.442695, %v1319_v36  ;;  %11307 = vst [vmem:[#allocation101_spill] sm:$0xff] %v8369_v63  ;;  %v2861_v28 = vrot.slane %v8369_v63, %v7567_v10 }
 0x1f4   :  { %11269 = vst [vmem:[#allocation89_spill] sm:$0xff] %v8240_v20  ;;  %v8247_v31 = vpop.eup %7136 }
 0x1f5   :  { %11271 = vst [vmem:[#allocation26_spill] sm:$0xff] %v8247_v31  ;;  %v8249_v49 = vpop.eup %7138  ;;  %7150 = vpow2.f32 %v1433_v55 }
 0x1f6   :  { %1634 = vperm.xlu1 %7043, %v8229_v57   ;;  %11272 = vst [vmem:[#allocation90_spill] sm:$0xff] %v8249_v49  ;;  %v8258_v41 = vpop.eup %7140 }
 0x1f7   :  { %1673 = vperm.xlu0 %7042, %v8231_v34   ;;  %11275 = vst [vmem:[#allocation91_spill] sm:$0xff] %v8258_v41  ;;  %v1321_v34 = vsub.f32 %v11277_v47, %v1160_v22  ;;  %v11280_v22 = vld [vmem:[#allocation34_spill] sm:$0xff]  ;;  %v11281_v47 = vld [vmem:[#allocation37_spill] sm:$0xff] }
 0x1fa   :  { %1640 = vperm.xlu1 %7043, %v8238_v48   ;;  %v8260_v54 = vpop.eup %7142 }
 0x1fb   :  { %1679 = vperm.xlu0 %7042, %v8240_v20   ;;  %11276 = vst [vmem:[#allocation92_spill] sm:$0xff] %v8260_v54  ;;  %v1168_v20 = vrot.slane %v8169_v27, %v7955_v6  ;;  %v8267_v35 = vpop.eup %7144  ;;  %v1437_v27 = vmul.f32 1.442695, %v1321_v34 }
 0x1fc   :  { %11278 = vst [vmem:[#allocation30_spill] sm:$0xff] %v8267_v35  ;;  %v8277_v48 = vpop.eup %7146 }
 0x1fd   :  { %11282 = vst [vmem:[#allocation32_spill] sm:$0xff] %v8277_v48  ;;  %7152 = vpow2.f32 %v1437_v27 }
 0x1fe   :  { %1646 = vperm.xlu1 %7043, %v8247_v31   ;;  %v1323_v31 = vsub.f32 %v11279_v8, %v1168_v20  ;;  %v11283_v20 = vld [vmem:[#allocation35_spill] sm:$0xff] }
 0x1ff   :  { %1685 = vperm.xlu0 %7042, %v8249_v49  }
 0x200   :  { %v1441_v57 = vmul.f32 1.442695, %v1323_v31 }
 0x202   :  { %1652 = vperm.xlu1 %7043, %v8258_v41  }
 0x203   :  { %1691 = vperm.xlu0 %7042, %v8260_v54  }
 0x205   :  { %v940_v7 = vpop.xlane.xlu1 %939 }
 0x206   :  { %v1180_v42 = vrot.slane %v940_v7, %v7912_v53  ;;  %v1188_v49 = vrot.slane %v940_v7, %v7920_v38  ;;  %1658 = vperm.xlu1 %7043, %v8267_v35   ;;  %v1176_v41 = vrot.slane %v940_v7, %v7567_v10  ;;  %v1196_v36 = vrot.slane %v940_v7, %v7946_v21  ;;  %v11284_v35 = vld [vmem:[#allocation39_spill] sm:$0xff]  ;;  %v8457_v21 = vld [vmem:[#allocation2 + $0x24] sm:$0x3] }
 0x207   :  { %v1184_v8 = vrot.slane %v940_v7, %v7915_v29  ;;  %v1204_v34 = vrot.slane %v940_v7, %v7958_v2  ;;  %11318 = vst [vmem:[#allocation112_spill] sm:$0xff] %v8457_v21  ;;  %v2982_v37 = vrot.slane %v8457_v21, %v7567_v10  ;;  %v8479_v29 = vld [vmem:[#allocation2 + $0x2a] sm:$0x3] }
 0x208   :  { %v1326_v46 = vsub.f32 %v11280_v22, %v1180_v42  ;;  %v1328_v54 = vsub.f32 %v11281_v47, %v1188_v49  ;;  %v1325_v55 = vsub.f32 %v11283_v20, %v1176_v41  ;;  %v1330_v3 = vsub.f32 %v11284_v35, %v1196_v36  ;;  %v8284_v22 = vpop.eup %7148  ;;  %v11287_v47 = vld [vmem:[#allocation41_spill] sm:$0xff]  ;;  %11321 = vst [vmem:[#allocation115_spill] sm:$0xff] %v8479_v29 }
 0x209   :  { %11285 = vst [vmem:[#allocation34_spill] sm:$0xff] %v8284_v22  ;;  %v1192_v49 = vrot.slane %v940_v7, %v7936_v60  ;;  %v8290_v20 = vpop.eup %7150  ;;  %v3015_v13 = vrot.slane %v8479_v29, %v7567_v10 }
 0x20a   :  { %v1447_v18 = vmul.f32 1.442695, %v1326_v46  ;;  %1664 = vperm.xlu1 %7043, %v8277_v48   ;;  %v1451_v42 = vmul.f32 1.442695, %v1328_v54  ;;  %v11286_v46 = vld [vmem:[#allocation36_spill] sm:$0xff]  ;;  %v1332_v48 = vsub.f32 %v11287_v47, %v1204_v34  ;;  %11288 = vst [vmem:[#allocation37_spill] sm:$0xff] %v8290_v20 }
 0x20b   :  { %v1327_v27 = vsub.f32 %v11286_v46, %v1184_v8  ;;  %v1445_v31 = vmul.f32 1.442695, %v1325_v55  ;;  %v1455_v41 = vmul.f32 1.442695, %v1330_v3  ;;  %v11289_v54 = vld [vmem:[#allocation38_spill] sm:$0xff]  ;;  %v11292_v55 = vld [vmem:[#allocation40_spill] sm:$0xff] }
 0x20c   :  { %7154 = vpow2.f32 %v1447_v18  ;;  %v1200_v18 = vrot.slane %v940_v7, %v7955_v6  ;;  %v1329_v35 = vsub.f32 %v11289_v54, %v1192_v49  ;;  %v8308_v49 = vpop.permute.xlu0 %2801  ;;  %v8449_v6 = vld [vmem:[#allocation2 + $0x22] sm:$0x3] }
 0x20d   :  { %7156 = vpow2.f32 %v1441_v57  ;;  %v1449_v36 = vmul.f32 1.442695, %v1327_v27  ;;  %v1459_v57 = vmul.f32 1.442695, %v1332_v48  ;;  %11295 = vst [vmem:[#allocation38_spill] sm:$0xff] %v8308_v49  ;;  %11317 = vst [vmem:[#allocation111_spill] sm:$0xff] %v8449_v6  ;;  %v2971_v24 = vrot.slane %v8449_v6, %v7567_v10 }
 0x20e   :  { %1670 = vperm.xlu1 %7043, %v8284_v22   ;;  %7158 = vpow2.f32 %v1451_v42  ;;  %v8295_v22 = vpop.eup %7152  ;;  %v1331_v3 = vsub.f32 %v11292_v55, %v1200_v18  ;;  %v1453_v34 = vmul.f32 1.442695, %v1329_v35  ;;  %v8334_v55 = vld [vmem:[#allocation2 + $0x6] sm:$0x3] }
 0x20f   :  { %7160 = vpow2.f32 %v1445_v31  ;;  %11290 = vst [vmem:[#allocation35_spill] sm:$0xff] %v8295_v22 }
 0x210   :  { %7162 = vpow2.f32 %v1455_v41  ;;  %v1457_v48 = vmul.f32 1.442695, %v1331_v3  ;;  %v2817_v3 = vrot.slane %v8334_v55, %v7567_v10 }
 0x211   :  { %7164 = vpow2.f32 %v1449_v36 }
 0x212   :  { %1676 = vperm.xlu1 %7043, %v8290_v20   ;;  %7166 = vpow2.f32 %v1459_v57  ;;  %v11301_v57 = vld [vmem:[#allocation33_spill] sm:$0xff] }
 0x213   :  { %7168 = vpow2.f32 %v1453_v34  ;;  %11302 = vst [vmem:[#allocation33_spill] sm:$0xff] %v8334_v55 }
 0x214   :  { %7170 = vpow2.f32 %v1457_v48 }
 0x216   :  { %v8297_v8 = vpop.eup %7154  ;;  %1682 = vperm.xlu1 %7043, %v8295_v22  }
 0x217   :  { %11291 = vst [vmem:[#allocation39_spill] sm:$0xff] %v8297_v8  ;;  %1697 = vperm.xlu0 %7042, %v8297_v8   ;;  %v8302_v7 = vpop.eup %7156 }
 0x218   :  { %11293 = vst [vmem:[#allocation36_spill] sm:$0xff] %v8302_v7  ;;  %v8304_v42 = vpop.eup %7158 }
 0x219   :  { %11294 = vst [vmem:[#allocation41_spill] sm:$0xff] %v8304_v42  ;;  %v8310_v46 = vpop.eup %7160 }
 0x21a   :  { %1688 = vperm.xlu1 %7043, %v8302_v7   ;;  %11296 = vst [vmem:[#allocation40_spill] sm:$0xff] %v8310_v46  ;;  %v8312_v27 = vpop.eup %7162  ;;  %v8361_v7 = vld [vmem:[#allocation2 + $0xc] sm:$0x3] }
 0x21b   :  { %1703 = vperm.xlu0 %7042, %v8304_v42   ;;  %11297 = vst [vmem:[#allocation93_spill] sm:$0xff] %v8312_v27  ;;  %v8316_v31 = vpop.eup %7164  ;;  %11306 = vst [vmem:[#allocation100_spill] sm:$0xff] %v8361_v7  ;;  %v2850_v22 = vrot.slane %v8361_v7, %v7567_v10 }
 0x21c   :  { %11298 = vst [vmem:[#allocation94_spill] sm:$0xff] %v8316_v31  ;;  %v8320_v41 = vpop.eup %7166 }
 0x21d   :  { %11299 = vst [vmem:[#allocation95_spill] sm:$0xff] %v8320_v41  ;;  %v8326_v54 = vpop.eup %7168 }
 0x21e   :  { %1694 = vperm.xlu1 %7043, %v8310_v46   ;;  %11300 = vst [vmem:[#allocation96_spill] sm:$0xff] %v8326_v54  ;;  %v8338_v34 = vpop.eup %7170 }
 0x21f   :  { %1709 = vperm.xlu0 %7042, %v8312_v27   ;;  %11303 = vst [vmem:[#allocation97_spill] sm:$0xff] %v8338_v34  ;;  %v8345_v27 = vld [vmem:[#allocation2 + $0x8] sm:$0x3] }
 0x220   :  { %11304 = vst [vmem:[#allocation98_spill] sm:$0xff] %v8345_v27 }
 0x221   :  { %v8318_v47 = vpop.permute.xlu1 %1529 }
 0x222   :  { %v8322_v18 = vpop.permute.xlu0 %1526  ;;  %1700 = vperm.xlu1 %7043, %v8316_v31   ;;  %v8353_v31 = vld [vmem:[#allocation2 + $0xa] sm:$0x3] }
 0x223   :  { %1715 = vperm.xlu0 %7042, %v8320_v41   ;;  %11305 = vst [vmem:[#allocation99_spill] sm:$0xff] %v8353_v31  ;;  %v2839_v8 = vrot.slane %v8353_v31, %v7567_v10 }
 0x225   :  { %v8328_v35 = vpop.permute.xlu1 %1532 }
 0x226   :  { %v8330_v36 = vpop.permute.xlu0 %1553  ;;  %1706 = vperm.xlu1 %7043, %v8326_v54   ;;  %v2828_v54 = vrot.slane %v8345_v27, %v7567_v10  ;;  %v1728_v31 = vrot.slane %v8328_v35, %v11327_v59 }
 0x227   :  { %2812 = vbcast.lane.b32.xlu0 %v11301_v57, 264  ;;  %v1756_v7 = vrot.slane %v8330_v36, %v11327_v59 }
 0x229   :  { %v8340_v48 = vpop.permute.xlu1 %1535 }
 0x22a   :  { %v8342_v41 = vpop.permute.xlu0 %1559  ;;  %1712 = vperm.xlu1 %7043, %v8338_v34   ;;  %v1732_v27 = vrot.slane %v8340_v48, %v11327_v59 }
 0x22b   :  { %2823 = vbcast.lane.b32.xlu0 %v2817_v3, 264  ;;  %v1764_v48 = vrot.slane %v8342_v41, %v11327_v59 }
 0x22d   :  { %v8349_v57 = vpop.permute.xlu1 %1538 }
 0x22e   :  { %v8351_v42 = vpop.permute.xlu0 %1565  ;;  %2819 = vbcast.lane.b32.xlu1 %v2817_v3, 256 }
 0x22f   :  { %2834 = vbcast.lane.b32.xlu0 %v2828_v54, 264 }
 0x231   :  { %v8357_v46 = vpop.permute.xlu1 %1541 }
 0x232   :  { %v8359_v34 = vpop.permute.xlu0 %1571  ;;  %2830 = vbcast.lane.b32.xlu1 %v2828_v54, 256 }
 0x233   :  { %2845 = vbcast.lane.b32.xlu0 %v2839_v8, 264 }
 0x235   :  { %v8365_v20 = vpop.permute.xlu1 %1544 }
 0x236   :  { %v8367_v3 = vpop.permute.xlu0 %1577  ;;  %2841 = vbcast.lane.b32.xlu1 %v2839_v8, 256 }
 0x237   :  { %2856 = vbcast.lane.b32.xlu0 %v2850_v22, 264 }
 0x239   :  { %v8373_v17 = vpop.permute.xlu1 %1547 }
 0x23a   :  { %v8375_v54 = vpop.permute.xlu0 %1583  ;;  %2852 = vbcast.lane.b32.xlu1 %v2850_v22, 256 }
 0x23b   :  { %2867 = vbcast.lane.b32.xlu0 %v2861_v28, 264 }
 0x23d   :  { %v8381_v62 = vpop.permute.xlu1 %1550 }
 0x23e   :  { %v8383_v8 = vpop.permute.xlu0 %1589  ;;  %2863 = vbcast.lane.b32.xlu1 %v2861_v28, 256 }
 0x23f   :  { %2878 = vbcast.lane.b32.xlu0 %v2872_v5, 264 }
 0x241   :  { %v8389_v14 = vpop.permute.xlu1 %1556 }
 0x242   :  { %v8391_v22 = vpop.permute.xlu0 %1595  ;;  %2874 = vbcast.lane.b32.xlu1 %v2872_v5, 256  ;;  %v1760_v63 = vrot.slane %v8389_v14, %v11327_v59 }
 0x243   :  { %2889 = vbcast.lane.b32.xlu0 %v2883_v51, 264 }
 0x245   :  { %v8397_v52 = vpop.permute.xlu1 %1562 }
 0x246   :  { %v8399_v28 = vpop.permute.xlu0 %1601  ;;  %2885 = vbcast.lane.b32.xlu1 %v2883_v51, 256 }
 0x247   :  { %2900 = vbcast.lane.b32.xlu0 %v2894_v58, 264 }
 0x249   :  { %v8405_v50 = vpop.permute.xlu1 %1568 }
 0x24a   :  { %v8407_v5 = vpop.permute.xlu0 %1607  ;;  %2896 = vbcast.lane.b32.xlu1 %v2894_v58, 256 }
 0x24b   :  { %2911 = vbcast.lane.b32.xlu0 %v2905_v12, 264 }
 0x24d   :  { %v8413_v11 = vpop.permute.xlu1 %1574 }
 0x24e   :  { %v8415_v51 = vpop.permute.xlu0 %1613  ;;  %2907 = vbcast.lane.b32.xlu1 %v2905_v12, 256  ;;  %v1784_v14 = vrot.slane %v8413_v11, %v11327_v59 }
 0x24f   :  { %2922 = vbcast.lane.b32.xlu0 %v2916_v15, 264 }
 0x251   :  { %v8421_v0 = vpop.permute.xlu1 %1580 }
 0x252   :  { %v8423_v58 = vpop.permute.xlu0 %1619  ;;  %2918 = vbcast.lane.b32.xlu1 %v2916_v15, 256  ;;  %v1792_v36 = vrot.slane %v8421_v0, %v11327_v59  ;;  %v1740_v0 = vrot.slane %v8357_v46, %v11327_v59  ;;  %v1772_v46 = vrot.slane %v8351_v42, %v11327_v59  ;;  %v1804_v42 = vrot.slane %v8383_v8, %v11327_v59 }
 0x253   :  { %2933 = vbcast.lane.b32.xlu0 %v2927_v40, 264 }
 0x255   :  { %v8429_v9 = vpop.permute.xlu1 %1586 }
 0x256   :  { %v8431_v12 = vpop.permute.xlu0 %1625  ;;  %2929 = vbcast.lane.b32.xlu1 %v2927_v40, 256 }
 0x257   :  { %2944 = vbcast.lane.b32.xlu0 %v2938_v25, 264 }
 0x259   :  { %v8437_v44 = vpop.permute.xlu1 %1592 }
 0x25a   :  { %v8439_v15 = vpop.permute.xlu0 %1631  ;;  %2940 = vbcast.lane.b32.xlu1 %v2938_v25, 256 }
 0x25b   :  { %2955 = vbcast.lane.b32.xlu0 %v2949_v39, 264 }
 0x25d   :  { %v8445_v2 = vpop.permute.xlu1 %1598 }
 0x25e   :  { %v8447_v40 = vpop.permute.xlu0 %1637  ;;  %2951 = vbcast.lane.b32.xlu1 %v2949_v39, 256  ;;  %v8463_v39 = vld [vmem:[#allocation2 + $0x26] sm:$0x3] }
 0x25f   :  { %2966 = vbcast.lane.b32.xlu0 %v2960_v32, 264  ;;  %11319 = vst [vmem:[#allocation113_spill] sm:$0xff] %v8463_v39  ;;  %v2993_v49 = vrot.slane %v8463_v39, %v7567_v10 }
 0x261   :  { %v8453_v45 = vpop.permute.xlu1 %1604 }
 0x262   :  { %v8455_v25 = vpop.permute.xlu0 %1643  ;;  %2962 = vbcast.lane.b32.xlu1 %v2960_v32, 256  ;;  %v8471_v32 = vld [vmem:[#allocation2 + $0x28] sm:$0x3] }
 0x263   :  { %2977 = vbcast.lane.b32.xlu0 %v2971_v24, 264  ;;  %11320 = vst [vmem:[#allocation114_spill] sm:$0xff] %v8471_v32  ;;  %v3004_v38 = vrot.slane %v8471_v32, %v7567_v10 }
 0x265   :  { %v8461_v60 = vpop.permute.xlu1 %1610 }
 0x266   :  { %2973 = vbcast.lane.b32.xlu1 %v2971_v24, 256  ;;  %v8467_v19 = vpop.permute.xlu0 %1649 }
 0x267   :  { %2988 = vbcast.lane.b32.xlu0 %v2982_v37, 264 }
 0x269   :  { %v8469_v30 = vpop.permute.xlu1 %1616 }
 0x26a   :  { %2984 = vbcast.lane.b32.xlu1 %v2982_v37, 256  ;;  %v8477_v24 = vpop.permute.xlu0 %1655  ;;  %v8485_v37 = vld [vmem:[#allocation2 + $0x2c] sm:$0x3] }
 0x26b   :  { %2999 = vbcast.lane.b32.xlu0 %v2993_v49, 264  ;;  %11322 = vst [vmem:[#allocation116_spill] sm:$0xff] %v8485_v37  ;;  %v3026_v32 = vrot.slane %v8485_v37, %v7567_v10  ;;  %v3048_v37 = vrot.slane %v8501_v56, %v7567_v10  ;;  %v8519_v56 = vld [vmem:[#allocation2 + $0x34] sm:$0x3] }
 0x26c   :  { %11326 = vst [vmem:[#allocation120_spill] sm:$0xff] %v8519_v56 }
 0x26d   :  { %v8475_v23 = vpop.permute.xlu1 %1622 }
 0x26e   :  { %2995 = vbcast.lane.b32.xlu1 %v2993_v49, 256  ;;  %v8489_v21 = vpop.permute.xlu0 %1661  ;;  %v8493_v49 = vld [vmem:[#allocation2 + $0x2e] sm:$0x3] }
 0x26f   :  { %3010 = vbcast.lane.b32.xlu0 %v3004_v38, 264  ;;  %11323 = vst [vmem:[#allocation117_spill] sm:$0xff] %v8493_v49  ;;  %v3037_v29 = vrot.slane %v8493_v49, %v7567_v10 }
 0x271   :  { %v8483_v39 = vpop.permute.xlu1 %1628 }
 0x272   :  { %3006 = vbcast.lane.b32.xlu1 %v3004_v38, 256  ;;  %v8499_v38 = vpop.permute.xlu0 %1667 }
 0x273   :  { %3021 = vbcast.lane.b32.xlu0 %v3015_v13, 264 }
 0x275   :  { %v8491_v6 = vpop.permute.xlu1 %1634 }
 0x276   :  { %3017 = vbcast.lane.b32.xlu1 %v3015_v13, 256  ;;  %v8507_v13 = vld [vmem:[#allocation2 + $0x32] sm:$0x3]  ;;  %v8511_v61 = vpop.permute.xlu0 %1673  ;;  %v1864_v8 = vrot.slane %v8491_v6, %v11327_v59  ;;  %v1820_v6 = vrot.slane %v8399_v28, %v11327_v59 }
 0x277   :  { %3032 = vbcast.lane.b32.xlu0 %v3026_v32, 264  ;;  %11325 = vst [vmem:[#allocation119_spill] sm:$0xff] %v8507_v13  ;;  %v3059_v49 = vrot.slane %v8507_v13, %v7567_v10 }
 0x279   :  { %v8497_v33 = vpop.permute.xlu1 %1640 }
 0x27a   :  { %3028 = vbcast.lane.b32.xlu1 %v3026_v32, 256  ;;  %v8517_v1 = vpop.permute.xlu0 %1679  ;;  %v1872_v28 = vrot.slane %v8497_v33, %v11327_v59 }
 0x27b   :  { %3043 = vbcast.lane.b32.xlu0 %v3037_v29, 264 }
 0x27d   :  { %v8505_v4 = vpop.permute.xlu1 %1646 }
 0x27e   :  { %3039 = vbcast.lane.b32.xlu1 %v3037_v29, 256  ;;  %v8523_v29 = vrot.slane %v8519_v56, %v7567_v10  ;;  %v8528_v13 = vpop.permute.xlu0 %1685  ;;  %v1720_v56 = vrot.slane %v8322_v18, %v11327_v59  ;;  %v1768_v18 = vrot.slane %v8397_v52, %v11327_v59 }
 0x27f   :  { %3054 = vbcast.lane.b32.xlu0 %v3048_v37, 264 }
 0x281   :  { %v8513_v26 = vpop.permute.xlu1 %1652 }
 0x282   :  { %3050 = vbcast.lane.b32.xlu1 %v3048_v37, 256  ;;  %v1752_v37 = vrot.slane %v8381_v62, %v11327_v59  ;;  %v8552_v53 = vpop.permute.xlu0 %1691 }
 0x283   :  { %3065 = vbcast.lane.b32.xlu0 %v3059_v49, 264 }
 0x284   :  { %v1980_v62 = vsel %vm845_vm1, %v1756_v7, %v1752_v37  ;;  %v1788_v7 = vrot.slane %v8367_v3, %v11327_v59 }
 0x285   :  { %v8515_v32 = vpop.permute.xlu1 %1658 }
 0x286   :  { %3061 = vbcast.lane.b32.xlu1 %v3059_v49, 256  ;;  %v1724_v49 = vrot.slane %v8318_v47, %v11327_v59  ;;  %v1981_v47 = vsel %vm847_vm2, %v1760_v63, %v1980_v62  ;;  %v1736_v63 = vrot.slane %v8349_v57, %v11327_v59  ;;  %v1848_v57 = vrot.slane %v8475_v23, %v11327_v59 }
 0x287   :  { %v1982_v37 = vsel %vm849_vm3, %v1764_v48, %v1981_v47  ;;  %v1796_v62 = vrot.slane %v8375_v54, %v11327_v59  ;;  %v1856_v47 = vrot.slane %v8483_v39, %v11327_v59  ;;  %v1852_v23 = vrot.slane %v8431_v12, %v11327_v59 }
 0x288   :  { %v1973_v35 = vsel %vm845_vm1, %v1724_v49, %v1720_v56  ;;  %v1987_v56 = vsel %vm845_vm1, %v1788_v7, %v1784_v14  ;;  %v1983_v41 = vsel %vm851_vm4, %v1768_v18, %v1982_v37  ;;  %v1776_v14 = vrot.slane %v8405_v50, %v11327_v59 }
 0x289   :  { %v8525_v43 = vpop.permute.xlu1 %1664  ;;  %v1974_v11 = vsel %vm847_vm2, %v1728_v31, %v1973_v35  ;;  %v1988_v3 = vsel %vm847_vm2, %v1792_v36, %v1987_v56  ;;  %v1800_v31 = vrot.slane %v8429_v9, %v11327_v59  ;;  %v1780_v9 = vrot.slane %v8359_v34, %v11327_v59 }
 0x28a   :  { %3072 = vbcast.lane.b32.xlu1 %v8523_v29, 256  ;;  %v1975_v52 = vsel %vm849_vm3, %v1732_v27, %v1974_v11  ;;  %v1989_v54 = vsel %vm849_vm3, %v1796_v62, %v1988_v3  ;;  %v1984_v39 = vsel %vm853_vm5, %v1772_v46, %v1983_v41  ;;  %v1808_v34 = vrot.slane %v8437_v44, %v11327_v59 }
 0x28b   :  { %v1976_v18 = vsel %vm851_vm4, %v1736_v63, %v1975_v52  ;;  %v1990_v35 = vsel %vm851_vm4, %v1800_v31, %v1989_v54  ;;  %v2001_v48 = vsel %vm845_vm1, %v1852_v23, %v1848_v57  ;;  %v1985_v52 = vsel %vm855_vm6, %v1776_v14, %v1984_v39 }
 0x28c   :  { %v8591_v36 = vsel %vm853_vm5, %v1740_v0, %v1976_v18  ;;  %v2002_v11 = vsel %vm847_vm2, %v1856_v47, %v2001_v48  ;;  %v1744_v0 = vrot.slane %v8365_v20, %v11327_v59  ;;  %v1860_v44 = vrot.slane %v8439_v15, %v11327_v59 }
 0x28d   :  { %v1671_v16 = vpop.permute.xlu1 %1670  ;;  %v1916_v37 = vrot.slane %v8511_v61, %v11327_v59  ;;  %v1748_v56 = vrot.slane %v8373_v17, %v11327_v59  ;;  %v1991_v20 = vsel %vm853_vm5, %v1804_v42, %v1990_v35  ;;  %v1986_v61 = vsel %vm857_vm7, %v1780_v9, %v1985_v52 }
 0x28e   :  { %v1912_v12 = vrot.slane %v1671_v16, %v11327_v59  ;;  %v1816_v16 = vrot.slane %v8445_v2, %v11327_v59  ;;  %v2003_v15 = vsel %vm849_vm3, %v1860_v44, %v2002_v11  ;;  %v1992_v31 = vsel %vm855_vm6, %v1808_v34, %v1991_v20 }
 0x28f   :  { %v2004_v17 = vsel %vm851_vm4, %v1864_v8, %v2003_v15  ;;  %v1812_v46 = vrot.slane %v8391_v22, %v11327_v59  ;;  %v1868_v14 = vrot.slane %v8447_v40, %v11327_v59  ;;  %v1924_v47 = vrot.slane %v8517_v1, %v11327_v59 }
 0x290   :  { %v2015_v3 = vsel %vm845_vm1, %v1916_v37, %v1912_v12  ;;  %v1994_v62 = vsel %vm845_vm1, %v1820_v6, %v1816_v16  ;;  %v1828_v18 = vrot.slane %v8407_v5, %v11327_v59  ;;  %v1832_v9 = vrot.slane %v8461_v60, %v11327_v59 }
 0x291   :  { %v1677_v55 = vpop.permute.xlu1 %1676  ;;  %v2040_v23 = vsel %vm916_vm8, %v1986_v61, 0.0  ;;  %v1880_v22 = vrot.slane %v8505_v4, %v11327_v59  ;;  %v1993_v1 = vsel %vm857_vm7, %v1812_v46, %v1992_v31  ;;  %v2005_v5 = vsel %vm853_vm5, %v1868_v14, %v2004_v17 }
 0x292   :  { %v1920_v63 = vrot.slane %v1677_v55, %v11327_v59  ;;  %v1824_v55 = vrot.slane %v8453_v45, %v11327_v59  ;;  %v1888_v54 = vrot.slane %v8513_v26, %v11327_v59  ;;  %v2006_v35 = vsel %vm855_vm6, %v1872_v28, %v2005_v5 }
 0x293   :  { %v1876_v4 = vrot.slane %v8455_v25, %v11327_v59  ;;  %v1884_v48 = vrot.slane %v8467_v19, %v11327_v59  ;;  %v1932_v12 = vrot.slane %v8528_v13, %v11327_v59  ;;  %v1836_v26 = vrot.slane %v8415_v51, %v11327_v59 }
 0x294   :  { %v2016_v45 = vsel %vm847_vm2, %v1920_v63, %v2015_v3  ;;  %v1995_v33 = vsel %vm847_vm2, %v1824_v55, %v1994_v62  ;;  %v2043_v63 = vsel %vm916_vm8, %v1993_v1, 0.0  ;;  %v1896_v16 = vrot.slane %v8515_v32, %v11327_v59 }
 0x295   :  { %v8567_v49 = vpop.permute.xlu1 %1682  ;;  %v2017_v42 = vsel %vm849_vm3, %v1924_v47, %v2016_v45  ;;  %v1996_v34 = vsel %vm849_vm3, %v1828_v18, %v1995_v33  ;;  %v2008_v25 = vsel %vm845_vm1, %v1884_v48, %v1880_v22  ;;  %v2007_v13 = vsel %vm857_vm7, %v1876_v4, %v2006_v35 }
 0x296   :  { %v8575_v27 = vpop.permute.xlu0 %1697  ;;  %v1928_v57 = vrot.slane %v8567_v49, %v11327_v59  ;;  %v1997_v11 = vsel %vm851_vm4, %v1832_v9, %v1996_v34  ;;  %v2009_v51 = vsel %vm847_vm2, %v1888_v54, %v2008_v25  ;;  %v1892_v6 = vrot.slane %v8477_v24, %v11327_v59 }
 0x297   :  { %v1940_v55 = vrot.slane %v8552_v53, %v11327_v59  ;;  %v1978_v20 = vsel %vm855_vm6, %v1744_v0, %v8591_v36  ;;  %v2049_v3 = vsel %vm916_vm8, %v2007_v13, 0.0  ;;  %v1998_v61 = vsel %vm853_vm5, %v1836_v26, %v1997_v11  ;;  %v8754_v26 = vld [vmem:[#allocation2 + $0x36] sm:$0x3] }
 0x298   :  { %v2018_v60 = vsel %vm851_vm4, %v1928_v57, %v2017_v42  ;;  %v1979_v32 = vsel %vm857_vm7, %v1748_v56, %v1978_v20  ;;  %v2010_v31 = vsel %vm849_vm3, %v1892_v6, %v2009_v51  ;;  %v1904_v0 = vrot.slane %v8525_v43, %v11327_v59  ;;  %v8790_v20 = vld [vmem:[#allocation2 + $0x40] sm:$0x3] }
 0x299   :  { %v8596_v50 = vpop.permute.xlu1 %1688  ;;  %v2019_v44 = vsel %vm853_vm5, %v1932_v12, %v2018_v60  ;;  %v2011_v36 = vsel %vm851_vm4, %v1896_v16, %v2010_v31  ;;  %v1844_v45 = vrot.slane %v8423_v58, %v11327_v59  ;;  %v1900_v57 = vrot.slane %v8489_v21, %v11327_v59 }
 0x29a   :  { %v8604_v7 = vpop.permute.xlu0 %1703  ;;  %v1936_v39 = vrot.slane %v8596_v50, %v11327_v59  ;;  %v1840_v50 = vrot.slane %v8469_v30, %v11327_v59  ;;  %v2037_v14 = vsel %vm916_vm8, %v1979_v32, 0.0 }
 0x29b   :  { %v1956_v46 = vrot.slane %v8604_v7, %v11327_v59  ;;  %v2012_v33 = vsel %vm853_vm5, %v1900_v57, %v2011_v36 }
 0x29c   :  { %v2020_v37 = vsel %vm855_vm6, %v1936_v39, %v2019_v44  ;;  %v2013_v9 = vsel %vm855_vm6, %v1904_v0, %v2012_v33  ;;  %v8774_v44 = vld [vmem:[#allocation2 + $0x3c] sm:$0x3]  ;;  %v8810_v0 = vld [vmem:[#allocation2 + $0x46] sm:$0x3]  ;;  %v8830_v33 = vld [vmem:[#allocation2 + $0x4c] sm:$0x3] }
 0x29d   :  { %v1695_v41 = vpop.permute.xlu1 %1694  ;;  %v2021_v53 = vsel %vm857_vm7, %v1940_v55, %v2020_v37  ;;  %v3114_v51 = vrot.slane %v8774_v44, %v7567_v10  ;;  %v8782_v37 = vld [vmem:[#allocation2 + $0x3e] sm:$0x3] }
 0x29e   :  { %v8628_v2 = vpop.permute.xlu0 %1709  ;;  %v1944_v52 = vrot.slane %v1695_v41, %v11327_v59  ;;  %v1948_v41 = vrot.slane %v8575_v27, %v11327_v59  ;;  %v1999_v27 = vsel %vm855_vm6, %v1840_v50, %v1998_v61  ;;  %v2055_v47 = vsel %vm916_vm8, %v2021_v53, 0.0 }
 0x29f   :  { %v2000_v58 = vsel %vm857_vm7, %v1844_v45, %v1999_v27  ;;  %v3125_v6 = vrot.slane %v8782_v37, %v7567_v10 }
 0x2a0   :  { %v2022_v24 = vsel %vm845_vm1, %v1948_v41, %v1944_v52  ;;  %v2046_v22 = vsel %vm916_vm8, %v2000_v58, 0.0 }
 0x2a1   :  { %v1701_v49 = vpop.permute.xlu1 %1700 }
 0x2a2   :  { %2041 = vadd.xlane.f32.xlu0 %v2040_v23  ;;  %v8654_v40 = vpop.permute.xlu0 %1715  ;;  %v1952_v30 = vrot.slane %v1701_v49, %v11327_v59  ;;  %v1908_v49 = vrot.slane %v8499_v38, %v11327_v59  ;;  %v1964_v23 = vrot.slane %v8628_v2, %v11327_v59 }
 0x2a3   :  { %v1972_v39 = vrot.slane %v8654_v40, %v11327_v59  ;;  %v3081_v40 = vrot.slane %v8754_v26, %v7567_v10 }
 0x2a4   :  { %v2023_v56 = vsel %vm847_vm2, %v1952_v30, %v2022_v24  ;;  %v2014_v42 = vsel %vm857_vm7, %v1908_v49, %v2013_v9  ;;  %v8802_v24 = vld [vmem:[#allocation2 + $0x44] sm:$0x3] }
 0x2a5   :  { %v1707_v8 = vpop.permute.xlu1 %1706  ;;  %v2024_v43 = vsel %vm849_vm3, %v1956_v46, %v2023_v56  ;;  %v2052_v38 = vsel %vm916_vm8, %v2014_v42, 0.0  ;;  %v3158_v53 = vrot.slane %v8802_v24, %v7567_v10  ;;  %v3169_v56 = vrot.slane %v8810_v0, %v7567_v10 }
 0x2a6   :  { %2044 = vadd.xlane.f32.xlu0 %v2043_v63  ;;  %v8679_v19 = vpop.permute.xlu0 %2812  ;;  %v1960_v28 = vrot.slane %v1707_v8, %v11327_v59  ;;  %v8762_v8 = vld [vmem:[#allocation2 + $0x38] sm:$0x3] }
 0x2a7   :  { %v3092_v63 = vrot.slane %v8762_v8, %v7567_v10 }
 0x2a8   :  { %v2025_v21 = vsel %vm851_vm4, %v1960_v28, %v2024_v43  ;;  %v8814_v28 = vld [vmem:[#allocation2 + $0x48] sm:$0x3] }
 0x2a9   :  { %v1713_v15 = vpop.permute.xlu1 %1712  ;;  %v2026_v1 = vsel %vm853_vm5, %v1964_v23, %v2025_v21  ;;  %v3180_v45 = vrot.slane %v8814_v28, %v7567_v10  ;;  %v3202_v21 = vrot.slane %v8830_v33, %v7567_v10 }
 0x2aa   :  { %2050 = vadd.xlane.f32.xlu0 %v2049_v3  ;;  %v8701_v17 = vpop.permute.xlu0 %2823  ;;  %v1968_v7 = vrot.slane %v1713_v15, %v11327_v59  ;;  %v3136_v15 = vrot.slane %v8790_v20, %v7567_v10  ;;  %v8794_v3 = vld [vmem:[#allocation2 + $0x42] sm:$0x3] }
 0x2ab   :  { %v3147_v32 = vrot.slane %v8794_v3, %v7567_v10 }
 0x2ac   :  { %v2027_v60 = vsel %vm855_vm6, %v1968_v7, %v2026_v1  ;;  %v8834_v7 = vld [vmem:[#allocation2 + $0x4e] sm:$0x3] }
 0x2ad   :  { %v8716_v62 = vpop.permute.xlu1 %2819  ;;  %v2028_v2 = vsel %vm857_vm7, %v1972_v39, %v2027_v60  ;;  %v3213_v9 = vrot.slane %v8834_v7, %v7567_v10  ;;  %v8850_v39 = vld [vmem:[#allocation2 + $0x52] sm:$0x3] }
 0x2ae   :  { %2038 = vadd.xlane.f32.xlu1 %v2037_v14  ;;  %2056 = vadd.xlane.f32.xlu0 %v2055_v47  ;;  %v8721_v18 = vpop.permute.xlu0 %2834  ;;  %v2058_v34 = vsel %vm916_vm8, %v2028_v2, 0.0  ;;  %v8822_v14 = vld [vmem:[#allocation2 + $0x4a] sm:$0x3]  ;;  %v8854_v2 = vld [vmem:[#allocation2 + $0x54] sm:$0x3] }
 0x2af   :  { %v3191_v47 = vrot.slane %v8822_v14, %v7567_v10 }
 0x2b1   :  { %v8735_v5 = vpop.permute.xlu1 %2830 }
 0x2b2   :  { %2047 = vadd.xlane.f32.xlu1 %v2046_v22  ;;  %v8737_v54 = vpop.permute.xlu0 %2845  ;;  %v8842_v22 = vld [vmem:[#allocation2 + $0x50] sm:$0x3] }
 0x2b3   :  { %v3224_v42 = vrot.slane %v8842_v22, %v7567_v10 }
 0x2b5   :  { %v8744_v35 = vpop.permute.xlu1 %2841 }
 0x2b6   :  { %2053 = vadd.xlane.f32.xlu1 %v2052_v38  ;;  %v8746_v4 = vpop.permute.xlu0 %2856  ;;  %v3235_v38 = vrot.slane %v8850_v39, %v7567_v10 }
 0x2b9   :  { %v8749_v48 = vpop.permute.xlu1 %2852 }
 0x2ba   :  { %2059 = vadd.xlane.f32.xlu1 %v2058_v34  ;;  %v8751_v12 = vpop.permute.xlu0 %2867  ;;  %v3246_v34 = vrot.slane %v8854_v2, %v7567_v10 }
 0x2bd   :  { %v8758_v11 = vpop.permute.xlu1 %2863 }
 0x2be   :  { %v8760_v50 = vpop.permute.xlu0 %2878 }
 0x2c1   :  { %v8766_v25 = vpop.permute.xlu1 %2874 }
 0x2c2   :  { %11328 = vst [vmem:[#allocation121_spill] sm:$0xff] %v8766_v25  ;;  %v8768_v52 = vpop.permute.xlu0 %2889 }
 0x2c3   :  { %11329 = vst [vmem:[#allocation122_spill] sm:$0xff] %v8768_v52 }
 0x2c4   :  { %3076 = vbcast.lane.b32.xlu0 %v8523_v29, 264  ;;  %v8770_v29 = vld [vmem:[#allocation2 + $0x3a] sm:$0x3] }
 0x2c5   :  { %v3103_v13 = vrot.slane %v8770_v29, %v7567_v10  ;;  %v8778_v16 = vpop.permute.xlu1 %2885 }
 0x2c6   :  { %11330 = vst [vmem:[#allocation123_spill] sm:$0xff] %v8778_v16  ;;  %v8780_v30 = vpop.permute.xlu0 %2900  ;;  %v11381_v16 = vld [vmem:[#allocation44_spill] sm:$0xff] }
 0x2c7   :  { %11331 = vst [vmem:[#allocation124_spill] sm:$0xff] %v8780_v30  ;;  %v7250_v30 = vld [vmem:[#allocation2] sm:$0x3] }
 0x2c8   :  { %3087 = vbcast.lane.b32.xlu0 %v3081_v40, 264 }
 0x2c9   :  { %v8786_v55 = vpop.permute.xlu1 %2896 }
 0x2ca   :  { %11332 = vst [vmem:[#allocation125_spill] sm:$0xff] %v8786_v55  ;;  %v8788_v41 = vpop.permute.xlu0 %2911  ;;  %v9008_v55 = vld [vmem:[#allocation2 + $0x7e] sm:$0x3] }
 0x2cb   :  { %3083 = vbcast.lane.b32.xlu1 %v3081_v40, 256  ;;  %11333 = vst [vmem:[#allocation126_spill] sm:$0xff] %v8788_v41  ;;  %v9000_v41 = vld [vmem:[#allocation2 + $0x7c] sm:$0x3] }
 0x2cc   :  { %3098 = vbcast.lane.b32.xlu0 %v3092_v63, 264 }
 0x2cd   :  { %v8798_v61 = vpop.permute.xlu1 %2907 }
 0x2ce   :  { %11334 = vst [vmem:[#allocation127_spill] sm:$0xff] %v8798_v61  ;;  %v8800_v31 = vpop.permute.xlu0 %2922  ;;  %v8992_v61 = vld [vmem:[#allocation2 + $0x7a] sm:$0x3] }
 0x2cf   :  { %3094 = vbcast.lane.b32.xlu1 %v3092_v63, 256  ;;  %11335 = vst [vmem:[#allocation128_spill] sm:$0xff] %v8800_v31  ;;  %v8984_v31 = vld [vmem:[#allocation2 + $0x78] sm:$0x3] }
 0x2d0   :  { %3109 = vbcast.lane.b32.xlu0 %v3103_v13, 264 }
 0x2d1   :  { %v8806_v27 = vpop.permute.xlu1 %2918 }
 0x2d2   :  { %11336 = vst [vmem:[#allocation129_spill] sm:$0xff] %v8806_v27  ;;  %v8808_v36 = vpop.permute.xlu0 %2933 }
 0x2d3   :  { %3105 = vbcast.lane.b32.xlu1 %v3103_v13, 256  ;;  %11337 = vst [vmem:[#allocation130_spill] sm:$0xff] %v8808_v36  ;;  %v8862_v13 = vld [vmem:[#allocation2 + $0x56] sm:$0x3] }
 0x2d4   :  { %3120 = vbcast.lane.b32.xlu0 %v3114_v51, 264  ;;  %v8976_v36 = vld [vmem:[#allocation2 + $0x76] sm:$0x3] }
 0x2d5   :  { %v8818_v57 = vpop.permute.xlu1 %2929 }
 0x2d6   :  { %11338 = vst [vmem:[#allocation131_spill] sm:$0xff] %v8818_v57  ;;  %v8820_v46 = vpop.permute.xlu0 %2944  ;;  %v8968_v57 = vld [vmem:[#allocation2 + $0x74] sm:$0x3] }
 0x2d7   :  { %3116 = vbcast.lane.b32.xlu1 %v3114_v51, 256  ;;  %11339 = vst [vmem:[#allocation132_spill] sm:$0xff] %v8820_v46  ;;  %v3257_v51 = vrot.slane %v8862_v13, %v7567_v10  ;;  %v8960_v46 = vld [vmem:[#allocation2 + $0x72] sm:$0x3]  ;;  %v3422_v27 = vrot.slane %v8968_v57, %v7567_v10 }
 0x2d8   :  { %3131 = vbcast.lane.b32.xlu0 %v3125_v6, 264 }
 0x2d9   :  { %v8826_v43 = vpop.permute.xlu1 %2940 }
 0x2da   :  { %11340 = vst [vmem:[#allocation133_spill] sm:$0xff] %v8826_v43  ;;  %v8828_v58 = vpop.permute.xlu0 %2955 }
 0x2db   :  { %3127 = vbcast.lane.b32.xlu1 %v3125_v6, 256  ;;  %11341 = vst [vmem:[#allocation134_spill] sm:$0xff] %v8828_v58  ;;  %v8952_v58 = vld [vmem:[#allocation2 + $0x70] sm:$0x3] }
 0x2dc   :  { %3142 = vbcast.lane.b32.xlu0 %v3136_v15, 264 }
 0x2dd   :  { %v8838_v49 = vpop.permute.xlu1 %2951 }
 0x2de   :  { %11342 = vst [vmem:[#allocation135_spill] sm:$0xff] %v8838_v49  ;;  %v8840_v23 = vpop.permute.xlu0 %2966 }
 0x2df   :  { %3138 = vbcast.lane.b32.xlu1 %v3136_v15, 256  ;;  %11343 = vst [vmem:[#allocation136_spill] sm:$0xff] %v8840_v23 }
 0x2e0   :  { %3153 = vbcast.lane.b32.xlu0 %v3147_v32, 264 }
 0x2e1   :  { %v8846_v1 = vpop.permute.xlu1 %2962 }
 0x2e2   :  { %11344 = vst [vmem:[#allocation137_spill] sm:$0xff] %v8846_v1  ;;  %v8848_v60 = vpop.permute.xlu0 %2977 }
 0x2e3   :  { %3149 = vbcast.lane.b32.xlu1 %v3147_v32, 256  ;;  %11345 = vst [vmem:[#allocation138_spill] sm:$0xff] %v8848_v60  ;;  %v8870_v32 = vld [vmem:[#allocation2 + $0x58] sm:$0x3]  ;;  %v8930_v60 = vld [vmem:[#allocation2 + $0x6a] sm:$0x3] }
 0x2e4   :  { %3164 = vbcast.lane.b32.xlu0 %v3158_v53, 264 }
 0x2e5   :  { %v8858_v40 = vpop.permute.xlu1 %2973 }
 0x2e6   :  { %11346 = vst [vmem:[#allocation139_spill] sm:$0xff] %v8858_v40  ;;  %v8860_v63 = vpop.permute.xlu0 %2988 }
 0x2e7   :  { %3160 = vbcast.lane.b32.xlu1 %v3158_v53, 256  ;;  %11347 = vst [vmem:[#allocation140_spill] sm:$0xff] %v8860_v63  ;;  %v3268_v53 = vrot.slane %v8870_v32, %v7567_v10 }
 0x2e8   :  { %3175 = vbcast.lane.b32.xlu0 %v3169_v56, 264 }
 0x2e9   :  { %v8866_v6 = vpop.permute.xlu1 %2984 }
 0x2ea   :  { %11348 = vst [vmem:[#allocation141_spill] sm:$0xff] %v8866_v6  ;;  %v8868_v15 = vpop.permute.xlu0 %2999 }
 0x2eb   :  { %3171 = vbcast.lane.b32.xlu1 %v3169_v56, 256  ;;  %11349 = vst [vmem:[#allocation142_spill] sm:$0xff] %v8868_v15  ;;  %v8874_v56 = vld [vmem:[#allocation2 + $0x5a] sm:$0x3]  ;;  %v8910_v15 = vld [vmem:[#allocation2 + $0x64] sm:$0x3] }
 0x2ec   :  { %3186 = vbcast.lane.b32.xlu0 %v3180_v45, 264 }
 0x2ef   :  { %3182 = vbcast.lane.b32.xlu1 %v3180_v45, 256  ;;  %v3279_v45 = vrot.slane %v8874_v56, %v7567_v10 }
 0x2f0   :  { %3197 = vbcast.lane.b32.xlu0 %v3191_v47, 264 }
 0x2f3   :  { %3193 = vbcast.lane.b32.xlu1 %v3191_v47, 256  ;;  %v8878_v47 = vpop.permute.xlu1 %2995 }
 0x2f4   :  { %3208 = vbcast.lane.b32.xlu0 %v3202_v21, 264  ;;  %11350 = vst [vmem:[#allocation143_spill] sm:$0xff] %v8878_v47 }
 0x2f7   :  { %3204 = vbcast.lane.b32.xlu1 %v3202_v21, 256  ;;  %v8880_v21 = vpop.permute.xlu0 %3010 }
 0x2f8   :  { %3219 = vbcast.lane.b32.xlu0 %v3213_v9, 264  ;;  %11351 = vst [vmem:[#allocation144_spill] sm:$0xff] %v8880_v21 }
 0x2fb   :  { %3215 = vbcast.lane.b32.xlu1 %v3213_v9, 256  ;;  %v8882_v9 = vld [vmem:[#allocation2 + $0x5c] sm:$0x3] }
 0x2fc   :  { %3230 = vbcast.lane.b32.xlu0 %v3224_v42, 264 }
 0x2ff   :  { %3226 = vbcast.lane.b32.xlu1 %v3224_v42, 256  ;;  %v3290_v42 = vrot.slane %v8882_v9, %v7567_v10 }
 0x300   :  { %3241 = vbcast.lane.b32.xlu0 %v3235_v38, 264 }
 0x303   :  { %3237 = vbcast.lane.b32.xlu1 %v3235_v38, 256  ;;  %v8886_v38 = vpop.permute.xlu1 %3006 }
 0x304   :  { %3252 = vbcast.lane.b32.xlu0 %v3246_v34, 264  ;;  %11352 = vst [vmem:[#allocation145_spill] sm:$0xff] %v8886_v38 }
 0x307   :  { %3248 = vbcast.lane.b32.xlu1 %v3246_v34, 256  ;;  %v8888_v34 = vpop.permute.xlu0 %3021  ;;  %v8898_v47 = vpop.permute.xlu1 %3017 }
 0x308   :  { %3263 = vbcast.lane.b32.xlu0 %v3257_v51, 264  ;;  %11353 = vst [vmem:[#allocation146_spill] sm:$0xff] %v8888_v34  ;;  %11354 = vst [vmem:[#allocation147_spill] sm:$0xff] %v8898_v47  ;;  %v3334_v47 = vrot.slane %v8910_v15, %v7567_v10 }
 0x30b   :  { %3259 = vbcast.lane.b32.xlu1 %v3257_v51, 256  ;;  %v8890_v51 = vld [vmem:[#allocation2 + $0x5e] sm:$0x3]  ;;  %v8900_v6 = vpop.permute.xlu0 %3032  ;;  %v8906_v38 = vpop.permute.xlu1 %3028 }
 0x30c   :  { %3274 = vbcast.lane.b32.xlu0 %v3268_v53, 264  ;;  %v3301_v59 = vrot.slane %v8890_v51, %v7567_v10  ;;  %11355 = vst [vmem:[#allocation148_spill] sm:$0xff] %v8900_v6  ;;  %11356 = vst [vmem:[#allocation149_spill] sm:$0xff] %v8906_v38 }
 0x30f   :  { %3270 = vbcast.lane.b32.xlu1 %v3268_v53, 256  ;;  %v8894_v53 = vld [vmem:[#allocation2 + $0x60] sm:$0x3]  ;;  %v8918_v40 = vpop.permute.xlu1 %3039 }
 0x310   :  { %3285 = vbcast.lane.b32.xlu0 %v3279_v45, 264  ;;  %v3312_v21 = vrot.slane %v8894_v53, %v7567_v10  ;;  %11358 = vst [vmem:[#allocation151_spill] sm:$0xff] %v8918_v40  ;;  %v3367_v40 = vrot.slane %v8930_v60, %v7567_v10 }
 0x313   :  { %3281 = vbcast.lane.b32.xlu1 %v3279_v45, 256  ;;  %v8902_v45 = vld [vmem:[#allocation2 + $0x62] sm:$0x3]  ;;  %v8926_v38 = vpop.permute.xlu1 %3050 }
 0x314   :  { %3296 = vbcast.lane.b32.xlu0 %v3290_v42, 264  ;;  %v3323_v34 = vrot.slane %v8902_v45, %v7567_v10  ;;  %11360 = vst [vmem:[#allocation153_spill] sm:$0xff] %v8926_v38 }
 0x317   :  { %3292 = vbcast.lane.b32.xlu1 %v3290_v42, 256  ;;  %v8908_v42 = vpop.permute.xlu0 %3043  ;;  %v8940_v23 = vpop.permute.xlu1 %3061 }
 0x318   :  { %3307 = vbcast.lane.b32.xlu0 %v3301_v59, 264  ;;  %11357 = vst [vmem:[#allocation150_spill] sm:$0xff] %v8908_v42  ;;  %11362 = vst [vmem:[#allocation155_spill] sm:$0xff] %v8940_v23  ;;  %v3400_v23 = vrot.slane %v8952_v58, %v7567_v10 }
 0x31b   :  { %3303 = vbcast.lane.b32.xlu1 %v3301_v59, 256  ;;  %v8914_v59 = vld [vmem:[#allocation2 + $0x66] sm:$0x3]  ;;  %v8920_v63 = vpop.permute.xlu0 %3054 }
 0x31c   :  { %3318 = vbcast.lane.b32.xlu0 %v3312_v21, 264  ;;  %v3345_v6 = vrot.slane %v8914_v59, %v7567_v10  ;;  %11359 = vst [vmem:[#allocation152_spill] sm:$0xff] %v8920_v63 }
 0x31f   :  { %3314 = vbcast.lane.b32.xlu1 %v3312_v21, 256  ;;  %v8922_v21 = vld [vmem:[#allocation2 + $0x68] sm:$0x3] }
 0x320   :  { %3329 = vbcast.lane.b32.xlu0 %v3323_v34, 264  ;;  %v3356_v42 = vrot.slane %v8922_v21, %v7567_v10 }
 0x323   :  { %3325 = vbcast.lane.b32.xlu1 %v3323_v34, 256  ;;  %v8928_v34 = vpop.permute.xlu0 %3065 }
 0x324   :  { %3340 = vbcast.lane.b32.xlu0 %v3334_v47, 264  ;;  %11361 = vst [vmem:[#allocation154_spill] sm:$0xff] %v8928_v34 }
 0x327   :  { %3336 = vbcast.lane.b32.xlu1 %v3334_v47, 256  ;;  %v8936_v47 = vld [vmem:[#allocation2 + $0x6c] sm:$0x3] }
 0x328   :  { %3351 = vbcast.lane.b32.xlu0 %v3345_v6, 264  ;;  %v3378_v1 = vrot.slane %v8936_v47, %v7567_v10 }
 0x32b   :  { %3347 = vbcast.lane.b32.xlu1 %v3345_v6, 256  ;;  %v8944_v6 = vld [vmem:[#allocation2 + $0x6e] sm:$0x3] }
 0x32c   :  { %3362 = vbcast.lane.b32.xlu0 %v3356_v42, 264  ;;  %v3389_v38 = vrot.slane %v8944_v6, %v7567_v10 }
 0x32f   :  { %3358 = vbcast.lane.b32.xlu1 %v3356_v42, 256  ;;  %v8934_v63 = vpop.xlane.xlu0 %2041  ;;  %v8948_v42 = vpop.permute.xlu1 %3072 }
 0x330   :  { %3373 = vbcast.lane.b32.xlu0 %v3367_v40, 264  ;;  %11364 = vst [vmem:[#allocation157_spill] sm:$0xff] %v8948_v42  ;;  %v3411_v42 = vrot.slane %v8960_v46, %v7567_v10 }
 0x333   :  { %3369 = vbcast.lane.b32.xlu1 %v3367_v40, 256  ;;  %v8942_v34 = vpop.xlane.xlu0 %2044 }
 0x334   :  { %11363 = vst [vmem:[#allocation156_spill] sm:$0xff] %v8942_v34  ;;  %3384 = vbcast.lane.b32.xlu0 %v3378_v1, 264  ;;  %v4000_v34 = vrot.slane %v7250_v30, %v11381_v16 }
 0x337   :  { %3380 = vbcast.lane.b32.xlu1 %v3378_v1, 256  ;;  %v8950_v49 = vpop.xlane.xlu0 %2050 }
 0x338   :  { %11365 = vst [vmem:[#allocation158_spill] sm:$0xff] %v8950_v49  ;;  %3395 = vbcast.lane.b32.xlu0 %v3389_v38, 264 }
 0x33b   :  { %v8956_v40 = vpop.xlane.xlu1 %2038  ;;  %3391 = vbcast.lane.b32.xlu1 %v3389_v38, 256  ;;  %v8958_v43 = vpop.xlane.xlu0 %2056 }
 0x33c   :  { %11366 = vst [vmem:[#allocation159_spill] sm:$0xff] %v8958_v43  ;;  %3406 = vbcast.lane.b32.xlu0 %v3400_v23, 264  ;;  %7172 = vrcp.f32 %v8956_v40 }
 0x33d   :  { %7174 = vrcp.f32 %v8934_v63 }
 0x33f   :  { %v8964_v1 = vpop.xlane.xlu1 %2047  ;;  %3402 = vbcast.lane.b32.xlu1 %v3400_v23, 256  ;;  %v8966_v49 = vpop.permute.xlu0 %3076 }
 0x340   :  { %11367 = vst [vmem:[#allocation160_spill] sm:$0xff] %v8964_v1  ;;  %11368 = vst [vmem:[#allocation161_spill] sm:$0xff] %v8966_v49  ;;  %3417 = vbcast.lane.b32.xlu0 %v3411_v42, 264  ;;  %v3433_v1 = vrot.slane %v8976_v36, %v7567_v10 }
 0x343   :  { %v8972_v38 = vpop.xlane.xlu1 %2053  ;;  %3413 = vbcast.lane.b32.xlu1 %v3411_v42, 256  ;;  %v8974_v43 = vpop.permute.xlu0 %3087 }
 0x344   :  { %11369 = vst [vmem:[#allocation162_spill] sm:$0xff] %v8972_v38  ;;  %11370 = vst [vmem:[#allocation163_spill] sm:$0xff] %v8974_v43  ;;  %3428 = vbcast.lane.b32.xlu0 %v3422_v27, 264  ;;  %v3444_v38 = vrot.slane %v8984_v31, %v7567_v10 }
 0x347   :  { %3424 = vbcast.lane.b32.xlu1 %v3422_v27, 256  ;;  %v8980_v23 = vpop.xlane.xlu1 %2059  ;;  %v8982_v49 = vpop.permute.xlu0 %3098  ;;  %v3455_v27 = vrot.slane %v8992_v61, %v7567_v10 }
 0x348   :  { %11371 = vst [vmem:[#allocation164_spill] sm:$0xff] %v8980_v23  ;;  %11372 = vst [vmem:[#allocation165_spill] sm:$0xff] %v8982_v49  ;;  %3439 = vbcast.lane.b32.xlu0 %v3433_v1, 264 }
 0x34b   :  { %3435 = vbcast.lane.b32.xlu1 %v3433_v1, 256  ;;  %v8988_v42 = vpop.permute.xlu1 %3083  ;;  %v8990_v43 = vpop.permute.xlu0 %3109  ;;  %v3466_v1 = vrot.slane %v9000_v41, %v7567_v10 }
 0x34c   :  { %11373 = vst [vmem:[#allocation166_spill] sm:$0xff] %v8988_v42  ;;  %11374 = vst [vmem:[#allocation167_spill] sm:$0xff] %v8990_v43  ;;  %3450 = vbcast.lane.b32.xlu0 %v3444_v38, 264 }
 0x34f   :  { %3446 = vbcast.lane.b32.xlu1 %v3444_v38, 256  ;;  %v8996_v23 = vpop.permute.xlu1 %3094  ;;  %v8998_v49 = vpop.permute.xlu0 %3120  ;;  %v3477_v38 = vrot.slane %v9008_v55, %v7567_v10 }
 0x350   :  { %11375 = vst [vmem:[#allocation168_spill] sm:$0xff] %v8996_v23  ;;  %11376 = vst [vmem:[#allocation169_spill] sm:$0xff] %v8998_v49  ;;  %3461 = vbcast.lane.b32.xlu0 %v3455_v27, 264 }
 0x353   :  { %3457 = vbcast.lane.b32.xlu1 %v3455_v27, 256  ;;  %v9004_v42 = vpop.permute.xlu1 %3105  ;;  %v9006_v43 = vpop.permute.xlu0 %3131 }
 0x354   :  { %11377 = vst [vmem:[#allocation170_spill] sm:$0xff] %v9004_v42  ;;  %11378 = vst [vmem:[#allocation171_spill] sm:$0xff] %v9006_v43  ;;  %3472 = vbcast.lane.b32.xlu0 %v3466_v1, 264  ;;  %v7251_v43 = vld [vmem:[#allocation2 + $0x2] sm:$0x3] }
 0x355   :  { %v4011_v52 = vrot.slane %v7251_v43, %v11381_v16 }
 0x357   :  { %3468 = vbcast.lane.b32.xlu1 %v3466_v1, 256  ;;  %v9012_v23 = vpop.permute.xlu1 %3116  ;;  %v9014_v49 = vpop.permute.xlu0 %3142 }
 0x358   :  { %11379 = vst [vmem:[#allocation172_spill] sm:$0xff] %v9012_v23  ;;  %11380 = vst [vmem:[#allocation173_spill] sm:$0xff] %v9014_v49  ;;  %3483 = vbcast.lane.b32.xlu0 %v3477_v38, 264  ;;  %v7252_v49 = vld [vmem:[#allocation2 + $0x4] sm:$0x3] }
 0x359   :  { %v4022_v23 = vrot.slane %v7252_v49, %v11381_v16 }
 0x35b   :  { %3479 = vbcast.lane.b32.xlu1 %v3477_v38, 256  ;;  %v9017_v27 = vpop.permute.xlu1 %3127  ;;  %v9019_v42 = vpop.permute.xlu0 %3153 }
 0x35c   :  { %11382 = vst [vmem:[#allocation44_spill] sm:$0xff] %v9017_v27  ;;  %11383 = vst [vmem:[#allocation174_spill] sm:$0xff] %v9019_v42  ;;  %4006 = vbcast.lane.b32.xlu0 %v4000_v34, 264  ;;  %v11388_v42 = vld [vmem:[#allocation33_spill] sm:$0xff] }
 0x35d   :  { %v4033_v27 = vrot.slane %v11388_v42, %v11381_v16 }
 0x35f   :  { %4002 = vbcast.lane.b32.xlu1 %v4000_v34, 256  ;;  %v9022_v25 = vpop.permute.xlu1 %3138  ;;  %v9024_v1 = vpop.permute.xlu0 %3164 }
 0x360   :  { %11384 = vst [vmem:[#allocation175_spill] sm:$0xff] %v9022_v25  ;;  %11385 = vst [vmem:[#allocation176_spill] sm:$0xff] %v9024_v1  ;;  %4017 = vbcast.lane.b32.xlu0 %v4011_v52, 264  ;;  %v11391_v1 = vld [vmem:[#allocation98_spill] sm:$0xff] }
 0x361   :  { %v4044_v25 = vrot.slane %v11391_v1, %v11381_v16 }
 0x363   :  { %4013 = vbcast.lane.b32.xlu1 %v4011_v52, 256  ;;  %v9027_v30 = vpop.permute.xlu1 %3149  ;;  %v9029_v38 = vpop.permute.xlu0 %3175 }
 0x364   :  { %11386 = vst [vmem:[#allocation177_spill] sm:$0xff] %v9027_v30  ;;  %11387 = vst [vmem:[#allocation178_spill] sm:$0xff] %v9029_v38  ;;  %4028 = vbcast.lane.b32.xlu0 %v4022_v23, 264  ;;  %v11394_v38 = vld [vmem:[#allocation99_spill] sm:$0xff] }
 0x365   :  { %v4055_v30 = vrot.slane %v11394_v38, %v11381_v16 }
 0x367   :  { %4024 = vbcast.lane.b32.xlu1 %v4022_v23, 256  ;;  %v9033_v43 = vpop.permute.xlu1 %3160  ;;  %v9035_v34 = vpop.permute.xlu0 %3186 }
 0x368   :  { %11389 = vst [vmem:[#allocation33_spill] sm:$0xff] %v9033_v43  ;;  %11390 = vst [vmem:[#allocation179_spill] sm:$0xff] %v9035_v34  ;;  %4039 = vbcast.lane.b32.xlu0 %v4033_v27, 264  ;;  %v11397_v34 = vld [vmem:[#allocation100_spill] sm:$0xff] }
 0x369   :  { %v4066_v43 = vrot.slane %v11397_v34, %v11381_v16 }
 0x36b   :  { %4035 = vbcast.lane.b32.xlu1 %v4033_v27, 256  ;;  %v9039_v49 = vpop.permute.xlu1 %3171  ;;  %v9041_v52 = vpop.permute.xlu0 %3197 }
 0x36c   :  { %11392 = vst [vmem:[#allocation98_spill] sm:$0xff] %v9039_v49  ;;  %11393 = vst [vmem:[#allocation180_spill] sm:$0xff] %v9041_v52  ;;  %4050 = vbcast.lane.b32.xlu0 %v4044_v25, 264  ;;  %v11400_v52 = vld [vmem:[#allocation101_spill] sm:$0xff] }
 0x36d   :  { %v4077_v49 = vrot.slane %v11400_v52, %v11381_v16 }
 0x36f   :  { %4046 = vbcast.lane.b32.xlu1 %v4044_v25, 256  ;;  %v9045_v42 = vpop.permute.xlu1 %3182  ;;  %v9047_v23 = vpop.permute.xlu0 %3208 }
 0x370   :  { %11395 = vst [vmem:[#allocation99_spill] sm:$0xff] %v9045_v42  ;;  %11396 = vst [vmem:[#allocation181_spill] sm:$0xff] %v9047_v23  ;;  %4061 = vbcast.lane.b32.xlu0 %v4055_v30, 264  ;;  %v11403_v23 = vld [vmem:[#allocation102_spill] sm:$0xff] }
 0x371   :  { %v4088_v42 = vrot.slane %v11403_v23, %v11381_v16 }
 0x373   :  { %4057 = vbcast.lane.b32.xlu1 %v4055_v30, 256  ;;  %v9051_v1 = vpop.permute.xlu1 %3193  ;;  %v9053_v27 = vpop.permute.xlu0 %3219 }
 0x374   :  { %11398 = vst [vmem:[#allocation100_spill] sm:$0xff] %v9051_v1  ;;  %11399 = vst [vmem:[#allocation182_spill] sm:$0xff] %v9053_v27  ;;  %4072 = vbcast.lane.b32.xlu0 %v4066_v43, 264  ;;  %v11406_v27 = vld [vmem:[#allocation103_spill] sm:$0xff] }
 0x375   :  { %v4099_v1 = vrot.slane %v11406_v27, %v11381_v16 }
 0x377   :  { %4068 = vbcast.lane.b32.xlu1 %v4066_v43, 256  ;;  %v9057_v38 = vpop.permute.xlu1 %3204  ;;  %v9059_v25 = vpop.permute.xlu0 %3230 }
 0x378   :  { %11401 = vst [vmem:[#allocation101_spill] sm:$0xff] %v9057_v38  ;;  %11402 = vst [vmem:[#allocation183_spill] sm:$0xff] %v9059_v25  ;;  %4083 = vbcast.lane.b32.xlu0 %v4077_v49, 264  ;;  %v11409_v25 = vld [vmem:[#allocation104_spill] sm:$0xff] }
 0x379   :  { %v4110_v38 = vrot.slane %v11409_v25, %v11381_v16 }
 0x37b   :  { %4079 = vbcast.lane.b32.xlu1 %v4077_v49, 256  ;;  %v9063_v34 = vpop.permute.xlu1 %3215  ;;  %v9065_v30 = vpop.permute.xlu0 %3241 }
 0x37c   :  { %11404 = vst [vmem:[#allocation102_spill] sm:$0xff] %v9063_v34  ;;  %11405 = vst [vmem:[#allocation184_spill] sm:$0xff] %v9065_v30  ;;  %4094 = vbcast.lane.b32.xlu0 %v4088_v42, 264  ;;  %v11412_v30 = vld [vmem:[#allocation105_spill] sm:$0xff] }
 0x37d   :  { %v4121_v34 = vrot.slane %v11412_v30, %v11381_v16 }
 0x37f   :  { %4090 = vbcast.lane.b32.xlu1 %v4088_v42, 256  ;;  %v9069_v52 = vpop.permute.xlu1 %3226  ;;  %v9071_v43 = vpop.permute.xlu0 %3252 }
 0x380   :  { %11407 = vst [vmem:[#allocation103_spill] sm:$0xff] %v9069_v52  ;;  %11408 = vst [vmem:[#allocation185_spill] sm:$0xff] %v9071_v43  ;;  %4105 = vbcast.lane.b32.xlu0 %v4099_v1, 264  ;;  %v11415_v43 = vld [vmem:[#allocation106_spill] sm:$0xff] }
 0x381   :  { %v4132_v52 = vrot.slane %v11415_v43, %v11381_v16 }
 0x383   :  { %4101 = vbcast.lane.b32.xlu1 %v4099_v1, 256  ;;  %v9075_v23 = vpop.permute.xlu1 %3237  ;;  %v9077_v49 = vpop.permute.xlu0 %3263 }
 0x384   :  { %11410 = vst [vmem:[#allocation104_spill] sm:$0xff] %v9075_v23  ;;  %11411 = vst [vmem:[#allocation186_spill] sm:$0xff] %v9077_v49  ;;  %4116 = vbcast.lane.b32.xlu0 %v4110_v38, 264  ;;  %v11418_v49 = vld [vmem:[#allocation107_spill] sm:$0xff] }
 0x385   :  { %v4143_v23 = vrot.slane %v11418_v49, %v11381_v16 }
 0x387   :  { %4112 = vbcast.lane.b32.xlu1 %v4110_v38, 256  ;;  %v9081_v27 = vpop.permute.xlu1 %3248  ;;  %v9083_v42 = vpop.permute.xlu0 %3274 }
 0x388   :  { %11413 = vst [vmem:[#allocation105_spill] sm:$0xff] %v9081_v27  ;;  %11414 = vst [vmem:[#allocation187_spill] sm:$0xff] %v9083_v42  ;;  %4127 = vbcast.lane.b32.xlu0 %v4121_v34, 264  ;;  %v11421_v42 = vld [vmem:[#allocation108_spill] sm:$0xff] }
 0x389   :  { %v4154_v27 = vrot.slane %v11421_v42, %v11381_v16 }
 0x38b   :  { %4123 = vbcast.lane.b32.xlu1 %v4121_v34, 256  ;;  %v9087_v25 = vpop.permute.xlu1 %3259  ;;  %v9089_v1 = vpop.permute.xlu0 %3285 }
 0x38c   :  { %11416 = vst [vmem:[#allocation106_spill] sm:$0xff] %v9087_v25  ;;  %11417 = vst [vmem:[#allocation188_spill] sm:$0xff] %v9089_v1  ;;  %4138 = vbcast.lane.b32.xlu0 %v4132_v52, 264  ;;  %v11424_v1 = vld [vmem:[#allocation109_spill] sm:$0xff] }
 0x38d   :  { %v4165_v25 = vrot.slane %v11424_v1, %v11381_v16 }
 0x38f   :  { %4134 = vbcast.lane.b32.xlu1 %v4132_v52, 256  ;;  %v9093_v30 = vpop.permute.xlu1 %3270  ;;  %v9095_v38 = vpop.permute.xlu0 %3296 }
 0x390   :  { %11419 = vst [vmem:[#allocation107_spill] sm:$0xff] %v9093_v30  ;;  %11420 = vst [vmem:[#allocation189_spill] sm:$0xff] %v9095_v38  ;;  %4149 = vbcast.lane.b32.xlu0 %v4143_v23, 264  ;;  %v11427_v38 = vld [vmem:[#allocation110_spill] sm:$0xff] }
 0x391   :  { %v4176_v30 = vrot.slane %v11427_v38, %v11381_v16 }
 0x393   :  { %4145 = vbcast.lane.b32.xlu1 %v4143_v23, 256  ;;  %v9099_v43 = vpop.permute.xlu1 %3281  ;;  %v9101_v34 = vpop.permute.xlu0 %3307 }
 0x394   :  { %11422 = vst [vmem:[#allocation108_spill] sm:$0xff] %v9099_v43  ;;  %11423 = vst [vmem:[#allocation190_spill] sm:$0xff] %v9101_v34  ;;  %4160 = vbcast.lane.b32.xlu0 %v4154_v27, 264  ;;  %v11430_v34 = vld [vmem:[#allocation111_spill] sm:$0xff] }
 0x395   :  { %v4187_v43 = vrot.slane %v11430_v34, %v11381_v16 }
 0x397   :  { %4156 = vbcast.lane.b32.xlu1 %v4154_v27, 256  ;;  %v9105_v49 = vpop.permute.xlu1 %3292  ;;  %v9107_v52 = vpop.permute.xlu0 %3318 }
 0x398   :  { %11425 = vst [vmem:[#allocation109_spill] sm:$0xff] %v9105_v49  ;;  %11426 = vst [vmem:[#allocation191_spill] sm:$0xff] %v9107_v52  ;;  %4171 = vbcast.lane.b32.xlu0 %v4165_v25, 264  ;;  %v11433_v52 = vld [vmem:[#allocation112_spill] sm:$0xff] }
 0x399   :  { %v4198_v49 = vrot.slane %v11433_v52, %v11381_v16 }
 0x39b   :  { %4167 = vbcast.lane.b32.xlu1 %v4165_v25, 256  ;;  %v9111_v42 = vpop.permute.xlu1 %3303  ;;  %v9113_v23 = vpop.permute.xlu0 %3329 }
 0x39c   :  { %11428 = vst [vmem:[#allocation110_spill] sm:$0xff] %v9111_v42  ;;  %11429 = vst [vmem:[#allocation192_spill] sm:$0xff] %v9113_v23  ;;  %4182 = vbcast.lane.b32.xlu0 %v4176_v30, 264  ;;  %v11436_v23 = vld [vmem:[#allocation113_spill] sm:$0xff] }
 0x39d   :  { %v4209_v42 = vrot.slane %v11436_v23, %v11381_v16 }
 0x39f   :  { %4178 = vbcast.lane.b32.xlu1 %v4176_v30, 256  ;;  %v9117_v1 = vpop.permute.xlu1 %3314  ;;  %v9119_v27 = vpop.permute.xlu0 %3340 }
 0x3a0   :  { %11431 = vst [vmem:[#allocation111_spill] sm:$0xff] %v9117_v1  ;;  %11432 = vst [vmem:[#allocation193_spill] sm:$0xff] %v9119_v27  ;;  %4193 = vbcast.lane.b32.xlu0 %v4187_v43, 264  ;;  %v11439_v27 = vld [vmem:[#allocation114_spill] sm:$0xff] }
 0x3a1   :  { %v4220_v1 = vrot.slane %v11439_v27, %v11381_v16 }
 0x3a3   :  { %4189 = vbcast.lane.b32.xlu1 %v4187_v43, 256  ;;  %v9123_v38 = vpop.permute.xlu1 %3325  ;;  %v9125_v25 = vpop.permute.xlu0 %3351 }
 0x3a4   :  { %11434 = vst [vmem:[#allocation112_spill] sm:$0xff] %v9123_v38  ;;  %11435 = vst [vmem:[#allocation194_spill] sm:$0xff] %v9125_v25  ;;  %4204 = vbcast.lane.b32.xlu0 %v4198_v49, 264  ;;  %v11442_v25 = vld [vmem:[#allocation115_spill] sm:$0xff] }
 0x3a5   :  { %v4231_v38 = vrot.slane %v11442_v25, %v11381_v16 }
 0x3a7   :  { %4200 = vbcast.lane.b32.xlu1 %v4198_v49, 256  ;;  %v9129_v34 = vpop.permute.xlu1 %3336  ;;  %v9131_v30 = vpop.permute.xlu0 %3362 }
 0x3a8   :  { %11437 = vst [vmem:[#allocation113_spill] sm:$0xff] %v9129_v34  ;;  %11438 = vst [vmem:[#allocation195_spill] sm:$0xff] %v9131_v30  ;;  %4215 = vbcast.lane.b32.xlu0 %v4209_v42, 264  ;;  %v11445_v30 = vld [vmem:[#allocation116_spill] sm:$0xff] }
 0x3a9   :  { %v4242_v34 = vrot.slane %v11445_v30, %v11381_v16 }
 0x3ab   :  { %4211 = vbcast.lane.b32.xlu1 %v4209_v42, 256  ;;  %v9135_v52 = vpop.permute.xlu1 %3347  ;;  %v9137_v43 = vpop.permute.xlu0 %3373 }
 0x3ac   :  { %11440 = vst [vmem:[#allocation114_spill] sm:$0xff] %v9135_v52  ;;  %11441 = vst [vmem:[#allocation196_spill] sm:$0xff] %v9137_v43  ;;  %4226 = vbcast.lane.b32.xlu0 %v4220_v1, 264  ;;  %v11448_v43 = vld [vmem:[#allocation117_spill] sm:$0xff] }
 0x3ad   :  { %v4253_v52 = vrot.slane %v11448_v43, %v11381_v16 }
 0x3af   :  { %4222 = vbcast.lane.b32.xlu1 %v4220_v1, 256  ;;  %v9141_v23 = vpop.permute.xlu1 %3358  ;;  %v9143_v49 = vpop.permute.xlu0 %3384 }
 0x3b0   :  { %11443 = vst [vmem:[#allocation115_spill] sm:$0xff] %v9141_v23  ;;  %11444 = vst [vmem:[#allocation197_spill] sm:$0xff] %v9143_v49  ;;  %4237 = vbcast.lane.b32.xlu0 %v4231_v38, 264  ;;  %v11451_v49 = vld [vmem:[#allocation118_spill] sm:$0xff] }
 0x3b1   :  { %v4264_v23 = vrot.slane %v11451_v49, %v11381_v16 }
 0x3b3   :  { %4233 = vbcast.lane.b32.xlu1 %v4231_v38, 256  ;;  %v9147_v27 = vpop.permute.xlu1 %3369  ;;  %v9149_v42 = vpop.permute.xlu0 %3395 }
 0x3b4   :  { %11446 = vst [vmem:[#allocation116_spill] sm:$0xff] %v9147_v27  ;;  %11447 = vst [vmem:[#allocation198_spill] sm:$0xff] %v9149_v42  ;;  %4248 = vbcast.lane.b32.xlu0 %v4242_v34, 264  ;;  %v11454_v42 = vld [vmem:[#allocation119_spill] sm:$0xff] }
 0x3b5   :  { %v4275_v27 = vrot.slane %v11454_v42, %v11381_v16 }
 0x3b7   :  { %4244 = vbcast.lane.b32.xlu1 %v4242_v34, 256  ;;  %v9153_v25 = vpop.permute.xlu1 %3380  ;;  %v9155_v1 = vpop.permute.xlu0 %3406 }
 0x3b8   :  { %11449 = vst [vmem:[#allocation117_spill] sm:$0xff] %v9153_v25  ;;  %11450 = vst [vmem:[#allocation199_spill] sm:$0xff] %v9155_v1  ;;  %4259 = vbcast.lane.b32.xlu0 %v4253_v52, 264  ;;  %v11457_v1 = vld [vmem:[#allocation120_spill] sm:$0xff] }
 0x3b9   :  { %v4286_v25 = vrot.slane %v11457_v1, %v11381_v16 }
 0x3bb   :  { %4255 = vbcast.lane.b32.xlu1 %v4253_v52, 256  ;;  %v9159_v30 = vpop.permute.xlu1 %3391  ;;  %v9161_v38 = vpop.permute.xlu0 %3417 }
 0x3bc   :  { %11452 = vst [vmem:[#allocation118_spill] sm:$0xff] %v9159_v30  ;;  %11453 = vst [vmem:[#allocation200_spill] sm:$0xff] %v9161_v38  ;;  %4270 = vbcast.lane.b32.xlu0 %v4264_v23, 264  ;;  %v4297_v38 = vrot.slane %v8754_v26, %v11381_v16  ;;  %v4462_v30 = vrot.slane %v8854_v2, %v11381_v16 }
 0x3bf   :  { %4266 = vbcast.lane.b32.xlu1 %v4264_v23, 256  ;;  %v9165_v43 = vpop.permute.xlu1 %3402  ;;  %v9167_v34 = vpop.permute.xlu0 %3428 }
 0x3c0   :  { %11455 = vst [vmem:[#allocation119_spill] sm:$0xff] %v9165_v43  ;;  %11456 = vst [vmem:[#allocation201_spill] sm:$0xff] %v9167_v34  ;;  %4281 = vbcast.lane.b32.xlu0 %v4275_v27, 264  ;;  %v4308_v34 = vrot.slane %v8762_v8, %v11381_v16  ;;  %v4451_v43 = vrot.slane %v8850_v39, %v11381_v16 }
 0x3c3   :  { %4277 = vbcast.lane.b32.xlu1 %v4275_v27, 256  ;;  %v9171_v49 = vpop.permute.xlu1 %3413  ;;  %v9173_v52 = vpop.permute.xlu0 %3439 }
 0x3c4   :  { %11458 = vst [vmem:[#allocation120_spill] sm:$0xff] %v9171_v49  ;;  %11459 = vst [vmem:[#allocation202_spill] sm:$0xff] %v9173_v52  ;;  %4292 = vbcast.lane.b32.xlu0 %v4286_v25, 264  ;;  %v4319_v52 = vrot.slane %v8770_v29, %v11381_v16  ;;  %v4440_v49 = vrot.slane %v8842_v22, %v11381_v16 }
 0x3c7   :  { %4288 = vbcast.lane.b32.xlu1 %v4286_v25, 256  ;;  %v9177_v42 = vpop.permute.xlu1 %3424  ;;  %v9179_v23 = vpop.permute.xlu0 %3450 }
 0x3c8   :  { %11460 = vst [vmem:[#allocation203_spill] sm:$0xff] %v9177_v42  ;;  %11461 = vst [vmem:[#allocation204_spill] sm:$0xff] %v9179_v23  ;;  %4303 = vbcast.lane.b32.xlu0 %v4297_v38, 264  ;;  %v4330_v23 = vrot.slane %v8774_v44, %v11381_v16  ;;  %v4429_v42 = vrot.slane %v8834_v7, %v11381_v16 }
 0x3cb   :  { %4299 = vbcast.lane.b32.xlu1 %v4297_v38, 256  ;;  %v9183_v1 = vpop.permute.xlu1 %3435  ;;  %v9185_v27 = vpop.permute.xlu0 %3461 }
 0x3cc   :  { %11462 = vst [vmem:[#allocation205_spill] sm:$0xff] %v9183_v1  ;;  %11463 = vst [vmem:[#allocation206_spill] sm:$0xff] %v9185_v27  ;;  %4314 = vbcast.lane.b32.xlu0 %v4308_v34, 264  ;;  %v4341_v27 = vrot.slane %v8782_v37, %v11381_v16  ;;  %v4418_v1 = vrot.slane %v8830_v33, %v11381_v16 }
 0x3cf   :  { %4310 = vbcast.lane.b32.xlu1 %v4308_v34, 256  ;;  %v9189_v26 = vpop.permute.xlu1 %3446  ;;  %v9191_v25 = vpop.permute.xlu0 %3472 }
 0x3d0   :  { %11464 = vst [vmem:[#allocation207_spill] sm:$0xff] %v9189_v26  ;;  %11465 = vst [vmem:[#allocation208_spill] sm:$0xff] %v9191_v25  ;;  %4325 = vbcast.lane.b32.xlu0 %v4319_v52, 264  ;;  %v4352_v25 = vrot.slane %v8790_v20, %v11381_v16  ;;  %v4407_v26 = vrot.slane %v8822_v14, %v11381_v16 }
 0x3d3   :  { %4321 = vbcast.lane.b32.xlu1 %v4319_v52, 256  ;;  %v9195_v8 = vpop.permute.xlu1 %3457  ;;  %v9197_v38 = vpop.permute.xlu0 %3483 }
 0x3d4   :  { %11466 = vst [vmem:[#allocation209_spill] sm:$0xff] %v9195_v8  ;;  %11467 = vst [vmem:[#allocation210_spill] sm:$0xff] %v9197_v38  ;;  %4336 = vbcast.lane.b32.xlu0 %v4330_v23, 264  ;;  %v4363_v38 = vrot.slane %v8794_v3, %v11381_v16  ;;  %v4396_v8 = vrot.slane %v8814_v28, %v11381_v16 }
 0x3d7   :  { %4332 = vbcast.lane.b32.xlu1 %v4330_v23, 256  ;;  %v9201_v29 = vpop.permute.xlu1 %3468  ;;  %v9203_v34 = vpop.permute.xlu0 %4006 }
 0x3d8   :  { %11468 = vst [vmem:[#allocation211_spill] sm:$0xff] %v9201_v29  ;;  %4347 = vbcast.lane.b32.xlu0 %v4341_v27, 264  ;;  %v4374_v29 = vrot.slane %v8802_v24, %v11381_v16 }
 0x3db   :  { %4343 = vbcast.lane.b32.xlu1 %v4341_v27, 256  ;;  %v9207_v44 = vpop.permute.xlu1 %3479  ;;  %v9209_v52 = vpop.permute.xlu0 %4017 }
 0x3dc   :  { %11469 = vst [vmem:[#allocation212_spill] sm:$0xff] %v9207_v44  ;;  %4358 = vbcast.lane.b32.xlu0 %v4352_v25, 264  ;;  %v4385_v44 = vrot.slane %v8810_v0, %v11381_v16 }
 0x3df   :  { %4354 = vbcast.lane.b32.xlu1 %v4352_v25, 256  ;;  %v9213_v37 = vpop.permute.xlu1 %4002  ;;  %v9215_v23 = vpop.permute.xlu0 %4028 }
 0x3e0   :  { %4369 = vbcast.lane.b32.xlu0 %v4363_v38, 264 }
 0x3e3   :  { %4365 = vbcast.lane.b32.xlu1 %v4363_v38, 256  ;;  %v9219_v20 = vpop.permute.xlu1 %4013  ;;  %v9221_v27 = vpop.permute.xlu0 %4039 }
 0x3e4   :  { %4380 = vbcast.lane.b32.xlu0 %v4374_v29, 264 }
 0x3e7   :  { %4376 = vbcast.lane.b32.xlu1 %v4374_v29, 256  ;;  %v9225_v3 = vpop.permute.xlu1 %4024  ;;  %v9227_v25 = vpop.permute.xlu0 %4050 }
 0x3e8   :  { %4391 = vbcast.lane.b32.xlu0 %v4385_v44, 264 }
 0x3eb   :  { %4387 = vbcast.lane.b32.xlu1 %v4385_v44, 256  ;;  %v9231_v24 = vpop.permute.xlu1 %4035  ;;  %v9233_v38 = vpop.permute.xlu0 %4061 }
 0x3ec   :  { %4402 = vbcast.lane.b32.xlu0 %v4396_v8, 264 }
 0x3ef   :  { %4398 = vbcast.lane.b32.xlu1 %v4396_v8, 256  ;;  %v9237_v0 = vpop.permute.xlu1 %4046  ;;  %v9239_v29 = vpop.permute.xlu0 %4072 }
 0x3f0   :  { %4413 = vbcast.lane.b32.xlu0 %v4407_v26, 264 }
 0x3f3   :  { %4409 = vbcast.lane.b32.xlu1 %v4407_v26, 256  ;;  %v9243_v28 = vpop.permute.xlu1 %4057  ;;  %v9245_v44 = vpop.permute.xlu0 %4083 }
 0x3f4   :  { %4424 = vbcast.lane.b32.xlu0 %v4418_v1, 264 }
 0x3f7   :  { %4420 = vbcast.lane.b32.xlu1 %v4418_v1, 256  ;;  %v9249_v14 = vpop.permute.xlu1 %4068  ;;  %v9251_v8 = vpop.permute.xlu0 %4094 }
 0x3f8   :  { %4435 = vbcast.lane.b32.xlu0 %v4429_v42, 264 }
 0x3fb   :  { %4431 = vbcast.lane.b32.xlu1 %v4429_v42, 256  ;;  %v9255_v33 = vpop.permute.xlu1 %4079  ;;  %v9257_v26 = vpop.permute.xlu0 %4105 }
 0x3fc   :  { %11470 = vst [vmem:[#allocation213_spill] sm:$0xff] %v9257_v26  ;;  %4446 = vbcast.lane.b32.xlu0 %v4440_v49, 264  ;;  %v4473_v26 = vrot.slane %v8862_v13, %v11381_v16 }
 0x3ff   :  { %4442 = vbcast.lane.b32.xlu1 %v4440_v49, 256  ;;  %v9261_v7 = vpop.permute.xlu1 %4090  ;;  %v9263_v1 = vpop.permute.xlu0 %4116 }
 0x400   :  { %11471 = vst [vmem:[#allocation214_spill] sm:$0xff] %v9263_v1  ;;  %4457 = vbcast.lane.b32.xlu0 %v4451_v43, 264  ;;  %v4484_v1 = vrot.slane %v8870_v32, %v11381_v16 }
 0x403   :  { %4453 = vbcast.lane.b32.xlu1 %v4451_v43, 256  ;;  %v9267_v22 = vpop.permute.xlu1 %4101  ;;  %v9269_v42 = vpop.permute.xlu0 %4127 }
 0x404   :  { %11472 = vst [vmem:[#allocation215_spill] sm:$0xff] %v9269_v42  ;;  %4468 = vbcast.lane.b32.xlu0 %v4462_v30, 264  ;;  %v4495_v42 = vrot.slane %v8874_v56, %v11381_v16 }
 0x407   :  { %4464 = vbcast.lane.b32.xlu1 %v4462_v30, 256  ;;  %v9273_v39 = vpop.permute.xlu1 %4112  ;;  %v9275_v49 = vpop.permute.xlu0 %4138 }
 0x408   :  { %11473 = vst [vmem:[#allocation216_spill] sm:$0xff] %v9275_v49  ;;  %4479 = vbcast.lane.b32.xlu0 %v4473_v26, 264  ;;  %v4506_v49 = vrot.slane %v8882_v9, %v11381_v16 }
 0x40b   :  { %4475 = vbcast.lane.b32.xlu1 %v4473_v26, 256  ;;  %v9279_v2 = vpop.permute.xlu1 %4123  ;;  %v9281_v43 = vpop.permute.xlu0 %4149 }
 0x40c   :  { %11474 = vst [vmem:[#allocation217_spill] sm:$0xff] %v9281_v43  ;;  %4490 = vbcast.lane.b32.xlu0 %v4484_v1, 264  ;;  %v4517_v43 = vrot.slane %v8890_v51, %v11381_v16 }
 0x40f   :  { %4486 = vbcast.lane.b32.xlu1 %v4484_v1, 256  ;;  %v9285_v13 = vpop.permute.xlu1 %4134  ;;  %v9287_v30 = vpop.permute.xlu0 %4160 }
 0x410   :  { %11475 = vst [vmem:[#allocation218_spill] sm:$0xff] %v9287_v30  ;;  %4501 = vbcast.lane.b32.xlu0 %v4495_v42, 264  ;;  %v4528_v30 = vrot.slane %v8894_v53, %v11381_v16 }
 0x413   :  { %4497 = vbcast.lane.b32.xlu1 %v4495_v42, 256  ;;  %v9291_v32 = vpop.permute.xlu1 %4145  ;;  %v9293_v26 = vpop.permute.xlu0 %4171 }
 0x414   :  { %11476 = vst [vmem:[#allocation219_spill] sm:$0xff] %v9293_v26  ;;  %4512 = vbcast.lane.b32.xlu0 %v4506_v49, 264  ;;  %v4539_v26 = vrot.slane %v8902_v45, %v11381_v16 }
 0x417   :  { %4508 = vbcast.lane.b32.xlu1 %v4506_v49, 256  ;;  %v9297_v56 = vpop.permute.xlu1 %4156  ;;  %v9299_v1 = vpop.permute.xlu0 %4182 }
 0x418   :  { %11477 = vst [vmem:[#allocation220_spill] sm:$0xff] %v9299_v1  ;;  %4523 = vbcast.lane.b32.xlu0 %v4517_v43, 264  ;;  %v4550_v1 = vrot.slane %v8910_v15, %v11381_v16 }
 0x41b   :  { %4519 = vbcast.lane.b32.xlu1 %v4517_v43, 256  ;;  %v9303_v9 = vpop.permute.xlu1 %4167  ;;  %v9305_v42 = vpop.permute.xlu0 %4193 }
 0x41c   :  { %11478 = vst [vmem:[#allocation221_spill] sm:$0xff] %v9305_v42  ;;  %4534 = vbcast.lane.b32.xlu0 %v4528_v30, 264  ;;  %v4561_v42 = vrot.slane %v8914_v59, %v11381_v16 }
 0x41f   :  { %4530 = vbcast.lane.b32.xlu1 %v4528_v30, 256  ;;  %v9309_v51 = vpop.permute.xlu1 %4178  ;;  %v9311_v49 = vpop.permute.xlu0 %4204 }
 0x420   :  { %11479 = vst [vmem:[#allocation222_spill] sm:$0xff] %v9309_v51  ;;  %11480 = vst [vmem:[#allocation223_spill] sm:$0xff] %v9311_v49  ;;  %4545 = vbcast.lane.b32.xlu0 %v4539_v26, 264  ;;  %v4572_v49 = vrot.slane %v8922_v21, %v11381_v16 }
 0x423   :  { %4541 = vbcast.lane.b32.xlu1 %v4539_v26, 256  ;;  %v9315_v53 = vpop.permute.xlu1 %4189  ;;  %v9317_v43 = vpop.permute.xlu0 %4215 }
 0x424   :  { %11481 = vst [vmem:[#allocation224_spill] sm:$0xff] %v9315_v53  ;;  %11482 = vst [vmem:[#allocation225_spill] sm:$0xff] %v9317_v43  ;;  %4556 = vbcast.lane.b32.xlu0 %v4550_v1, 264  ;;  %v4583_v43 = vrot.slane %v8930_v60, %v11381_v16 }
 0x427   :  { %4552 = vbcast.lane.b32.xlu1 %v4550_v1, 256  ;;  %v9321_v45 = vpop.permute.xlu1 %4200  ;;  %v9323_v30 = vpop.permute.xlu0 %4226 }
 0x428   :  { %11483 = vst [vmem:[#allocation226_spill] sm:$0xff] %v9321_v45  ;;  %11484 = vst [vmem:[#allocation227_spill] sm:$0xff] %v9323_v30  ;;  %4567 = vbcast.lane.b32.xlu0 %v4561_v42, 264  ;;  %v4594_v30 = vrot.slane %v8936_v47, %v11381_v16 }
 0x42b   :  { %4563 = vbcast.lane.b32.xlu1 %v4561_v42, 256  ;;  %v9327_v15 = vpop.permute.xlu1 %4211  ;;  %v9329_v26 = vpop.permute.xlu0 %4237 }
 0x42c   :  { %11485 = vst [vmem:[#allocation228_spill] sm:$0xff] %v9327_v15  ;;  %11486 = vst [vmem:[#allocation229_spill] sm:$0xff] %v9329_v26  ;;  %4578 = vbcast.lane.b32.xlu0 %v4572_v49, 264  ;;  %v4605_v26 = vrot.slane %v8944_v6, %v11381_v16 }
 0x42f   :  { %4574 = vbcast.lane.b32.xlu1 %v4572_v49, 256  ;;  %v9333_v59 = vpop.permute.xlu1 %4222  ;;  %v9335_v1 = vpop.permute.xlu0 %4248 }
 0x430   :  { %11487 = vst [vmem:[#allocation230_spill] sm:$0xff] %v9333_v59  ;;  %11488 = vst [vmem:[#allocation231_spill] sm:$0xff] %v9335_v1  ;;  %4589 = vbcast.lane.b32.xlu0 %v4583_v43, 264  ;;  %v4616_v1 = vrot.slane %v8952_v58, %v11381_v16  ;;  %v4638_v58 = vrot.slane %v8968_v57, %v11381_v16 }
 0x433   :  { %4585 = vbcast.lane.b32.xlu1 %v4583_v43, 256  ;;  %v9339_v21 = vpop.permute.xlu1 %4233  ;;  %v9341_v42 = vpop.permute.xlu0 %4259 }
 0x434   :  { %11489 = vst [vmem:[#allocation232_spill] sm:$0xff] %v9339_v21  ;;  %11490 = vst [vmem:[#allocation233_spill] sm:$0xff] %v9341_v42  ;;  %4600 = vbcast.lane.b32.xlu0 %v4594_v30, 264  ;;  %v4627_v42 = vrot.slane %v8960_v46, %v11381_v16  ;;  %v4649_v46 = vrot.slane %v8976_v36, %v11381_v16  ;;  %v4671_v36 = vrot.slane %v8992_v61, %v11381_v16 }
 0x437   :  { %4596 = vbcast.lane.b32.xlu1 %v4594_v30, 256  ;;  %v9345_v60 = vpop.permute.xlu1 %4244  ;;  %v9347_v49 = vpop.permute.xlu0 %4270 }
 0x438   :  { %11491 = vst [vmem:[#allocation234_spill] sm:$0xff] %v9345_v60  ;;  %11492 = vst [vmem:[#allocation235_spill] sm:$0xff] %v9347_v49  ;;  %4611 = vbcast.lane.b32.xlu0 %v4605_v26, 264  ;;  %v11515_v60 = vld [vmem:[#allocation42_spill] sm:$0xff] }
 0x43b   :  { %4607 = vbcast.lane.b32.xlu1 %v4605_v26, 256  ;;  %v9351_v47 = vpop.permute.xlu1 %4255  ;;  %v9353_v43 = vpop.permute.xlu0 %4281 }
 0x43c   :  { %11493 = vst [vmem:[#allocation236_spill] sm:$0xff] %v9351_v47  ;;  %11494 = vst [vmem:[#allocation237_spill] sm:$0xff] %v9353_v43  ;;  %4622 = vbcast.lane.b32.xlu0 %v4616_v1, 264  ;;  %v9376_v43 = vpop.eup %7172 }
 0x43f   :  { %4618 = vbcast.lane.b32.xlu1 %v4616_v1, 256  ;;  %v9358_v6 = vpop.permute.xlu1 %4266  ;;  %v9360_v30 = vpop.permute.xlu0 %4292 }
 0x440   :  { %11495 = vst [vmem:[#allocation238_spill] sm:$0xff] %v9358_v6  ;;  %11496 = vst [vmem:[#allocation239_spill] sm:$0xff] %v9360_v30  ;;  %4633 = vbcast.lane.b32.xlu0 %v4627_v42, 264  ;;  %v4660_v30 = vrot.slane %v8984_v31, %v11381_v16  ;;  %v11505_v31 = vld [vmem:[#allocation53_spill] sm:$0xff] }
 0x443   :  { %4629 = vbcast.lane.b32.xlu1 %v4627_v42, 256  ;;  %v9364_v26 = vpop.permute.xlu1 %4277  ;;  %v9366_v49 = vpop.permute.xlu0 %4303 }
 0x444   :  { %11497 = vst [vmem:[#allocation240_spill] sm:$0xff] %v9364_v26  ;;  %11498 = vst [vmem:[#allocation241_spill] sm:$0xff] %v9366_v49  ;;  %4644 = vbcast.lane.b32.xlu0 %v4638_v58, 264  ;;  %v2080_v49 = vrot.slane %v9376_v43, %v7567_v10 }
 0x447   :  { %4640 = vbcast.lane.b32.xlu1 %v4638_v58, 256  ;;  %v9370_v40 = vpop.permute.xlu1 %4288  ;;  %v9372_v1 = vpop.permute.xlu0 %4314 }
 0x448   :  { %11499 = vst [vmem:[#allocation242_spill] sm:$0xff] %v9370_v40  ;;  %11500 = vst [vmem:[#allocation243_spill] sm:$0xff] %v9372_v1  ;;  %4655 = vbcast.lane.b32.xlu0 %v4649_v46, 264  ;;  %v9391_v40 = vmul.f32 %v11505_v31, %v2080_v49  ;;  %v11510_v31 = vld [vmem:[#allocation52_spill] sm:$0xff] }
 0x44a   :  { %11506 = vst [vmem:[#allocation53_spill] sm:$0xff] %v9391_v40  ;;  %v3744_v49 = vrot.slane %v9391_v40, %v11381_v16 }
 0x44b   :  { %4651 = vbcast.lane.b32.xlu1 %v4649_v46, 256  ;;  %v9378_v57 = vpop.permute.xlu1 %4299  ;;  %v9380_v42 = vpop.permute.xlu0 %4325  ;;  %v2084_v46 = vrot.slane %v9376_v43, %v11381_v16 }
 0x44c   :  { %11501 = vst [vmem:[#allocation244_spill] sm:$0xff] %v9378_v57  ;;  %11502 = vst [vmem:[#allocation245_spill] sm:$0xff] %v9380_v42  ;;  %4666 = vbcast.lane.b32.xlu0 %v4660_v30, 264  ;;  %v4682_v42 = vrot.slane %v9000_v41, %v11381_v16  ;;  %v11507_v57 = vld [vmem:[#allocation45_spill] sm:$0xff]  ;;  %v4693_v41 = vrot.slane %v9008_v55, %v11381_v16  ;;  %v4830_v6 = vmul.f32 %v9203_v34, %v3744_v49 }
 0x44d   :  { %v2088_v26 = vrot.slane %v9376_v43, %v11507_v57  ;;  %v4829_v34 = vmul.f32 %v9213_v37, %v3744_v49 }
 0x44f   :  { %4662 = vbcast.lane.b32.xlu1 %v4660_v30, 256  ;;  %v9386_v58 = vpop.permute.xlu1 %4310  ;;  %v9388_v1 = vpop.permute.xlu0 %4336 }
 0x450   :  { %11503 = vst [vmem:[#allocation246_spill] sm:$0xff] %v9386_v58  ;;  %11504 = vst [vmem:[#allocation247_spill] sm:$0xff] %v9388_v1  ;;  %4677 = vbcast.lane.b32.xlu0 %v4671_v36, 264  ;;  %v2464_v1 = vrot.slane %v9391_v40, %v7567_v10  ;;  %v9408_v58 = vmul.f32 %v11510_v31, %v2084_v46  ;;  %v11516_v40 = vld [vmem:[#allocation54_spill] sm:$0xff] }
 0x451   :  { %v9425_v55 = vmul.f32 %v11516_v40, %v2088_v26 }
 0x452   :  { %11511 = vst [vmem:[#allocation52_spill] sm:$0xff] %v9408_v58  ;;  %v3614_v21 = vmul.f32 %v11515_v60, %v2464_v1  ;;  %v2468_v46 = vrot.slane %v9408_v58, %v7567_v10  ;;  %v3748_v31 = vrot.slane %v9408_v58, %v11381_v16  ;;  %v11521_v58 = vld [vmem:[#allocation38_spill] sm:$0xff] }
 0x453   :  { %4673 = vbcast.lane.b32.xlu1 %v4671_v36, 256  ;;  %v9399_v61 = vpop.permute.xlu1 %4321  ;;  %v9401_v30 = vpop.permute.xlu0 %4347  ;;  %v11512_v36 = vld [vmem:[#allocation47_spill] sm:$0xff]  ;;  %11517 = vst [vmem:[#allocation42_spill] sm:$0xff] %v9425_v55  ;;  %v2472_v26 = vrot.slane %v9425_v55, %v7567_v10  ;;  %v3752_v37 = vrot.slane %v9425_v55, %v11381_v16 }
 0x454   :  { %11508 = vst [vmem:[#allocation248_spill] sm:$0xff] %v9399_v61  ;;  %11509 = vst [vmem:[#allocation249_spill] sm:$0xff] %v9401_v30  ;;  %4688 = vbcast.lane.b32.xlu0 %v4682_v42, 264  ;;  %v2092_v61 = vrot.slane %v9376_v43, %v11512_v36  ;;  %v4958_v59 = vadd.f32 %v4830_v6, %v3614_v21  ;;  %v3616_v51 = vmul.f32 %v11521_v58, %v2468_v46  ;;  %v11522_v21 = vld [vmem:[#allocation48_spill] sm:$0xff] }
 0x457   :  { %4684 = vbcast.lane.b32.xlu1 %v4682_v42, 256  ;;  %v9415_v30 = vpop.permute.xlu1 %4332  ;;  %v9417_v47 = vpop.permute.xlu0 %4358  ;;  %v4832_v42 = vmul.f32 %v9209_v52, %v3748_v31  ;;  %v2096_v52 = vrot.slane %v9376_v43, %v11522_v21 }
 0x458   :  { %11513 = vst [vmem:[#allocation250_spill] sm:$0xff] %v9415_v30  ;;  %11514 = vst [vmem:[#allocation251_spill] sm:$0xff] %v9417_v47  ;;  %4699 = vbcast.lane.b32.xlu0 %v4693_v41, 264  ;;  %v11518_v30 = vld [vmem:[#allocation43_spill] sm:$0xff]  ;;  %v11519_v47 = vld [vmem:[#allocation56_spill] sm:$0xff] }
 0x459   :  { %v3613_v15 = vmul.f32 %v11518_v30, %v2464_v1  ;;  %v9431_v45 = vmul.f32 %v11519_v47, %v2092_v61  ;;  %v4831_v47 = vmul.f32 %v9219_v20, %v3748_v31  ;;  %v4960_v40 = vadd.f32 %v4832_v42, %v3616_v51  ;;  %v11523_v61 = vld [vmem:[#allocation46_spill] sm:$0xff]  ;;  %v11526_v51 = vld [vmem:[#allocation49_spill] sm:$0xff] }
 0x45a   :  { %v4834_v1 = vmul.f32 %v9215_v23, %v3752_v37  ;;  %v3615_v58 = vmul.f32 %v11523_v61, %v2468_v46  ;;  %v2100_v23 = vrot.slane %v9376_v43, %v11526_v51  ;;  %v4833_v31 = vmul.f32 %v9225_v3, %v3752_v37  ;;  %v11527_v61 = vld [vmem:[#allocation28_spill] sm:$0xff]  ;;  %v11530_v37 = vld [vmem:[#allocation50_spill] sm:$0xff] }
 0x45b   :  { %11520 = vst [vmem:[#allocation54_spill] sm:$0xff] %v9431_v45  ;;  %4695 = vbcast.lane.b32.xlu1 %v4693_v41, 256  ;;  %v9433_v60 = vpop.permute.xlu1 %4343  ;;  %v9435_v53 = vpop.permute.xlu0 %4369  ;;  %v4957_v6 = vadd.f32 %v4829_v34, %v3613_v15  ;;  %v2476_v30 = vrot.slane %v9431_v45, %v7567_v10  ;;  %v3756_v20 = vrot.slane %v9431_v45, %v11381_v16  ;;  %v11524_v15 = vld [vmem:[#allocation58_spill] sm:$0xff] }
 0x45c   :  { %5226 = vperm.xlu0 %7042, %v4958_v59   ;;  %v3618_v59 = vmul.f32 %v8679_v19, %v2472_v26  ;;  %v9458_v63 = vmul.f32 %v11524_v15, %v2096_v52  ;;  %v4959_v46 = vadd.f32 %v4831_v47, %v3615_v58  ;;  %v3617_v19 = vmul.f32 %v11527_v61, %v2472_v26  ;;  %v11531_v15 = vld [vmem:[#allocation51_spill] sm:$0xff] }
 0x45d   :  { %v4836_v42 = vmul.f32 %v9221_v27, %v3756_v20  ;;  %v2104_v27 = vrot.slane %v9376_v43, %v11530_v37  ;;  %v4835_v26 = vmul.f32 %v9231_v24, %v3756_v20  ;;  %v11532_v20 = vld [vmem:[#allocation62_spill] sm:$0xff] }
 0x45e   :  { %11525 = vst [vmem:[#allocation43_spill] sm:$0xff] %v9458_v63  ;;  %v4962_v34 = vadd.f32 %v4834_v1, %v3618_v59  ;;  %v2480_v52 = vrot.slane %v9458_v63, %v7567_v10  ;;  %v3760_v47 = vrot.slane %v9458_v63, %v11381_v16  ;;  %v3619_v59 = vmul.f32 %v8716_v62, %v2476_v30 }
 0x45f   :  { %5223 = vperm.xlu1 %7043, %v4957_v6   ;;  %v9450_v49 = vpop.permute.xlu1 %4354  ;;  %v9452_v41 = vpop.permute.xlu0 %4380  ;;  %v3620_v6 = vmul.f32 %v8701_v17, %v2476_v30  ;;  %v4961_v17 = vadd.f32 %v4833_v31, %v3617_v19  ;;  %v9496_v62 = vmul.f32 %v11532_v20, %v2104_v27 }
 0x460   :  { %5232 = vperm.xlu0 %7042, %v4960_v40   ;;  %v11528_v40 = vld [vmem:[#allocation60_spill] sm:$0xff]  ;;  %v4838_v58 = vmul.f32 %v9227_v25, %v3760_v47  ;;  %v4837_v30 = vmul.f32 %v9237_v0, %v3760_v47 }
 0x461   :  { %v9475_v3 = vmul.f32 %v11528_v40, %v2100_v23  ;;  %v4964_v1 = vadd.f32 %v4836_v42, %v3620_v6  ;;  %v9488_v40 = vpop.eup %7174  ;;  %11533 = vst [vmem:[#allocation38_spill] sm:$0xff] %v9496_v62  ;;  %v3621_v6 = vmul.f32 %v8735_v5, %v2480_v52  ;;  %v3768_v0 = vrot.slane %v9496_v62, %v11381_v16  ;;  %v11534_v47 = vld [vmem:[#allocation64_spill] sm:$0xff] }
 0x463   :  { %5229 = vperm.xlu1 %7043, %v4959_v46   ;;  %v9466_v55 = vpop.permute.xlu1 %4365  ;;  %v9468_v45 = vpop.permute.xlu0 %4391  ;;  %11529 = vst [vmem:[#allocation56_spill] sm:$0xff] %v9475_v3  ;;  %v2108_v46 = vrot.slane %v9376_v43, %v11531_v15  ;;  %v2484_v24 = vrot.slane %v9475_v3, %v7567_v10  ;;  %v3764_v25 = vrot.slane %v9475_v3, %v11381_v16 }
 0x464   :  { %5238 = vperm.xlu0 %7042, %v4962_v34   ;;  %v3622_v34 = vmul.f32 %v8721_v18, %v2480_v52  ;;  %v4963_v43 = vadd.f32 %v4835_v26, %v3619_v59  ;;  %v2112_v18 = vrot.slane %v9488_v40, %v7567_v10  ;;  %v2488_v26 = vrot.slane %v9496_v62, %v7567_v10 }
 0x465   :  { %v4840_v42 = vmul.f32 %v9233_v38, %v3764_v25  ;;  %v3624_v27 = vmul.f32 %v8737_v54, %v2484_v24  ;;  %v9513_v38 = vmul.f32 %v11534_v47, %v2108_v46  ;;  %v4965_v5 = vadd.f32 %v4837_v30, %v3621_v6 }
 0x466   :  { %v4966_v31 = vadd.f32 %v4838_v58, %v3622_v34  ;;  %v4839_v52 = vmul.f32 %v9243_v28, %v3764_v25  ;;  %v4842_v58 = vmul.f32 %v9239_v29, %v3768_v0  ;;  %v3623_v59 = vmul.f32 %v8744_v35, %v2484_v24  ;;  %v11536_v25 = vld [vmem:[#allocation66_spill] sm:$0xff] }
 0x467   :  { %5235 = vperm.xlu1 %7043, %v4961_v17   ;;  %v9484_v61 = vpop.permute.xlu1 %4376  ;;  %v9486_v23 = vpop.permute.xlu0 %4402  ;;  %11535 = vst [vmem:[#allocation48_spill] sm:$0xff] %v9513_v38  ;;  %v2116_v54 = vrot.slane %v9488_v40, %v11381_v16  ;;  %v3626_v46 = vmul.f32 %v8746_v4, %v2488_v26  ;;  %v3772_v28 = vrot.slane %v9513_v38, %v11381_v16 }
 0x468   :  { %5244 = vperm.xlu0 %7042, %v4964_v1   ;;  %v4968_v1 = vadd.f32 %v4840_v42, %v3624_v27  ;;  %v9530_v29 = vmul.f32 %v11536_v25, %v2112_v18  ;;  %v4967_v35 = vadd.f32 %v4839_v52, %v3623_v59  ;;  %v4841_v24 = vmul.f32 %v9249_v14, %v3768_v0  ;;  %v11538_v0 = vld [vmem:[#allocation55_spill] sm:$0xff] }
 0x469   :  { %v4970_v30 = vadd.f32 %v4842_v58, %v3626_v46  ;;  %v3625_v42 = vmul.f32 %v8749_v48, %v2488_v26  ;;  %v2120_v4 = vrot.slane %v9488_v40, %v11507_v57  ;;  %v4843_v26 = vmul.f32 %v9255_v33, %v3772_v28 }
 0x46a   :  { %11537 = vst [vmem:[#allocation46_spill] sm:$0xff] %v9530_v29  ;;  %v2496_v47 = vrot.slane %v9530_v29, %v7567_v10  ;;  %v3776_v14 = vrot.slane %v9530_v29, %v11381_v16 }
 0x46b   :  { %5241 = vperm.xlu1 %7043, %v4963_v43   ;;  %v9503_v19 = vpop.permute.xlu1 %4387  ;;  %v9505_v17 = vpop.permute.xlu0 %4413  ;;  %v2492_v43 = vrot.slane %v9513_v38, %v7567_v10  ;;  %v4969_v48 = vadd.f32 %v4841_v24, %v3625_v42 }
 0x46c   :  { %5250 = vperm.xlu0 %7042, %v4966_v31   ;;  %v4844_v31 = vmul.f32 %v9245_v44, %v3772_v28  ;;  %v9547_v44 = vmul.f32 %v11538_v0, %v2116_v54  ;;  %v4846_v52 = vmul.f32 %v9251_v8, %v3776_v14  ;;  %v3630_v54 = vmul.f32 %v8760_v50, %v2496_v47  ;;  %v11540_v28 = vld [vmem:[#allocation68_spill] sm:$0xff]  ;;  %v11544_v0 = vld [vmem:[#allocation122_spill] sm:$0xff] }
 0x46d   :  { %v3628_v18 = vmul.f32 %v8751_v12, %v2492_v43  ;;  %v2124_v12 = vrot.slane %v9488_v40, %v11512_v36  ;;  %v9564_v8 = vmul.f32 %v11540_v28, %v2120_v4  ;;  %v2128_v50 = vrot.slane %v9488_v40, %v11522_v21  ;;  %v11548_v28 = vld [vmem:[#allocation156_spill] sm:$0xff] }
 0x46e   :  { %11539 = vst [vmem:[#allocation58_spill] sm:$0xff] %v9547_v44  ;;  %v2500_v46 = vrot.slane %v9547_v44, %v7567_v10  ;;  %v3780_v33 = vrot.slane %v9547_v44, %v11381_v16  ;;  %v4974_v25 = vadd.f32 %v4846_v52, %v3630_v54  ;;  %7176 = vrcp.f32 %v11548_v28 }
 0x46f   :  { %5247 = vperm.xlu1 %7043, %v4965_v5   ;;  %v9520_v34 = vpop.permute.xlu1 %4398  ;;  %v9522_v20 = vpop.permute.xlu0 %4424  ;;  %v4972_v5 = vadd.f32 %v4844_v31, %v3628_v18  ;;  %11541 = vst [vmem:[#allocation49_spill] sm:$0xff] %v9564_v8 }
 0x470   :  { %5256 = vperm.xlu0 %7042, %v4968_v1   ;;  %v3627_v1 = vmul.f32 %v8758_v11, %v2492_v43  ;;  %v4845_v43 = vmul.f32 %v9261_v7, %v3776_v14  ;;  %v3632_v4 = vmul.f32 %v11544_v0, %v2500_v46  ;;  %v3784_v7 = vrot.slane %v9564_v8, %v11381_v16  ;;  %v11545_v14 = vld [vmem:[#allocation57_spill] sm:$0xff] }
 0x472   :  { %v4971_v11 = vadd.f32 %v4843_v26, %v3627_v1  ;;  %v9581_v26 = vmul.f32 %v11545_v14, %v2124_v12  ;;  %v11547_v1 = vld [vmem:[#allocation214_spill] sm:$0xff]  ;;  %v11550_v12 = vld [vmem:[#allocation124_spill] sm:$0xff]  ;;  %v11553_v14 = vld [vmem:[#allocation215_spill] sm:$0xff] }
 0x473   :  { %5253 = vperm.xlu1 %7043, %v4967_v35   ;;  %v9537_v6 = vpop.permute.xlu1 %4409  ;;  %v9539_v27 = vpop.permute.xlu0 %4435  ;;  %v11542_v35 = vld [vmem:[#allocation213_spill] sm:$0xff]  ;;  %v4850_v54 = vmul.f32 %v11547_v1, %v3784_v7 }
 0x474   :  { %5262 = vperm.xlu0 %7042, %v4970_v30   ;;  %v4848_v24 = vmul.f32 %v11542_v35, %v3780_v33  ;;  %v11543_v30 = vld [vmem:[#allocation121_spill] sm:$0xff]  ;;  %11546 = vst [vmem:[#allocation28_spill] sm:$0xff] %v9581_v26 }
 0x475   :  { %v3629_v31 = vmul.f32 %v11543_v30, %v2496_v47  ;;  %v2132_v30 = vrot.slane %v9488_v40, %v11526_v51  ;;  %v11554_v1 = vld [vmem:[#allocation125_spill] sm:$0xff] }
 0x476   :  { %v4976_v52 = vadd.f32 %v4848_v24, %v3632_v4 }
 0x477   :  { %5259 = vperm.xlu1 %7043, %v4969_v48   ;;  %v9554_v58 = vpop.permute.xlu1 %4420  ;;  %v9556_v59 = vpop.permute.xlu0 %4446  ;;  %v2504_v48 = vrot.slane %v9564_v8, %v7567_v10  ;;  %v4973_v47 = vadd.f32 %v4845_v43, %v3629_v31  ;;  %v11551_v43 = vld [vmem:[#allocation70_spill] sm:$0xff]  ;;  %v4849_v31 = vmul.f32 %v9273_v39, %v3784_v7  ;;  %v2136_v7 = vrot.slane %v9488_v40, %v11530_v37 }
 0x478   :  { %5268 = vperm.xlu0 %7042, %v4972_v5   ;;  %v4847_v5 = vmul.f32 %v9267_v22, %v3780_v33  ;;  %v2508_v22 = vrot.slane %v9581_v26, %v7567_v10  ;;  %v3788_v33 = vrot.slane %v9581_v26, %v11381_v16  ;;  %v9599_v24 = vmul.f32 %v11551_v43, %v2128_v50  ;;  %v11557_v26 = vld [vmem:[#allocation126_spill] sm:$0xff] }
 0x479   :  { %v3633_v28 = vmul.f32 %v11554_v1, %v2504_v48  ;;  %v11560_v1 = vld [vmem:[#allocation128_spill] sm:$0xff] }
 0x47a   :  { %11552 = vst [vmem:[#allocation60_spill] sm:$0xff] %v9599_v24  ;;  %v3636_v50 = vmul.f32 %v11557_v26, %v2508_v22  ;;  %v3792_v39 = vrot.slane %v9599_v24, %v11381_v16 }
 0x47b   :  { %5265 = vperm.xlu1 %7043, %v4971_v11   ;;  %v9571_v42 = vpop.permute.xlu1 %4431  ;;  %v9573_v18 = vpop.permute.xlu0 %4457  ;;  %v11549_v11 = vld [vmem:[#allocation123_spill] sm:$0xff] }
 0x47c   :  { %5274 = vperm.xlu0 %7042, %v4974_v25   ;;  %v3631_v35 = vmul.f32 %v11549_v11, %v2500_v46  ;;  %v3634_v25 = vmul.f32 %v11550_v12, %v2504_v48  ;;  %v11555_v11 = vld [vmem:[#allocation59_spill] sm:$0xff]  ;;  %v4977_v48 = vadd.f32 %v4849_v31, %v3633_v28  ;;  %v4853_v28 = vmul.f32 %v9285_v13, %v3792_v39 }
 0x47d   :  { %v9605_v12 = vmul.f32 %v11555_v11, %v2132_v30 }
 0x47e   :  { %v4975_v46 = vadd.f32 %v4847_v5, %v3631_v35  ;;  %v4978_v4 = vadd.f32 %v4850_v54, %v3634_v25  ;;  %v2512_v5 = vrot.slane %v9599_v24, %v7567_v10  ;;  %v11558_v35 = vld [vmem:[#allocation216_spill] sm:$0xff]  ;;  %v11559_v25 = vld [vmem:[#allocation127_spill] sm:$0xff]  ;;  %v11565_v24 = vld [vmem:[#allocation129_spill] sm:$0xff] }
 0x47f   :  { %v9589_v0 = vpop.permute.xlu1 %4442  ;;  %5271 = vperm.xlu1 %7043, %v4973_v47   ;;  %v9591_v8 = vpop.permute.xlu0 %4468  ;;  %v4852_v47 = vmul.f32 %v11553_v14, %v3788_v33  ;;  %11556 = vst [vmem:[#allocation50_spill] sm:$0xff] %v9605_v12  ;;  %v4854_v30 = vmul.f32 %v11558_v35, %v3792_v39  ;;  %v3635_v43 = vmul.f32 %v11559_v25, %v2508_v22  ;;  %v11564_v25 = vld [vmem:[#allocation130_spill] sm:$0xff] }
 0x480   :  { %5280 = vperm.xlu0 %7042, %v4976_v52   ;;  %v4851_v52 = vmul.f32 %v9279_v2, %v3788_v33  ;;  %v2516_v26 = vrot.slane %v9605_v12, %v7567_v10  ;;  %v3638_v11 = vmul.f32 %v11560_v1, %v2512_v5  ;;  %v3796_v31 = vrot.slane %v9605_v12, %v11381_v16  ;;  %v9635_v22 = vpop.eup %7176 }
 0x481   :  { %v4980_v54 = vadd.f32 %v4852_v47, %v3636_v50  ;;  %v2140_v33 = vrot.slane %v9488_v40, %v11531_v15  ;;  %v3637_v62 = vmul.f32 %v11565_v24, %v2512_v5  ;;  %v2144_v39 = vrot.slane %v9635_v22, %v7567_v10 }
 0x482   :  { %v4979_v47 = vadd.f32 %v4851_v52, %v3635_v43  ;;  %v4982_v50 = vadd.f32 %v4854_v30, %v3638_v11  ;;  %v3640_v1 = vmul.f32 %v11564_v25, %v2516_v26  ;;  %v4855_v24 = vmul.f32 %v9291_v32, %v3796_v31  ;;  %v11568_v43 = vld [vmem:[#allocation218_spill] sm:$0xff] }
 0x483   :  { %v9607_v29 = vpop.permute.xlu1 %4453  ;;  %5277 = vperm.xlu1 %7043, %v4975_v46   ;;  %v9609_v44 = vpop.permute.xlu0 %4479  ;;  %v4981_v30 = vadd.f32 %v4853_v28, %v3637_v62  ;;  %v2156_v3 = vrot.slane %v9635_v22, %v11512_v36 }
 0x484   :  { %5286 = vperm.xlu0 %7042, %v4978_v4   ;;  %v11561_v4 = vld [vmem:[#allocation72_spill] sm:$0xff] }
 0x485   :  { %v9631_v2 = vmul.f32 %v11561_v4, %v2136_v7  ;;  %v11569_v4 = vld [vmem:[#allocation131_spill] sm:$0xff] }
 0x487   :  { %v9623_v46 = vpop.permute.xlu1 %4464  ;;  %5283 = vperm.xlu1 %7043, %v4977_v48   ;;  %v9625_v14 = vpop.permute.xlu0 %4490  ;;  %11562 = vst [vmem:[#allocation51_spill] sm:$0xff] %v9631_v2  ;;  %v11563_v48 = vld [vmem:[#allocation217_spill] sm:$0xff]  ;;  %v2520_v40 = vrot.slane %v9631_v2, %v7567_v10  ;;  %v3800_v52 = vrot.slane %v9631_v2, %v11381_v16 }
 0x488   :  { %5292 = vperm.xlu0 %7042, %v4980_v54   ;;  %v4856_v35 = vmul.f32 %v11563_v48, %v3796_v31  ;;  %v11566_v54 = vld [vmem:[#allocation61_spill] sm:$0xff]  ;;  %v2148_v48 = vrot.slane %v9635_v22, %v11381_v16  ;;  %v11572_v31 = vld [vmem:[#allocation74_spill] sm:$0xff] }
 0x489   :  { %v9650_v13 = vmul.f32 %v11566_v54, %v2140_v33  ;;  %v4858_v11 = vmul.f32 %v11568_v43, %v3800_v52  ;;  %v11571_v54 = vld [vmem:[#allocation132_spill] sm:$0xff]  ;;  %v9669_v28 = vmul.f32 %v11572_v31, %v2144_v39  ;;  %v11575_v43 = vld [vmem:[#allocation133_spill] sm:$0xff] }
 0x48a   :  { %v4984_v5 = vadd.f32 %v4856_v35, %v3640_v1  ;;  %v3642_v2 = vmul.f32 %v11571_v54, %v2520_v40  ;;  %v11574_v1 = vld [vmem:[#allocation219_spill] sm:$0xff]  ;;  %v2152_v54 = vrot.slane %v9635_v22, %v11507_v57 }
 0x48b   :  { %v9641_v12 = vpop.permute.xlu1 %4475  ;;  %5289 = vperm.xlu1 %7043, %v4979_v47   ;;  %v9643_v7 = vpop.permute.xlu0 %4501  ;;  %11567 = vst [vmem:[#allocation62_spill] sm:$0xff] %v9650_v13  ;;  %v3639_v47 = vmul.f32 %v11569_v4, %v2516_v26  ;;  %v2524_v62 = vrot.slane %v9650_v13, %v7567_v10  ;;  %v3804_v32 = vrot.slane %v9650_v13, %v11381_v16  ;;  %11573 = vst [vmem:[#allocation66_spill] sm:$0xff] %v9669_v28  ;;  %v11578_v13 = vld [vmem:[#allocation134_spill] sm:$0xff] }
 0x48c   :  { %5298 = vperm.xlu0 %7042, %v4982_v50   ;;  %v4857_v50 = vmul.f32 %v9297_v56, %v3800_v52  ;;  %v4986_v35 = vadd.f32 %v4858_v11, %v3642_v2  ;;  %v3641_v4 = vmul.f32 %v11575_v43, %v2520_v40  ;;  %v3808_v56 = vrot.slane %v9669_v28, %v11381_v16  ;;  %v11579_v2 = vld [vmem:[#allocation63_spill] sm:$0xff]  ;;  %v11583_v43 = vld [vmem:[#allocation76_spill] sm:$0xff] }
 0x48d   :  { %v4983_v26 = vadd.f32 %v4855_v24, %v3639_v47  ;;  %v3644_v39 = vmul.f32 %v11578_v13, %v2524_v62  ;;  %v2528_v24 = vrot.slane %v9669_v28, %v7567_v10  ;;  %v9686_v52 = vmul.f32 %v11579_v2, %v2148_v48  ;;  %v11581_v47 = vld [vmem:[#allocation220_spill] sm:$0xff] }
 0x48e   :  { %v4985_v40 = vadd.f32 %v4857_v50, %v3641_v4  ;;  %v4862_v31 = vmul.f32 %v11581_v47, %v3808_v56  ;;  %v9692_v13 = vmul.f32 %v11583_v43, %v2152_v54  ;;  %v11590_v47 = vld [vmem:[#allocation137_spill] sm:$0xff] }
 0x48f   :  { %v9659_v25 = vpop.permute.xlu1 %4486  ;;  %5295 = vperm.xlu1 %7043, %v4981_v30   ;;  %v9661_v33 = vpop.permute.xlu0 %4512  ;;  %v4860_v30 = vmul.f32 %v11574_v1, %v3804_v32  ;;  %11580 = vst [vmem:[#allocation213_spill] sm:$0xff] %v9686_v52  ;;  %v11591_v43 = vld [vmem:[#allocation65_spill] sm:$0xff] }
 0x490   :  { %11570 = vst [vmem:[#allocation64_spill] sm:$0xff] %v9661_v33  ;;  %5304 = vperm.xlu0 %7042, %v4984_v5   ;;  %v4859_v5 = vmul.f32 %v9303_v9, %v3804_v32  ;;  %11584 = vst [vmem:[#allocation121_spill] sm:$0xff] %v9692_v13  ;;  %v2532_v9 = vrot.slane %v9686_v52, %v7567_v10  ;;  %v3812_v32 = vrot.slane %v9686_v52, %v11381_v16 }
 0x491   :  { %v4988_v11 = vadd.f32 %v4860_v30, %v3644_v39  ;;  %v11588_v30 = vld [vmem:[#allocation222_spill] sm:$0xff]  ;;  %v11589_v39 = vld [vmem:[#allocation221_spill] sm:$0xff] }
 0x492   :  { %v4861_v4 = vmul.f32 %v11588_v30, %v3808_v56  ;;  %v4864_v2 = vmul.f32 %v11589_v39, %v3812_v32  ;;  %v3816_v56 = vrot.slane %v9692_v13, %v11381_v16  ;;  %v11596_v30 = vld [vmem:[#allocation224_spill] sm:$0xff] }
 0x493   :  { %v9676_v38 = vpop.permute.xlu1 %4497  ;;  %5301 = vperm.xlu1 %7043, %v4983_v26   ;;  %v9678_v63 = vpop.permute.xlu0 %4523  ;;  %v11582_v26 = vld [vmem:[#allocation135_spill] sm:$0xff] }
 0x494   :  { %11576 = vst [vmem:[#allocation55_spill] sm:$0xff] %v9676_v38  ;;  %11577 = vst [vmem:[#allocation68_spill] sm:$0xff] %v9678_v63  ;;  %5310 = vperm.xlu0 %7042, %v4986_v35   ;;  %v3643_v1 = vmul.f32 %v11582_v26, %v2524_v62  ;;  %v11587_v35 = vld [vmem:[#allocation136_spill] sm:$0xff]  ;;  %v3645_v26 = vmul.f32 %v11590_v47, %v2528_v24 }
 0x495   :  { %v3646_v50 = vmul.f32 %v11587_v35, %v2528_v24  ;;  %v9711_v35 = vmul.f32 %v11591_v43, %v2156_v3  ;;  %v5085_v24 = vld [vmem:[#allocation7] sm:$0xff]  ;;  %v4863_v3 = vmul.f32 %v11596_v30, %v3812_v32 }
 0x496   :  { %v4987_v62 = vadd.f32 %v4859_v5, %v3643_v1  ;;  %v5086_v1 = vld [vmem:[#allocation7 + $0x8] sm:$0xff]  ;;  %v11598_v43 = vld [vmem:[#allocation223_spill] sm:$0xff] }
 0x497   :  { %v9696_v63 = vpop.permute.xlu1 %4508  ;;  %5307 = vperm.xlu1 %7043, %v4985_v40   ;;  %v9698_v48 = vpop.permute.xlu0 %4534  ;;  %v4990_v54 = vadd.f32 %v4862_v31, %v3646_v50  ;;  %v2536_v40 = vrot.slane %v9692_v13, %v7567_v10  ;;  %11592 = vst [vmem:[#allocation214_spill] sm:$0xff] %v9711_v35  ;;  %v2160_v31 = vrot.slane %v9635_v22, %v11522_v21  ;;  %v11597_v47 = vld [vmem:[#allocation160_spill] sm:$0xff] }
 0x498   :  { %11585 = vst [vmem:[#allocation122_spill] sm:$0xff] %v9696_v63  ;;  %11586 = vst [vmem:[#allocation57_spill] sm:$0xff] %v9698_v48  ;;  %5316 = vperm.xlu0 %7042, %v4988_v11   ;;  %v11595_v11 = vld [vmem:[#allocation138_spill] sm:$0xff]  ;;  %v4989_v50 = vadd.f32 %v4861_v4, %v3645_v26  ;;  %v7025_v39 = vpack.c.bf16 %v5086_v1, %v5085_v24  ;;  %7178 = vrcp.f32 %v11597_v47  ;;  %v11606_v24 = vld [vmem:[#allocation225_spill] sm:$0xff] }
 0x499   :  { %v3648_v5 = vmul.f32 %v11595_v11, %v2532_v9  ;;  %v4866_v52 = vmul.f32 %v11598_v43, %v3816_v56  ;;  %v2540_v13 = vrot.slane %v9711_v35, %v7567_v10  ;;  %v3820_v32 = vrot.slane %v9711_v35, %v11381_v16  ;;  %v11603_v4 = vld [vmem:[#allocation78_spill] sm:$0xff]  ;;  %v11608_v47 = vld [vmem:[#allocation141_spill] sm:$0xff] }
 0x49a   :  { %7026 = vmatprep.subr.bf16.mxu0 %v7025_v39  ;;  %7029 = vmatprep.subr.bf16.mxu1 %v7025_v39  ;;  %v3649_v43 = vmul.f32 %v11608_v47, %v2536_v40  ;;  %v2172_v47 = vrot.slane %v9635_v22, %v11531_v15 }
 0x49b   :  { %v9713_v28 = vpop.permute.xlu1 %4519  ;;  %5313 = vperm.xlu1 %7043, %v4987_v62   ;;  %v9715_v48 = vpop.permute.xlu0 %4545  ;;  %v4992_v62 = vadd.f32 %v4864_v2, %v3648_v5  ;;  %v9736_v2 = vmul.f32 %v11603_v4, %v2160_v31  ;;  %7028 = vmatpush3.bf16.msra.mxu0 %v7025_v39  ;;  %v4868_v1 = vmul.f32 %v11606_v24, %v3820_v32  ;;  %v11615_v24 = vld [vmem:[#allocation143_spill] sm:$0xff] }
 0x49c   :  { %11593 = vst [vmem:[#allocation156_spill] sm:$0xff] %v9713_v28  ;;  %11594 = vst [vmem:[#allocation123_spill] sm:$0xff] %v9715_v48  ;;  %5322 = vperm.xlu0 %7042, %v4990_v54   ;;  %v11599_v48 = vld [vmem:[#allocation140_spill] sm:$0xff]  ;;  %v11600_v28 = vld [vmem:[#allocation139_spill] sm:$0xff]  ;;  %7030 = vmatpush3.bf16.msra.mxu1 %v7025_v39 }
 0x49d   :  { %v3650_v11 = vmul.f32 %v11599_v48, %v2536_v40  ;;  %v3647_v63 = vmul.f32 %v11600_v28, %v2532_v9  ;;  %11604 = vst [vmem:[#allocation215_spill] sm:$0xff] %v9736_v2  ;;  %v2164_v48 = vrot.slane %v9635_v22, %v11526_v51  ;;  %v11605_v9 = vld [vmem:[#allocation226_spill] sm:$0xff]  ;;  %v11613_v40 = vld [vmem:[#allocation228_spill] sm:$0xff] }
 0x49e   :  { %v4865_v26 = vmul.f32 %v11605_v9, %v3816_v56  ;;  %v11611_v56 = vld [vmem:[#allocation67_spill] sm:$0xff] }
 0x49f   :  { %v9729_v33 = vpop.permute.xlu1 %4530  ;;  %5319 = vperm.xlu1 %7043, %v4989_v50   ;;  %v9731_v54 = vpop.permute.xlu0 %4556  ;;  %v4991_v28 = vadd.f32 %v4863_v3, %v3647_v63  ;;  %v4994_v5 = vadd.f32 %v4866_v52, %v3650_v11  ;;  %v11607_v50 = vld [vmem:[#allocation142_spill] sm:$0xff]  ;;  %v3824_v63 = vrot.slane %v9736_v2, %v11381_v16  ;;  %v9753_v52 = vmul.f32 %v11611_v56, %v2164_v48 }
 0x4a0   :  { %11601 = vst [vmem:[#allocation124_spill] sm:$0xff] %v9729_v33  ;;  %11602 = vst [vmem:[#allocation70_spill] sm:$0xff] %v9731_v54  ;;  %5328 = vperm.xlu0 %7042, %v4992_v62   ;;  %v3652_v30 = vmul.f32 %v11607_v50, %v2540_v13  ;;  %v2544_v62 = vrot.slane %v9736_v2, %v7567_v10  ;;  %v2168_v3 = vrot.slane %v9635_v22, %v11530_v37  ;;  %v11618_v2 = vld [vmem:[#allocation144_spill] sm:$0xff] }
 0x4a1   :  { %11612 = vst [vmem:[#allocation126_spill] sm:$0xff] %v9753_v52  ;;  %v4993_v39 = vadd.f32 %v4865_v26, %v3649_v43  ;;  %v4867_v11 = vmul.f32 %v11613_v40, %v3820_v32  ;;  %v3651_v50 = vmul.f32 %v11615_v24, %v2540_v13  ;;  %v2548_v32 = vrot.slane %v9753_v52, %v7567_v10  ;;  %v11622_v40 = vld [vmem:[#allocation229_spill] sm:$0xff] }
 0x4a2   :  { %v4996_v4 = vadd.f32 %v4868_v1, %v3652_v30  ;;  %v9766_v56 = vpop.eup %7178  ;;  %v3828_v26 = vrot.slane %v9753_v52, %v11381_v16  ;;  %v11619_v1 = vld [vmem:[#allocation80_spill] sm:$0xff]  ;;  %v11621_v30 = vld [vmem:[#allocation230_spill] sm:$0xff]  ;;  %v11623_v24 = vld [vmem:[#allocation145_spill] sm:$0xff] }
 0x4a3   :  { %v9744_v35 = vpop.permute.xlu1 %4541  ;;  %5325 = vperm.xlu1 %7043, %v4991_v28   ;;  %v9746_v31 = vpop.permute.xlu0 %4567  ;;  %v11614_v28 = vld [vmem:[#allocation227_spill] sm:$0xff]  ;;  %v9774_v13 = vmul.f32 %v11619_v1, %v2168_v3  ;;  %v4995_v22 = vadd.f32 %v4867_v11, %v3651_v50  ;;  %v4869_v43 = vmul.f32 %v11621_v30, %v3824_v63  ;;  %v11626_v52 = vld [vmem:[#allocation146_spill] sm:$0xff]  ;;  %v11629_v50 = vld [vmem:[#allocation232_spill] sm:$0xff] }
 0x4a4   :  { %11609 = vst [vmem:[#allocation125_spill] sm:$0xff] %v9744_v35  ;;  %11610 = vst [vmem:[#allocation59_spill] sm:$0xff] %v9746_v31  ;;  %5334 = vperm.xlu0 %7042, %v4994_v5   ;;  %v4870_v9 = vmul.f32 %v11614_v28, %v3824_v63  ;;  %v3654_v5 = vmul.f32 %v11618_v2, %v2544_v62  ;;  %v4872_v28 = vmul.f32 %v11622_v40, %v3828_v26  ;;  %v11630_v30 = vld [vmem:[#allocation231_spill] sm:$0xff]  ;;  %v11699_v35 = vld [vmem:[#allocation22_spill] sm:$0xff] }
 0x4a5   :  { %11620 = vst [vmem:[#allocation128_spill] sm:$0xff] %v9774_v13  ;;  %v2176_v2 = vrot.slane %v9766_v56, %v7567_v10  ;;  %v3656_v3 = vmul.f32 %v11626_v52, %v2548_v32  ;;  %v2552_v11 = vrot.slane %v9774_v13, %v7567_v10  ;;  %v3832_v63 = vrot.slane %v9774_v13, %v11381_v16  ;;  %v11631_v40 = vld [vmem:[#allocation147_spill] sm:$0xff]  ;;  %v11634_v13 = vld [vmem:[#allocation148_spill] sm:$0xff] }
 0x4a6   :  { %v2180_v52 = vrot.slane %v9766_v56, %v11381_v16 }
 0x4a7   :  { %v9762_v31 = vpop.permute.xlu1 %4552  ;;  %5331 = vperm.xlu1 %7043, %v4993_v39   ;;  %v9764_v48 = vpop.permute.xlu0 %4578  ;;  %v4998_v39 = vadd.f32 %v4870_v9, %v3654_v5  ;;  %v4871_v5 = vmul.f32 %v11629_v50, %v3828_v26  ;;  %v5000_v1 = vadd.f32 %v4872_v28, %v3656_v3  ;;  %v11637_v28 = vld [vmem:[#allocation234_spill] sm:$0xff]  ;;  %v11638_v50 = vld [vmem:[#allocation233_spill] sm:$0xff] }
 0x4a8   :  { %11616 = vst [vmem:[#allocation216_spill] sm:$0xff] %v9762_v31  ;;  %11617 = vst [vmem:[#allocation127_spill] sm:$0xff] %v9764_v48  ;;  %5340 = vperm.xlu0 %7042, %v4996_v4   ;;  %v3653_v48 = vmul.f32 %v11623_v24, %v2544_v62  ;;  %v11627_v4 = vld [vmem:[#allocation69_spill] sm:$0xff]  ;;  %v3655_v24 = vmul.f32 %v11631_v40, %v2548_v32  ;;  %v4873_v3 = vmul.f32 %v11637_v28, %v3832_v63  ;;  %v11646_v28 = vld [vmem:[#allocation235_spill] sm:$0xff] }
 0x4a9   :  { %v9791_v9 = vmul.f32 %v11627_v4, %v2172_v47  ;;  %v3658_v47 = vmul.f32 %v11634_v13, %v2552_v11  ;;  %v11639_v13 = vld [vmem:[#allocation149_spill] sm:$0xff] }
 0x4aa   :  { %v4997_v62 = vadd.f32 %v4869_v43, %v3653_v48  ;;  %v11635_v43 = vld [vmem:[#allocation82_spill] sm:$0xff]  ;;  %v4999_v32 = vadd.f32 %v4871_v5, %v3655_v24  ;;  %v3657_v40 = vmul.f32 %v11639_v13, %v2552_v11 }
 0x4ab   :  { %v9781_v31 = vpop.permute.xlu1 %4563  ;;  %5337 = vperm.xlu1 %7043, %v4995_v22   ;;  %v9783_v54 = vpop.permute.xlu0 %4589  ;;  %11628 = vst [vmem:[#allocation130_spill] sm:$0xff] %v9791_v9  ;;  %v4874_v22 = vmul.f32 %v11630_v30, %v3832_v63  ;;  %v2556_v48 = vrot.slane %v9791_v9, %v7567_v10  ;;  %v3836_v26 = vrot.slane %v9791_v9, %v11381_v16  ;;  %v11642_v9 = vld [vmem:[#allocation150_spill] sm:$0xff] }
 0x4ac   :  { %11624 = vst [vmem:[#allocation72_spill] sm:$0xff] %v9781_v31  ;;  %11625 = vst [vmem:[#allocation217_spill] sm:$0xff] %v9783_v54  ;;  %5346 = vperm.xlu0 %7042, %v4998_v39   ;;  %v9808_v39 = vmul.f32 %v11635_v43, %v2176_v2  ;;  %v2184_v30 = vrot.slane %v9766_v56, %v11507_v57  ;;  %v5001_v24 = vadd.f32 %v4873_v3, %v3657_v40 }
 0x4ad   :  { %v5002_v4 = vadd.f32 %v4874_v22, %v3658_v47  ;;  %v3660_v2 = vmul.f32 %v11642_v9, %v2556_v48  ;;  %v11645_v47 = vld [vmem:[#allocation236_spill] sm:$0xff]  ;;  %v11647_v9 = vld [vmem:[#allocation151_spill] sm:$0xff] }
 0x4ae   :  { %11636 = vst [vmem:[#allocation218_spill] sm:$0xff] %v9808_v39  ;;  %v2560_v5 = vrot.slane %v9808_v39, %v7567_v10  ;;  %v3840_v63 = vrot.slane %v9808_v39, %v11381_v16  ;;  %v4875_v11 = vmul.f32 %v11645_v47, %v3836_v26  ;;  %v3659_v13 = vmul.f32 %v11647_v9, %v2556_v48  ;;  %v11650_v39 = vld [vmem:[#allocation84_spill] sm:$0xff]  ;;  %v11654_v47 = vld [vmem:[#allocation237_spill] sm:$0xff] }
 0x4af   :  { %v9798_v54 = vpop.permute.xlu1 %4574  ;;  %5343 = vperm.xlu1 %7043, %v4997_v62   ;;  %v9800_v31 = vpop.permute.xlu0 %4600  ;;  %v4876_v62 = vmul.f32 %v11638_v50, %v3836_v26  ;;  %v2188_v50 = vrot.slane %v9766_v56, %v11512_v36 }
 0x4b0   :  { %11632 = vst [vmem:[#allocation129_spill] sm:$0xff] %v9798_v54  ;;  %11633 = vst [vmem:[#allocation61_spill] sm:$0xff] %v9800_v31  ;;  %5352 = vperm.xlu0 %7042, %v5000_v1   ;;  %v11643_v1 = vld [vmem:[#allocation71_spill] sm:$0xff]  ;;  %v5003_v40 = vadd.f32 %v4875_v11, %v3659_v13 }
 0x4b1   :  { %v9825_v22 = vmul.f32 %v11643_v1, %v2180_v52  ;;  %v5004_v43 = vadd.f32 %v4876_v62, %v3660_v2  ;;  %v9837_v52 = vmul.f32 %v11650_v39, %v2184_v30  ;;  %v11653_v2 = vld [vmem:[#allocation238_spill] sm:$0xff]  ;;  %v11655_v39 = vld [vmem:[#allocation153_spill] sm:$0xff] }
 0x4b2   :  { %v4877_v48 = vmul.f32 %v11653_v2, %v3840_v63  ;;  %v3661_v30 = vmul.f32 %v11655_v39, %v2560_v5  ;;  %v11661_v2 = vld [vmem:[#allocation240_spill] sm:$0xff]  ;;  %v11663_v39 = vld [vmem:[#allocation239_spill] sm:$0xff] }
 0x4b3   :  { %v9815_v31 = vpop.permute.xlu1 %4585  ;;  %5349 = vperm.xlu1 %7043, %v4999_v32   ;;  %v9817_v54 = vpop.permute.xlu0 %4611  ;;  %11644 = vst [vmem:[#allocation74_spill] sm:$0xff] %v9825_v22  ;;  %v4878_v32 = vmul.f32 %v11646_v28, %v3840_v63  ;;  %11651 = vst [vmem:[#allocation134_spill] sm:$0xff] %v9837_v52  ;;  %v2564_v26 = vrot.slane %v9825_v22, %v7567_v10  ;;  %v3844_v62 = vrot.slane %v9825_v22, %v11381_v16  ;;  %v11660_v63 = vld [vmem:[#allocation154_spill] sm:$0xff] }
 0x4b4   :  { %11640 = vst [vmem:[#allocation131_spill] sm:$0xff] %v9815_v31  ;;  %11641 = vst [vmem:[#allocation132_spill] sm:$0xff] %v9817_v54  ;;  %5358 = vperm.xlu0 %7042, %v5002_v4   ;;  %v11652_v4 = vld [vmem:[#allocation152_spill] sm:$0xff]  ;;  %v2192_v28 = vrot.slane %v9766_v56, %v11522_v21  ;;  %v2568_v22 = vrot.slane %v9837_v52, %v7567_v10  ;;  %v3848_v13 = vrot.slane %v9837_v52, %v11381_v16  ;;  %v11667_v52 = vld [vmem:[#allocation161_spill] sm:$0xff] }
 0x4b5   :  { %v3662_v3 = vmul.f32 %v11652_v4, %v2560_v5  ;;  %v4879_v5 = vmul.f32 %v11661_v2, %v3844_v62  ;;  %v11670_v2 = vld [vmem:[#allocation242_spill] sm:$0xff] }
 0x4b7   :  { %v9832_v54 = vpop.permute.xlu1 %4596  ;;  %5355 = vperm.xlu1 %7043, %v5001_v24   ;;  %v9834_v31 = vpop.permute.xlu0 %4622  ;;  %v5006_v1 = vadd.f32 %v4878_v32, %v3662_v3  ;;  %v4880_v24 = vmul.f32 %v11654_v47, %v3844_v62  ;;  %v3664_v32 = vmul.f32 %v11660_v63, %v2564_v26  ;;  %v5005_v3 = vadd.f32 %v4877_v48, %v3661_v30  ;;  %v11662_v47 = vld [vmem:[#allocation158_spill] sm:$0xff] }
 0x4b8   :  { %11648 = vst [vmem:[#allocation219_spill] sm:$0xff] %v9832_v54  ;;  %11649 = vst [vmem:[#allocation133_spill] sm:$0xff] %v9834_v31  ;;  %5364 = vperm.xlu0 %7042, %v5004_v43   ;;  %v11658_v43 = vld [vmem:[#allocation73_spill] sm:$0xff]  ;;  %7180 = vrcp.f32 %v11662_v47  ;;  %v2196_v31 = vrot.slane %v9766_v56, %v11526_v51  ;;  %v11668_v48 = vld [vmem:[#allocation86_spill] sm:$0xff] }
 0x4b9   :  { %v9856_v11 = vmul.f32 %v11658_v43, %v2188_v50  ;;  %v9875_v30 = vmul.f32 %v11668_v48, %v2192_v28  ;;  %v11671_v47 = vld [vmem:[#allocation241_spill] sm:$0xff]  ;;  %v11675_v48 = vld [vmem:[#allocation163_spill] sm:$0xff] }
 0x4bb   :  { %v9849_v9 = vpop.permute.xlu1 %4607  ;;  %5361 = vperm.xlu1 %7043, %v5003_v40   ;;  %v9851_v4 = vpop.permute.xlu0 %4633  ;;  %11659 = vst [vmem:[#allocation135_spill] sm:$0xff] %v9856_v11  ;;  %v5008_v40 = vadd.f32 %v4880_v24, %v3664_v32  ;;  %v2572_v62 = vrot.slane %v9856_v11, %v7567_v10  ;;  %11669 = vst [vmem:[#allocation222_spill] sm:$0xff] %v9875_v30  ;;  %v3852_v24 = vrot.slane %v9856_v11, %v11381_v16 }
 0x4bc   :  { %11656 = vst [vmem:[#allocation63_spill] sm:$0xff] %v9849_v9  ;;  %11657 = vst [vmem:[#allocation220_spill] sm:$0xff] %v9851_v4  ;;  %5370 = vperm.xlu0 %7042, %v5006_v1   ;;  %v4882_v4 = vmul.f32 %v11663_v39, %v3848_v13  ;;  %v11664_v9 = vld [vmem:[#allocation155_spill] sm:$0xff]  ;;  %v3666_v1 = vmul.f32 %v11667_v52, %v2568_v22  ;;  %v2200_v39 = vrot.slane %v9766_v56, %v11530_v37  ;;  %v11672_v52 = vld [vmem:[#allocation157_spill] sm:$0xff] }
 0x4bd   :  { %v3663_v50 = vmul.f32 %v11664_v9, %v2564_v26  ;;  %v4881_v26 = vmul.f32 %v11670_v2, %v3848_v13  ;;  %v3668_v54 = vmul.f32 %v11675_v48, %v2572_v62  ;;  %v2204_v48 = vrot.slane %v9766_v56, %v11531_v15 }
 0x4be   :  { %v5010_v9 = vadd.f32 %v4882_v4, %v3666_v1  ;;  %v3856_v4 = vrot.slane %v9875_v30, %v11381_v16  ;;  %v11678_v1 = vld [vmem:[#allocation244_spill] sm:$0xff] }
 0x4bf   :  { %v9867_v43 = vpop.permute.xlu1 %4618  ;;  %5367 = vperm.xlu1 %7043, %v5005_v3   ;;  %v9869_v63 = vpop.permute.xlu0 %4644  ;;  %v5007_v32 = vadd.f32 %v4879_v5, %v3663_v50  ;;  %v4884_v3 = vmul.f32 %v11671_v47, %v3852_v24  ;;  %v2576_v5 = vrot.slane %v9875_v30, %v7567_v10  ;;  %v11679_v47 = vld [vmem:[#allocation243_spill] sm:$0xff]  ;;  %v11683_v30 = vld [vmem:[#allocation165_spill] sm:$0xff] }
 0x4c0   :  { %11665 = vst [vmem:[#allocation76_spill] sm:$0xff] %v9867_v43  ;;  %11666 = vst [vmem:[#allocation136_spill] sm:$0xff] %v9869_v63  ;;  %5376 = vperm.xlu0 %7042, %v5008_v40   ;;  %v3665_v63 = vmul.f32 %v11672_v52, %v2568_v22  ;;  %v11676_v40 = vld [vmem:[#allocation75_spill] sm:$0xff]  ;;  %v4883_v22 = vmul.f32 %v11678_v1, %v3852_v24  ;;  %v11680_v52 = vld [vmem:[#allocation166_spill] sm:$0xff] }
 0x4c1   :  { %v9892_v13 = vmul.f32 %v11676_v40, %v2196_v31  ;;  %v5012_v2 = vadd.f32 %v4884_v3, %v3668_v54  ;;  %v3667_v11 = vmul.f32 %v11680_v52, %v2572_v62  ;;  %v11684_v54 = vld [vmem:[#allocation21_spill] sm:$0xff]  ;;  %v11688_v52 = vld [vmem:[#allocation168_spill] sm:$0xff] }
 0x4c2   :  { %v5009_v50 = vadd.f32 %v4881_v26, %v3665_v63  ;;  %v9905_v40 = vpop.eup %7180  ;;  %v9911_v24 = vmul.f32 %v11684_v54, %v2200_v39  ;;  %v11686_v26 = vld [vmem:[#allocation246_spill] sm:$0xff]  ;;  %v11687_v1 = vld [vmem:[#allocation245_spill] sm:$0xff]  ;;  %v11691_v54 = vld [vmem:[#allocation167_spill] sm:$0xff] }
 0x4c3   :  { %v9884_v43 = vpop.permute.xlu1 %4629  ;;  %5373 = vperm.xlu1 %7043, %v5007_v32   ;;  %v9886_v28 = vpop.permute.xlu0 %4655  ;;  %11677 = vst [vmem:[#allocation65_spill] sm:$0xff] %v9892_v13  ;;  %v4886_v32 = vmul.f32 %v11679_v47, %v3856_v4  ;;  %v2580_v63 = vrot.slane %v9892_v13, %v7567_v10  ;;  %v3860_v62 = vrot.slane %v9892_v13, %v11381_v16 }
 0x4c4   :  { %11673 = vst [vmem:[#allocation221_spill] sm:$0xff] %v9884_v43  ;;  %11674 = vst [vmem:[#allocation137_spill] sm:$0xff] %v9886_v28  ;;  %5382 = vperm.xlu0 %7042, %v5010_v9   ;;  %v3670_v9 = vmul.f32 %v11683_v30, %v2576_v5  ;;  %v5011_v56 = vadd.f32 %v4883_v22, %v3667_v11  ;;  %v4885_v3 = vmul.f32 %v11686_v26, %v3856_v4  ;;  %v11692_v22 = vld [vmem:[#allocation77_spill] sm:$0xff] }
 0x4c5   :  { %11685 = vst [vmem:[#allocation160_spill] sm:$0xff] %v9911_v24  ;;  %v4888_v47 = vmul.f32 %v11687_v1, %v3860_v62  ;;  %v2208_v30 = vrot.slane %v9905_v40, %v7567_v10  ;;  %v3672_v43 = vmul.f32 %v11691_v54, %v2580_v63  ;;  %v2584_v11 = vrot.slane %v9911_v24, %v7567_v10  ;;  %v11695_v1 = vld [vmem:[#allocation247_spill] sm:$0xff]  ;;  %v11698_v54 = vld [vmem:[#allocation169_spill] sm:$0xff] }
 0x4c6   :  { %v9928_v4 = vmul.f32 %v11692_v22, %v2204_v48  ;;  %v2212_v22 = vrot.slane %v9905_v40, %v11381_v16 }
 0x4c7   :  { %v9901_v28 = vpop.permute.xlu1 %4640  ;;  %5379 = vperm.xlu1 %7043, %v5009_v50   ;;  %v9903_v31 = vpop.permute.xlu0 %4666  ;;  %v5014_v50 = vadd.f32 %v4886_v32, %v3670_v9  ;;  %v11694_v32 = vld [vmem:[#allocation248_spill] sm:$0xff]  ;;  %v5016_v26 = vadd.f32 %v4888_v47, %v3672_v43  ;;  %v9939_v48 = vmul.f32 %v11699_v35, %v2208_v30 }
 0x4c8   :  { %11681 = vst [vmem:[#allocation138_spill] sm:$0xff] %v9901_v28  ;;  %11682 = vst [vmem:[#allocation224_spill] sm:$0xff] %v9903_v31  ;;  %5388 = vperm.xlu0 %7042, %v5012_v2   ;;  %v3669_v31 = vmul.f32 %v11688_v52, %v2576_v5  ;;  %v3864_v2 = vrot.slane %v9911_v24, %v11381_v16  ;;  %v4887_v9 = vmul.f32 %v11694_v32, %v3860_v62  ;;  %v11696_v52 = vld [vmem:[#allocation170_spill] sm:$0xff]  ;;  %v11704_v35 = vld [vmem:[#allocation172_spill] sm:$0xff] }
 0x4c9   :  { %11693 = vst [vmem:[#allocation139_spill] sm:$0xff] %v9928_v4  ;;  %v3671_v13 = vmul.f32 %v11696_v52, %v2580_v63  ;;  %11700 = vst [vmem:[#allocation226_spill] sm:$0xff] %v9939_v48  ;;  %v11701_v62 = vld [vmem:[#allocation250_spill] sm:$0xff]  ;;  %v2588_v63 = vrot.slane %v9928_v4, %v7567_v10  ;;  %v3673_v30 = vmul.f32 %v11704_v35, %v2584_v11  ;;  %v11706_v52 = vld [vmem:[#allocation171_spill] sm:$0xff] }
 0x4ca   :  { %v5013_v5 = vadd.f32 %v4885_v3, %v3669_v31  ;;  %v3868_v31 = vrot.slane %v9928_v4, %v11381_v16  ;;  %v4889_v3 = vmul.f32 %v11701_v62, %v3864_v2  ;;  %v11707_v24 = vld [vmem:[#allocation79_spill] sm:$0xff] }
 0x4cb   :  { %v9920_v28 = vpop.permute.xlu1 %4651  ;;  %5385 = vperm.xlu1 %7043, %v5011_v56   ;;  %v9922_v39 = vpop.permute.xlu0 %4677  ;;  %v4890_v56 = vmul.f32 %v11695_v1, %v3864_v2  ;;  %v5015_v43 = vadd.f32 %v4887_v9, %v3671_v13  ;;  %v2216_v13 = vrot.slane %v9905_v40, %v11507_v57  ;;  %v3872_v2 = vrot.slane %v9939_v48, %v11381_v16 }
 0x4cc   :  { %11689 = vst [vmem:[#allocation223_spill] sm:$0xff] %v9920_v28  ;;  %11690 = vst [vmem:[#allocation140_spill] sm:$0xff] %v9922_v39  ;;  %5394 = vperm.xlu0 %7042, %v5014_v50   ;;  %v3674_v28 = vmul.f32 %v11698_v54, %v2584_v11  ;;  %v3676_v54 = vmul.f32 %v11706_v52, %v2588_v63  ;;  %v4891_v9 = vmul.f32 %v9433_v60, %v3868_v31  ;;  %v11713_v52 = vld [vmem:[#allocation173_spill] sm:$0xff] }
 0x4cd   :  { %v2592_v11 = vrot.slane %v9939_v48, %v7567_v10  ;;  %v2220_v60 = vrot.slane %v9905_v40, %v11512_v36 }
 0x4ce   :  { %v5018_v47 = vadd.f32 %v4890_v56, %v3674_v28  ;;  %v5017_v28 = vadd.f32 %v4889_v3, %v3673_v30 }
 0x4cf   :  { %v9935_v39 = vpop.permute.xlu1 %4662  ;;  %5391 = vperm.xlu1 %7043, %v5013_v5   ;;  %v9946_v50 = vpop.permute.xlu0 %4688  ;;  %v11703_v5 = vld [vmem:[#allocation249_spill] sm:$0xff]  ;;  %v3678_v4 = vmul.f32 %v11713_v52, %v2592_v11  ;;  %v11719_v52 = vld [vmem:[#allocation174_spill] sm:$0xff] }
 0x4d0   :  { %11697 = vst [vmem:[#allocation78_spill] sm:$0xff] %v9935_v39  ;;  %5400 = vperm.xlu0 %7042, %v5016_v26   ;;  %11702 = vst [vmem:[#allocation225_spill] sm:$0xff] %v9946_v50  ;;  %v4892_v32 = vmul.f32 %v11703_v5, %v3868_v31  ;;  %v9956_v26 = vmul.f32 %v11707_v24, %v2212_v22  ;;  %v11710_v5 = vld [vmem:[#allocation44_spill] sm:$0xff]  ;;  %v11714_v50 = vld [vmem:[#allocation23_spill] sm:$0xff] }
 0x4d1   :  { %v3675_v35 = vmul.f32 %v11710_v5, %v2588_v63  ;;  %v4893_v63 = vmul.f32 %v9450_v49, %v3872_v2  ;;  %v2224_v49 = vrot.slane %v9905_v40, %v11522_v21 }
 0x4d2   :  { %11708 = vst [vmem:[#allocation141_spill] sm:$0xff] %v9956_v26  ;;  %v5020_v56 = vadd.f32 %v4892_v32, %v3676_v54  ;;  %v3876_v31 = vrot.slane %v9956_v26, %v11381_v16  ;;  %v11716_v32 = vld [vmem:[#allocation162_spill] sm:$0xff]  ;;  %v2596_v30 = vrot.slane %v9956_v26, %v7567_v10  ;;  %v11724_v26 = vld [vmem:[#allocation24_spill] sm:$0xff] }
 0x4d3   :  { %v9952_v1 = vpop.permute.xlu1 %4673  ;;  %5397 = vperm.xlu1 %7043, %v5015_v43   ;;  %v11709_v43 = vld [vmem:[#allocation251_spill] sm:$0xff]  ;;  %v9967_v24 = vpop.permute.xlu0 %4699  ;;  %v5019_v3 = vadd.f32 %v4891_v9, %v3675_v35  ;;  %7182 = vrcp.f32 %v11716_v32  ;;  %v11720_v9 = vld [vmem:[#allocation81_spill] sm:$0xff] }
 0x4d4   :  { %11705 = vst [vmem:[#allocation142_spill] sm:$0xff] %v9952_v1  ;;  %5406 = vperm.xlu0 %7042, %v5018_v47   ;;  %v4894_v62 = vmul.f32 %v11709_v43, %v3872_v2  ;;  %11711 = vst [vmem:[#allocation67_spill] sm:$0xff] %v9967_v24  ;;  %v9973_v47 = vmul.f32 %v11714_v50, %v2216_v13  ;;  %v11717_v50 = vld [vmem:[#allocation175_spill] sm:$0xff]  ;;  %v9991_v35 = vmul.f32 %v11720_v9, %v2220_v60  ;;  %v11722_v32 = vld [vmem:[#allocation177_spill] sm:$0xff] }
 0x4d5   :  { %v3677_v13 = vmul.f32 %v11717_v50, %v2592_v11  ;;  %v4895_v2 = vmul.f32 %v9466_v55, %v3876_v31  ;;  %v3679_v50 = vmul.f32 %v11722_v32, %v2596_v30  ;;  %v11723_v9 = vld [vmem:[#allocation176_spill] sm:$0xff]  ;;  %v2228_v55 = vrot.slane %v9905_v40, %v11526_v51 }
 0x4d6   :  { %11715 = vst [vmem:[#allocation227_spill] sm:$0xff] %v9973_v47  ;;  %v5022_v54 = vadd.f32 %v4894_v62, %v3678_v4  ;;  %11721 = vst [vmem:[#allocation144_spill] sm:$0xff] %v9991_v35  ;;  %v3880_v4 = vrot.slane %v9973_v47, %v11381_v16  ;;  %v2600_v11 = vrot.slane %v9973_v47, %v7567_v10 }
 0x4d7   :  { %v9969_v22 = vpop.permute.xlu1 %4684  ;;  %5403 = vperm.xlu1 %7043, %v5017_v28   ;;  %v4896_v28 = vmul.f32 %v9435_v53, %v3876_v31  ;;  %v5021_v53 = vadd.f32 %v4893_v63, %v3677_v13  ;;  %v3884_v31 = vrot.slane %v9991_v35, %v11381_v16 }
 0x4d8   :  { %11712 = vst [vmem:[#allocation228_spill] sm:$0xff] %v9969_v22  ;;  %5412 = vperm.xlu0 %7042, %v5020_v56   ;;  %v3680_v56 = vmul.f32 %v11719_v52, %v2596_v30  ;;  %v3682_v48 = vmul.f32 %v11723_v9, %v2600_v11  ;;  %v4897_v63 = vmul.f32 %v9484_v61, %v3880_v4  ;;  %v11727_v9 = vld [vmem:[#allocation178_spill] sm:$0xff] }
 0x4d9   :  { %v2604_v30 = vrot.slane %v9991_v35, %v7567_v10  ;;  %v4900_v13 = vmul.f32 %v9468_v45, %v3884_v31  ;;  %v2232_v61 = vrot.slane %v9905_v40, %v11530_v37  ;;  %v11737_v35 = vld [vmem:[#allocation99_spill] sm:$0xff]  ;;  %v11738_v22 = vld [vmem:[#allocation26_spill] sm:$0xff] }
 0x4da   :  { %v5024_v62 = vadd.f32 %v4896_v28, %v3680_v56  ;;  %v11726_v56 = vld [vmem:[#allocation33_spill] sm:$0xff] }
 0x4db   :  { %v9985_v43 = vpop.permute.xlu1 %4695  ;;  %5409 = vperm.xlu1 %7043, %v5019_v3   ;;  %v9987_v5 = vpop.permute.xlu0 %5226  ;;  %v4898_v3 = vmul.f32 %v9452_v41, %v3880_v4  ;;  %v5023_v41 = vadd.f32 %v4895_v2, %v3679_v50  ;;  %v11728_v2 = vld [vmem:[#allocation83_spill] sm:$0xff] }
 0x4dc   :  { %11718 = vst [vmem:[#allocation143_spill] sm:$0xff] %v9985_v43  ;;  %5418 = vperm.xlu0 %7042, %v5022_v54   ;;  %v10008_v54 = vmul.f32 %v11724_v26, %v2224_v49  ;;  %v10027_v50 = vmul.f32 %v11728_v2, %v2228_v55 }
 0x4dd   :  { %v5026_v28 = vadd.f32 %v4898_v3, %v3682_v48  ;;  %v10023_v32 = vpop.eup %7182  ;;  %v2236_v48 = vrot.slane %v9905_v40, %v11531_v15 }
 0x4de   :  { %11725 = vst [vmem:[#allocation80_spill] sm:$0xff] %v10008_v54  ;;  %11729 = vst [vmem:[#allocation230_spill] sm:$0xff] %v10027_v50  ;;  %v3888_v45 = vrot.slane %v10008_v54, %v11381_v16  ;;  %v2608_v3 = vrot.slane %v10008_v54, %v7567_v10  ;;  %v2240_v2 = vrot.slane %v10023_v32, %v7567_v10  ;;  %v11736_v54 = vld [vmem:[#allocation159_spill] sm:$0xff] }
 0x4df   :  { %v10002_v60 = vpop.permute.xlu1 %5223  ;;  %5415 = vperm.xlu1 %7043, %v5021_v53   ;;  %v10004_v52 = vpop.permute.xlu0 %5232  ;;  %v3681_v53 = vmul.f32 %v11726_v56, %v2600_v11  ;;  %v4899_v11 = vmul.f32 %v9503_v19, %v3884_v31  ;;  %v11730_v56 = vld [vmem:[#allocation98_spill] sm:$0xff]  ;;  %v11731_v19 = vld [vmem:[#allocation179_spill] sm:$0xff]  ;;  %7184 = vrcp.f32 %v11736_v54 }
 0x4e0   :  { %5424 = vperm.xlu0 %7042, %v5024_v62   ;;  %v3684_v62 = vmul.f32 %v11727_v9, %v2604_v30  ;;  %v4902_v55 = vmul.f32 %v9486_v23, %v3888_v45  ;;  %v3683_v9 = vmul.f32 %v11730_v56, %v2604_v30  ;;  %v3686_v31 = vmul.f32 %v11731_v19, %v2608_v3 }
 0x4e1   :  { %v5025_v4 = vadd.f32 %v4897_v63, %v3681_v53  ;;  %v11732_v63 = vld [vmem:[#allocation25_spill] sm:$0xff]  ;;  %v2248_v23 = vrot.slane %v10023_v32, %v11507_v57  ;;  %v3892_v30 = vrot.slane %v10027_v50, %v11381_v16  ;;  %v2612_v19 = vrot.slane %v10027_v50, %v7567_v10  ;;  %v11748_v50 = vld [vmem:[#allocation183_spill] sm:$0xff] }
 0x4e2   :  { %v10050_v53 = vmul.f32 %v11732_v63, %v2232_v61  ;;  %v5027_v56 = vadd.f32 %v4899_v11, %v3683_v9  ;;  %v5030_v61 = vadd.f32 %v4902_v55, %v3686_v31  ;;  %v3685_v43 = vmul.f32 %v11737_v35, %v2608_v3  ;;  %v11741_v35 = vld [vmem:[#allocation91_spill] sm:$0xff] }
 0x4e3   :  { %v10019_v26 = vpop.permute.xlu1 %5229  ;;  %5421 = vperm.xlu1 %7043, %v5023_v41   ;;  %v10021_v49 = vpop.permute.xlu0 %5238  ;;  %v5028_v41 = vadd.f32 %v4900_v13, %v3684_v62  ;;  %v11734_v13 = vld [vmem:[#allocation85_spill] sm:$0xff]  ;;  %v4904_v63 = vmul.f32 %v9505_v17, %v3892_v30  ;;  %v10066_v24 = vmul.f32 %v11738_v22, %v2240_v2  ;;  %v10081_v3 = vmul.f32 %v11741_v35, %v2248_v23 }
 0x4e4   :  { %5430 = vperm.xlu0 %7042, %v5026_v28   ;;  %v2244_v28 = vrot.slane %v10023_v32, %v11381_v16  ;;  %11733 = vst [vmem:[#allocation229_spill] sm:$0xff] %v10050_v53  ;;  %v10057_v62 = vmul.f32 %v11734_v13, %v2236_v48  ;;  %v2252_v48 = vrot.slane %v10023_v32, %v11512_v36 }
 0x4e5   :  { %v2616_v17 = vrot.slane %v10050_v53, %v7567_v10  ;;  %v3896_v22 = vrot.slane %v10050_v53, %v11381_v16 }
 0x4e6   :  { %11735 = vst [vmem:[#allocation145_spill] sm:$0xff] %v10057_v62  ;;  %v2620_v55 = vrot.slane %v10057_v62, %v7567_v10  ;;  %v3900_v23 = vrot.slane %v10057_v62, %v11381_v16 }
 0x4e7   :  { %v10044_v47 = vpop.permute.xlu1 %5235  ;;  %5427 = vperm.xlu1 %7043, %v5025_v4   ;;  %v10046_v40 = vpop.permute.xlu0 %5244  ;;  %v4901_v4 = vmul.f32 %v9520_v34, %v3888_v45  ;;  %v11740_v45 = vld [vmem:[#allocation180_spill] sm:$0xff]  ;;  %v4906_v13 = vmul.f32 %v9522_v20, %v3896_v22 }
 0x4e8   :  { %5436 = vperm.xlu0 %7042, %v5028_v41   ;;  %v11739_v41 = vld [vmem:[#allocation87_spill] sm:$0xff]  ;;  %v3688_v11 = vmul.f32 %v11740_v45, %v2612_v19  ;;  %v11743_v45 = vld [vmem:[#allocation100_spill] sm:$0xff] }
 0x4e9   :  { %v10069_v1 = vmul.f32 %v11739_v41, %v2244_v28  ;;  %v5029_v2 = vadd.f32 %v4901_v4, %v3685_v43  ;;  %v4903_v28 = vmul.f32 %v9537_v6, %v3892_v30  ;;  %v3687_v35 = vmul.f32 %v11743_v45, %v2612_v19  ;;  %v11744_v43 = vld [vmem:[#allocation27_spill] sm:$0xff]  ;;  %v11745_v30 = vld [vmem:[#allocation181_spill] sm:$0xff] }
 0x4ea   :  { %v5032_v31 = vadd.f32 %v4904_v63, %v3688_v11  ;;  %v10102_v4 = vmul.f32 %v11744_v43, %v2252_v48  ;;  %v3690_v63 = vmul.f32 %v11745_v30, %v2616_v17  ;;  %v11746_v11 = vld [vmem:[#allocation182_spill] sm:$0xff]  ;;  %v10108_v19 = vrot.slane %v10081_v3, %v7567_v10  ;;  %v11747_v45 = vld [vmem:[#allocation101_spill] sm:$0xff] }
 0x4eb   :  { %v10073_v34 = vpop.permute.xlu1 %5241  ;;  %5433 = vperm.xlu1 %7043, %v5027_v56   ;;  %v10075_v54 = vpop.permute.xlu0 %5250  ;;  %v11742_v56 = vld [vmem:[#allocation19_spill] sm:$0xff]  ;;  %v10099_v53 = vrot.slane %v10069_v1, %v7567_v10  ;;  %v3692_v9 = vmul.f32 %v11746_v11, %v2620_v55  ;;  %v3689_v62 = vmul.f32 %v11747_v45, %v2616_v17  ;;  %v5031_v48 = vadd.f32 %v4903_v28, %v3687_v35  ;;  %v11750_v30 = vld [vmem:[#allocation18_spill] sm:$0xff]  ;;  %v11751_v11 = vld [vmem:[#allocation20_spill] sm:$0xff] }
 0x4ec   :  { %5442 = vperm.xlu0 %7042, %v5030_v61   ;;  %v5610_v41 = vadd.s32 4294967288, %v11742_v56  ;;  %v2624_v61 = vrot.slane %v10066_v24, %v7567_v10  ;;  %v4908_v56 = vmul.f32 %v9539_v27, %v3900_v23  ;;  %v4905_v43 = vmul.f32 %v9554_v58, %v3896_v22  ;;  %v10125_v22 = vpop.eup %7184 }
 0x4ed   :  { %v5034_v38 = vadd.f32 %v4906_v13, %v3690_v63  ;;  %v5620_v57 = vrot.slane %v10019_v26, %v11751_v11  ;;  %v3904_v27 = vrot.slane %v10066_v24, %v11381_v16  ;;  %v5609_v28 = vrot.slane %v10002_v60, %v11751_v11 }
 0x4ee   :  { %v3694_v39 = vmul.f32 %v11748_v50, %v2624_v61  ;;  %v10116_v36 = vsub.s32 %v5610_v41, %v11750_v30  ;;  %v5629_v50 = vrot.slane %v10044_v47, %v11751_v11  ;;  %v5638_v13 = vrot.slane %v10073_v34, %v11751_v11 }
 0x4ef   :  { %v5248_v6 = vpop.permute.xlu1 %5247  ;;  %5439 = vperm.xlu1 %7043, %v5029_v2   ;;  %v5257_v20 = vpop.permute.xlu0 %5256  ;;  %v11749_v2 = vld [vmem:[#allocation102_spill] sm:$0xff] }
 0x4f0   :  { %5448 = vperm.xlu0 %7042, %v5032_v31   ;;  %v3691_v33 = vmul.f32 %v11749_v2, %v2620_v55  ;;  %v4907_v31 = vmul.f32 %v9571_v42, %v3900_v23  ;;  %v5036_v55 = vadd.f32 %v4908_v56, %v3692_v9  ;;  %v5624_v26 = vrot.slane %v10004_v52, %v10116_v36 }
 0x4f1   :  { %v5033_v42 = vadd.f32 %v4905_v43, %v3689_v62  ;;  %v4910_v23 = vmul.f32 %v9556_v59, %v3904_v27  ;;  %v5633_v47 = vrot.slane %v10021_v49, %v10116_v36  ;;  %v5647_v41 = vrot.slane %v5248_v6, %v11751_v11 }
 0x4f2   :  { %v5614_v9 = vrot.slane %v9987_v5, %v10116_v36  ;;  %v5625_v60 = vsel %vm5615_vm9, %v5624_v26, %v5620_v57  ;;  %v5642_v52 = vrot.slane %v10046_v40, %v10116_v36  ;;  %v5035_v34 = vadd.f32 %v4907_v31, %v3691_v33 }
 0x4f3   :  { %v5254_v17 = vpop.permute.xlu1 %5253  ;;  %5445 = vperm.xlu1 %7043, %v5031_v48   ;;  %v5263_v58 = vpop.permute.xlu0 %5262  ;;  %v5634_v59 = vsel %vm5615_vm9, %v5633_v47, %v5629_v50  ;;  %v5651_v49 = vrot.slane %v10075_v54, %v10116_v36  ;;  %v5660_v40 = vrot.slane %v5257_v20, %v10116_v36  ;;  %v4909_v33 = vmul.f32 %v9589_v0, %v3904_v27  ;;  %v11752_v20 = vld [vmem:[#allocation184_spill] sm:$0xff]  ;;  %v11753_v50 = vld [vmem:[#allocation103_spill] sm:$0xff] }
 0x4f4   :  { %5454 = vperm.xlu0 %7042, %v5034_v38   ;;  %v5656_v35 = vrot.slane %v5254_v17, %v11751_v11  ;;  %v3908_v38 = vrot.slane %v10069_v1, %v11381_v16  ;;  %v5616_v5 = vsel %vm5615_vm9, %v5614_v9, %v5609_v28  ;;  %v5643_v57 = vsel %vm5615_vm9, %v5642_v52, %v5638_v13 }
 0x4f5   :  { %v6184_v56 = vsel %vm845_vm1, %v5625_v60, %v5616_v5  ;;  %v5652_v45 = vsel %vm5615_vm9, %v5651_v49, %v5647_v41  ;;  %v5669_v54 = vrot.slane %v5263_v58, %v10116_v36  ;;  %v5038_v48 = vadd.f32 %v4910_v23, %v3694_v39  ;;  %v11754_v60 = vld [vmem:[#allocation104_spill] sm:$0xff] }
 0x4f6   :  { %v4912_v43 = vmul.f32 %v9573_v18, %v3908_v38  ;;  %v6185_v2 = vsel %vm847_vm2, %v5634_v59, %v6184_v56  ;;  %v5661_v30 = vsel %vm5615_vm9, %v5660_v40, %v5656_v35  ;;  %v3696_v31 = vmul.f32 %v11752_v20, %v10099_v53  ;;  %v11755_v59 = vld [vmem:[#allocation185_spill] sm:$0xff] }
 0x4f7   :  { %v5260_v62 = vpop.permute.xlu1 %5259  ;;  %5451 = vperm.xlu1 %7043, %v5033_v42   ;;  %v5269_v6 = vpop.permute.xlu0 %5268  ;;  %v3693_v17 = vmul.f32 %v11753_v50, %v2624_v61  ;;  %v6186_v0 = vsel %vm849_vm3, %v5643_v57, %v6185_v2  ;;  %v3912_v18 = vrot.slane %v10081_v3, %v11381_v16  ;;  %v4911_v61 = vmul.f32 %v9607_v29, %v3908_v38  ;;  %v11758_v56 = vld [vmem:[#allocation105_spill] sm:$0xff] }
 0x4f8   :  { %v5665_v63 = vrot.slane %v5260_v62, %v11751_v11  ;;  %5460 = vperm.xlu0 %7042, %v5036_v55   ;;  %v5678_v39 = vrot.slane %v5269_v6, %v10116_v36  ;;  %v6187_v26 = vsel %vm851_vm4, %v5652_v45, %v6186_v0  ;;  %v5040_v23 = vadd.f32 %v4912_v43, %v3696_v31  ;;  %v11757_v62 = vld [vmem:[#allocation30_spill] sm:$0xff] }
 0x4f9   :  { %v5037_v13 = vadd.f32 %v4909_v33, %v3693_v17  ;;  %v6188_v42 = vsel %vm853_vm5, %v5661_v30, %v6187_v26  ;;  %v4914_v47 = vmul.f32 %v9591_v8, %v3912_v18  ;;  %v3695_v52 = vmul.f32 %v11754_v60, %v10099_v53  ;;  %v11759_v43 = vld [vmem:[#allocation186_spill] sm:$0xff]  ;;  %v11760_v30 = vld [vmem:[#allocation29_spill] sm:$0xff] }
 0x4fa   :  { %v5670_v58 = vsel %vm5615_vm9, %v5669_v54, %v5665_v63  ;;  %v2260_v35 = vrot.slane %v10023_v32, %v11526_v51  ;;  %v3698_v8 = vmul.f32 %v11755_v59, %v10108_v19  ;;  %v11756_v49 = vrot.slane %v10023_v32, %v11522_v21 }
 0x4fb   :  { %v5266_v27 = vpop.permute.xlu1 %5265  ;;  %5457 = vperm.xlu1 %7043, %v5035_v34   ;;  %v10163_v55 = vpop.permute.xlu0 %5274  ;;  %v6189_v9 = vsel %vm855_vm6, %v5670_v58, %v6188_v42  ;;  %v3916_v53 = vrot.slane %v10102_v4, %v11381_v16  ;;  %v5039_v5 = vadd.f32 %v4911_v61, %v3695_v52  ;;  %v4913_v57 = vmul.f32 %v9623_v46, %v3912_v18  ;;  %v11761_v58 = vld [vmem:[#allocation106_spill] sm:$0xff]  ;;  %v11763_v61 = vld [vmem:[#allocation32_spill] sm:$0xff] }
 0x4fc   :  { %v5674_v28 = vrot.slane %v5266_v27, %v11751_v11  ;;  %5466 = vperm.xlu0 %7042, %v5038_v48   ;;  %v10191_v6 = vmul.f32 %v11757_v62, %v11756_v49  ;;  %v2636_v40 = vrot.slane %v10102_v4, %v7567_v10  ;;  %v5042_v63 = vadd.f32 %v4914_v47, %v3698_v8  ;;  %v11766_v8 = vld [vmem:[#allocation34_spill] sm:$0xff] }
 0x4fd   :  { %v4916_v33 = vmul.f32 %v9609_v44, %v3916_v53  ;;  %v3697_v45 = vmul.f32 %v11758_v56, %v10108_v19  ;;  %v10208_v20 = vmul.f32 %v11760_v30, %v2260_v35  ;;  %v2264_v46 = vrot.slane %v10023_v32, %v11530_v37  ;;  %v11770_v56 = vld [vmem:[#allocation164_spill] sm:$0xff]  ;;  %v11772_v30 = vld [vmem:[#allocation55_spill] sm:$0xff] }
 0x4fe   :  { %v5679_v41 = vsel %vm5615_vm9, %v5678_v39, %v5674_v28  ;;  %v3700_v2 = vmul.f32 %v11759_v43, %v2636_v40  ;;  %v3920_v31 = vrot.slane %v10191_v6, %v11381_v16  ;;  %v4915_v19 = vmul.f32 %v9641_v12, %v3916_v53  ;;  %v11762_v12 = vld [vmem:[#allocation187_spill] sm:$0xff] }
 0x4ff   :  { %v10180_v34 = vpop.permute.xlu1 %5271  ;;  %5463 = vperm.xlu1 %7043, %v5037_v13   ;;  %v10182_v29 = vpop.permute.xlu0 %5280  ;;  %v6190_v38 = vsel %vm857_vm7, %v5679_v41, %v6189_v9  ;;  %v5041_v44 = vadd.f32 %v4913_v57, %v3697_v45  ;;  %v2640_v50 = vrot.slane %v10191_v6, %v7567_v10  ;;  %v2268_v17 = vrot.slane %v10023_v32, %v11531_v15  ;;  %v11764_v9 = vld [vmem:[#allocation31_spill] sm:$0xff]  ;;  %v11768_v57 = vld [vmem:[#allocation88_spill] sm:$0xff] }
 0x500   :  { %5472 = vperm.xlu0 %7042, %v5040_v23   ;;  %7013 = vmatprep.mubr.msk.f32.mxu0 %vm6240_vm10, %v6190_v38  ;;  %v5044_v0 = vadd.f32 %v4916_v33, %v3700_v2  ;;  %v4918_v27 = vmul.f32 %v9625_v14, %v3920_v31  ;;  %v3699_v18 = vmul.f32 %v11761_v58, %v2636_v40  ;;  %v11765_v38 = vld [vmem:[#allocation107_spill] sm:$0xff]  ;;  %7186 = vrcp.f32 %v11770_v56 }
 0x501   :  { %v2272_v39 = vrot.slane %v10125_v22, %v7567_v10  ;;  %v3702_v13 = vmul.f32 %v11762_v12, %v2640_v50  ;;  %v10229_v42 = vmul.f32 %v11763_v61, %v2264_v46  ;;  %v2276_v32 = vrot.slane %v10125_v22, %v11381_v16  ;;  %v11771_v45 = vld [vmem:[#allocation47_spill] sm:$0xff]  ;;  %v11775_v61 = vld [vmem:[#allocation189_spill] sm:$0xff] }
 0x502   :  { %v3924_v14 = vrot.slane %v10208_v20, %v11381_v16  ;;  %v5043_v23 = vadd.f32 %v4915_v19, %v3699_v18  ;;  %v4917_v47 = vmul.f32 %v9659_v25, %v3920_v31  ;;  %v2644_v41 = vrot.slane %v10208_v20, %v7567_v10  ;;  %v11767_v25 = vld [vmem:[#allocation188_spill] sm:$0xff] }
 0x503   :  { %v10202_v54 = vpop.permute.xlu1 %5277  ;;  %5469 = vperm.xlu1 %7043, %v5039_v5   ;;  %v10204_v48 = vpop.permute.xlu0 %5286  ;;  %v10239_v60 = vmul.f32 %v11764_v9, %v2268_v17  ;;  %v5046_v52 = vadd.f32 %v4918_v27, %v3702_v13  ;;  %v3701_v59 = vmul.f32 %v11765_v38, %v2640_v50  ;;  %v10244_v49 = vmul.f32 %v11766_v8, %v2272_v39  ;;  %v11773_v19 = vld [vmem:[#allocation64_spill] sm:$0xff]  ;;  %v11779_v38 = vld [vmem:[#allocation89_spill] sm:$0xff] }
 0x504   :  { %5478 = vperm.xlu0 %7042, %v5042_v63   ;;  %v4920_v35 = vmul.f32 %v9643_v7, %v3924_v14  ;;  %v3704_v5 = vmul.f32 %v11767_v25, %v2644_v41  ;;  %v10252_v40 = vmul.f32 %v11768_v57, %v2276_v32  ;;  %v11769_v63 = vld [vmem:[#allocation45_spill] sm:$0xff]  ;;  %v3928_v7 = vrot.slane %v10229_v42, %v11381_v16  ;;  %v11780_v25 = vld [vmem:[#allocation122_spill] sm:$0xff] }
 0x505   :  { %v2280_v33 = vrot.slane %v10125_v22, %v11769_v63  ;;  %v2284_v43 = vrot.slane %v10125_v22, %v11771_v45  ;;  %v5045_v2 = vadd.f32 %v4917_v47, %v3701_v59  ;;  %v4919_v46 = vmul.f32 %v11772_v30, %v3924_v14  ;;  %v11781_v30 = vld [vmem:[#allocation109_spill] sm:$0xff] }
 0x506   :  { %v2648_v31 = vrot.slane %v10229_v42, %v7567_v10  ;;  %v4922_v50 = vmul.f32 %v11773_v19, %v3928_v7  ;;  %v3932_v17 = vrot.slane %v10239_v60, %v11381_v16  ;;  %v2652_v58 = vrot.slane %v10239_v60, %v7567_v10  ;;  %v11782_v19 = vld [vmem:[#allocation110_spill] sm:$0xff] }
 0x507   :  { %v10223_v28 = vpop.permute.xlu1 %5283  ;;  %5475 = vperm.xlu1 %7043, %v5041_v44   ;;  %v10225_v26 = vpop.permute.xlu0 %5292  ;;  %v5048_v44 = vadd.f32 %v4920_v35, %v3704_v5  ;;  %v2656_v18 = vrot.slane %v10244_v49, %v7567_v10  ;;  %v2288_v39 = vrot.slane %v10125_v22, %v11522_v21  ;;  %v10277_v14 = vrot.slane %v10252_v40, %v7567_v10 }
 0x508   :  { %5484 = vperm.xlu0 %7042, %v5044_v0   ;;  %v11774_v0 = vld [vmem:[#allocation108_spill] sm:$0xff]  ;;  %v3706_v32 = vmul.f32 %v11775_v61, %v2648_v31  ;;  %v10285_v59 = vmul.f32 %v11779_v38, %v2284_v43  ;;  %v4921_v5 = vmul.f32 %v11780_v25, %v3928_v7  ;;  %v3936_v56 = vrot.slane %v10244_v49, %v11381_v16 }
 0x509   :  { %v3703_v27 = vmul.f32 %v11774_v0, %v2644_v41  ;;  %v11777_v41 = vld [vmem:[#allocation68_spill] sm:$0xff]  ;;  %v3707_v0 = vmul.f32 %v11782_v19, %v2652_v58 }
 0x50a   :  { %v4924_v9 = vmul.f32 %v11777_v41, %v3932_v17  ;;  %v5050_v57 = vadd.f32 %v4922_v50, %v3706_v32  ;;  %v11783_v61 = vld [vmem:[#allocation156_spill] sm:$0xff]  ;;  %v5683_v32 = vrot.slane %v10180_v34, %v11751_v11 }
 0x50b   :  { %v10246_v62 = vpop.permute.xlu1 %5289  ;;  %5481 = vperm.xlu1 %7043, %v5043_v23   ;;  %v10248_v53 = vpop.permute.xlu0 %5298  ;;  %v11776_v23 = vld [vmem:[#allocation37_spill] sm:$0xff]  ;;  %v5047_v8 = vadd.f32 %v4919_v46, %v3703_v27  ;;  %v4923_v43 = vmul.f32 %v11783_v61, %v3932_v17  ;;  %v5701_v46 = vrot.slane %v10223_v28, %v11751_v11  ;;  %v5705_v28 = vrot.slane %v10204_v48, %v10116_v36 }
 0x50c   :  { %5490 = vperm.xlu0 %7042, %v5046_v52   ;;  %v10280_v47 = vmul.f32 %v11776_v23, %v2280_v33  ;;  %v11778_v52 = vld [vmem:[#allocation190_spill] sm:$0xff]  ;;  %v5692_v33 = vrot.slane %v10202_v54, %v11751_v11  ;;  %v5696_v23 = vrot.slane %v10182_v29, %v10116_v36  ;;  %v5710_v54 = vrot.slane %v10246_v62, %v11751_v11  ;;  %v10315_v62 = vpop.eup %7186 }
 0x50d   :  { %v3708_v35 = vmul.f32 %v11778_v52, %v2652_v58  ;;  %v11784_v58 = vld [vmem:[#allocation57_spill] sm:$0xff]  ;;  %v5714_v29 = vrot.slane %v10225_v26, %v10116_v36  ;;  %v5706_v25 = vsel %vm5615_vm9, %v5705_v28, %v5701_v46  ;;  %v5723_v48 = vrot.slane %v10248_v53, %v10116_v36 }
 0x50e   :  { %v4926_v17 = vmul.f32 %v11784_v58, %v3936_v56  ;;  %v5697_v34 = vsel %vm5615_vm9, %v5696_v23, %v5692_v33  ;;  %v11788_v23 = vld [vmem:[#allocation111_spill] sm:$0xff] }
 0x50f   :  { %v5296_v12 = vpop.permute.xlu1 %5295  ;;  %5487 = vperm.xlu1 %7043, %v5045_v2   ;;  %v5305_v13 = vpop.permute.xlu0 %5304  ;;  %v3940_v2 = vrot.slane %v10252_v40, %v11381_v16  ;;  %v5052_v27 = vadd.f32 %v4924_v9, %v3708_v35  ;;  %v5687_v9 = vrot.slane %v10163_v55, %v10116_v36  ;;  %v11785_v35 = vld [vmem:[#allocation191_spill] sm:$0xff] }
 0x510   :  { %5496 = vperm.xlu0 %7042, %v5048_v44   ;;  %v3705_v44 = vmul.f32 %v11781_v30, %v2648_v31  ;;  %v5719_v41 = vrot.slane %v5296_v12, %v11751_v11  ;;  %v3710_v38 = vmul.f32 %v11785_v35, %v2656_v18  ;;  %v5732_v26 = vrot.slane %v5305_v13, %v10116_v36  ;;  %v11786_v30 = vld [vmem:[#allocation124_spill] sm:$0xff] }
 0x511   :  { %v3709_v13 = vmul.f32 %v11788_v23, %v2656_v18 }
 0x512   :  { %v5049_v31 = vadd.f32 %v4921_v5, %v3705_v44  ;;  %v5688_v5 = vsel %vm5615_vm9, %v5687_v9, %v5683_v32  ;;  %v4925_v44 = vmul.f32 %v11786_v30, %v3936_v56  ;;  %v5054_v61 = vadd.f32 %v4926_v17, %v3710_v38  ;;  %v11793_v30 = vld [vmem:[#allocation193_spill] sm:$0xff] }
 0x513   :  { %v5302_v7 = vpop.permute.xlu1 %5301  ;;  %5493 = vperm.xlu1 %7043, %v5047_v8   ;;  %v5311_v50 = vpop.permute.xlu0 %5310  ;;  %v5051_v8 = vadd.f32 %v4923_v43, %v3707_v0  ;;  %v6191_v19 = vsel %vm845_vm1, %v5697_v34, %v5688_v5  ;;  %v5724_v0 = vsel %vm5615_vm9, %v5723_v48, %v5719_v41  ;;  %v11787_v43 = vld [vmem:[#allocation123_spill] sm:$0xff]  ;;  %v2664_v9 = vrot.slane %v10280_v47, %v7567_v10 }
 0x514   :  { %5502 = vperm.xlu0 %7042, %v5050_v57   ;;  %v5728_v52 = vrot.slane %v5302_v7, %v11751_v11  ;;  %v5715_v57 = vsel %vm5615_vm9, %v5714_v29, %v5710_v54  ;;  %v5741_v53 = vrot.slane %v5311_v50, %v10116_v36  ;;  %v4928_v46 = vmul.f32 %v11787_v43, %v3940_v2  ;;  %v11789_v50 = vld [vmem:[#allocation192_spill] sm:$0xff]  ;;  %v11790_v29 = vld [vmem:[#allocation125_spill] sm:$0xff] }
 0x515   :  { %v6192_v7 = vsel %vm847_vm2, %v5706_v25, %v6191_v19  ;;  %v3712_v17 = vmul.f32 %v11789_v50, %v10277_v14  ;;  %v5053_v34 = vadd.f32 %v4925_v44, %v3709_v13  ;;  %v3714_v44 = vmul.f32 %v11793_v30, %v2664_v9  ;;  %v11794_v19 = vld [vmem:[#allocation35_spill] sm:$0xff]  ;;  %v11797_v13 = vld [vmem:[#allocation113_spill] sm:$0xff]  ;;  %v11804_v30 = vld [vmem:[#allocation36_spill] sm:$0xff] }
 0x516   :  { %v5733_v32 = vsel %vm5615_vm9, %v5732_v26, %v5728_v52  ;;  %v6193_v56 = vsel %vm849_vm3, %v5715_v57, %v6192_v7  ;;  %v4927_v52 = vmul.f32 %v11790_v29, %v3940_v2  ;;  %v2292_v57 = vrot.slane %v10125_v22, %v11526_v51 }
 0x517   :  { %v5308_v12 = vpop.permute.xlu1 %5307  ;;  %5499 = vperm.xlu1 %7043, %v5049_v31   ;;  %v5317_v55 = vpop.permute.xlu0 %5316  ;;  %v6194_v28 = vsel %vm851_vm4, %v5724_v0, %v6193_v56  ;;  %v5056_v38 = vadd.f32 %v4928_v46, %v3712_v17  ;;  %v10365_v0 = vmul.f32 %v11794_v19, %v2288_v39  ;;  %v2668_v46 = vrot.slane %v10285_v59, %v7567_v10  ;;  %v11799_v17 = vld [vmem:[#allocation90_spill] sm:$0xff] }
 0x518   :  { %v5737_v33 = vrot.slane %v5308_v12, %v11751_v11  ;;  %5508 = vperm.xlu0 %7042, %v5052_v27   ;;  %v3944_v27 = vrot.slane %v10280_v47, %v11381_v16  ;;  %v5750_v41 = vrot.slane %v5317_v55, %v10116_v36  ;;  %v6195_v35 = vsel %vm853_vm5, %v5733_v32, %v6194_v28  ;;  %v11792_v55 = vld [vmem:[#allocation112_spill] sm:$0xff]  ;;  %v11796_v32 = vld [vmem:[#allocation59_spill] sm:$0xff] }
 0x519   :  { %v3711_v5 = vmul.f32 %v11792_v55, %v10277_v14  ;;  %v3948_v14 = vrot.slane %v10285_v59, %v11381_v16  ;;  %v3713_v56 = vmul.f32 %v11797_v13, %v2664_v9  ;;  %v10381_v28 = vmul.f32 %v11799_v17, %v2292_v57  ;;  %v11803_v57 = vld [vmem:[#allocation195_spill] sm:$0xff] }
 0x51a   :  { %v5742_v54 = vsel %vm5615_vm9, %v5741_v53, %v5737_v33  ;;  %v2672_v29 = vrot.slane %v10365_v0, %v7567_v10  ;;  %v2308_v19 = vrot.slane %v10315_v62, %v11381_v16 }
 0x51b   :  { %v5314_v31 = vpop.permute.xlu1 %5313  ;;  %5505 = vperm.xlu1 %7043, %v5051_v8   ;;  %v10337_v58 = vpop.permute.xlu0 %5322  ;;  %v11791_v8 = vld [vmem:[#allocation70_spill] sm:$0xff]  ;;  %v6196_v12 = vsel %vm855_vm6, %v5742_v54, %v6195_v35  ;;  %v5055_v53 = vadd.f32 %v4927_v52, %v3711_v5  ;;  %v4932_v23 = vmul.f32 %v11796_v32, %v3948_v14  ;;  %v2300_v52 = vrot.slane %v10125_v22, %v11531_v15 }
 0x51c   :  { %v5746_v18 = vrot.slane %v5314_v31, %v11751_v11  ;;  %5514 = vperm.xlu0 %7042, %v5054_v61   ;;  %v4930_v25 = vmul.f32 %v11791_v8, %v3944_v27  ;;  %v11795_v61 = vld [vmem:[#allocation216_spill] sm:$0xff]  ;;  %v11798_v31 = vld [vmem:[#allocation194_spill] sm:$0xff] }
 0x51d   :  { %v4929_v43 = vmul.f32 %v11795_v61, %v3944_v27  ;;  %v3716_v50 = vmul.f32 %v11798_v31, %v2668_v46  ;;  %v2296_v27 = vrot.slane %v10125_v22, %v11530_v37  ;;  %v3956_v22 = vrot.slane %v10381_v28, %v11381_v16 }
 0x51e   :  { %v5751_v48 = vsel %vm5615_vm9, %v5750_v41, %v5746_v18  ;;  %v5058_v7 = vadd.f32 %v4930_v25, %v3714_v44  ;;  %v3952_v41 = vrot.slane %v10365_v0, %v11381_v16  ;;  %v11802_v25 = vld [vmem:[#allocation114_spill] sm:$0xff] }
 0x51f   :  { %v10355_v26 = vpop.permute.xlu1 %5319  ;;  %5511 = vperm.xlu1 %7043, %v5053_v34   ;;  %v10357_v33 = vpop.permute.xlu0 %5328  ;;  %v6197_v2 = vsel %vm857_vm7, %v5751_v48, %v6196_v12  ;;  %v5057_v18 = vadd.f32 %v4929_v43, %v3713_v56  ;;  %v11800_v34 = vld [vmem:[#allocation72_spill] sm:$0xff]  ;;  %v5060_v35 = vadd.f32 %v4932_v23, %v3716_v50  ;;  %v3715_v48 = vmul.f32 %v11802_v25, %v2668_v46  ;;  %v11808_v23 = vld [vmem:[#allocation217_spill] sm:$0xff]  ;;  %v11809_v56 = vld [vmem:[#allocation115_spill] sm:$0xff] }
 0x520   :  { %5520 = vperm.xlu0 %7042, %v5056_v38   ;;  %7014 = vmatmul.mubr.msk.f32.vlgmr.msra.gmra.mrb[0].mxu0 %vm6240_vm10, %v6197_v2  ;;  %v4931_v9 = vmul.f32 %v11800_v34, %v3948_v14  ;;  %v11801_v38 = vld [vmem:[#allocation127_spill] sm:$0xff]  ;;  %v2304_v12 = vrot.slane %v10315_v62, %v7567_v10  ;;  %v3718_v2 = vmul.f32 %v11803_v57, %v2672_v29  ;;  %v11806_v46 = vld [vmem:[#allocation92_spill] sm:$0xff] }
 0x521   :  { %v4934_v8 = vmul.f32 %v11801_v38, %v3952_v41  ;;  %v10402_v44 = vmul.f32 %v11804_v30, %v2296_v27  ;;  %v2676_v43 = vrot.slane %v10381_v28, %v7567_v10  ;;  %v4936_v13 = vmul.f32 %v11808_v23, %v3956_v22  ;;  %v11810_v50 = vld [vmem:[#allocation40_spill] sm:$0xff]  ;;  %v11813_v25 = vld [vmem:[#allocation131_spill] sm:$0xff] }
 0x522   :  { %v5059_v14 = vadd.f32 %v4931_v9, %v3715_v48  ;;  %v3717_v31 = vmul.f32 %v11809_v56, %v2672_v29  ;;  %v10417_v17 = vmul.f32 %v11810_v50, %v2304_v12  ;;  %v2312_v9 = vrot.slane %v10315_v62, %v11769_v63  ;;  %v11812_v29 = vld [vmem:[#allocation39_spill] sm:$0xff] }
 0x523   :  { %v10375_v54 = vpop.permute.xlu1 %5325  ;;  %5517 = vperm.xlu1 %7043, %v5055_v53   ;;  %v10377_v39 = vpop.permute.xlu0 %5334  ;;  %v11805_v53 = vld [vmem:[#allocation129_spill] sm:$0xff]  ;;  %v5062_v32 = vadd.f32 %v4934_v8, %v3718_v2  ;;  %v10431_v38 = vmul.f32 %v11812_v29, %v2308_v19  ;;  %v4935_v48 = vmul.f32 %v11813_v25, %v3956_v22  ;;  %v2680_v12 = vrot.slane %v10402_v44, %v7567_v10  ;;  %v11820_v25 = vld [vmem:[#allocation219_spill] sm:$0xff] }
 0x524   :  { %5526 = vperm.xlu0 %7042, %v5058_v7   ;;  %v4933_v61 = vmul.f32 %v11805_v53, %v3952_v41  ;;  %v10412_v7 = vmul.f32 %v11806_v46, %v2300_v52  ;;  %v11811_v41 = vld [vmem:[#allocation196_spill] sm:$0xff]  ;;  %v2316_v52 = vrot.slane %v10315_v62, %v11771_v45  ;;  %v11814_v2 = vld [vmem:[#allocation61_spill] sm:$0xff]  ;;  %v2688_v19 = vrot.slane %v10417_v17, %v7567_v10 }
 0x525   :  { %v3720_v34 = vmul.f32 %v11811_v41, %v2676_v43  ;;  %v11815_v45 = vld [vmem:[#allocation116_spill] sm:$0xff] }
 0x526   :  { %11807 = vst [vmem:[#allocation146_spill] sm:$0xff] %v10412_v7  ;;  %v5061_v8 = vadd.f32 %v4933_v61, %v3717_v31  ;;  %v3964_v63 = vrot.slane %v10412_v7, %v11381_v16  ;;  %v2684_v53 = vrot.slane %v10412_v7, %v7567_v10  ;;  %v11818_v31 = vld [vmem:[#allocation41_spill] sm:$0xff]  ;;  %v11824_v7 = vld [vmem:[#allocation63_spill] sm:$0xff] }
 0x527   :  { %v10396_v55 = vpop.permute.xlu1 %5331  ;;  %5523 = vperm.xlu1 %7043, %v5057_v18   ;;  %v10398_v5 = vpop.permute.xlu0 %5340  ;;  %v5064_v57 = vadd.f32 %v4936_v13, %v3720_v34  ;;  %v11817_v13 = vld [vmem:[#allocation94_spill] sm:$0xff]  ;;  %v10451_v50 = vmul.f32 %v11818_v31, %v2316_v52  ;;  %v10456_v34 = vrot.slane %v10431_v38, %v7567_v10  ;;  %v3972_v52 = vrot.slane %v10431_v38, %v11381_v16 }
 0x528   :  { %5532 = vperm.xlu0 %7042, %v5060_v35   ;;  %v3960_v35 = vrot.slane %v10402_v44, %v11381_v16  ;;  %v10448_v56 = vmul.f32 %v11817_v13, %v2312_v9  ;;  %v5764_v13 = vrot.slane %v10375_v54, %v11751_v11 }
 0x52a   :  { %v4938_v30 = vmul.f32 %v11814_v2, %v3960_v35  ;;  %v4937_v2 = vmul.f32 %v11820_v25, %v3960_v35  ;;  %v5773_v35 = vrot.slane %v10396_v55, %v11751_v11  ;;  %v5777_v55 = vrot.slane %v10377_v39, %v10116_v36 }
 0x52b   :  { %v10419_v27 = vpop.permute.xlu1 %5337  ;;  %5529 = vperm.xlu1 %7043, %v5059_v14   ;;  %v10421_v18 = vpop.permute.xlu0 %5346  ;;  %v3719_v14 = vmul.f32 %v11815_v45, %v2676_v43  ;;  %v11819_v43 = vld [vmem:[#allocation132_spill] sm:$0xff]  ;;  %v11821_v45 = vld [vmem:[#allocation198_spill] sm:$0xff] }
 0x52c   :  { %5538 = vperm.xlu0 %7042, %v5062_v32   ;;  %v11816_v32 = vld [vmem:[#allocation197_spill] sm:$0xff]  ;;  %v4940_v41 = vmul.f32 %v11819_v43, %v3964_v63  ;;  %v11823_v43 = vld [vmem:[#allocation118_spill] sm:$0xff]  ;;  %v5782_v54 = vrot.slane %v10419_v27, %v11751_v11  ;;  %v11826_v27 = vld [vmem:[#allocation199_spill] sm:$0xff]  ;;  %v5795_v39 = vrot.slane %v10421_v18, %v10116_v36 }
 0x52d   :  { %v3722_v23 = vmul.f32 %v11816_v32, %v2680_v12  ;;  %v5063_v29 = vadd.f32 %v4935_v48, %v3719_v14  ;;  %v3724_v32 = vmul.f32 %v11821_v45, %v2684_v53  ;;  %v3723_v22 = vmul.f32 %v11823_v43, %v2684_v53  ;;  %v11825_v53 = vld [vmem:[#allocation133_spill] sm:$0xff]  ;;  %v11827_v43 = vld [vmem:[#allocation76_spill] sm:$0xff] }
 0x52e   :  { %v4939_v48 = vmul.f32 %v11824_v7, %v3964_v63 }
 0x52f   :  { %v5344_v61 = vpop.permute.xlu1 %5343  ;;  %5535 = vperm.xlu1 %7043, %v5061_v8   ;;  %v5353_v46 = vpop.permute.xlu0 %5352  ;;  %v3968_v8 = vrot.slane %v10417_v17, %v11381_v16  ;;  %v5066_v9 = vadd.f32 %v4938_v30, %v3722_v23  ;;  %v5068_v45 = vadd.f32 %v4940_v41, %v3724_v32  ;;  %v5755_v30 = vrot.slane %v10355_v26, %v11751_v11 }
 0x530   :  { %5544 = vperm.xlu0 %7042, %v5064_v57   ;;  %v11822_v57 = vld [vmem:[#allocation117_spill] sm:$0xff]  ;;  %v5768_v23 = vrot.slane %v10357_v33, %v10116_v36  ;;  %v5791_v63 = vrot.slane %v5344_v61, %v11751_v11  ;;  %v5759_v41 = vrot.slane %v10337_v58, %v10116_v36  ;;  %v5786_v33 = vrot.slane %v10398_v5, %v10116_v36 }
 0x531   :  { %v3721_v31 = vmul.f32 %v11822_v57, %v2680_v12  ;;  %v4942_v7 = vmul.f32 %v11825_v53, %v3968_v8  ;;  %v3726_v32 = vmul.f32 %v11826_v27, %v2688_v19  ;;  %v11829_v53 = vld [vmem:[#allocation119_spill] sm:$0xff] }
 0x532   :  { %v5769_v26 = vsel %vm5615_vm9, %v5768_v23, %v5764_v13  ;;  %v5760_v58 = vsel %vm5615_vm9, %v5759_v41, %v5755_v30  ;;  %v5787_v13 = vsel %vm5615_vm9, %v5786_v33, %v5782_v54  ;;  %v11828_v23 = vld [vmem:[#allocation220_spill] sm:$0xff] }
 0x533   :  { %v5350_v14 = vpop.permute.xlu1 %5349  ;;  %5541 = vperm.xlu1 %7043, %v5063_v29   ;;  %v5359_v25 = vpop.permute.xlu0 %5358  ;;  %v5065_v12 = vadd.f32 %v4937_v2, %v3721_v31  ;;  %v5067_v2 = vadd.f32 %v4939_v48, %v3723_v22  ;;  %v5804_v31 = vrot.slane %v5353_v46, %v10116_v36  ;;  %v6198_v22 = vsel %vm845_vm1, %v5769_v26, %v5760_v58 }
 0x534   :  { %5550 = vperm.xlu0 %7042, %v5066_v9   ;;  %v5800_v29 = vrot.slane %v5350_v14, %v11751_v11  ;;  %v5778_v9 = vsel %vm5615_vm9, %v5777_v55, %v5773_v35  ;;  %v4941_v14 = vmul.f32 %v11827_v43, %v3968_v8  ;;  %v5796_v48 = vsel %vm5615_vm9, %v5795_v39, %v5791_v63 }
 0x535   :  { %v5813_v18 = vrot.slane %v5359_v25, %v10116_v36  ;;  %v5070_v35 = vadd.f32 %v4942_v7, %v3726_v32  ;;  %v6199_v30 = vsel %vm847_vm2, %v5778_v9, %v6198_v22  ;;  %v3725_v46 = vmul.f32 %v11829_v53, %v2688_v19  ;;  %v11830_v25 = vld [vmem:[#allocation200_spill] sm:$0xff]  ;;  %v11831_v32 = vld [vmem:[#allocation221_spill] sm:$0xff] }
 0x536   :  { %v5805_v54 = vsel %vm5615_vm9, %v5804_v31, %v5800_v29  ;;  %v6200_v8 = vsel %vm849_vm3, %v5787_v13, %v6199_v30  ;;  %v3728_v7 = vmul.f32 %v11830_v25, %v10456_v34  ;;  %v2696_v29 = vrot.slane %v10448_v56, %v7567_v10  ;;  %v11835_v22 = vld [vmem:[#allocation96_spill] sm:$0xff]  ;;  %v11837_v30 = vld [vmem:[#allocation138_spill] sm:$0xff] }
 0x537   :  { %v5356_v57 = vpop.permute.xlu1 %5355  ;;  %5547 = vperm.xlu1 %7043, %v5065_v12   ;;  %v5365_v61 = vpop.permute.xlu0 %5364  ;;  %v4944_v12 = vmul.f32 %v11828_v23, %v3972_v52  ;;  %v6201_v26 = vsel %vm851_vm4, %v5796_v48, %v6200_v8  ;;  %v5069_v27 = vadd.f32 %v4941_v14, %v3725_v46  ;;  %v4943_v9 = vmul.f32 %v11831_v32, %v3972_v52  ;;  %v11838_v8 = vld [vmem:[#allocation137_spill] sm:$0xff] }
 0x538   :  { %v5809_v5 = vrot.slane %v5356_v57, %v11751_v11  ;;  %5556 = vperm.xlu0 %7042, %v5068_v45   ;;  %v3976_v45 = vrot.slane %v10448_v56, %v11381_v16  ;;  %v5822_v33 = vrot.slane %v5365_v61, %v10116_v36  ;;  %v11832_v57 = vld [vmem:[#allocation136_spill] sm:$0xff]  ;;  %v11834_v43 = vrot.slane %v10315_v62, %v11522_v21 }
 0x539   :  { %v5072_v39 = vadd.f32 %v4944_v12, %v3728_v7  ;;  %v11833_v61 = vld [vmem:[#allocation120_spill] sm:$0xff]  ;;  %v2324_v12 = vrot.slane %v10315_v62, %v11526_v51  ;;  %v2700_v53 = vrot.slane %v10451_v50, %v7567_v10 }
 0x53a   :  { %v5814_v55 = vsel %vm5615_vm9, %v5813_v18, %v5809_v5  ;;  %v4946_v58 = vmul.f32 %v11832_v57, %v3976_v45  ;;  %v3727_v5 = vmul.f32 %v11833_v61, %v10456_v34  ;;  %v10527_v48 = vmul.f32 %v11835_v22, %v11834_v43  ;;  %v11844_v61 = vld [vmem:[#allocation205_spill] sm:$0xff]  ;;  %v11845_v22 = vld [vmem:[#allocation204_spill] sm:$0xff] }
 0x53b   :  { %v5362_v41 = vpop.permute.xlu1 %5361  ;;  %5553 = vperm.xlu1 %7043, %v5067_v2   ;;  %v10507_v63 = vpop.permute.xlu0 %5370  ;;  %v6202_v2 = vsel %vm853_vm5, %v5805_v54, %v6201_v26  ;;  %v3980_v34 = vrot.slane %v10451_v50, %v11381_v16  ;;  %v4945_v54 = vmul.f32 %v11837_v30, %v3976_v45  ;;  %v11840_v26 = vld [vmem:[#allocation202_spill] sm:$0xff]  ;;  %v2328_v45 = vrot.slane %v10315_v62, %v11530_v37  ;;  %v11848_v30 = vld [vmem:[#allocation95_spill] sm:$0xff] }
 0x53c   :  { %v5818_v19 = vrot.slane %v5362_v41, %v11751_v11  ;;  %5562 = vperm.xlu0 %7042, %v5070_v35   ;;  %v6203_v31 = vsel %vm855_vm6, %v5814_v55, %v6202_v2  ;;  %v11836_v35 = vld [vmem:[#allocation201_spill] sm:$0xff]  ;;  %v5071_v21 = vadd.f32 %v4943_v9, %v3727_v5  ;;  %v11839_v41 = vld [vmem:[#allocation203_spill] sm:$0xff]  ;;  %v3984_v32 = vrot.slane %v10527_v48, %v11381_v16 }
 0x53d   :  { %v3730_v23 = vmul.f32 %v11836_v35, %v2696_v29  ;;  %v4948_v55 = vmul.f32 %v11838_v8, %v3980_v34  ;;  %v3729_v25 = vmul.f32 %v11839_v41, %v2696_v29  ;;  %v11842_v2 = vld [vmem:[#allocation223_spill] sm:$0xff]  ;;  %v2332_v57 = vrot.slane %v10315_v62, %v11531_v15  ;;  %v11846_v35 = vld [vmem:[#allocation97_spill] sm:$0xff]  ;;  %v11847_v15 = vld [vmem:[#allocation78_spill] sm:$0xff] }
 0x53e   :  { %v5823_v13 = vsel %vm5615_vm9, %v5822_v33, %v5818_v19  ;;  %v3732_v33 = vmul.f32 %v11840_v26, %v2700_v53  ;;  %v11841_v19 = vld [vmem:[#allocation93_spill] sm:$0xff]  ;;  %v4947_v29 = vmul.f32 %v11842_v2, %v3980_v34  ;;  %v3731_v5 = vmul.f32 %v11844_v61, %v2700_v53 }
 0x53f   :  { %v10529_v14 = vpop.permute.xlu1 %5367  ;;  %5559 = vperm.xlu1 %7043, %v5069_v27   ;;  %v10531_v52 = vpop.permute.xlu0 %5376  ;;  %v6204_v18 = vsel %vm857_vm7, %v5823_v13, %v6203_v31  ;;  %v5074_v46 = vadd.f32 %v4946_v58, %v3730_v23  ;;  %v10551_v27 = vmul.f32 %v11841_v19, %v2324_v12  ;;  %v5073_v9 = vadd.f32 %v4945_v54, %v3729_v25  ;;  %v11843_v13 = vld [vmem:[#allocation224_spill] sm:$0xff] }
 0x540   :  { %5568 = vperm.xlu0 %7042, %v5072_v39   ;;  %7016 = vmatprep.mubr.msk.f32.mxu0 %vm6240_vm10, %v6204_v18  ;;  %v2704_v39 = vrot.slane %v10527_v48, %v7567_v10  ;;  %v5076_v58 = vadd.f32 %v4948_v55, %v3732_v33  ;;  %v4950_v31 = vmul.f32 %v11843_v13, %v3984_v32  ;;  %v11850_v55 = vld [vmem:[#allocation207_spill] sm:$0xff]  ;;  %v11851_v33 = vld [vmem:[#allocation206_spill] sm:$0xff] }
 0x541   :  { %v10568_v23 = vmul.f32 %v11846_v35, %v2328_v45  ;;  %v3988_v12 = vrot.slane %v10551_v27, %v11381_v16  ;;  %v5075_v34 = vadd.f32 %v4947_v29, %v3731_v5  ;;  %v4949_v62 = vmul.f32 %v11847_v15, %v3984_v32 }
 0x542   :  { %v3734_v18 = vmul.f32 %v11845_v22, %v2704_v39  ;;  %v10576_v54 = vmul.f32 %v11848_v30, %v2332_v57  ;;  %v3733_v41 = vmul.f32 %v11850_v55, %v2704_v39  ;;  %v11857_v30 = vld [vmem:[#allocation228_spill] sm:$0xff] }
 0x543   :  { %v10545_v7 = vpop.permute.xlu1 %5373  ;;  %5565 = vperm.xlu1 %7043, %v5071_v21   ;;  %v10547_v51 = vpop.permute.xlu0 %5382  ;;  %v2708_v21 = vrot.slane %v10551_v27, %v7567_v10  ;;  %v3992_v45 = vrot.slane %v10568_v23, %v11381_v16  ;;  %v2712_v29 = vrot.slane %v10568_v23, %v7567_v10 }
 0x544   :  { %5574 = vperm.xlu0 %7042, %v5074_v46   ;;  %v5078_v53 = vadd.f32 %v4950_v31, %v3734_v18  ;;  %v11849_v46 = vld [vmem:[#allocation140_spill] sm:$0xff]  ;;  %v5077_v32 = vadd.f32 %v4949_v62, %v3733_v41  ;;  %v3996_v39 = vrot.slane %v10576_v54, %v11381_v16  ;;  %v11854_v31 = vld [vmem:[#allocation209_spill] sm:$0xff]  ;;  %v5836_v16 = vrot.slane %v10545_v7, %v11751_v11 }
 0x545   :  { %v4952_v8 = vmul.f32 %v11849_v46, %v3988_v12  ;;  %v3736_v19 = vmul.f32 %v11851_v33, %v2708_v21  ;;  %v3735_v61 = vmul.f32 %v11854_v31, %v2708_v21  ;;  %v11855_v18 = vld [vmem:[#allocation208_spill] sm:$0xff]  ;;  %v11858_v46 = vld [vmem:[#allocation210_spill] sm:$0xff]  ;;  %v11859_v21 = vld [vmem:[#allocation211_spill] sm:$0xff] }
 0x546   :  { %v3738_v35 = vmul.f32 %v11855_v18, %v2712_v29  ;;  %v3737_v41 = vmul.f32 %v11859_v21, %v2712_v29  ;;  %v5849_v29 = vrot.slane %v10547_v51, %v10116_v36 }
 0x547   :  { %v5380_v43 = vpop.permute.xlu1 %5379  ;;  %5571 = vperm.xlu1 %7043, %v5073_v9   ;;  %v10564_v37 = vpop.permute.xlu0 %5388  ;;  %v11852_v9 = vld [vmem:[#allocation142_spill] sm:$0xff]  ;;  %v5080_v57 = vadd.f32 %v4952_v8, %v3736_v19 }
 0x548   :  { %5580 = vperm.xlu0 %7042, %v5076_v58   ;;  %v4951_v2 = vmul.f32 %v11852_v9, %v3988_v12  ;;  %v11853_v58 = vld [vmem:[#allocation225_spill] sm:$0xff]  ;;  %v11856_v12 = vld [vmem:[#allocation67_spill] sm:$0xff]  ;;  %v5845_v33 = vrot.slane %v5380_v43, %v11751_v11  ;;  %v5827_v9 = vrot.slane %v10529_v14, %v11751_v11  ;;  %v5858_v14 = vrot.slane %v10564_v37, %v10116_v36 }
 0x549   :  { %v4954_v13 = vmul.f32 %v11853_v58, %v3992_v45  ;;  %v4956_v15 = vmul.f32 %v11856_v12, %v3996_v39  ;;  %v11860_v58 = vld [vmem:[#allocation143_spill] sm:$0xff] }
 0x54a   :  { %v5079_v62 = vadd.f32 %v4951_v2, %v3735_v61  ;;  %v4955_v7 = vmul.f32 %v11860_v58, %v3996_v39  ;;  %v5850_v18 = vsel %vm5615_vm9, %v5849_v29, %v5845_v33  ;;  %v11862_v33 = vld [vmem:[#allocation52_spill] sm:$0xff]  ;;  %v11864_v58 = vld [vmem:[#allocation54_spill] sm:$0xff] }
 0x54b   :  { %v5386_v25 = vpop.permute.xlu1 %5385  ;;  %5577 = vperm.xlu1 %7043, %v5075_v34   ;;  %v5395_v26 = vpop.permute.xlu0 %5394  ;;  %v2716_v34 = vrot.slane %v10576_v54, %v7567_v10  ;;  %v5082_v55 = vadd.f32 %v4954_v13, %v3738_v35  ;;  %v5831_v13 = vrot.slane %v10507_v63, %v10116_v36  ;;  %v11865_v29 = vld [vmem:[#allocation42_spill] sm:$0xff] }
 0x54c   :  { %5586 = vperm.xlu0 %7042, %v5078_v53   ;;  %v4953_v53 = vmul.f32 %v11857_v30, %v3992_v45  ;;  %v5840_v45 = vrot.slane %v10531_v52, %v10116_v36  ;;  %v5854_v2 = vrot.slane %v5386_v25, %v11751_v11  ;;  %v11861_v25 = vld [vmem:[#allocation212_spill] sm:$0xff]  ;;  %v5867_v39 = vrot.slane %v5395_v26, %v10116_v36 }
 0x54d   :  { %v3740_v8 = vmul.f32 %v11858_v46, %v2716_v34  ;;  %v3739_v61 = vmul.f32 %v11861_v25, %v2716_v34  ;;  %v11868_v25 = vld [vmem:[#allocation48_spill] sm:$0xff] }
 0x54e   :  { %v5841_v31 = vsel %vm5615_vm9, %v5840_v45, %v5836_v16  ;;  %v5859_v63 = vsel %vm5615_vm9, %v5858_v14, %v5854_v2  ;;  %v11863_v45 = vld [vmem:[#allocation53_spill] sm:$0xff]  ;;  %v11867_v14 = vld [vmem:[#allocation43_spill] sm:$0xff] }
 0x54f   :  { %v5392_v5 = vpop.permute.xlu1 %5391  ;;  %5583 = vperm.xlu1 %7043, %v5077_v32   ;;  %v5401_v22 = vpop.permute.xlu0 %5400  ;;  %v5084_v10 = vadd.f32 %v4956_v15, %v3740_v8  ;;  %v5083_v37 = vadd.f32 %v4955_v7, %v3739_v61 }
 0x550   :  { %5592 = vperm.xlu0 %7042, %v5080_v57   ;;  %v5081_v57 = vadd.f32 %v4953_v53, %v3737_v41  ;;  %v5863_v43 = vrot.slane %v5392_v5, %v11751_v11  ;;  %v5832_v5 = vsel %vm5615_vm9, %v5831_v13, %v5827_v9  ;;  %v5876_v12 = vrot.slane %v5401_v22, %v10116_v36  ;;  %v11866_v13 = vld [vmem:[#allocation56_spill] sm:$0xff] }
 0x552   :  { %v5868_v34 = vsel %vm5615_vm9, %v5867_v39, %v5863_v43 }
 0x553   :  { %v5398_v19 = vpop.permute.xlu1 %5397  ;;  %5589 = vperm.xlu1 %7043, %v5079_v62   ;;  %v5407_v32 = vpop.permute.xlu0 %5406  ;;  %v6205_v62 = vsel %vm845_vm1, %v5841_v31, %v5832_v5  ;;  %v11871_v5 = vld [vmem:[#allocation46_spill] sm:$0xff] }
 0x554   :  { %5598 = vperm.xlu0 %7042, %v5082_v55   ;;  %v5872_v52 = vrot.slane %v5398_v19, %v11751_v11  ;;  %v5885_v30 = vrot.slane %v5407_v32, %v10116_v36  ;;  %v6206_v26 = vsel %vm847_vm2, %v5850_v18, %v6205_v62  ;;  %v11869_v18 = vld [vmem:[#allocation38_spill] sm:$0xff] }
 0x555   :  { %v6207_v46 = vsel %vm849_vm3, %v5859_v63, %v6206_v26 }
 0x556   :  { %v5877_v53 = vsel %vm5615_vm9, %v5876_v12, %v5872_v52  ;;  %v6208_v16 = vsel %vm851_vm4, %v5868_v34, %v6207_v46  ;;  %v11872_v12 = vld [vmem:[#allocation28_spill] sm:$0xff]  ;;  %v11873_v34 = vld [vmem:[#allocation49_spill] sm:$0xff] }
 0x557   :  { %v5404_v35 = vpop.permute.xlu1 %5403  ;;  %5595 = vperm.xlu1 %7043, %v5081_v57   ;;  %v5413_v51 = vpop.permute.xlu0 %5412  ;;  %v6209_v19 = vsel %vm853_vm5, %v5877_v53, %v6208_v16 }
 0x558   :  { %v5881_v15 = vrot.slane %v5404_v35, %v11751_v11  ;;  %5604 = vperm.xlu0 %7042, %v5084_v10   ;;  %v5894_v21 = vrot.slane %v5413_v51, %v10116_v36  ;;  %v11870_v35 = vld [vmem:[#allocation58_spill] sm:$0xff] }
 0x55a   :  { %v5886_v8 = vsel %vm5615_vm9, %v5885_v30, %v5881_v15 }
 0x55b   :  { %v5410_v55 = vpop.permute.xlu1 %5409  ;;  %5601 = vperm.xlu1 %7043, %v5083_v37   ;;  %v5419_v22 = vpop.permute.xlu0 %5418  ;;  %v6210_v10 = vsel %vm855_vm6, %v5886_v8, %v6209_v19  ;;  %v11874_v8 = vld [vmem:[#allocation50_spill] sm:$0xff] }
 0x55c   :  { %v5890_v41 = vrot.slane %v5410_v55, %v11751_v11  ;;  %6439 = vperm.xlu0 %7042, %v11862_v33  }
 0x55e   :  { %v5895_v32 = vsel %vm5615_vm9, %v5894_v21, %v5890_v41  ;;  %v5903_v21 = vrot.slane %v5419_v22, %v10116_v36 }
 0x55f   :  { %v5416_v9 = vpop.permute.xlu1 %5415  ;;  %6436 = vperm.xlu1 %7043, %v11863_v45   ;;  %v5425_v2 = vpop.permute.xlu0 %5424  ;;  %v6211_v57 = vsel %vm857_vm7, %v5895_v32, %v6210_v10  ;;  %v11875_v45 = vld [vmem:[#allocation60_spill] sm:$0xff] }
 0x560   :  { %6445 = vperm.xlu0 %7042, %v11864_v58   ;;  %7017 = vmatmul.mubr.msk.f32.gmra.mrb[2].mxu0 %vm6240_vm10, %v6211_v57  ;;  %v5899_v26 = vrot.slane %v5416_v9, %v11751_v11  ;;  %v5912_v53 = vrot.slane %v5425_v2, %v10116_v36 }
 0x562   :  { %v5904_v57 = vsel %vm5615_vm9, %v5903_v21, %v5899_v26  ;;  %v11882_v21 = vld [vmem:[#allocation126_spill] sm:$0xff] }
 0x563   :  { %v5422_v7 = vpop.permute.xlu1 %5421  ;;  %6442 = vperm.xlu1 %7043, %v11865_v29   ;;  %v5431_v43 = vpop.permute.xlu0 %5430  ;;  %v11876_v29 = vld [vmem:[#allocation62_spill] sm:$0xff] }
 0x564   :  { %6451 = vperm.xlu0 %7042, %v11866_v13   ;;  %v5908_v15 = vrot.slane %v5422_v7, %v11751_v11  ;;  %v5921_v55 = vrot.slane %v5431_v43, %v10116_v36 }
 0x566   :  { %v5913_v41 = vsel %vm5615_vm9, %v5912_v53, %v5908_v15 }
 0x567   :  { %v5428_v31 = vpop.permute.xlu1 %5427  ;;  %6448 = vperm.xlu1 %7043, %v11867_v14   ;;  %v5437_v52 = vpop.permute.xlu0 %5436  ;;  %v6212_v43 = vsel %vm845_vm1, %v5913_v41, %v5904_v57 }
 0x568   :  { %6457 = vperm.xlu0 %7042, %v11868_v25   ;;  %v5917_v37 = vrot.slane %v5428_v31, %v11751_v11  ;;  %v5930_v33 = vrot.slane %v5437_v52, %v10116_v36 }
 0x56a   :  { %v5922_v32 = vsel %vm5615_vm9, %v5921_v55, %v5917_v37  ;;  %v11881_v55 = vld [vmem:[#allocation121_spill] sm:$0xff] }
 0x56b   :  { %v5434_v61 = vpop.permute.xlu1 %5433  ;;  %6454 = vperm.xlu1 %7043, %v11869_v18   ;;  %v5443_v39 = vpop.permute.xlu0 %5442  ;;  %v6213_v14 = vsel %vm847_vm2, %v5922_v32, %v6212_v43  ;;  %v11877_v18 = vld [vmem:[#allocation51_spill] sm:$0xff]  ;;  %v11884_v32 = vld [vmem:[#allocation130_spill] sm:$0xff] }
 0x56c   :  { %6463 = vperm.xlu0 %7042, %v11870_v35   ;;  %v5926_v46 = vrot.slane %v5434_v61, %v11751_v11  ;;  %v5939_v10 = vrot.slane %v5443_v39, %v10116_v36 }
 0x56e   :  { %v5931_v58 = vsel %vm5615_vm9, %v5930_v33, %v5926_v46  ;;  %v11880_v46 = vld [vmem:[#allocation214_spill] sm:$0xff]  ;;  %v11883_v33 = vld [vmem:[#allocation215_spill] sm:$0xff] }
 0x56f   :  { %v5440_v51 = vpop.permute.xlu1 %5439  ;;  %6460 = vperm.xlu1 %7043, %v11871_v5   ;;  %v5449_v63 = vpop.permute.xlu0 %5448  ;;  %v6214_v25 = vsel %vm849_vm3, %v5931_v58, %v6213_v14  ;;  %v11887_v58 = vld [vmem:[#allocation218_spill] sm:$0xff] }
 0x570   :  { %6469 = vperm.xlu0 %7042, %v11872_v12   ;;  %v5935_v16 = vrot.slane %v5440_v51, %v11751_v11  ;;  %v5948_v22 = vrot.slane %v5449_v63, %v10116_v36  ;;  %v11878_v63 = vld [vmem:[#allocation213_spill] sm:$0xff] }
 0x572   :  { %v5940_v13 = vsel %vm5615_vm9, %v5939_v10, %v5935_v16 }
 0x573   :  { %v5446_v62 = vpop.permute.xlu1 %5445  ;;  %6466 = vperm.xlu1 %7043, %v11873_v34   ;;  %v5455_v30 = vpop.permute.xlu0 %5454  ;;  %v6215_v12 = vsel %vm851_vm4, %v5940_v13, %v6214_v25 }
 0x574   :  { %6475 = vperm.xlu0 %7042, %v11874_v8   ;;  %v5944_v19 = vrot.slane %v5446_v62, %v11751_v11  ;;  %v5957_v31 = vrot.slane %v5455_v30, %v10116_v36  ;;  %v11879_v30 = vld [vmem:[#allocation66_spill] sm:$0xff] }
 0x576   :  { %v5949_v52 = vsel %vm5615_vm9, %v5948_v22, %v5944_v19 }
 0x577   :  { %v5452_v9 = vpop.permute.xlu1 %5451  ;;  %6472 = vperm.xlu1 %7043, %v11875_v45   ;;  %v5461_v2 = vpop.permute.xlu0 %5460  ;;  %v6216_v15 = vsel %vm853_vm5, %v5949_v52, %v6215_v12 }
 0x578   :  { %v5953_v7 = vrot.slane %v5452_v9, %v11751_v11  ;;  %6481 = vperm.xlu0 %7042, %v11876_v29   ;;  %v5966_v51 = vrot.slane %v5461_v2, %v10116_v36  ;;  %v11885_v9 = vld [vmem:[#allocation128_spill] sm:$0xff]  ;;  %v11886_v2 = vld [vmem:[#allocation74_spill] sm:$0xff] }
 0x57a   :  { %v5958_v35 = vsel %vm5615_vm9, %v5957_v31, %v5953_v7  ;;  %v11888_v7 = vld [vmem:[#allocation135_spill] sm:$0xff]  ;;  %v11889_v31 = vld [vmem:[#allocation134_spill] sm:$0xff] }
 0x57b   :  { %v5458_v61 = vpop.permute.xlu1 %5457  ;;  %6478 = vperm.xlu1 %7043, %v11877_v18   ;;  %v5467_v39 = vpop.permute.xlu0 %5466  ;;  %v6217_v62 = vsel %vm855_vm6, %v5958_v35, %v6216_v15  ;;  %v11890_v18 = vld [vmem:[#allocation65_spill] sm:$0xff] }
 0x57c   :  { %v5962_v5 = vrot.slane %v5458_v61, %v11751_v11  ;;  %6487 = vperm.xlu0 %7042, %v11878_v63  }
 0x57e   :  { %v5967_v37 = vsel %vm5615_vm9, %v5966_v51, %v5962_v5  ;;  %v5975_v5 = vrot.slane %v5467_v39, %v10116_v36 }
 0x57f   :  { %v5464_v34 = vpop.permute.xlu1 %5463  ;;  %6484 = vperm.xlu1 %7043, %v11879_v30   ;;  %v5473_v26 = vpop.permute.xlu0 %5472  ;;  %v6218_v53 = vsel %vm857_vm7, %v5967_v37, %v6217_v62  ;;  %v11891_v30 = vld [vmem:[#allocation222_spill] sm:$0xff] }
 0x580   :  { %6493 = vperm.xlu0 %7042, %v11880_v46   ;;  %7019 = vmatprep.mubr.msk.f32.mxu1 %vm6240_vm10, %v6218_v53  ;;  %v5971_v52 = vrot.slane %v5464_v34, %v11751_v11  ;;  %v5984_v25 = vrot.slane %v5473_v26, %v10116_v36 }
 0x582   :  { %v5976_v53 = vsel %vm5615_vm9, %v5975_v5, %v5971_v52  ;;  %v11898_v5 = vld [vmem:[#allocation230_spill] sm:$0xff] }
 0x583   :  { %v5470_v8 = vpop.permute.xlu1 %5469  ;;  %6490 = vperm.xlu1 %7043, %v11881_v55   ;;  %v5479_v16 = vpop.permute.xlu0 %5478  ;;  %v11892_v55 = vld [vmem:[#allocation139_spill] sm:$0xff] }
 0x584   :  { %6499 = vperm.xlu0 %7042, %v11882_v21   ;;  %v5980_v29 = vrot.slane %v5470_v8, %v11751_v11  ;;  %v5993_v35 = vrot.slane %v5479_v16, %v10116_v36 }
 0x586   :  { %v5985_v63 = vsel %vm5615_vm9, %v5984_v25, %v5980_v29 }
 0x587   :  { %v5476_v41 = vpop.permute.xlu1 %5475  ;;  %6496 = vperm.xlu1 %7043, %v11883_v33   ;;  %v5485_v19 = vpop.permute.xlu0 %5484  ;;  %v6219_v16 = vsel %vm845_vm1, %v5985_v63, %v5976_v53  ;;  %v11899_v63 = vld [vmem:[#allocation80_spill] sm:$0xff] }
 0x588   :  { %6505 = vperm.xlu0 %7042, %v11884_v32   ;;  %v5989_v43 = vrot.slane %v5476_v41, %v11751_v11  ;;  %v6002_v12 = vrot.slane %v5485_v19, %v10116_v36 }
 0x58a   :  { %v5994_v37 = vsel %vm5615_vm9, %v5993_v35, %v5989_v43 }
 0x58b   :  { %v5482_v10 = vpop.permute.xlu1 %5481  ;;  %6502 = vperm.xlu1 %7043, %v11885_v9   ;;  %v5491_v45 = vpop.permute.xlu0 %5490  ;;  %v6220_v33 = vsel %vm847_vm2, %v5994_v37, %v6219_v16  ;;  %v11900_v37 = vld [vmem:[#allocation145_spill] sm:$0xff] }
 0x58c   :  { %6511 = vperm.xlu0 %7042, %v11886_v2   ;;  %v5998_v61 = vrot.slane %v5482_v10, %v11751_v11  ;;  %v6011_v62 = vrot.slane %v5491_v45, %v10116_v36  ;;  %v11893_v45 = vld [vmem:[#allocation160_spill] sm:$0xff] }
 0x58e   :  { %v6003_v46 = vsel %vm5615_vm9, %v6002_v12, %v5998_v61  ;;  %v11896_v61 = vld [vmem:[#allocation144_spill] sm:$0xff] }
 0x58f   :  { %v5488_v57 = vpop.permute.xlu1 %5487  ;;  %6508 = vperm.xlu1 %7043, %v11887_v58   ;;  %v5497_v22 = vpop.permute.xlu0 %5496  ;;  %v6221_v32 = vsel %vm849_vm3, %v6003_v46, %v6220_v33 }
 0x590   :  { %6517 = vperm.xlu0 %7042, %v11888_v7   ;;  %v6007_v51 = vrot.slane %v5488_v57, %v11751_v11  ;;  %v6020_v39 = vrot.slane %v5497_v22, %v10116_v36  ;;  %v11894_v7 = vld [vmem:[#allocation141_spill] sm:$0xff] }
 0x592   :  { %v6012_v21 = vsel %vm5615_vm9, %v6011_v62, %v6007_v51  ;;  %v11901_v62 = vld [vmem:[#allocation229_spill] sm:$0xff] }
 0x593   :  { %v5494_v13 = vpop.permute.xlu1 %5493  ;;  %6514 = vperm.xlu1 %7043, %v11889_v31   ;;  %v5503_v14 = vpop.permute.xlu0 %5502  ;;  %v6222_v57 = vsel %vm851_vm4, %v6012_v21, %v6221_v32  ;;  %v11895_v31 = vld [vmem:[#allocation226_spill] sm:$0xff] }
 0x594   :  { %6523 = vperm.xlu0 %7042, %v11890_v18   ;;  %v6016_v15 = vrot.slane %v5494_v13, %v11751_v11  ;;  %v6029_v41 = vrot.slane %v5503_v14, %v10116_v36  ;;  %v11897_v18 = vld [vmem:[#allocation227_spill] sm:$0xff] }
 0x596   :  { %v6021_v19 = vsel %vm5615_vm9, %v6020_v39, %v6016_v15 }
 0x597   :  { %v5500_v34 = vpop.permute.xlu1 %5499  ;;  %6520 = vperm.xlu1 %7043, %v11891_v30   ;;  %v5509_v26 = vpop.permute.xlu0 %5508  ;;  %v6223_v29 = vsel %vm853_vm5, %v6021_v19, %v6222_v57 }
 0x598   :  { %v6025_v8 = vrot.slane %v5500_v34, %v11751_v11  ;;  %6529 = vperm.xlu0 %7042, %v11892_v55   ;;  %v6038_v58 = vrot.slane %v5509_v26, %v10116_v36 }
 0x59a   :  { %v6030_v10 = vsel %vm5615_vm9, %v6029_v41, %v6025_v8 }
 0x59b   :  { %v5506_v9 = vpop.permute.xlu1 %5505  ;;  %6526 = vperm.xlu1 %7043, %v11893_v45   ;;  %v5515_v2 = vpop.permute.xlu0 %5514  ;;  %v6224_v13 = vsel %vm855_vm6, %v6030_v10, %v6223_v29 }
 0x59c   :  { %v6034_v22 = vrot.slane %v5506_v9, %v11751_v11  ;;  %6535 = vperm.xlu0 %7042, %v11894_v7   ;;  %v6047_v41 = vrot.slane %v5515_v2, %v10116_v36 }
 0x59e   :  { %v6039_v43 = vsel %vm5615_vm9, %v6038_v58, %v6034_v22 }
 0x59f   :  { %6532 = vperm.xlu1 %7043, %v11895_v31   ;;  %v5512_v14 = vpop.permute.xlu1 %5511  ;;  %v5521_v52 = vpop.permute.xlu0 %5520  ;;  %v6225_v25 = vsel %vm857_vm7, %v6039_v43, %v6224_v13 }
 0x5a0   :  { %6541 = vperm.xlu0 %7042, %v11896_v61   ;;  %7020 = vmatmul.mubr.msk.f32.vlgmr.msra.gmra.mrb[0].mxu1 %vm6240_vm10, %v6225_v25  ;;  %v6043_v16 = vrot.slane %v5512_v14, %v11751_v11  ;;  %v6056_v21 = vrot.slane %v5521_v52, %v10116_v36 }
 0x5a2   :  { %v6048_v45 = vsel %vm5615_vm9, %v6047_v41, %v6043_v16 }
 0x5a3   :  { %6538 = vperm.xlu1 %7043, %v11897_v18   ;;  %v5518_v35 = vpop.permute.xlu1 %5517  ;;  %v5527_v51 = vpop.permute.xlu0 %5526 }
 0x5a4   :  { %6547 = vperm.xlu0 %7042, %v11898_v5   ;;  %v6052_v46 = vrot.slane %v5518_v35, %v11751_v11 }
 0x5a6   :  { %v6057_v33 = vsel %vm5615_vm9, %v6056_v21, %v6052_v46 }
 0x5a7   :  { %6544 = vperm.xlu1 %7043, %v11899_v63   ;;  %v5524_v12 = vpop.permute.xlu1 %5523  ;;  %v5533_v15 = vpop.permute.xlu0 %5532  ;;  %v6226_v22 = vsel %vm845_vm1, %v6057_v33, %v6048_v45 }
 0x5a8   :  { %6553 = vperm.xlu0 %7042, %v11900_v37   ;;  %v6061_v39 = vrot.slane %v5524_v12, %v11751_v11 }
 0x5ab   :  { %6550 = vperm.xlu1 %7043, %v11901_v62   ;;  %v5530_v34 = vpop.permute.xlu1 %5529  ;;  %v5539_v30 = vpop.permute.xlu0 %5538 }
 0x5ac   :  { %6559 = vperm.xlu0 %7042, %v10069_v1   ;;  %v6070_v1 = vrot.slane %v5530_v34, %v11751_v11  ;;  %v6083_v10 = vrot.slane %v5539_v30, %v10116_v36 }
 0x5af   :  { %6556 = vperm.xlu1 %7043, %v10066_v24   ;;  %v5536_v26 = vpop.permute.xlu1 %5535  ;;  %v5545_v53 = vpop.permute.xlu0 %5544  ;;  %v6065_v24 = vrot.slane %v5527_v51, %v10116_v36 }
 0x5b0   :  { %6565 = vperm.xlu0 %7042, %v10102_v4   ;;  %v6079_v4 = vrot.slane %v5536_v26, %v11751_v11  ;;  %v6092_v2 = vrot.slane %v5545_v53, %v10116_v36 }
 0x5b1   :  { %v6066_v32 = vsel %vm5615_vm9, %v6065_v24, %v6061_v39 }
 0x5b2   :  { %v6084_v7 = vsel %vm5615_vm9, %v6083_v10, %v6079_v4  ;;  %v11902_v10 = vld [vmem:[#allocation146_spill] sm:$0xff] }
 0x5b3   :  { %6562 = vperm.xlu1 %7043, %v10081_v3   ;;  %v5542_v8 = vpop.permute.xlu1 %5541  ;;  %v5551_v55 = vpop.permute.xlu0 %5550  ;;  %v6074_v3 = vrot.slane %v5533_v15, %v10116_v36 }
 0x5b4   :  { %6571 = vperm.xlu0 %7042, %v10208_v20   ;;  %v6088_v19 = vrot.slane %v5542_v8, %v11751_v11  ;;  %v6101_v29 = vrot.slane %v5551_v55, %v10116_v36 }
 0x5b5   :  { %v6075_v57 = vsel %vm5615_vm9, %v6074_v3, %v6070_v1 }
 0x5b6   :  { %v6093_v43 = vsel %vm5615_vm9, %v6092_v2, %v6088_v19 }
 0x5b7   :  { %6568 = vperm.xlu1 %7043, %v10191_v6   ;;  %v5548_v9 = vpop.permute.xlu1 %5547  ;;  %v5557_v20 = vpop.permute.xlu0 %5556  ;;  %v6227_v6 = vsel %vm847_vm2, %v6066_v32, %v6226_v22 }
 0x5b8   :  { %v6097_v58 = vrot.slane %v5548_v9, %v11751_v11  ;;  %6583 = vperm.xlu0 %7042, %v10252_v40   ;;  %v6228_v13 = vsel %vm849_vm3, %v6075_v57, %v6227_v6  ;;  %v6110_v25 = vrot.slane %v5557_v20, %v10116_v36 }
 0x5b9   :  { %v6229_v40 = vsel %vm851_vm4, %v6084_v7, %v6228_v13 }
 0x5ba   :  { %v6102_v31 = vsel %vm5615_vm9, %v6101_v29, %v6097_v58  ;;  %v6230_v18 = vsel %vm853_vm5, %v6093_v43, %v6229_v40 }
 0x5bb   :  { %6580 = vperm.xlu1 %7043, %v10244_v49   ;;  %v5554_v14 = vpop.permute.xlu1 %5553  ;;  %v5563_v52 = vpop.permute.xlu0 %5562  ;;  %v6231_v51 = vsel %vm855_vm6, %v6102_v31, %v6230_v18 }
 0x5bc   :  { %v6106_v61 = vrot.slane %v5554_v14, %v11751_v11  ;;  %6607 = vperm.xlu0 %7042, %v10431_v38   ;;  %v6119_v26 = vrot.slane %v5563_v52, %v10116_v36 }
 0x5be   :  { %v6111_v35 = vsel %vm5615_vm9, %v6110_v25, %v6106_v61 }
 0x5bf   :  { %6604 = vperm.xlu1 %7043, %v10417_v17   ;;  %v5560_v5 = vpop.permute.xlu1 %5559  ;;  %v5569_v49 = vpop.permute.xlu0 %5568  ;;  %v6232_v63 = vsel %vm857_vm7, %v6111_v35, %v6231_v51 }
 0x5c0   :  { %6610 = vperm.xlu0 %7042, %v10448_v56   ;;  %7022 = vmatprep.mubr.msk.f32.mxu1 %vm6240_vm10, %v6232_v63  ;;  %v6128_v30 = vrot.slane %v5569_v49, %v10116_v36 }
 0x5c3   :  { %6586 = vperm.xlu1 %7043, %v10280_v47   ;;  %v5566_v12 = vpop.permute.xlu1 %5565  ;;  %v5575_v38 = vpop.permute.xlu0 %5574 }
 0x5c4   :  { %6613 = vperm.xlu0 %7042, %v10451_v50   ;;  %v6124_v50 = vrot.slane %v5566_v12, %v11751_v11 }
 0x5c6   :  { %v6129_v53 = vsel %vm5615_vm9, %v6128_v30, %v6124_v50 }
 0x5c7   :  { %6589 = vperm.xlu1 %7043, %v10285_v59   ;;  %v5572_v15 = vpop.permute.xlu1 %5571  ;;  %v5581_v37 = vpop.permute.xlu0 %5580 }
 0x5c8   :  { %6616 = vperm.xlu0 %7042, %v10527_v48   ;;  %v6133_v59 = vrot.slane %v5572_v15, %v11751_v11 }
 0x5cb   :  { %6592 = vperm.xlu1 %7043, %v10365_v0   ;;  %v5578_v17 = vpop.permute.xlu1 %5577  ;;  %v5587_v62 = vpop.permute.xlu0 %5586  ;;  %v6115_v0 = vrot.slane %v5560_v5, %v11751_v11 }
 0x5cc   :  { %6619 = vperm.xlu0 %7042, %v10551_v27   ;;  %v6142_v27 = vrot.slane %v5578_v17, %v11751_v11  ;;  %v6155_v8 = vrot.slane %v5587_v62, %v10116_v36 }
 0x5cd   :  { %v6120_v16 = vsel %vm5615_vm9, %v6119_v26, %v6115_v0 }
 0x5ce   :  { %v6233_v4 = vsel %vm845_vm1, %v6129_v53, %v6120_v16 }
 0x5cf   :  { %6595 = vperm.xlu1 %7043, %v10381_v28   ;;  %v5584_v56 = vpop.permute.xlu1 %5583  ;;  %v5593_v47 = vpop.permute.xlu0 %5592  ;;  %v6137_v28 = vrot.slane %v5575_v38, %v10116_v36 }
 0x5d0   :  { %6598 = vperm.xlu0 %7042, %v10402_v44   ;;  %v6151_v44 = vrot.slane %v5584_v56, %v11751_v11  ;;  %v6164_v1 = vrot.slane %v5593_v47, %v10116_v36 }
 0x5d1   :  { %v6138_v39 = vsel %vm5615_vm9, %v6137_v28, %v6133_v59  ;;  %v10846_v59 = vld [vmem:[#allocation8] ss:$0 sm:$0xff] }
 0x5d2   :  { %v6156_v41 = vsel %vm5615_vm9, %v6155_v8, %v6151_v44 }
 0x5d3   :  { %6574 = vperm.xlu1 %7043, %v10229_v42   ;;  %v5590_v34 = vpop.permute.xlu1 %5589  ;;  %v5599_v48 = vpop.permute.xlu0 %5598  ;;  %v6146_v42 = vrot.slane %v5581_v37, %v10116_v36 }
 0x5d4   :  { %6577 = vperm.xlu0 %7042, %v10239_v60   ;;  %v6160_v46 = vrot.slane %v5590_v34, %v11751_v11  ;;  %v6173_v33 = vrot.slane %v5599_v48, %v10116_v36 }
 0x5d5   :  { %v6147_v21 = vsel %vm5615_vm9, %v6146_v42, %v6142_v27 }
 0x5d6   :  { %v6165_v3 = vsel %vm5615_vm9, %v6164_v1, %v6160_v46 }
 0x5d7   :  { %6622 = vperm.xlu1 %7043, %v10568_v23   ;;  %v5596_v55 = vpop.permute.xlu1 %5595  ;;  %v5605_v60 = vpop.permute.xlu0 %5604  ;;  %v6234_v23 = vsel %vm847_vm2, %v6138_v39, %v6233_v4 }
 0x5d8   :  { %v6169_v24 = vrot.slane %v5596_v55, %v11751_v11  ;;  %6625 = vperm.xlu0 %7042, %v10576_v54   ;;  %v6235_v19 = vsel %vm849_vm3, %v6147_v21, %v6234_v23  ;;  %v6182_v45 = vrot.slane %v5605_v60, %v10116_v36 }
 0x5d9   :  { %v6236_v54 = vsel %vm851_vm4, %v6156_v41, %v6235_v19 }
 0x5da   :  { %v6174_v32 = vsel %vm5615_vm9, %v6173_v33, %v6169_v24  ;;  %v6237_v2 = vsel %vm853_vm5, %v6165_v3, %v6236_v54 }
 0x5db   :  { %6601 = vperm.xlu1 %7043, %v11902_v10   ;;  %v5602_v9 = vpop.permute.xlu1 %5601  ;;  %v6440_v20 = vpop.permute.xlu0 %6439  ;;  %v6238_v22 = vsel %vm855_vm6, %v6174_v32, %v6237_v2 }
 0x5dc   :  { %v6178_v57 = vrot.slane %v5602_v9, %v11751_v11  ;;  %v6634_v13 = vrot.slane %v6440_v20, %v11751_v11 }
 0x5de   :  { %v6183_v58 = vsel %vm5615_vm9, %v6182_v45, %v6178_v57 }
 0x5df   :  { %v6437_v7 = vpop.permute.xlu1 %6436  ;;  %v6446_v29 = vpop.permute.xlu0 %6445  ;;  %v6239_v6 = vsel %vm857_vm7, %v6183_v58, %v6238_v22 }
 0x5e0   :  { %7023 = vmatmul.mubr.msk.f32.gmra.mrb[2].mxu1 %vm6240_vm10, %v6239_v6  ;;  %v6630_v43 = vrot.slane %v6437_v7, %v11751_v11  ;;  %v6642_v25 = vrot.slane %v6446_v29, %v11751_v11 }
 0x5e2   :  { %v6883_v52 = vsel %vm845_vm1, %v6634_v13, %v6630_v43 }
 0x5e3   :  { %v6443_v31 = vpop.permute.xlu1 %6442  ;;  %v6452_v36 = vpop.permute.xlu0 %6451 }
 0x5e4   :  { %v6638_v14 = vrot.slane %v6443_v31, %v11751_v11  ;;  %v6650_v49 = vrot.slane %v6452_v36, %v11751_v11 }
 0x5e6   :  { %v6884_v40 = vsel %vm847_vm2, %v6638_v14, %v6883_v52 }
 0x5e7   :  { %v6449_v61 = vpop.permute.xlu1 %6448  ;;  %v6458_v18 = vpop.permute.xlu0 %6457  ;;  %v6885_v51 = vsel %vm849_vm3, %v6642_v25, %v6884_v40 }
 0x5e8   :  { %v6646_v35 = vrot.slane %v6449_v61, %v11751_v11  ;;  %v6658_v15 = vrot.slane %v6458_v18, %v11751_v11 }
 0x5ea   :  { %v6886_v5 = vsel %vm851_vm4, %v6646_v35, %v6885_v51 }
 0x5eb   :  { %v6455_v63 = vpop.permute.xlu1 %6454  ;;  %v6464_v12 = vpop.permute.xlu0 %6463  ;;  %v6887_v37 = vsel %vm853_vm5, %v6650_v49, %v6886_v5 }
 0x5ec   :  { %v6654_v38 = vrot.slane %v6455_v63, %v11751_v11  ;;  %v6666_v34 = vrot.slane %v6464_v12, %v11751_v11 }
 0x5ee   :  { %v6888_v17 = vsel %vm855_vm6, %v6654_v38, %v6887_v37 }
 0x5ef   :  { %v6889_v62 = vsel %vm857_vm7, %v6658_v15, %v6888_v17  ;;  %v6461_v56 = vpop.permute.xlu1 %6460  ;;  %v6470_v47 = vpop.permute.xlu0 %6469 }
 0x5f0   :  { %6947 = vst.msk [vmem:[#allocation11] sm:$0xff] %vm916_vm8, %v6889_v62  ;;  %v6662_v50 = vrot.slane %v6461_v56, %v11751_v11  ;;  %v6674_v46 = vrot.slane %v6470_v47, %v11751_v11 }
 0x5f2   :  { %v6890_v26 = vsel %vm845_vm1, %v6666_v34, %v6662_v50 }
 0x5f3   :  { %v6467_v48 = vpop.permute.xlu1 %6466  ;;  %v7015_v0 = vpop.f32.mrb[0].mxu0 }
 0x5f4   :  { %v6670_v30 = vrot.slane %v6467_v48, %v11751_v11  ;;  %v6329_v27 = vadd.f32 %v7015_v0, %v10846_v59  ;;  %v6476_v28 = vpop.permute.xlu0 %6475  ;;  %v6323_v44 = vpop.f32.mrb[1].mxu0 }
 0x5f5   :  { %v6324_v53 = vadd.f32 %v10846_v59, %v6323_v44  ;;  %v6682_v21 = vrot.slane %v6476_v28, %v11751_v11 }
 0x5f6   :  { %v6891_v42 = vsel %vm847_vm2, %v6670_v30, %v6890_v26  ;;  %6364 = vst.msk [vmem:[#allocation10 + $0x8] sm:$0xff] %vm6362_vm11, %v6329_v27 }
 0x5f7   :  { %6363 = vst.msk [vmem:[#allocation10] sm:$0xff] %vm6362_vm11, %v6324_v53  ;;  %v6473_v39 = vpop.permute.xlu1 %6472  ;;  %v6892_v60 = vsel %vm849_vm3, %v6674_v46, %v6891_v42 }
 0x5f8   :  { %v6678_v8 = vrot.slane %v6473_v39, %v11751_v11  ;;  %v6482_v55 = vpop.permute.xlu0 %6481 }
 0x5f9   :  { %v6690_v41 = vrot.slane %v6482_v55, %v11751_v11 }
 0x5fa   :  { %v6893_v16 = vsel %vm851_vm4, %v6678_v8, %v6892_v60 }
 0x5fb   :  { %v6479_v1 = vpop.permute.xlu1 %6478  ;;  %v6894_v33 = vsel %vm853_vm5, %v6682_v21, %v6893_v16 }
 0x5fc   :  { %v6686_v24 = vrot.slane %v6479_v1, %v11751_v11  ;;  %v6488_v4 = vpop.permute.xlu0 %6487 }
 0x5fd   :  { %v6698_v9 = vrot.slane %v6488_v4, %v11751_v11 }
 0x5fe   :  { %v6895_v23 = vsel %vm855_vm6, %v6686_v24, %v6894_v33 }
 0x5ff   :  { %v6896_v3 = vsel %vm857_vm7, %v6690_v41, %v6895_v23  ;;  %v6485_v19 = vpop.permute.xlu1 %6484 }
 0x600   :  { %6948 = vst.msk [vmem:[#allocation11 + $0x8] sm:$0xff] %vm916_vm8, %v6896_v3  ;;  %v6494_v32 = vpop.permute.xlu0 %6493  ;;  %v6694_v10 = vrot.slane %v6485_v19, %v11751_v11 }
 0x601   :  { %v6706_v58 = vrot.slane %v6494_v32, %v11751_v11 }
 0x602   :  { %v6897_v57 = vsel %vm845_vm1, %v6698_v9, %v6694_v10 }
 0x603   :  { %v6491_v20 = vpop.permute.xlu1 %6490 }
 0x604   :  { %v6702_v54 = vrot.slane %v6491_v20, %v11751_v11  ;;  %v6500_v45 = vpop.permute.xlu0 %6499 }
 0x605   :  { %v6714_v13 = vrot.slane %v6500_v45, %v11751_v11 }
 0x606   :  { %v6898_v2 = vsel %vm847_vm2, %v6702_v54, %v6897_v57 }
 0x607   :  { %v6497_v22 = vpop.permute.xlu1 %6496  ;;  %v6899_v6 = vsel %vm849_vm3, %v6706_v58, %v6898_v2 }
 0x608   :  { %v6710_v7 = vrot.slane %v6497_v22, %v11751_v11  ;;  %v6506_v29 = vpop.permute.xlu0 %6505 }
 0x609   :  { %v6722_v52 = vrot.slane %v6506_v29, %v11751_v11 }
 0x60a   :  { %v6900_v43 = vsel %vm851_vm4, %v6710_v7, %v6899_v6 }
 0x60b   :  { %v6503_v31 = vpop.permute.xlu1 %6502  ;;  %v6901_v40 = vsel %vm853_vm5, %v6714_v13, %v6900_v43 }
 0x60c   :  { %v6718_v36 = vrot.slane %v6503_v31, %v11751_v11  ;;  %v6512_v14 = vpop.permute.xlu0 %6511 }
 0x60d   :  { %v6730_v5 = vrot.slane %v6512_v14, %v11751_v11 }
 0x60e   :  { %v6902_v25 = vsel %vm855_vm6, %v6718_v36, %v6901_v40 }
 0x60f   :  { %v6903_v61 = vsel %vm857_vm7, %v6722_v52, %v6902_v25  ;;  %v6509_v18 = vpop.permute.xlu1 %6508 }
 0x610   :  { %6949 = vst.msk [vmem:[#allocation11 + $0x10] sm:$0xff] %vm916_vm8, %v6903_v61  ;;  %v6518_v35 = vpop.permute.xlu0 %6517  ;;  %v6726_v51 = vrot.slane %v6509_v18, %v11751_v11 }
 0x611   :  { %v6738_v37 = vrot.slane %v6518_v35, %v11751_v11 }
 0x612   :  { %v6904_v38 = vsel %vm845_vm1, %v6730_v5, %v6726_v51 }
 0x613   :  { %v6515_v49 = vpop.permute.xlu1 %6514 }
 0x614   :  { %v6734_v63 = vrot.slane %v6515_v49, %v11751_v11  ;;  %v6524_v12 = vpop.permute.xlu0 %6523 }
 0x615   :  { %v6746_v34 = vrot.slane %v6524_v12, %v11751_v11 }
 0x616   :  { %v6905_v15 = vsel %vm847_vm2, %v6734_v63, %v6904_v38 }
 0x617   :  { %v6521_v17 = vpop.permute.xlu1 %6520  ;;  %v6906_v47 = vsel %vm849_vm3, %v6738_v37, %v6905_v15 }
 0x618   :  { %v6742_v62 = vrot.slane %v6521_v17, %v11751_v11  ;;  %v6530_v56 = vpop.permute.xlu0 %6529 }
 0x619   :  { %v6754_v27 = vrot.slane %v6530_v56, %v11751_v11 }
 0x61a   :  { %v6907_v50 = vsel %vm851_vm4, %v6742_v62, %v6906_v47 }
 0x61b   :  { %v6527_v48 = vpop.permute.xlu1 %6526  ;;  %v6908_v28 = vsel %vm853_vm5, %v6746_v34, %v6907_v50 }
 0x61c   :  { %v6750_v0 = vrot.slane %v6527_v48, %v11751_v11  ;;  %v6536_v30 = vpop.permute.xlu0 %6535 }
 0x61d   :  { %v6762_v39 = vrot.slane %v6536_v30, %v11751_v11 }
 0x61e   :  { %v6909_v44 = vsel %vm855_vm6, %v6750_v0, %v6908_v28 }
 0x61f   :  { %v6910_v26 = vsel %vm857_vm7, %v6754_v27, %v6909_v44  ;;  %v6533_v53 = vpop.permute.xlu1 %6532 }
 0x620   :  { %6950 = vst.msk [vmem:[#allocation11 + $0x18] sm:$0xff] %vm916_vm8, %v6910_v26  ;;  %v6542_v42 = vpop.permute.xlu0 %6541  ;;  %v6758_v46 = vrot.slane %v6533_v53, %v11751_v11 }
 0x621   :  { %v6770_v1 = vrot.slane %v6542_v42, %v11751_v11 }
 0x622   :  { %v6911_v16 = vsel %vm845_vm1, %v6762_v39, %v6758_v46 }
 0x623   :  { %v6539_v8 = vpop.permute.xlu1 %6538 }
 0x624   :  { %v6766_v55 = vrot.slane %v6539_v8, %v11751_v11  ;;  %v6548_v60 = vpop.permute.xlu0 %6547 }
 0x625   :  { %v6778_v3 = vrot.slane %v6548_v60, %v11751_v11 }
 0x626   :  { %v6912_v21 = vsel %vm847_vm2, %v6766_v55, %v6911_v16 }
 0x627   :  { %v6545_v24 = vpop.permute.xlu1 %6544  ;;  %v6913_v33 = vsel %vm849_vm3, %v6770_v1, %v6912_v21 }
 0x628   :  { %v6774_v4 = vrot.slane %v6545_v24, %v11751_v11  ;;  %v6554_v41 = vpop.permute.xlu0 %6553 }
 0x629   :  { %v6786_v9 = vrot.slane %v6554_v41, %v11751_v11 }
 0x62a   :  { %v6914_v23 = vsel %vm851_vm4, %v6774_v4, %v6913_v33 }
 0x62b   :  { %v6551_v19 = vpop.permute.xlu1 %6550  ;;  %v6915_v20 = vsel %vm853_vm5, %v6778_v3, %v6914_v23 }
 0x62c   :  { %v6782_v32 = vrot.slane %v6551_v19, %v11751_v11  ;;  %v6560_v10 = vpop.permute.xlu0 %6559 }
 0x62d   :  { %v6794_v49 = vrot.slane %v6560_v10, %v11751_v11 }
 0x62e   :  { %v6916_v54 = vsel %vm855_vm6, %v6782_v32, %v6915_v20 }
 0x62f   :  { %v6917_v45 = vsel %vm857_vm7, %v6786_v9, %v6916_v54  ;;  %v6557_v57 = vpop.permute.xlu1 %6556 }
 0x630   :  { %6951 = vst.msk [vmem:[#allocation11 + $0x20] sm:$0xff] %vm916_vm8, %v6917_v45  ;;  %v6566_v2 = vpop.permute.xlu0 %6565  ;;  %v6790_v51 = vrot.slane %v6557_v57, %v11751_v11 }
 0x631   :  { %v6802_v17 = vrot.slane %v6566_v2, %v11751_v11 }
 0x632   :  { %v6918_v38 = vsel %vm845_vm1, %v6794_v49, %v6790_v51 }
 0x633   :  { %v6563_v58 = vpop.permute.xlu1 %6562  ;;  %v7018_v22 = vpop.f32.mrb[2].mxu0 }
 0x634   :  { %v6339_v7 = vadd.f32 %v7018_v22, %v10846_v59  ;;  %v6572_v29 = vpop.permute.xlu0 %6571  ;;  %v6333_v6 = vpop.f32.mrb[3].mxu0  ;;  %v6798_v5 = vrot.slane %v6563_v58, %v11751_v11 }
 0x635   :  { %v6334_v43 = vadd.f32 %v10846_v59, %v6333_v6  ;;  %v6810_v27 = vrot.slane %v6572_v29, %v11751_v11 }
 0x636   :  { %6366 = vst.msk [vmem:[#allocation10 + $0x18] sm:$0xff] %vm6362_vm11, %v6339_v7  ;;  %v6919_v15 = vsel %vm847_vm2, %v6798_v5, %v6918_v38 }
 0x637   :  { %6365 = vst.msk [vmem:[#allocation10 + $0x10] sm:$0xff] %vm6362_vm11, %v6334_v43  ;;  %v6569_v13 = vpop.permute.xlu1 %6568  ;;  %v6920_v50 = vsel %vm849_vm3, %v6802_v17, %v6919_v15 }
 0x638   :  { %v6584_v31 = vpop.permute.xlu0 %6583  ;;  %v6806_v37 = vrot.slane %v6569_v13, %v11751_v11 }
 0x639   :  { %v6826_v42 = vrot.slane %v6584_v31, %v11751_v11 }
 0x63a   :  { %v6921_v48 = vsel %vm851_vm4, %v6806_v37, %v6920_v50 }
 0x63b   :  { %v6581_v36 = vpop.permute.xlu1 %6580  ;;  %v6922_v21 = vsel %vm853_vm5, %v6810_v27, %v6921_v48 }
 0x63c   :  { %v6608_v14 = vpop.permute.xlu0 %6607  ;;  %v6822_v0 = vrot.slane %v6581_v36, %v11751_v11 }
 0x63d   :  { %v6858_v34 = vrot.slane %v6608_v14, %v11751_v11 }
 0x63e   :  { %v6925_v24 = vsel %vm845_vm1, %v6826_v42, %v6822_v0 }
 0x63f   :  { %v6605_v52 = vpop.permute.xlu1 %6604 }
 0x640   :  { %v6611_v40 = vpop.permute.xlu0 %6610  ;;  %v6854_v62 = vrot.slane %v6605_v52, %v11751_v11 }
 0x641   :  { %v6862_v30 = vrot.slane %v6611_v40, %v11751_v11 }
 0x642   :  { %v6932_v28 = vsel %vm845_vm1, %v6858_v34, %v6854_v62 }
 0x643   :  { %v6587_v25 = vpop.permute.xlu1 %6586  ;;  %v6933_v4 = vsel %vm847_vm2, %v6862_v30, %v6932_v28 }
 0x644   :  { %v6614_v61 = vpop.permute.xlu0 %6613  ;;  %v6830_v44 = vrot.slane %v6587_v25, %v11751_v11 }
 0x645   :  { %v6866_v26 = vrot.slane %v6614_v61, %v11751_v11 }
 0x646   :  { %v6926_v23 = vsel %vm847_vm2, %v6830_v44, %v6925_v24 }
 0x647   :  { %v6590_v18 = vpop.permute.xlu1 %6589  ;;  %v6934_v3 = vsel %vm849_vm3, %v6866_v26, %v6933_v4 }
 0x648   :  { %v6617_v35 = vpop.permute.xlu0 %6616  ;;  %v6834_v46 = vrot.slane %v6590_v18, %v11751_v11 }
 0x649   :  { %v6870_v39 = vrot.slane %v6617_v35, %v11751_v11 }
 0x64a   :  { %v6927_v10 = vsel %vm849_vm3, %v6834_v46, %v6926_v23 }
 0x64b   :  { %v6593_v63 = vpop.permute.xlu1 %6592  ;;  %v6935_v9 = vsel %vm851_vm4, %v6870_v39, %v6934_v3 }
 0x64c   :  { %v6620_v12 = vpop.permute.xlu0 %6619  ;;  %v6838_v60 = vrot.slane %v6593_v63, %v11751_v11 }
 0x64d   :  { %v6874_v16 = vrot.slane %v6620_v12, %v11751_v11 }
 0x64e   :  { %v6928_v45 = vsel %vm851_vm4, %v6838_v60, %v6927_v10 }
 0x64f   :  { %v6596_v56 = vpop.permute.xlu1 %6595  ;;  %v6936_v57 = vsel %vm853_vm5, %v6874_v16, %v6935_v9 }
 0x650   :  { %v6599_v47 = vpop.permute.xlu0 %6598  ;;  %v6842_v41 = vrot.slane %v6596_v56, %v11751_v11 }
 0x651   :  { %v6846_v2 = vrot.slane %v6599_v47, %v11751_v11 }
 0x652   :  { %v6929_v22 = vsel %vm853_vm5, %v6842_v41, %v6928_v45 }
 0x653   :  { %v6575_v53 = vpop.permute.xlu1 %6574  ;;  %v6930_v13 = vsel %vm855_vm6, %v6846_v2, %v6929_v22 }
 0x654   :  { %v6814_v8 = vrot.slane %v6575_v53, %v11751_v11  ;;  %v6578_v55 = vpop.permute.xlu0 %6577 }
 0x655   :  { %v6818_v1 = vrot.slane %v6578_v55, %v11751_v11 }
 0x656   :  { %v6923_v33 = vsel %vm855_vm6, %v6814_v8, %v6922_v21 }
 0x657   :  { %v6924_v19 = vsel %vm857_vm7, %v6818_v1, %v6923_v33  ;;  %v6623_v32 = vpop.permute.xlu1 %6622 }
 0x658   :  { %6952 = vst.msk [vmem:[#allocation11 + $0x28] sm:$0xff] %vm916_vm8, %v6924_v19  ;;  %v6878_v20 = vrot.slane %v6623_v32, %v11751_v11  ;;  %v6626_v54 = vpop.permute.xlu0 %6625 }
 0x659   :  { %v6882_v58 = vrot.slane %v6626_v54, %v11751_v11 }
 0x65a   :  { %v6937_v7 = vsel %vm855_vm6, %v6878_v20, %v6936_v57 }
 0x65b   :  { %v6938_v29 = vsel %vm857_vm7, %v6882_v58, %v6937_v7  ;;  %v6602_v6 = vpop.permute.xlu1 %6601 }
 0x65c   :  { %6954 = vst.msk [vmem:[#allocation11 + $0x38] sm:$0xff] %vm916_vm8, %v6938_v29  ;;  %v6850_v43 = vrot.slane %v6602_v6, %v11751_v11 }
 0x65e   :  { %v6931_v31 = vsel %vm857_vm7, %v6850_v43, %v6930_v13 }
 0x65f   :  { %6953 = vst.msk [vmem:[#allocation11 + $0x30] sm:$0xff] %vm916_vm8, %v6931_v31 }
 0x660   :  { %7352 = shalt.err (!%p7349_p8)
}
 0x661   :  { %s7353_s22 = scalar_lea.hbm %s11010_s5, 1024 }
 0x662   :  { %p7354_p9 = scmp.ne.s32.totalorder %s11010_s5, %s7353_s22  ;;  %p7357_p10 = scmp.lt.u32.totalorder %s7353_s22, %s11010_s5 }
 0x664   :  { %p7359_p11 = pnand %p7357_p10, %p7354_p9 }
 0x666   :  { %7362 = shalt.err (!%p7359_p11)
}
 0x667   :  { %6978 = dma.vmem_to_hbm [thread:$0]  %s6973_s17, 1024, %s11010_s5, [#allocation12], %s7400_s0, %s7400_s0, %s7401_s21  }
 0x668   :  { %s7405_s29 = smov [#allocation10]  }
 0x669   :  { %s6960_s30 = sshll.u32 %s7405_s29, 4  ;;  %s6961_s30 = int_to_ptr.vmem [resolvable:$true] %s6960_s30 }
 0x66a   :  { %s7363_s5 = scalar_lea.vmem %s6961_s30, 1024  ;;  %p7368_p13 = scmp.lt.s32.totalorder %s6961_s30, %s6961_s30 }
 0x66b   :  { %p7364_p12 = scmp.ne.s32.totalorder %s6961_s30, %s7363_s5  ;;  %p7369_p0 = scmp.lt.s32.totalorder %s7363_s5, %s7363_s5 }
 0x66d   :  { %p7370_p1 = por %p7369_p0, %p7368_p13 }
 0x66f   :  { %p7371_p2 = pnand %p7370_p1, %p7364_p12 }
 0x673   :  { %v7021_v11 = vpop.f32.mrb[0].mxu1 }
 0x674   :  { %v6349_v36 = vadd.f32 %v7021_v11, %v10846_v59  ;;  %v6343_v14 = vpop.f32.mrb[1].mxu1 }
 0x675   :  { %v6344_v52 = vadd.f32 %v10846_v59, %v6343_v14 }
 0x676   :  { %6368 = vst.msk [vmem:[#allocation10 + $0x28] sm:$0xff] %vm6362_vm11, %v6349_v36 }
 0x677   :  { %6367 = vst.msk [vmem:[#allocation10 + $0x20] sm:$0xff] %vm6362_vm11, %v6344_v52 }
 0x6b3   :  { %v7024_v40 = vpop.f32.mrb[2].mxu1 }
 0x6b4   :  { %v6359_v25 = vadd.f32 %v7024_v40, %v10846_v59  ;;  %v6353_v61 = vpop.f32.mrb[3].mxu1 }
 0x6b5   :  { %v6354_v18 = vadd.f32 %v10846_v59, %v6353_v61 }
 0x6b6   :  { %6370 = vst.msk [vmem:[#allocation10 + $0x38] sm:$0xff] %vm6362_vm11, %v6359_v25 }
 0x6b7   :  { %6369 = vst.msk [vmem:[#allocation10 + $0x30] sm:$0xff] %vm6362_vm11, %v6354_v18 }
 0x6b8   :  { %7374 = shalt.err (!%p7371_p2)
}
 0x6b9   :  { %s7375_s8 = scalar_lea.hbm %s11009_s4, 1024 }
 0x6ba   :  { %p7376_p3 = scmp.ne.s32.totalorder %s11009_s4, %s7375_s8  ;;  %p7379_p4 = scmp.lt.u32.totalorder %s7375_s8, %s11009_s4 }
 0x6bc   :  { %p7381_p5 = pnand %p7379_p4, %p7376_p3 }
 0x6be   :  { %7384 = shalt.err (!%p7381_p5)
}
 0x6bf   :  { %6966 = dma.vmem_to_hbm [thread:$0]  %s6961_s30, 1024, %s11009_s4, [#allocation4], %s7400_s0, %s7400_s0, %s7401_s21  }
 0x6c0   :  { %7391 = dma.done.wait [#allocation4], 1024  }
 0x6c1   :  { %7392 = vsyncadd [#allocation4], 4294966272 }
 0x6c2   :  { %7393 = dma.done.wait [#allocation12], 1024  }
 0x6c3   :  { %7394 = vsyncadd [#allocation12], 4294966272 }
 0x6c4   :  { %6985 = vsyncpa [#allocation3], 1 }
 0x6c5   :  { %6986 = vsyncpa [#allocation6], 1 }
 0x6c6   :  { %6987 = vsyncpa [#allocation9], 1 }
 0x6c7   :  { %6988 = vsyncpa [#allocation4], 1 }
 0x6c8   :  { %6989 = vsyncpa [#allocation12], 1 }

</bundles_post_ra>
